<compile_context>
chip_gen: v6e
topology: v6e:2x2x1
jax: 0.10.0
libtpu: 0.0.40
codegen_flags: <defaults>
</compile_context>

<pallas_src>
import functools

import jax
import jax.numpy as jnp
import numpy as np
from jax.experimental import pallas as pl
from jax.experimental.pallas import tpu as pltpu


def _tpu_chip_info():
    """Best-effort generation / VMEM detection; conservative fallbacks."""
    kind = ""
    try:
        kind = jax.devices()[0].device_kind.lower()
    except Exception:
        pass
    vmem_phys = None
    try:
        vmem_phys = int(pltpu.get_tpu_info().vmem_capacity_bytes)
    except Exception:
        vmem_phys = None
    if not vmem_phys or vmem_phys <= 0:
        vmem_phys = (64 << 20) if ("v7" in kind or "7x" in kind) else (128 << 20)
    # bf16 VALU exists on v6e / v7x; v5e and older would emulate bf16 elementwise.
    bf16_valu = ("v6" in kind) or ("v7" in kind) or ("7x" in kind)
    return vmem_phys, bf16_valu


def _pick_pixel_tile(p_pad, target):
    """Largest divisor of p_pad that is a multiple of 128 (lane-dense stores)
    and <= target; p_pad is always a multiple of 128 so 128 is a valid floor."""
    cands = [t for t in range(128, p_pad + 1, 128) if p_pad % t == 0]
    fitting = [t for t in cands if t <= target]
    return max(fitting) if fitting else min(cands)


def _vmem_need_bytes(c, h_in, w_in, tp, bf16_tent):
    """Per-tile working set, counting tent-build temporaries and worst-case
    double buffering of the resident inputs."""
    f32 = 4
    tentb = 2 if bf16_tent else 4
    return int(
        2 * c * h_in * w_in * 2        # resident bf16 image (2 buffers worst case)
        + 2 * w_in * tp * f32          # resident xg iota slab (2 buffers worst case)
        + 2 * h_in * tp * f32          # resident yg iota slab
        + w_in * tp * f32              # dx = xg - ix (kept f32)
        + 2 * w_in * tp * tentb        # |dx| intermediate + tx result
        + 2 * h_in * tp * f32          # y-tent intermediate + ty
        + c * h_in * tp * f32          # stage-1 MXU accumulator A
        + h_in * tp * f32              # stage-2 per-channel product temp
        + 2 * c * tp * f32             # output block (double buffered)
        + 16 * tp * f32                # coordinate vectors / slack
        + (2 << 20))                   # fixed margin


def _grid_sample_kernel(coef_ref, img_ref, xg_ref, yg_ref, out_ref, *, c, h_in,
                        w_in, w_out, tile_pixels, bf16_tent):
    """grid = (P_pad // tile_pixels, N): one step samples `tile_pixels` output
    pixels of sample n = program_id(1) from the resident wide image."""
    j = pl.program_id(0)      # pixel-tile index (leading axis -> megacore split)
    n = pl.program_id(1)      # sample index

    # Folded affine coefficients (computed in the wrapper, read from SMEM):
    #   ix = ax*w + bx*h + cx ,  iy = ay*w + by*h + cy   (input pixel coords)
    ax = coef_ref[n, 0]
    bx = coef_ref[n, 1]
    cx = coef_ref[n, 2]
    ay = coef_ref[n, 3]
    by = coef_ref[n, 4]
    cy = coef_ref[n, 5]

    # Global flat output-pixel index p = h*W_out + w for this tile.  Recover
    # (h, w) with float ops (integer div/mod by a non-power-of-two W_out lowers
    # to a long per-lane VPU sequence).  floor((p+0.5)/W_out) is exact here.
    p_i = jax.lax.broadcasted_iota(jnp.int32, (1, tile_pixels), 1) + j * tile_pixels
    q = p_i.astype(jnp.float32)
    h = jnp.floor((q + 0.5) * (1.0 / w_out))
    w = q - h * float(w_out)

    ix = ax * w + bx * h + cx                                   # (1, TP)
    iy = ay * w + by * h + cy                                   # (1, TP)

    # Bilinear "tent" weights; out-of-bounds taps get weight 0 == zero padding.
    # The coordinate subtraction stays f32 (lane coords up to W_in may exceed
    # bf16's exact-integer range); the rest runs in bf16 on v6e/v7x.
    dx = xg_ref[...] - ix                                       # (W_in, TP) f32
    if bf16_tent:
        dxb = dx.astype(jnp.bfloat16)
        tx = jnp.maximum(0.0, 1.0 - jnp.abs(dxb))               # bf16 tent
    else:
        tx = jnp.maximum(0.0, 1.0 - jnp.abs(dx)).astype(jnp.bfloat16)

    ty = jnp.maximum(0.0, 1.0 - jnp.abs(yg_ref[...] - iy))      # (H_in, TP) f32

    # Stage 1 (MXU, single bf16 pass, f32 accumulate): contract input width.
    a = jnp.dot(img_ref[...], tx,
                preferred_element_type=jnp.float32)             # (C*H_in, TP) f32

    # Stage 2 (VPU multiply + sublane reduce): contract input height, one
    # channel at a time; rows are stored directly (no concatenate temp).
    for ch in range(c):
        a_c = a[ch * h_in:(ch + 1) * h_in, :]                   # (H_in, TP)
        out_ref[ch, :] = jnp.sum(a_c * ty, axis=0).astype(out_ref.dtype)


def image_sampler_forward(images, theta, out_hw=(224, 224),
                          target_tile_pixels=None, bf16_tent=None,
                          vmem_cap_bytes=None):
    """images: (C, H_in, W_in) f32 -- the width-concatenated multi-view image
    (batch dim of 1 already squeezed).  theta: (N, 2, 3).
    Returns (N, C, H_out, W_out) f32, matching torch.cat(samples, dim=0)."""
    C, H_in, W_in = images.shape
    N = theta.shape[0]
    H_out, W_out = out_hw
    P = H_out * W_out
    P_pad = ((P + 127) // 128) * 128     # lane-dense; extra pixels sliced off

    vmem_phys, bf16_valu = _tpu_chip_info()
    if bf16_tent is None:
        bf16_tent = bf16_valu            # f32 tent on v5e (no bf16 VALU)
    small_vmem = vmem_phys <= (64 << 20)
    if vmem_cap_bytes is None:
        # v7x: 64 MiB physical -> leave headroom for Pallas double buffers and
        # scheduler scratch; v5e/v6e: 128 MiB physical.
        vmem_cap_bytes = (48 << 20) if small_vmem else (100 << 20)
    if target_tile_pixels is None:
        # Bigger pixel tiles amortize the ~0.35 us per-grid-step overhead; the
        # total VPU/MXU work is TP-independent.
        target_tile_pixels = 4096 if small_vmem else 8192

    TP = _pick_pixel_tile(P_pad, target_tile_pixels)
    while (TP > 128
           and _vmem_need_bytes(C, H_in, W_in, TP, bf16_tent) > vmem_cap_bytes):
        smaller = [t for t in range(128, TP, 128) if P_pad % t == 0]
        if not smaller:
            break
        TP = max(smaller)
    n_tiles = P_pad // TP

    # Fold affine_grid (align_corners=False) + grid_sample unnormalization into
    #   ix = ax*w + bx*h + cx ,  iy = ay*w + by*h + cy     (exact algebra)
    t = theta.astype(jnp.float32)
    t00, t01, t02 = t[:, 0, 0], t[:, 0, 1], t[:, 0, 2]
    t10, t11, t12 = t[:, 1, 0], t[:, 1, 1], t[:, 1, 2]
    ax = (W_in / W_out) * t00
    bx = (W_in / H_out) * t01
    cx = 0.5 * W_in * (t00 / W_out + t01 / H_out - t00 - t01 + t02 + 1.0) - 0.5
    ay = (H_in / W_out) * t10
    by = (H_in / H_out) * t11
    cy = 0.5 * H_in * (t10 / W_out + t11 / H_out - t10 - t11 + t12 + 1.0) - 0.5
    coeffs = jnp.stack([ax, bx, cx, ay, by, cy], axis=-1)       # (N, 6) f32

    # bf16 image so the MXU matmul is a single pass; reduction math stays f32.
    img2d = images.reshape(C * H_in, W_in).astype(jnp.bfloat16)

    # Hoisted iota slabs: VMEM-resident across all grid steps (constant index
    # map), removing one full-slab VPU pass per step.
    xg = jnp.broadcast_to(jnp.arange(W_in, dtype=jnp.float32)[:, None], (W_in, TP))
    yg = jnp.broadcast_to(jnp.arange(H_in, dtype=jnp.float32)[:, None], (H_in, TP))

    kernel = functools.partial(_grid_sample_kernel, c=C, h_in=H_in, w_in=W_in,
                               w_out=W_out, tile_pixels=TP, bf16_tent=bf16_tent)

    need = _vmem_need_bytes(C, H_in, W_in, TP, bf16_tent)
    vmem_limit = int(min(max(need + (4 << 20), 32 << 20), vmem_cap_bytes))

    out_flat = pl.pallas_call(
        kernel,
        out_shape=jax.ShapeDtypeStruct((N, C, P_pad), jnp.float32),
        grid=(n_tiles, N),
        in_specs=[
            pl.BlockSpec(memory_space=pltpu.MemorySpace.SMEM),    # coeffs (N, 6)
            pl.BlockSpec((C * H_in, W_in), lambda j, n: (0, 0)),  # resident image
            pl.BlockSpec((W_in, TP), lambda j, n: (0, 0)),        # resident x iota
            pl.BlockSpec((H_in, TP), lambda j, n: (0, 0)),        # resident y iota
        ],
        # Leading (pixel-tile) axis parallel so a v7x megacore split lands on
        # the 7+ tile axis rather than the tiny N axis.
        out_specs=pl.BlockSpec((None, C, TP), lambda j, n: (n, 0, j)),
        compiler_params=pltpu.CompilerParams(
            dimension_semantics=("parallel", "arbitrary"),
            vmem_limit_bytes=vmem_limit),
    )(coeffs, img2d, xg, yg)

    return out_flat[:, :, :P].reshape(N, C, H_out, W_out)


# ---------------- pure-JAX reference (PyTorch grid_sample semantics) --------
def _ref_forward(images, theta, out_hw):
    C, H_in, W_in = images.shape
    H_out, W_out = out_hw
    xs = (2.0 * jnp.arange(W_out) + 1.0) / W_out - 1.0
    ys = (2.0 * jnp.arange(H_out) + 1.0) / H_out - 1.0
    xn, yn = jnp.meshgrid(xs, ys)                               # (H_out, W_out)

    def one(th):
        gx = th[0, 0] * xn + th[0, 1] * yn + th[0, 2]
        gy = th[1, 0] * xn + th[1, 1] * yn + th[1, 2]
        ix = ((gx + 1.0) * W_in - 1.0) / 2.0
        iy = ((gy + 1.0) * H_in - 1.0) / 2.0
        ix0 = jnp.floor(ix).astype(jnp.int32)
        iy0 = jnp.floor(iy).astype(jnp.int32)
        ix1, iy1 = ix0 + 1, iy0 + 1
        wx1 = ix - ix0
        wx0 = 1.0 - wx1
        wy1 = iy - iy0
        wy0 = 1.0 - wy1

        def gather(yy, xx):
            valid = (yy >= 0) & (yy < H_in) & (xx >= 0) & (xx < W_in)
            yyc = jnp.clip(yy, 0, H_in - 1)
            xxc = jnp.clip(xx, 0, W_in - 1)
            return images[:, yyc, xxc] * valid[None].astype(jnp.float32)

        return (gather(iy0, ix0) * (wy0 * wx0)[None]
                + gather(iy0, ix1) * (wy0 * wx1)[None]
                + gather(iy1, ix0) * (wy1 * wx0)[None]
                + gather(iy1, ix1) * (wy1 * wx1)[None])

    return jnp.stack([one(theta[i]) for i in range(theta.shape[0])], axis=0)


if __name__ == "__main__":
    key = jax.random.PRNGKey(0)
    k_img, k_th = jax.random.split(key)

    # Synthetic "loaded" images: 1 batch entry x 6 camera views, each (3,64,64),
    # normalized with the module's Normalize constants, concatenated along W
    # in image_order (glue -- stands in for load_images).
    num_views, C, H_img = 6, 3, 64
    image_order = [2, 0, 1, 5, 3, 4]
    raw = jax.random.uniform(k_img, (num_views, C, H_img, H_img), jnp.float32)
    mean = jnp.array([0.48145466, 0.4578275, 0.40821073]).reshape(1, C, 1, 1)
    std = jnp.array([0.26862954, 0.26130258, 0.27577711]).reshape(1, C, 1, 1)
    raw = (raw - mean) / std
    images = jnp.concatenate([raw[i] for i in image_order], axis=-1)  # (3,64,384)

    # Affine thetas (N, 2, 3): near-identity with small perturbation.
    N = 2
    base = jnp.broadcast_to(
        jnp.array([[1.0, 0.0, 0.0], [0.0, 1.0, 0.0]], jnp.float32), (N, 2, 3))
    theta = base + 0.1 * jax.random.normal(k_th, (N, 2, 3), jnp.float32)

    # Test 1: auto settings (hardware-tuned tile / tent dtype), small stand-in
    # for the module's fixed (224, 224) output.
    out_hw = (32, 32)
    ref = _ref_forward(images, theta, out_hw)
    samples = jax.block_until_ready(
        image_sampler_forward(images, theta, out_hw=out_hw))
    assert samples.shape == (N, C, out_hw[0], out_hw[1])
    np.testing.assert_allclose(np.asarray(samples), np.asarray(ref),
                               rtol=2e-2, atol=4e-2)

    # Test 2: multi-tile path with full-f32 tent math (tight tolerance).
    samples = jax.block_until_ready(
        image_sampler_forward(images, theta, out_hw=out_hw,
                              target_tile_pixels=256, bf16_tent=False))
    np.testing.assert_allclose(np.asarray(samples), np.asarray(ref),
                               rtol=2e-2, atol=2e-2)

    # Test 3: odd output size (exercises the lane padding + slice path) with
    # the bf16 tent math forced on.
    out_hw2 = (24, 30)
    ref2 = _ref_forward(images, theta, out_hw2)
    samples2 = jax.block_until_ready(
        image_sampler_forward(images, theta, out_hw=out_hw2, bf16_tent=True))
    assert samples2.shape == (N, C, out_hw2[0], out_hw2[1])
    np.testing.assert_allclose(np.asarray(samples2), np.asarray(ref2),
                               rtol=2e-2, atol=4e-2)

    print("KERNEL_OK")
</pallas_src>

<mosaic_0001>
module attributes {stable_mosaic.version = 11 : i64} {
  func.func @_grid_sample_kernel(%arg0: i32, %arg1: i32, %arg2: memref<2x6xf32, #tpu.memory_space<smem>>, %arg3: memref<192x384xbf16, #tpu.memory_space<vmem>>, %arg4: memref<384x1024xf32, #tpu.memory_space<vmem>>, %arg5: memref<64x1024xf32, #tpu.memory_space<vmem>>, %arg6: memref<1x3x1024xf32, #tpu.memory_space<vmem>>) attributes {dimension_semantics = [#tpu.dimension_semantics<parallel>, #tpu.dimension_semantics<arbitrary>], iteration_bounds = array<i64: 1, 2>, scalar_prefetch = 0 : i64, scratch_operands = 0 : i64, tpu.core_type = #tpu.core_type<tc>, window_params = [{transform_indices = @transform_0, window_bounds = array<i64: 2, 6>}, {pipeline_mode = #tpu.pipeline_mode<synchronous>, transform_indices = @transform_1, window_bounds = array<i64: 192, 384>}, {pipeline_mode = #tpu.pipeline_mode<synchronous>, transform_indices = @transform_2, window_bounds = array<i64: 384, 1024>}, {pipeline_mode = #tpu.pipeline_mode<synchronous>, transform_indices = @transform_3, window_bounds = array<i64: 64, 1024>}, {transform_indices = @transform_4, window_bounds = array<i64: 1, 3, 1024>}]} {
    %0 = arith.index_cast %arg1 : i32 to index
    %c0 = arith.constant 0 : index
    %1 = memref.load %arg2[%0, %c0] : memref<2x6xf32, #tpu.memory_space<smem>>
    %2 = arith.index_cast %arg1 : i32 to index
    %c1 = arith.constant 1 : index
    %3 = memref.load %arg2[%2, %c1] : memref<2x6xf32, #tpu.memory_space<smem>>
    %4 = arith.index_cast %arg1 : i32 to index
    %c2 = arith.constant 2 : index
    %5 = memref.load %arg2[%4, %c2] : memref<2x6xf32, #tpu.memory_space<smem>>
    %6 = arith.index_cast %arg1 : i32 to index
    %c3 = arith.constant 3 : index
    %7 = memref.load %arg2[%6, %c3] : memref<2x6xf32, #tpu.memory_space<smem>>
    %8 = arith.index_cast %arg1 : i32 to index
    %c4 = arith.constant 4 : index
    %9 = memref.load %arg2[%8, %c4] : memref<2x6xf32, #tpu.memory_space<smem>>
    %10 = arith.index_cast %arg1 : i32 to index
    %c5 = arith.constant 5 : index
    %11 = memref.load %arg2[%10, %c5] : memref<2x6xf32, #tpu.memory_space<smem>>
    %12 = tpu.iota {dimensions = array<i32: 1>} : vector<1x1024xi32>
    %c1024_i32 = arith.constant 1024 : i32
    %13 = arith.muli %arg0, %c1024_i32 : i32
    %14 = vector.broadcast %13 : i32 to vector<1x1024xi32>
    %15 = arith.addi %12, %14 : vector<1x1024xi32>
    %16 = arith.sitofp %15 : vector<1x1024xi32> to vector<1x1024xf32>
    %cst = arith.constant 5.000000e-01 : f32
    %17 = vector.broadcast %cst : f32 to vector<1x1024xf32>
    %18 = arith.addf %16, %17 : vector<1x1024xf32>
    %cst_0 = arith.constant 3.125000e-02 : f32
    %19 = vector.broadcast %cst_0 : f32 to vector<1x1024xf32>
    %20 = arith.mulf %18, %19 : vector<1x1024xf32>
    %21 = math.floor %20 : vector<1x1024xf32>
    %cst_1 = arith.constant 3.200000e+01 : f32
    %22 = vector.broadcast %cst_1 : f32 to vector<1x1024xf32>
    %23 = arith.mulf %21, %22 : vector<1x1024xf32>
    %24 = arith.subf %16, %23 : vector<1x1024xf32>
    %25 = vector.broadcast %1 : f32 to vector<1x1024xf32>
    %26 = arith.mulf %25, %24 : vector<1x1024xf32>
    %27 = vector.broadcast %3 : f32 to vector<1x1024xf32>
    %28 = arith.mulf %27, %21 : vector<1x1024xf32>
    %29 = arith.addf %26, %28 : vector<1x1024xf32>
    %30 = vector.broadcast %5 : f32 to vector<1x1024xf32>
    %31 = arith.addf %29, %30 : vector<1x1024xf32>
    %32 = vector.broadcast %7 : f32 to vector<1x1024xf32>
    %33 = arith.mulf %32, %24 : vector<1x1024xf32>
    %34 = vector.broadcast %9 : f32 to vector<1x1024xf32>
    %35 = arith.mulf %34, %21 : vector<1x1024xf32>
    %36 = arith.addf %33, %35 : vector<1x1024xf32>
    %37 = vector.broadcast %11 : f32 to vector<1x1024xf32>
    %38 = arith.addf %36, %37 : vector<1x1024xf32>
    %c0_2 = arith.constant 0 : index
    %c0_3 = arith.constant 0 : index
    %39 = vector.load %arg4[%c0_2, %c0_3] : memref<384x1024xf32, #tpu.memory_space<vmem>>, vector<384x1024xf32>
    %40 = vector.broadcast %31 : vector<1x1024xf32> to vector<384x1024xf32>
    %41 = arith.subf %39, %40 : vector<384x1024xf32>
    %42 = math.absf %41 : vector<384x1024xf32>
    %cst_4 = arith.constant 1.000000e+00 : f32
    %43 = vector.broadcast %cst_4 : f32 to vector<384x1024xf32>
    %44 = arith.subf %43, %42 : vector<384x1024xf32>
    %cst_5 = arith.constant 0.000000e+00 : f32
    %45 = vector.broadcast %cst_5 : f32 to vector<384x1024xf32>
    %46 = arith.maximumf %45, %44 : vector<384x1024xf32>
    %47 = arith.truncf %46 : vector<384x1024xf32> to vector<384x1024xbf16>
    %c0_6 = arith.constant 0 : index
    %c0_7 = arith.constant 0 : index
    %48 = vector.load %arg5[%c0_6, %c0_7] : memref<64x1024xf32, #tpu.memory_space<vmem>>, vector<64x1024xf32>
    %49 = vector.broadcast %38 : vector<1x1024xf32> to vector<64x1024xf32>
    %50 = arith.subf %48, %49 : vector<64x1024xf32>
    %51 = math.absf %50 : vector<64x1024xf32>
    %cst_8 = arith.constant 1.000000e+00 : f32
    %52 = vector.broadcast %cst_8 : f32 to vector<64x1024xf32>
    %53 = arith.subf %52, %51 : vector<64x1024xf32>
    %cst_9 = arith.constant 0.000000e+00 : f32
    %54 = vector.broadcast %cst_9 : f32 to vector<64x1024xf32>
    %55 = arith.maximumf %54, %53 : vector<64x1024xf32>
    %c0_10 = arith.constant 0 : index
    %c0_11 = arith.constant 0 : index
    %56 = vector.load %arg3[%c0_10, %c0_11] : memref<192x384xbf16, #tpu.memory_space<vmem>>, vector<192x384xbf16>
    %cst_12 = arith.constant dense<0.000000e+00> : vector<192x1024xf32>
    %57 = tpu.matmul %56, %47, %cst_12 {dimension_numbers = #tpu.dot_dimension_numbers<[1], [0], [0], [1], [0, 0, 1, 1], [], []>} : vector<192x384xbf16>, vector<384x1024xbf16>, vector<192x1024xf32> -> vector<192x1024xf32>
    %58 = vector.extract_strided_slice %57 {offsets = [0, 0], sizes = [64, 1024], strides = [1, 1]} : vector<192x1024xf32> to vector<64x1024xf32>
    %59 = arith.mulf %58, %55 : vector<64x1024xf32>
    %cst_13 = arith.constant dense<0.000000e+00> : vector<1024xf32>
    %60 = vector.multi_reduction <add>, %59, %cst_13 [0] : vector<64x1024xf32> to vector<1024xf32>
    %c0_14 = arith.constant 0 : index
    %c0_15 = arith.constant 0 : index
    %c0_16 = arith.constant 0 : index
    %61 = vector.load %arg6[%c0_14, %c0_15, %c0_16] : memref<1x3x1024xf32, #tpu.memory_space<vmem>>, vector<1x1x1024xf32>
    %62 = vector.shape_cast %61 : vector<1x1x1024xf32> to vector<1024xf32>
    %63 = vector.shape_cast %60 : vector<1024xf32> to vector<1x1x1024xf32>
    tpu.vector_store %arg6[%c0_14, %c0_15, %c0_16], %63 {strides = array<i32>} : memref<1x3x1024xf32, #tpu.memory_space<vmem>>, vector<1x1x1024xf32>,
    %64 = vector.extract_strided_slice %57 {offsets = [64, 0], sizes = [64, 1024], strides = [1, 1]} : vector<192x1024xf32> to vector<64x1024xf32>
    %65 = arith.mulf %64, %55 : vector<64x1024xf32>
    %cst_17 = arith.constant dense<0.000000e+00> : vector<1024xf32>
    %66 = vector.multi_reduction <add>, %65, %cst_17 [0] : vector<64x1024xf32> to vector<1024xf32>
    %c0_18 = arith.constant 0 : index
    %c1_19 = arith.constant 1 : index
    %c0_20 = arith.constant 0 : index
    %67 = vector.load %arg6[%c0_18, %c1_19, %c0_20] : memref<1x3x1024xf32, #tpu.memory_space<vmem>>, vector<1x1x1024xf32>
    %68 = vector.shape_cast %67 : vector<1x1x1024xf32> to vector<1024xf32>
    %69 = vector.shape_cast %66 : vector<1024xf32> to vector<1x1x1024xf32>
    tpu.vector_store %arg6[%c0_18, %c1_19, %c0_20], %69 {strides = array<i32>} : memref<1x3x1024xf32, #tpu.memory_space<vmem>>, vector<1x1x1024xf32>,
    %70 = vector.extract_strided_slice %57 {offsets = [128, 0], sizes = [64, 1024], strides = [1, 1]} : vector<192x1024xf32> to vector<64x1024xf32>
    %71 = arith.mulf %70, %55 : vector<64x1024xf32>
    %cst_21 = arith.constant dense<0.000000e+00> : vector<1024xf32>
    %72 = vector.multi_reduction <add>, %71, %cst_21 [0] : vector<64x1024xf32> to vector<1024xf32>
    %c0_22 = arith.constant 0 : index
    %c2_23 = arith.constant 2 : index
    %c0_24 = arith.constant 0 : index
    %73 = vector.load %arg6[%c0_22, %c2_23, %c0_24] : memref<1x3x1024xf32, #tpu.memory_space<vmem>>, vector<1x1x1024xf32>
    %74 = vector.shape_cast %73 : vector<1x1x1024xf32> to vector<1024xf32>
    %75 = vector.shape_cast %72 : vector<1024xf32> to vector<1x1x1024xf32>
    tpu.vector_store %arg6[%c0_22, %c2_23, %c0_24], %75 {strides = array<i32>} : memref<1x3x1024xf32, #tpu.memory_space<vmem>>, vector<1x1x1024xf32>,
    return
  }
  func.func @transform_0(%arg0: i32, %arg1: i32) -> (i32, i32) {
    %c0_i32 = arith.constant 0 : i32
    %c0_i32_0 = arith.constant 0 : i32
    %c0_i32_1 = arith.constant 0 : i32
    return %c0_i32, %c0_i32_0 : i32, i32
  }
  func.func @transform_1(%arg0: i32, %arg1: i32) -> (i32, i32) {
    %c0_i32 = arith.constant 0 : i32
    %c0_i32_0 = arith.constant 0 : i32
    %c0_i32_1 = arith.constant 0 : i32
    return %c0_i32, %c0_i32_0 : i32, i32
  }
  func.func @transform_2(%arg0: i32, %arg1: i32) -> (i32, i32) {
    %c0_i32 = arith.constant 0 : i32
    %c0_i32_0 = arith.constant 0 : i32
    %c0_i32_1 = arith.constant 0 : i32
    return %c0_i32, %c0_i32_0 : i32, i32
  }
  func.func @transform_3(%arg0: i32, %arg1: i32) -> (i32, i32) {
    %c0_i32 = arith.constant 0 : i32
    %c0_i32_0 = arith.constant 0 : i32
    %c0_i32_1 = arith.constant 0 : i32
    return %c0_i32, %c0_i32_0 : i32, i32
  }
  func.func @transform_4(%arg0: i32, %arg1: i32) -> (i32, i32, i32) {
    %c0_i32 = arith.constant 0 : i32
    %c0_i32_0 = arith.constant 0 : i32
    return %arg1, %c0_i32, %arg0 : i32, i32, i32
  }
}

</mosaic_0001>

<bundles_post_ra>
// kernel: tpu_custom_call.1
= control target key start
LH: loop header
LB: loop body
LE: loop exit
PB: predicated region body
PF: predicated region fallthrough
CT: control target
= control target key end

     0   :  { %9 = vsyncpa [#allocation4], 0  ;;  %s7933_s0 = inlined_call_operand.hbm [shape: f32[2,6], index: 0, kind: input, shape index: {}]   ;;  %s7934_s1 = inlined_call_operand.hbm [shape: bf16[192,384], index: 1, kind: input, shape index: {}]   ;;  %s7935_s2 = inlined_call_operand.hbm [shape: f32[384,1024], index: 2, kind: input, shape index: {}]   ;;  %s7936_s3 = inlined_call_operand.hbm [shape: f32[64,1024], index: 3, kind: input, shape index: {}]   ;;  %s7937_s4 = inlined_call_operand.vmem [shape: f32[2,3,1024], index: 4, kind: output, shape index: {}]  }
   0x1   :  { %10 = vsyncpa [#allocation3], 0 }
   0x2   :  { %11 = vsyncpa [#allocation7], 0  ;;  %s5534_s15 = smov 0   ;;  %s5536_s16 = smov 0  }
   0x3   :  { %s5538_s17 = smov 0  }
   0x4 LB: > { %s5499_s18 = smov [#allocation6]   ;;  %s5098_s20 = sadd.s32 4294967295, %s5497_s17   ;;  %s5497_s17 = sphi %s5538_s17, %s17_s17   ;;  %s5493_s16 = sphi %s5536_s16, %s8439_s16   ;;  %s5489_s15 = sphi %s5534_s15, %s8438_s15  }
   0x5   : > { %s180_s19 = sshll.u32 %s5499_s18, 4  ;;  %p5100_p0 = scmp.ge.s32.totalorder %s5497_s17, 1  ;;  %s181_s19 = int_to_ptr.vmem [resolvable:$true] %s180_s19 }
   0x6   : > { %p146_p1 = scmp.lt.s32.totalorder %s5497_s17, 3  ;;  %p5552_p2 = scmp.eq.s32.totalorder %s5098_s20, 0 }
   0x7   : > { %s26_s24 = sadd.s32 1, %s5493_s16  ;;  %s5385_s26 = scalar_lea.vmem %s181_s19, 49152 }
   0x8   : > { %p5556_p3 = pnand %p5100_p0, %p146_p1  ;;  %p5569_p6 = scmp.ge.s32.totalorder %s26_s24, 2 }
   0x9   : > { %p5386_p8 = scmp.ne.s32.totalorder %s181_s19, %s5385_s26  ;;  %p5393_p11 = scmp.lt.s32.totalorder %s181_s19, %s181_s19 }
   0xa   : > { %p5186_p4 = pneg %p5556_p3  ;;  %p5394_p12 = scmp.lt.s32.totalorder %s5385_s26, %s5385_s26 }
   0xc   : > { %p5564_p5 = pnand %p5552_p2, %p5186_p4  ;;  %p5395_p13 = por %p5394_p12, %p5393_p11 }
   0xe   : > { %p5376_p7 = pneg %p5564_p5 }
  0x10   : > { %p5388_p9 = pnand %p5386_p8, %p5376_p7 }
  0x12   : > { %p5389_p10 = pneg %p5388_p9 }
  0x14   : > { %p5396_p0 = pnand %p5395_p13, %p5389_p10 }
  0x16   : > { %5399 = shalt.err (!%p5396_p0)
}
  0x17   : > { %s5500_s27 = smov 1024   ;;  %s5501_s28 = smov 64  }
  0x18   : > { %5195 = dma.hbm_to_vmem [thread:$0]  (!%p5564_p5), %s7935_s2, 49152, %s181_s19, [#allocation7], %s5500_s27, %s5500_s27, %s5501_s28  }
  0x19   : > { %s8441_s24 = smov (%p5569_p6, %s26_s24), 0  ;;  %s5502_s5 = smov [#allocation2]  }
  0x1a   : > { %5189 = dma.hbm_to_smem (!%p5564_p5), %s7933_s0, 32, %s5502_s5, [#allocation4]  }
  0x1b   : > { %s5503_s8 = smov [#allocation5]  }
  0x1c   : > { %s167_s9 = sshll.u32 %s5503_s8, 4  ;;  %s168_s9 = int_to_ptr.vmem [resolvable:$true] %s167_s9 }
  0x1d   : > { %s5422_s10 = scalar_lea.vmem %s168_s9, 4608  ;;  %p5430_p9 = scmp.lt.s32.totalorder %s168_s9, %s168_s9 }
  0x1e   : > { %p5423_p1 = scmp.ne.s32.totalorder %s168_s9, %s5422_s10  ;;  %p5431_p10 = scmp.lt.s32.totalorder %s5422_s10, %s5422_s10 }
  0x20   : > { %p5425_p4 = pnand %p5423_p1, %p5376_p7  ;;  %p5432_p11 = por %p5431_p10, %p5430_p9 }
  0x22   : > { %p5426_p8 = pneg %p5425_p4 }
  0x24   : > { %p5433_p6 = pnand %p5432_p11, %p5426_p8 }
  0x26   : > { %5436 = shalt.err (!%p5433_p6)
}
  0x27   : > { %s5504_s11 = smov 192   ;;  %s5505_s12 = smov 12  }
  0x28   : > { %5192 = dma.hbm_to_vmem [thread:$0]  (!%p5564_p5), %s7934_s1, 4608, %s168_s9, [#allocation3], %s5504_s11, %s5504_s11, %s5505_s12  }
  0x29   : > { %s5506_s18 = smov [#allocation8]  }
  0x2a   : > { %s193_s19 = sshll.u32 %s5506_s18, 4  ;;  %s194_s19 = int_to_ptr.vmem [resolvable:$true] %s193_s19 }
  0x2b   : > { %s5448_s20 = scalar_lea.vmem %s194_s19, 8192  ;;  %p5456_p1 = scmp.lt.s32.totalorder %s194_s19, %s194_s19 }
  0x2c   : > { %p5449_p12 = scmp.ne.s32.totalorder %s194_s19, %s5448_s20  ;;  %p5457_p4 = scmp.lt.s32.totalorder %s5448_s20, %s5448_s20 }
  0x2e   : > { %p5451_p13 = pnand %p5449_p12, %p5376_p7  ;;  %p5458_p8 = por %p5457_p4, %p5456_p1 }
  0x30   : > { %p5452_p0 = pneg %p5451_p13 }
  0x32   : > { %p5459_p9 = pnand %p5458_p8, %p5452_p0 }
  0x34   : > { %5462 = shalt.err (!%p5459_p9)
}
  0x35   : > { %5198 = dma.hbm_to_vmem [thread:$0]  (!%p5564_p5), %s7936_s3, 8192, %s194_s19, [#allocation7], %s5500_s27, %s5500_s27, %s5501_s28  }
  0x36   : > { %209 = sbr.rel (%p5556_p3) target bundleno = 911 (0x38f), region = 36 }
  0x3b   : > { %5476 = dma.done.wait (%p5552_p2), [#allocation4], 32  }
  0x3c   : > { %5478 = vsyncadd (%p5552_p2), [#allocation4], 4294967264 }
  0x3d   : > { %5480 = dma.done.wait (%p5552_p2), [#allocation3], 4608  }
  0x3e   : > { %5482 = vsyncadd (%p5552_p2), [#allocation3], 4294962688 }
  0x3f   : > { %5484 = dma.done.wait (%p5552_p2), [#allocation7], 57344  }
  0x40   : > { %5486 = vsyncadd (%p5552_p2), [#allocation7], 4294909952 }
  0x41   : > { %227 = sfence }
  0x42   : > { %s5629_s22 = sshll.u32 %s5489_s15, 7  ;;  %v7938_v0 = vlaneseq  ;;  %v7941_v1 = vmov 0   ;;  %v519_v40 = vld [vmem:[#allocation6 + $0x380] sm:$0xff]  ;;  %v520_v42 = vld [vmem:[#allocation6 + $0x388] sm:$0xff]  ;;  %p248_p2 = scmp.lt.s32.totalorder %s5489_s15, 1 }
  0x43   : > { %s260_s23 = sadd.s32 1, %s5629_s22  ;;  %3264 = vmatprep.mubr.bf16.mxu1 %v7941_v1  ;;  %s259_s21 = sld [smem:[#allocation2 + %s5629_s22]]  ;;  %v527_v43 = vld [vmem:[#allocation6 + $0x3c0] sm:$0xff]  ;;  %v528_v52 = vld [vmem:[#allocation6 + $0x3c8] sm:$0xff] }
  0x44   : > { %v5634_v2 = vand.u32 127, %v7938_v0  ;;  %s261_s27 = sld [smem:[#allocation2 + %s260_s23]]  ;;  %s262_s28 = sadd.s32 2, %s5629_s22  ;;  %v775_v44 = vld [vmem:[#allocation6 + $0xb80] sm:$0xff]  ;;  %v776_v53 = vld [vmem:[#allocation6 + $0xb88] sm:$0xff] }
  0x45   : > { %s263_s29 = sld [smem:[#allocation2 + %s262_s28]]  ;;  %v783_v45 = vld [vmem:[#allocation6 + $0xbc0] sm:$0xff]  ;;  %v784_v54 = vld [vmem:[#allocation6 + $0xbc8] sm:$0xff]  ;;  %s264_s30 = sadd.s32 3, %s5629_s22 }
  0x46   : > { %v272_v3 = vadd.s32 128, %v5634_v2  ;;  %v289_v4 = vcvt.s32.f32 %v5634_v2  ;;  %v274_v5 = vadd.s32 384, %v5634_v2  ;;  %v273_v6 = vadd.s32 256, %v5634_v2  ;;  %v503_v49 = vld [vmem:[#allocation6 + $0x300] sm:$0xff]  ;;  %v504_v61 = vld [vmem:[#allocation6 + $0x308] sm:$0xff]  ;;  %s266_s5 = sadd.s32 4, %s5629_s22 }
  0x47   : > { %v5687_v50 = vld [vmem:[#allocation6 + $0x340] sm:$0xff]  ;;  %v512_v63 = vld [vmem:[#allocation6 + $0x348] sm:$0xff]  ;;  %s6002_s6 = sld [smem:[#allocation2 + %s264_s30]]  ;;  %s268_s8 = sadd.s32 5, %s5629_s22 }
  0x48   : > { %v290_v7 = vcvt.s32.f32 %v272_v3  ;;  %v297_v8 = vadd.f32 0.5, %v289_v4  ;;  %v292_v9 = vcvt.s32.f32 %v274_v5  ;;  %v291_v10 = vcvt.s32.f32 %v273_v6  ;;  %v5689_v51 = vld [vmem:[#allocation6 + $0xb00] sm:$0xff]  ;;  %s6007_s7 = sld [smem:[#allocation2 + %s266_s5]]  ;;  %s8443_s15 = smov (!%p248_p2, %s5489_s15), 1 }
  0x49   : > { %v5651_v23 = vstv %s259_s21  ;;  %s6310_s9 = sld [smem:[#allocation2 + %s268_s8]]  ;;  %s5153_s10 = sshll.u32 %s8443_s15, 5 }
  0x4a   : > { %v298_v11 = vadd.f32 0.5, %v290_v7  ;;  %v305_v12 = vmul.f32 0.03125, %v297_v8  ;;  %v300_v13 = vadd.f32 0.5, %v292_v9  ;;  %v299_v14 = vadd.f32 0.5, %v291_v10  ;;  %s7817_s12 = scalar_lea.vmem %s7937_s4, %s5153_s10 }
  0x4b   : > { %v5644_v18 = vstv %s261_s27  ;;  %v5670_v34 = vstv %s263_s29 }
  0x4c   : > { %v306_v15 = vmul.f32 0.03125, %v298_v11  ;;  %v5642_v16 = vfloor.f32 %v305_v12  ;;  %v308_v17 = vmul.f32 0.03125, %v300_v13  ;;  %v307_v19 = vmul.f32 0.03125, %v299_v14 }
  0x4e   : > { %v5646_v20 = vfloor.f32 %v306_v15  ;;  %v321_v21 = vmul.f32 32.0, %v5642_v16  ;;  %v5649_v22 = vfloor.f32 %v308_v17  ;;  %v5653_v24 = vfloor.f32 %v307_v19 }
  0x4f   : > { %v347_v27 = vmul.f32 %v5644_v18, %v5642_v16 }
  0x50   : > { %8025 = vst [vmem:[#allocation12_spill] sm:$0xff] %v5649_v22  ;;  %8026 = vst [vmem:[#allocation13_spill] sm:$0xff] %v5653_v24  ;;  %v322_v25 = vmul.f32 32.0, %v5646_v20  ;;  %v5656_v26 = vsub.f32 %v289_v4, %v321_v21  ;;  %v324_v28 = vmul.f32 32.0, %v5649_v22  ;;  %v323_v29 = vmul.f32 32.0, %v5653_v24 }
  0x51   : > { %v348_v31 = vmul.f32 %v5644_v18, %v5646_v20  ;;  %v350_v35 = vmul.f32 %v5644_v18, %v5649_v22  ;;  %v349_v37 = vmul.f32 %v5644_v18, %v5653_v24  ;;  %v8036_v22 = vmov 0  }
  0x52   : > { %v5662_v30 = vsub.f32 %v290_v7, %v322_v25  ;;  %v338_v32 = vmul.f32 %v5651_v23, %v5656_v26  ;;  %v5668_v33 = vsub.f32 %v292_v9, %v324_v28  ;;  %v5674_v36 = vsub.f32 %v291_v10, %v323_v29 }
  0x54   : > { %8027 = vst [vmem:[#allocation14_spill] sm:$0xff] %v5668_v33  ;;  %8028 = vst [vmem:[#allocation15_spill] sm:$0xff] %v5674_v36  ;;  %v339_v38 = vmul.f32 %v5651_v23, %v5662_v30  ;;  %v355_v39 = vadd.f32 %v347_v27, %v338_v32  ;;  %v341_v41 = vmul.f32 %v5651_v23, %v5668_v33 }
  0x55   : > { %v340_v46 = vmul.f32 %v5651_v23, %v5674_v36 }
  0x56   : > { %v356_v47 = vadd.f32 %v348_v31, %v339_v38  ;;  %v5685_v48 = vadd.f32 %v5670_v34, %v355_v39  ;;  %v5691_v55 = vadd.f32 %v350_v35, %v341_v41  ;;  %v768_v38 = vld [vmem:[#allocation6 + $0xb48] sm:$0xff] }
  0x57   : > { %v5693_v56 = vadd.f32 %v349_v37, %v340_v46  ;;  %v760_v37 = vld [vmem:[#allocation6 + $0xb08] sm:$0xff] }
  0x58   : > { %v5696_v57 = vadd.f32 %v5670_v34, %v356_v47  ;;  %v903_v58 = vsub.f32 %v519_v40, %v5685_v48  ;;  %v911_v59 = vsub.f32 %v527_v43, %v5685_v48  ;;  %v1159_v60 = vsub.f32 %v775_v44, %v5685_v48 }
  0x59   : > { %v1167_v62 = vsub.f32 %v783_v45, %v5685_v48  ;;  %v887_v3 = vsub.f32 %v503_v49, %v5685_v48  ;;  %v895_v4 = vsub.f32 %v5687_v50, %v5685_v48  ;;  %v1143_v5 = vsub.f32 %v5689_v51, %v5685_v48 }
  0x5a   : > { %v904_v6 = vsub.f32 %v520_v42, %v5696_v57  ;;  %v912_v7 = vsub.f32 %v528_v52, %v5696_v57  ;;  %v1160_v8 = vsub.f32 %v776_v53, %v5696_v57  ;;  %v1168_v9 = vsub.f32 %v784_v54, %v5696_v57  ;;  %v767_v52 = vld [vmem:[#allocation6 + $0xb40] sm:$0xff] }
  0x5b   : > { %v1287_v10 = vand.u32 2147483647, %v903_v58  ;;  %v1295_v11 = vand.u32 2147483647, %v911_v59  ;;  %v1543_v12 = vand.u32 2147483647, %v1159_v60  ;;  %v888_v13 = vsub.f32 %v504_v61, %v5696_v57 }
  0x5c   : > { %v1288_v14 = vand.u32 2147483647, %v904_v6  ;;  %v1296_v15 = vand.u32 2147483647, %v912_v7  ;;  %v1544_v17 = vand.u32 2147483647, %v1160_v8  ;;  %v896_v19 = vsub.f32 %v512_v63, %v5696_v57 }
  0x5d   : > { %v1552_v21 = vand.u32 2147483647, %v1168_v9  ;;  %v1671_v25 = vsub.f32 1.0, %v1287_v10  ;;  %v1679_v27 = vsub.f32 1.0, %v1295_v11  ;;  %v1551_v28 = vand.u32 2147483647, %v1167_v62 }
  0x5e   : > { %v1672_v29 = vsub.f32 1.0, %v1288_v14  ;;  %v1680_v31 = vsub.f32 1.0, %v1296_v15  ;;  %v1928_v32 = vsub.f32 1.0, %v1544_v17  ;;  %v1927_v35 = vsub.f32 1.0, %v1543_v12  ;;  %v488_v10 = vld [vmem:[#allocation6 + $0x288] sm:$0xff] }
  0x5f   : > { %v1936_v39 = vsub.f32 1.0, %v1552_v21  ;;  %v2055_v40 = vmax.f32 %v1671_v25, 0.0  ;;  %v2063_v41 = vmax.f32 %v1679_v27, 0.0  ;;  %v1935_v42 = vsub.f32 1.0, %v1551_v28  ;;  %v496_v25 = vld [vmem:[#allocation6 + $0x2c8] sm:$0xff] }
  0x60   : > { %v2056_v43 = vmax.f32 %v1672_v29, 0.0  ;;  %v2064_v44 = vmax.f32 %v1680_v31, 0.0  ;;  %v2312_v45 = vmax.f32 %v1928_v32, 0.0  ;;  %v2311_v46 = vmax.f32 %v1927_v35, 0.0  ;;  %v744_v31 = vld [vmem:[#allocation6 + $0xa88] sm:$0xff] }
  0x61   : > { %v2320_v47 = vmax.f32 %v1936_v39, 0.0  ;;  %v2383_v49 = vpack.c.bf16 %v2063_v41, %v2055_v40  ;;  %v2319_v50 = vmax.f32 %v1935_v42, 0.0  ;;  %v1272_v51 = vand.u32 2147483647, %v888_v13  ;;  %v752_v32 = vld [vmem:[#allocation6 + $0xac8] sm:$0xff] }
  0x62   : > { %v2384_v53 = vpack.c.bf16 %v2064_v44, %v2056_v43  ;;  %v1280_v54 = vand.u32 2147483647, %v896_v19  ;;  %v1144_v58 = vsub.f32 %v760_v37, %v5696_v57  ;;  %v1152_v59 = vsub.f32 %v768_v38, %v5696_v57  ;;  %v495_v43 = vld [vmem:[#allocation6 + $0x2c0] sm:$0xff] }
  0x63   : > { %v2512_v60 = vpack.c.bf16 %v2320_v47, %v2312_v45  ;;  %v2511_v61 = vpack.c.bf16 %v2319_v50, %v2311_v46  ;;  %v1656_v62 = vsub.f32 1.0, %v1272_v51  ;;  %v1271_v63 = vand.u32 2147483647, %v887_v3 }
  0x64   : > { %3079 = vmatprep.subr.bf16.mxu0 %v2384_v53  ;;  %v1664_v6 = vsub.f32 1.0, %v1280_v54  ;;  %v1528_v7 = vand.u32 2147483647, %v1144_v58  ;;  %v1536_v8 = vand.u32 2147483647, %v1152_v59  ;;  %v1151_v9 = vsub.f32 %v767_v52, %v5685_v48  ;;  %v751_v54 = vld [vmem:[#allocation6 + $0xac0] sm:$0xff] }
  0x65   : > { %3232 = vmatprep.subr.bf16.mxu1 %v2512_v60  ;;  %3080 = vmatpush1.bf16.msra.mxu0 %v2383_v49  ;;  %v2040_v11 = vmax.f32 %v1656_v62, 0.0  ;;  %v1279_v12 = vand.u32 2147483647, %v895_v4  ;;  %v1655_v13 = vsub.f32 1.0, %v1271_v63  ;;  %v1527_v14 = vand.u32 2147483647, %v1143_v5 }
  0x66   : > { %3233 = vmatpush1.bf16.msra.mxu1 %v2511_v61  ;;  %v2048_v15 = vmax.f32 %v1664_v6, 0.0  ;;  %v1912_v17 = vsub.f32 1.0, %v1528_v7  ;;  %v1920_v19 = vsub.f32 1.0, %v1536_v8  ;;  %v1535_v21 = vand.u32 2147483647, %v1151_v9  ;;  %v487_v4 = vld [vmem:[#allocation6 + $0x280] sm:$0xff] }
  0x67   : > { %v1663_v3 = vsub.f32 1.0, %v1279_v12  ;;  %v2039_v27 = vmax.f32 %v1655_v13, 0.0  ;;  %v1911_v28 = vsub.f32 1.0, %v1527_v14  ;;  %v872_v29 = vsub.f32 %v488_v10, %v5696_v57  ;;  %v743_v49 = vld [vmem:[#allocation6 + $0xa80] sm:$0xff]  ;;  %v472_v62 = vld [vmem:[#allocation6 + $0x208] sm:$0xff] }
  0x68   : > { %v2376_v35 = vpack.c.bf16 %v2048_v15, %v2040_v11  ;;  %v2296_v37 = vmax.f32 %v1912_v17, 0.0  ;;  %v2304_v38 = vmax.f32 %v1920_v19, 0.0  ;;  %v1919_v39 = vsub.f32 1.0, %v1535_v21  ;;  %v480_v13 = vld [vmem:[#allocation6 + $0x248] sm:$0xff] }
  0x69   : > { %v2047_v40 = vmax.f32 %v1663_v3, 0.0  ;;  %v2295_v5 = vmax.f32 %v1911_v28, 0.0  ;;  %v880_v41 = vsub.f32 %v496_v25, %v5696_v57  ;;  %v1256_v42 = vand.u32 2147483647, %v872_v29  ;;  %v728_v21 = vld [vmem:[#allocation6 + $0xa08] sm:$0xff] }
  0x6a   : > { %3081 = vmatprep.subr.bf16.mxu0 %v2376_v35  ;;  %v2504_v44 = vpack.c.bf16 %v2304_v38, %v2296_v37  ;;  %v2303_v45 = vmax.f32 %v1919_v39, 0.0  ;;  %v1128_v46 = vsub.f32 %v744_v31, %v5696_v57  ;;  %v1136_v47 = vsub.f32 %v752_v32, %v5696_v57  ;;  %v736_v29 = vld [vmem:[#allocation6 + $0xa48] sm:$0xff]  ;;  %v471_v38 = vld [vmem:[#allocation6 + $0x200] sm:$0xff] }
  0x6b   : > { %v2375_v50 = vpack.c.bf16 %v2047_v40, %v2039_v27  ;;  %v1264_v51 = vand.u32 2147483647, %v880_v41  ;;  %v1640_v52 = vsub.f32 1.0, %v1256_v42  ;;  %v871_v53 = vsub.f32 %v487_v4, %v5685_v48  ;;  %v479_v39 = vld [vmem:[#allocation6 + $0x240] sm:$0xff] }
  0x6c   : > { %3234 = vmatprep.subr.bf16.mxu1 %v2504_v44  ;;  %v2503_v58 = vpack.c.bf16 %v2303_v45, %v2295_v5  ;;  %v1512_v59 = vand.u32 2147483647, %v1128_v46  ;;  %v1520_v60 = vand.u32 2147483647, %v1136_v47  ;;  %v879_v61 = vsub.f32 %v495_v43, %v5685_v48  ;;  %v727_v46 = vld [vmem:[#allocation6 + $0xa00] sm:$0xff] }
  0x6d   : > { %3082 = vmatpush1.bf16.msra.mxu0 %v2375_v50  ;;  %v1648_v63 = vsub.f32 1.0, %v1264_v51  ;;  %v2024_v6 = vmax.f32 %v1640_v52, 0.0  ;;  %v1255_v7 = vand.u32 2147483647, %v871_v53  ;;  %v1127_v8 = vsub.f32 %v743_v49, %v5685_v48  ;;  %v735_v52 = vld [vmem:[#allocation6 + $0xa40] sm:$0xff] }
  0x6e   : > { %3235 = vmatpush1.bf16.msra.mxu1 %v2503_v58  ;;  %v1896_v9 = vsub.f32 1.0, %v1512_v59  ;;  %v1904_v10 = vsub.f32 1.0, %v1520_v60  ;;  %v1263_v11 = vand.u32 2147483647, %v879_v61  ;;  %v1135_v12 = vsub.f32 %v751_v54, %v5685_v48  ;;  %v456_v60 = vld [vmem:[#allocation6 + $0x188] sm:$0xff] }
  0x6f   : > { %v2032_v14 = vmax.f32 %v1648_v63, 0.0  ;;  %v1639_v15 = vsub.f32 1.0, %v1255_v7  ;;  %v1511_v17 = vand.u32 2147483647, %v1127_v8  ;;  %v856_v19 = vsub.f32 %v472_v62, %v5696_v57 }
  0x70   : > { %v2280_v25 = vmax.f32 %v1896_v9, 0.0  ;;  %v2288_v3 = vmax.f32 %v1904_v10, 0.0  ;;  %v1647_v27 = vsub.f32 1.0, %v1263_v11  ;;  %v1519_v28 = vand.u32 2147483647, %v1135_v12  ;;  %v464_v11 = vld [vmem:[#allocation6 + $0x1c8] sm:$0xff] }
  0x71   : > { %v2368_v31 = vpack.c.bf16 %v2032_v14, %v2024_v6  ;;  %v2023_v32 = vmax.f32 %v1639_v15, 0.0  ;;  %v1895_v35 = vsub.f32 1.0, %v1511_v17  ;;  %v864_v37 = vsub.f32 %v480_v13, %v5696_v57  ;;  %v712_v17 = vld [vmem:[#allocation6 + $0x988] sm:$0xff] }
  0x72   : > { %v2496_v4 = vpack.c.bf16 %v2288_v3, %v2280_v25  ;;  %v2031_v40 = vmax.f32 %v1647_v27, 0.0  ;;  %v1903_v5 = vsub.f32 1.0, %v1519_v28  ;;  %v1240_v41 = vand.u32 2147483647, %v856_v19  ;;  %v720_v27 = vld [vmem:[#allocation6 + $0x9c8] sm:$0xff] }
  0x73   : > { %3083 = vmatprep.subr.bf16.mxu0 %v2368_v31  ;;  %v2279_v42 = vmax.f32 %v1895_v35, 0.0  ;;  %v1248_v43 = vand.u32 2147483647, %v864_v37  ;;  %v1112_v44 = vsub.f32 %v728_v21, %v5696_v57  ;;  %v1120_v45 = vsub.f32 %v736_v29, %v5696_v57  ;;  %v5245_v28 = vld [vmem:[#allocation5 + $0x4] ss:$12 sps:$4 sm:$0xff]  }
  0x74   : > { %3236 = vmatprep.subr.bf16.mxu1 %v2496_v4  ;;  %v2367_v47 = vpack.c.bf16 %v2031_v40, %v2023_v32  ;;  %v2287_v49 = vmax.f32 %v1903_v5, 0.0  ;;  %v1624_v50 = vsub.f32 1.0, %v1240_v41  ;;  %v855_v51 = vsub.f32 %v471_v38, %v5685_v48  ;;  %v455_v37 = vld [vmem:[#allocation6 + $0x180] sm:$0xff]  ;;  %3111 = vmatprep.mubr.bf16.mxu0 %v5245_v28 }
  0x75   : > { %v1632_v53 = vsub.f32 1.0, %v1248_v43  ;;  %v1496_v54 = vand.u32 2147483647, %v1112_v44  ;;  %v1504_v58 = vand.u32 2147483647, %v1120_v45  ;;  %v863_v59 = vsub.f32 %v479_v39, %v5685_v48  ;;  %v463_v38 = vld [vmem:[#allocation6 + $0x1c0] sm:$0xff] }
  0x76   : > { %3084 = vmatpush1.bf16.msra.mxu0 %v2367_v47  ;;  %v2495_v61 = vpack.c.bf16 %v2287_v49, %v2279_v42  ;;  %v2008_v62 = vmax.f32 %v1624_v50, 0.0  ;;  %v1239_v63 = vand.u32 2147483647, %v855_v51  ;;  %v1111_v6 = vsub.f32 %v727_v46, %v5685_v48  ;;  %v711_v41 = vld [vmem:[#allocation6 + $0x980] sm:$0xff] }
  0x77   : > { %v2016_v7 = vmax.f32 %v1632_v53, 0.0  ;;  %v1880_v8 = vsub.f32 1.0, %v1496_v54  ;;  %v1888_v9 = vsub.f32 1.0, %v1504_v58  ;;  %v1247_v10 = vand.u32 2147483647, %v863_v59  ;;  %v719_v58 = vld [vmem:[#allocation6 + $0x9c0] sm:$0xff] }
  0x78   : > { %3237 = vmatpush1.bf16.msra.mxu1 %v2495_v61  ;;  %v1623_v12 = vsub.f32 1.0, %v1239_v63  ;;  %v1119_v13 = vsub.f32 %v735_v52, %v5685_v48  ;;  %v1495_v14 = vand.u32 2147483647, %v1111_v6  ;;  %v840_v15 = vsub.f32 %v456_v60, %v5696_v57  ;;  %v440_v63 = vld [vmem:[#allocation6 + $0x108] sm:$0xff] }
  0x79   : > { %v2360_v19 = vpack.c.bf16 %v2016_v7, %v2008_v62  ;;  %v2264_v21 = vmax.f32 %v1880_v8, 0.0  ;;  %v2272_v25 = vmax.f32 %v1888_v9, 0.0  ;;  %v1631_v3 = vsub.f32 1.0, %v1247_v10  ;;  %v448_v10 = vld [vmem:[#allocation6 + $0x148] sm:$0xff] }
  0x7a   : > { %v2007_v29 = vmax.f32 %v1623_v12, 0.0  ;;  %v1503_v31 = vand.u32 2147483647, %v1119_v13  ;;  %v1879_v32 = vsub.f32 1.0, %v1495_v14  ;;  %v848_v35 = vsub.f32 %v464_v11, %v5696_v57  ;;  %v696_v11 = vld [vmem:[#allocation6 + $0x908] sm:$0xff] }
  0x7b   : > { %3085 = vmatprep.subr.bf16.mxu0 %v2360_v19  ;;  %v2488_v39 = vpack.c.bf16 %v2272_v25, %v2264_v21  ;;  %v2015_v4 = vmax.f32 %v1631_v3, 0.0  ;;  %v1224_v40 = vand.u32 2147483647, %v840_v15  ;;  %v1096_v5 = vsub.f32 %v712_v17, %v5696_v57  ;;  %v704_v3 = vld [vmem:[#allocation6 + $0x948] sm:$0xff] }
  0x7c   : > { %v1887_v42 = vsub.f32 1.0, %v1503_v31  ;;  %v2263_v43 = vmax.f32 %v1879_v32, 0.0  ;;  %v1232_v44 = vand.u32 2147483647, %v848_v35  ;;  %v1104_v45 = vsub.f32 %v720_v27, %v5696_v57  ;;  %v439_v32 = vld [vmem:[#allocation6 + $0x100] sm:$0xff] }
  0x7d   : > { %3238 = vmatprep.subr.bf16.mxu1 %v2488_v39  ;;  %v2359_v46 = vpack.c.bf16 %v2015_v4, %v2007_v29  ;;  %v1608_v47 = vsub.f32 1.0, %v1224_v40  ;;  %v1480_v49 = vand.u32 2147483647, %v1096_v5  ;;  %v839_v50 = vsub.f32 %v455_v37, %v5685_v48  ;;  %v447_v35 = vld [vmem:[#allocation6 + $0x140] sm:$0xff] }
  0x7e   : > { %v2271_v51 = vmax.f32 %v1887_v42, 0.0  ;;  %v1616_v52 = vsub.f32 1.0, %v1232_v44  ;;  %v1488_v53 = vand.u32 2147483647, %v1104_v45  ;;  %v847_v54 = vsub.f32 %v463_v38, %v5685_v48  ;;  %v695_v40 = vld [vmem:[#allocation6 + $0x900] sm:$0xff] }
  0x7f   : > { %3086 = vmatpush1.bf16.msra.mxu0 %v2359_v46  ;;  %v1992_v59 = vmax.f32 %v1608_v47, 0.0  ;;  %v1864_v60 = vsub.f32 1.0, %v1480_v49  ;;  %v1223_v61 = vand.u32 2147483647, %v839_v50  ;;  %v1095_v62 = vsub.f32 %v711_v41, %v5685_v48 }
  0x80   : > { %v2487_v6 = vpack.c.bf16 %v2271_v51, %v2263_v43  ;;  %v2000_v7 = vmax.f32 %v1616_v52, 0.0  ;;  %v1872_v8 = vsub.f32 1.0, %v1488_v53  ;;  %v1231_v9 = vand.u32 2147483647, %v847_v54  ;;  %v703_v53 = vld [vmem:[#allocation6 + $0x940] sm:$0xff] }
  0x81   : > { %v2248_v12 = vmax.f32 %v1864_v60, 0.0  ;;  %v1607_v13 = vsub.f32 1.0, %v1223_v61  ;;  %v1103_v14 = vsub.f32 %v719_v58, %v5685_v48  ;;  %v1479_v15 = vand.u32 2147483647, %v1095_v62  ;;  %v424_v61 = vld [vmem:[#allocation6 + $0x88] sm:$0xff] }
  0x82   : > { %3239 = vmatpush1.bf16.msra.mxu1 %v2487_v6  ;;  %v2352_v17 = vpack.c.bf16 %v2000_v7, %v1992_v59  ;;  %v2256_v19 = vmax.f32 %v1872_v8, 0.0  ;;  %v1615_v21 = vsub.f32 1.0, %v1231_v9  ;;  %v824_v25 = vsub.f32 %v440_v63, %v5696_v57  ;;  %v432_v8 = vld [vmem:[#allocation6 + $0xc8] sm:$0xff] }
  0x83   : > { %v1991_v27 = vmax.f32 %v1607_v13, 0.0  ;;  %v1487_v28 = vand.u32 2147483647, %v1103_v14  ;;  %v1863_v29 = vsub.f32 1.0, %v1479_v15  ;;  %v832_v31 = vsub.f32 %v448_v10, %v5696_v57  ;;  %v680_v9 = vld [vmem:[#allocation6 + $0x888] sm:$0xff] }
  0x84   : > { %3087 = vmatprep.subr.bf16.mxu0 %v2352_v17  ;;  %v2480_v37 = vpack.c.bf16 %v2256_v19, %v2248_v12  ;;  %v1999_v38 = vmax.f32 %v1615_v21, 0.0  ;;  %v1208_v39 = vand.u32 2147483647, %v824_v25  ;;  %v1080_v4 = vsub.f32 %v696_v11, %v5696_v57  ;;  %v688_v21 = vld [vmem:[#allocation6 + $0x8c8] sm:$0xff]  ;;  %v423_v25 = vld [vmem:[#allocation6 + $0x80] sm:$0xff] }
  0x85   : > { %v1871_v5 = vsub.f32 1.0, %v1487_v28  ;;  %v2247_v41 = vmax.f32 %v1863_v29, 0.0  ;;  %v1216_v42 = vand.u32 2147483647, %v832_v31  ;;  %v1088_v43 = vsub.f32 %v704_v3, %v5696_v57 }
  0x86   : > { %3240 = vmatprep.subr.bf16.mxu1 %v2480_v37  ;;  %v2351_v44 = vpack.c.bf16 %v1999_v38, %v1991_v27  ;;  %v1592_v45 = vsub.f32 1.0, %v1208_v39  ;;  %v1464_v46 = vand.u32 2147483647, %v1080_v4  ;;  %v823_v47 = vsub.f32 %v439_v32, %v5685_v48  ;;  %v431_v38 = vld [vmem:[#allocation6 + $0xc0] sm:$0xff] }
  0x87   : > { %v2255_v49 = vmax.f32 %v1871_v5, 0.0  ;;  %v1600_v50 = vsub.f32 1.0, %v1216_v42  ;;  %v1472_v51 = vand.u32 2147483647, %v1088_v43  ;;  %v831_v52 = vsub.f32 %v447_v35, %v5685_v48 }
  0x88   : > { %3088 = vmatpush1.bf16.msra.mxu0 %v2351_v44  ;;  %v1976_v54 = vmax.f32 %v1592_v45, 0.0  ;;  %v1848_v58 = vsub.f32 1.0, %v1464_v46  ;;  %v1207_v59 = vand.u32 2147483647, %v823_v47  ;;  %v1079_v60 = vsub.f32 %v695_v40, %v5685_v48  ;;  %v687_v46 = vld [vmem:[#allocation6 + $0x8c0] sm:$0xff] }
  0x89   : > { %v2479_v62 = vpack.c.bf16 %v2255_v49, %v2247_v41  ;;  %v1984_v63 = vmax.f32 %v1600_v50, 0.0  ;;  %v1856_v6 = vsub.f32 1.0, %v1472_v51  ;;  %v1215_v7 = vand.u32 2147483647, %v831_v52  ;;  %v679_v41 = vld [vmem:[#allocation6 + $0x880] sm:$0xff] }
  0x8a   : > { %v2232_v10 = vmax.f32 %v1848_v58, 0.0  ;;  %v1591_v11 = vsub.f32 1.0, %v1207_v59  ;;  %v1087_v12 = vsub.f32 %v703_v53, %v5685_v48  ;;  %v1463_v13 = vand.u32 2147483647, %v1079_v60  ;;  %v408_v59 = vld [vmem:[#allocation6 + $0x8] sm:$0xff] }
  0x8b   : > { %3241 = vmatpush1.bf16.msra.mxu1 %v2479_v62  ;;  %v2344_v14 = vpack.c.bf16 %v1984_v63, %v1976_v54  ;;  %v2240_v15 = vmax.f32 %v1856_v6, 0.0  ;;  %v1599_v17 = vsub.f32 1.0, %v1215_v7  ;;  %v808_v19 = vsub.f32 %v424_v61, %v5696_v57  ;;  %v416_v6 = vld [vmem:[#allocation6 + $0x48] sm:$0xff] }
  0x8c   : > { %v1975_v3 = vmax.f32 %v1591_v11, 0.0  ;;  %v1471_v27 = vand.u32 2147483647, %v1087_v12  ;;  %v1847_v28 = vsub.f32 1.0, %v1463_v13  ;;  %v816_v29 = vsub.f32 %v432_v8, %v5696_v57  ;;  %v664_v7 = vld [vmem:[#allocation6 + $0x808] sm:$0xff] }
  0x8d   : > { %3089 = vmatprep.subr.bf16.mxu0 %v2344_v14  ;;  %v2472_v31 = vpack.c.bf16 %v2240_v15, %v2232_v10  ;;  %v1983_v32 = vmax.f32 %v1599_v17, 0.0  ;;  %v1192_v35 = vand.u32 2147483647, %v808_v19  ;;  %v1064_v37 = vsub.f32 %v680_v9, %v5696_v57  ;;  %v672_v17 = vld [vmem:[#allocation6 + $0x848] sm:$0xff] }
  0x8e   : > { %v1855_v39 = vsub.f32 1.0, %v1471_v27  ;;  %v2231_v4 = vmax.f32 %v1847_v28, 0.0  ;;  %v1200_v40 = vand.u32 2147483647, %v816_v29  ;;  %v1072_v5 = vsub.f32 %v688_v21, %v5696_v57  ;;  %v407_v27 = vld [vmem:[#allocation6] sm:$0xff] }
  0x8f   : > { %3242 = vmatprep.subr.bf16.mxu1 %v2472_v31  ;;  %v2343_v42 = vpack.c.bf16 %v1983_v32, %v1975_v3  ;;  %v1576_v43 = vsub.f32 1.0, %v1192_v35  ;;  %v1448_v44 = vand.u32 2147483647, %v1064_v37  ;;  %v807_v45 = vsub.f32 %v423_v25, %v5685_v48  ;;  %v415_v35 = vld [vmem:[#allocation6 + $0x40] sm:$0xff] }
  0x90   : > { %v2239_v47 = vmax.f32 %v1855_v39, 0.0  ;;  %v1584_v49 = vsub.f32 1.0, %v1200_v40  ;;  %v1456_v50 = vand.u32 2147483647, %v1072_v5  ;;  %v815_v51 = vsub.f32 %v431_v38, %v5685_v48  ;;  %v663_v40 = vld [vmem:[#allocation6 + $0x800] sm:$0xff] }
  0x91   : > { %3090 = vmatpush1.bf16.msra.mxu0 %v2343_v42  ;;  %v1960_v52 = vmax.f32 %v1576_v43, 0.0  ;;  %v1832_v53 = vsub.f32 1.0, %v1448_v44  ;;  %v1191_v54 = vand.u32 2147483647, %v807_v45  ;;  %v1063_v58 = vsub.f32 %v679_v41, %v5685_v48  ;;  %v671_v44 = vld [vmem:[#allocation6 + $0x840] sm:$0xff] }
  0x92   : > { %v2471_v60 = vpack.c.bf16 %v2239_v47, %v2231_v4  ;;  %v1968_v61 = vmax.f32 %v1584_v49, 0.0  ;;  %v1840_v62 = vsub.f32 1.0, %v1456_v50  ;;  %v1199_v63 = vand.u32 2147483647, %v815_v51 }
  0x93   : > { %v2216_v8 = vmax.f32 %v1832_v53, 0.0  ;;  %v1575_v9 = vsub.f32 1.0, %v1191_v54  ;;  %v1071_v10 = vsub.f32 %v687_v46, %v5685_v48  ;;  %v1447_v11 = vand.u32 2147483647, %v1063_v58  ;;  %v648_v54 = vld [vmem:[#allocation6 + $0x788] sm:$0xff] }
  0x94   : > { %3243 = vmatpush1.bf16.msra.mxu1 %v2471_v60  ;;  %v2336_v12 = vpack.c.bf16 %v1968_v61, %v1960_v52  ;;  %v2224_v13 = vmax.f32 %v1840_v62, 0.0  ;;  %v1583_v14 = vsub.f32 1.0, %v1199_v63  ;;  %v792_v15 = vsub.f32 %v408_v59, %v5696_v57  ;;  %v656_v62 = vld [vmem:[#allocation6 + $0x7c8] sm:$0xff] }
  0x95   : > { %v1959_v19 = vmax.f32 %v1575_v9, 0.0  ;;  %v1455_v21 = vand.u32 2147483647, %v1071_v10  ;;  %v1831_v25 = vsub.f32 1.0, %v1447_v11  ;;  %v800_v3 = vsub.f32 %v416_v6, %v5696_v57  ;;  %v647_v9 = vld [vmem:[#allocation6 + $0x780] sm:$0xff] }
  0x96   : > { %3091 = vmatprep.subr.bf16.mxu0 %v2336_v12  ;;  %v2464_v28 = vpack.c.bf16 %v2224_v13, %v2216_v8  ;;  %v1967_v29 = vmax.f32 %v1583_v14, 0.0  ;;  %v1176_v31 = vand.u32 2147483647, %v792_v15  ;;  %v1048_v32 = vsub.f32 %v664_v7, %v5696_v57  ;;  %v655_v10 = vld [vmem:[#allocation6 + $0x7c0] sm:$0xff] }
  0x97   : > { %v1839_v37 = vsub.f32 1.0, %v1455_v21  ;;  %v2215_v38 = vmax.f32 %v1831_v25, 0.0  ;;  %v1184_v39 = vand.u32 2147483647, %v800_v3  ;;  %v1056_v4 = vsub.f32 %v672_v17, %v5696_v57  ;;  %v632_v25 = vld [vmem:[#allocation6 + $0x708] sm:$0xff] }
  0x98   : > { %3244 = vmatprep.subr.bf16.mxu1 %v2464_v28  ;;  %v2335_v5 = vpack.c.bf16 %v1967_v29, %v1959_v19  ;;  %v1560_v41 = vsub.f32 1.0, %v1176_v31  ;;  %v1432_v42 = vand.u32 2147483647, %v1048_v32  ;;  %v791_v43 = vsub.f32 %v407_v27, %v5685_v48  ;;  %v640_v31 = vld [vmem:[#allocation6 + $0x748] sm:$0xff] }
  0x99   : > { %v2223_v45 = vmax.f32 %v1839_v37, 0.0  ;;  %v1568_v46 = vsub.f32 1.0, %v1184_v39  ;;  %v1440_v47 = vand.u32 2147483647, %v1056_v4  ;;  %v799_v49 = vsub.f32 %v415_v35, %v5685_v48  ;;  %v631_v39 = vld [vmem:[#allocation6 + $0x700] sm:$0xff] }
  0x9a   : > { %3092 = vmatpush1.bf16.msra.mxu0 %v2335_v5  ;;  %v1944_v50 = vmax.f32 %v1560_v41, 0.0  ;;  %v1816_v51 = vsub.f32 1.0, %v1432_v42  ;;  %v1175_v52 = vand.u32 2147483647, %v791_v43  ;;  %v1047_v53 = vsub.f32 %v663_v40, %v5685_v48  ;;  %v639_v42 = vld [vmem:[#allocation6 + $0x740] sm:$0xff] }
  0x9b   : > { %v2463_v58 = vpack.c.bf16 %v2223_v45, %v2215_v38  ;;  %v1952_v59 = vmax.f32 %v1568_v46, 0.0  ;;  %v1824_v60 = vsub.f32 1.0, %v1440_v47  ;;  %v1183_v61 = vand.u32 2147483647, %v799_v49  ;;  %v5241_v49 = vld [vmem:[#allocation5 + $0x8] ss:$12 sps:$4 sm:$0xff]  }
  0x9c   : > { %v2200_v63 = vmax.f32 %v1816_v51, 0.0  ;;  %v1559_v6 = vsub.f32 1.0, %v1175_v52  ;;  %v1055_v7 = vsub.f32 %v671_v44, %v5685_v48  ;;  %v1431_v8 = vand.u32 2147483647, %v1047_v53  ;;  %v616_v53 = vld [vmem:[#allocation6 + $0x688] sm:$0xff] }
  0x9d   : > { %3245 = vmatpush1.bf16.msra.mxu1 %v2463_v58  ;;  %v2328_v11 = vpack.c.bf16 %v1952_v59, %v1944_v50  ;;  %v2208_v12 = vmax.f32 %v1824_v60, 0.0  ;;  %v1567_v13 = vsub.f32 1.0, %v1183_v61  ;;  %v1032_v14 = vsub.f32 %v648_v54, %v5696_v57  ;;  %v624_v61 = vld [vmem:[#allocation6 + $0x6c8] sm:$0xff] }
  0x9e   : > { %v1943_v15 = vmax.f32 %v1559_v6, 0.0  ;;  %v1439_v17 = vand.u32 2147483647, %v1055_v7  ;;  %v1815_v19 = vsub.f32 1.0, %v1431_v8  ;;  %v1040_v21 = vsub.f32 %v656_v62, %v5696_v57 }
  0x9f   : > { %3093 = vmatprep.subr.bf16.mxu0 %v2328_v11  ;;  %v2456_v3 = vpack.c.bf16 %v2208_v12, %v2200_v63  ;;  %v1951_v27 = vmax.f32 %v1567_v13, 0.0  ;;  %v1416_v28 = vand.u32 2147483647, %v1032_v14  ;;  %v1031_v29 = vsub.f32 %v647_v9, %v5685_v48  ;;  %v615_v12 = vld [vmem:[#allocation6 + $0x680] sm:$0xff] }
  0xa0   : > { %v1823_v32 = vsub.f32 1.0, %v1439_v17  ;;  %v2199_v35 = vmax.f32 %v1815_v19, 0.0  ;;  %v1424_v37 = vand.u32 2147483647, %v1040_v21  ;;  %v1039_v38 = vsub.f32 %v655_v10, %v5685_v48  ;;  %v522_v19 = vld [vmem:[#allocation6 + $0x398] sm:$0xff] }
  0xa1   : > { %3246 = vmatprep.subr.bf16.mxu1 %v2456_v3  ;;  %v2327_v4 = vpack.c.bf16 %v1951_v27, %v1943_v15  ;;  %v1800_v40 = vsub.f32 1.0, %v1416_v28  ;;  %v1415_v5 = vand.u32 2147483647, %v1031_v29  ;;  %v1016_v41 = vsub.f32 %v632_v25, %v5696_v57  ;;  %v530_v21 = vld [vmem:[#allocation6 + $0x3d8] sm:$0xff]  ;;  %v623_v29 = vld [vmem:[#allocation6 + $0x6c0] sm:$0xff] }
  0xa2   : > { %v2207_v43 = vmax.f32 %v1823_v32, 0.0  ;;  %v1808_v44 = vsub.f32 1.0, %v1424_v37  ;;  %v1423_v45 = vand.u32 2147483647, %v1039_v38  ;;  %v1024_v46 = vsub.f32 %v640_v31, %v5696_v57 }
  0xa3   : > { %3094 = vmatpush1.bf16.msra.mxu0 %v2327_v4  ;;  %v2184_v47 = vmax.f32 %v1800_v40, 0.0  ;;  %v1799_v50 = vsub.f32 1.0, %v1415_v5  ;;  %v1400_v51 = vand.u32 2147483647, %v1016_v41  ;;  %v1015_v52 = vsub.f32 %v631_v39, %v5685_v48  ;;  %v521_v5 = vld [vmem:[#allocation6 + $0x390] sm:$0xff] }
  0xa4   : > { %v2455_v54 = vpack.c.bf16 %v2207_v43, %v2199_v35  ;;  %v2192_v58 = vmax.f32 %v1808_v44, 0.0  ;;  %v1807_v59 = vsub.f32 1.0, %v1423_v45  ;;  %v1408_v60 = vand.u32 2147483647, %v1024_v46  ;;  %v529_v41 = vld [vmem:[#allocation6 + $0x3d0] sm:$0xff] }
  0xa5   : > { %v2183_v62 = vmax.f32 %v1799_v50, 0.0  ;;  %v1784_v63 = vsub.f32 1.0, %v1400_v51  ;;  %v1023_v6 = vsub.f32 %v639_v42, %v5685_v48  ;;  %v1399_v7 = vand.u32 2147483647, %v1015_v52  ;;  %v5242_v43 = vld [vmem:[#allocation5 + $0x20] ss:$12 sps:$4 sm:$0xff]  }
  0xa6   : > { %3247 = vmatpush1.bf16.msra.mxu1 %v2455_v54  ;;  %v2448_v8 = vpack.c.bf16 %v2192_v58, %v2184_v47  ;;  %v2191_v9 = vmax.f32 %v1807_v59, 0.0  ;;  %v1792_v10 = vsub.f32 1.0, %v1408_v60  ;;  %v1000_v11 = vsub.f32 %v616_v53, %v5696_v57  ;;  %v600_v51 = vld [vmem:[#allocation6 + $0x608] sm:$0xff] }
  0xa7   : > { %v2168_v13 = vmax.f32 %v1784_v63, 0.0  ;;  %v1407_v14 = vand.u32 2147483647, %v1023_v6  ;;  %v1783_v15 = vsub.f32 1.0, %v1399_v7  ;;  %v1008_v17 = vsub.f32 %v624_v61, %v5696_v57  ;;  %v608_v63 = vld [vmem:[#allocation6 + $0x648] sm:$0xff]  ;;  %v599_v6 = vld [vmem:[#allocation6 + $0x600] sm:$0xff] }
  0xa8   : > { %3095 = vmatprep.subr.bf16.mxu0 %v2448_v8  ;;  %v2447_v25 = vpack.c.bf16 %v2191_v9, %v2183_v62  ;;  %v2176_v3 = vmax.f32 %v1792_v10, 0.0  ;;  %v1384_v27 = vand.u32 2147483647, %v1000_v11  ;;  %v5776_v28 = vadd.f32 %v5670_v34, %v5691_v55  ;;  %v607_v10 = vld [vmem:[#allocation6 + $0x640] sm:$0xff] }
  0xa9   : > { %3265 = vmatmul.mubr.bf16.vlgmr.msra.gmra.mxu1 %v5241_v49  ;;  %v1791_v31 = vsub.f32 1.0, %v1407_v14  ;;  %v2167_v32 = vmax.f32 %v1783_v15, 0.0  ;;  %v1392_v35 = vand.u32 2147483647, %v1008_v17  ;;  %v999_v37 = vsub.f32 %v615_v12, %v5685_v48 }
  0xaa   : > { %3096 = vmatpush2.bf16.msra.mxu0 %v2447_v25  ;;  %v2440_v38 = vpack.c.bf16 %v2176_v3, %v2168_v13  ;;  %3274 = vmatprep.mubr.bf16.mxu1 %v7941_v1  ;;  %v1768_v39 = vsub.f32 1.0, %v1384_v27  ;;  %v906_v4 = vsub.f32 %v522_v19, %v5776_v28  ;;  %v914_v40 = vsub.f32 %v530_v21, %v5776_v28  ;;  %v506_v25 = vld [vmem:[#allocation6 + $0x318] sm:$0xff] }
  0xab   : > { %v2175_v55 = vmax.f32 %v1791_v31, 0.0  ;;  %v1776_v42 = vsub.f32 1.0, %v1392_v35  ;;  %v1007_v44 = vsub.f32 %v623_v29, %v5685_v48  ;;  %v1383_v45 = vand.u32 2147483647, %v999_v37 }
  0xac   : > { %3097 = vmatprep.subr.bf16.mxu0 %v2440_v38  ;;  %v2152_v46 = vmax.f32 %v1768_v39, 0.0  ;;  %v1290_v47 = vand.u32 2147483647, %v906_v4  ;;  %v1298_v49 = vand.u32 2147483647, %v914_v40  ;;  %v5785_v50 = vadd.f32 %v5670_v34, %v5693_v56  ;;  %v505_v4 = vld [vmem:[#allocation6 + $0x310] sm:$0xff] }
  0xad   : > { %v2439_v52 = vpack.c.bf16 %v2175_v55, %v2167_v32  ;;  %v2160_v53 = vmax.f32 %v1776_v42, 0.0  ;;  %v1391_v54 = vand.u32 2147483647, %v1007_v44  ;;  %v1767_v58 = vsub.f32 1.0, %v1383_v45  ;;  %v514_v32 = vld [vmem:[#allocation6 + $0x358] sm:$0xff]  ;;  %v513_v42 = vld [vmem:[#allocation6 + $0x350] sm:$0xff] }
  0xae   : > { %v1674_v59 = vsub.f32 1.0, %v1290_v47  ;;  %v1682_v60 = vsub.f32 1.0, %v1298_v49  ;;  %v905_v61 = vsub.f32 %v521_v5, %v5785_v50  ;;  %v913_v62 = vsub.f32 %v529_v41, %v5785_v50  ;;  %v584_v47 = vld [vmem:[#allocation6 + $0x588] sm:$0xff]  ;;  %v5243_v49 = vld [vmem:[#allocation5 + $0x38] ss:$12 sps:$4 sm:$0xff]  }
  0xaf   : > { %3098 = vmatpush2.bf16.msra.mxu0 %v2439_v52  ;;  %v2432_v7 = vpack.c.bf16 %v2160_v53, %v2152_v46  ;;  %v1775_v8 = vsub.f32 1.0, %v1391_v54  ;;  %v2151_v9 = vmax.f32 %v1767_v58, 0.0  ;;  %v984_v56 = vsub.f32 %v600_v51, %v5696_v57  ;;  %v592_v58 = vld [vmem:[#allocation6 + $0x5c8] sm:$0xff] }
  0xb0   : > { %v2058_v11 = vmax.f32 %v1674_v59, 0.0  ;;  %v2066_v12 = vmax.f32 %v1682_v60, 0.0  ;;  %v1289_v13 = vand.u32 2147483647, %v905_v61  ;;  %v1297_v14 = vand.u32 2147483647, %v913_v62 }
  0xb1   : > { %3099 = vmatprep.subr.bf16.mxu0 %v2432_v7  ;;  %3275 = vmatmul.mubr.bf16.gmra.mxu1 %v5242_v43  ;;  %v2159_v15 = vmax.f32 %v1775_v8, 0.0  ;;  %v992_v17 = vsub.f32 %v608_v63, %v5696_v57  ;;  %v1368_v19 = vand.u32 2147483647, %v984_v56  ;;  %v983_v21 = vsub.f32 %v599_v6, %v5685_v48 }
  0xb2   : > { %v2386_v3 = vpack.c.bf16 %v2066_v12, %v2058_v11  ;;  %v1673_v27 = vsub.f32 1.0, %v1289_v13  ;;  %v1681_v29 = vsub.f32 1.0, %v1297_v14  ;;  %v991_v31 = vsub.f32 %v607_v10, %v5685_v48  ;;  %3284 = vmatprep.mubr.bf16.mxu1 %v7941_v1  ;;  %v591_v13 = vld [vmem:[#allocation6 + $0x5c0] sm:$0xff]  ;;  %v568_v14 = vld [vmem:[#allocation6 + $0x508] sm:$0xff] }
  0xb3   : > { %v2431_v35 = vpack.c.bf16 %v2159_v15, %v2151_v9  ;;  %v1376_v37 = vand.u32 2147483647, %v992_v17  ;;  %v1752_v38 = vsub.f32 1.0, %v1368_v19  ;;  %v1367_v39 = vand.u32 2147483647, %v983_v21  ;;  %v583_v9 = vld [vmem:[#allocation6 + $0x580] sm:$0xff] }
  0xb4   : > { %3385 = vmatprep.subr.bf16.mxu1 %v2386_v3  ;;  %v2057_v40 = vmax.f32 %v1673_v27, 0.0  ;;  %v2065_v5 = vmax.f32 %v1681_v29, 0.0  ;;  %v1375_v41 = vand.u32 2147483647, %v991_v31  ;;  %v890_v55 = vsub.f32 %v506_v25, %v5776_v28  ;;  %v576_v25 = vld [vmem:[#allocation6 + $0x548] sm:$0xff] }
  0xb5   : > { %3100 = vmatpush2.bf16.msra.mxu0 %v2431_v35  ;;  %v1760_v43 = vsub.f32 1.0, %v1376_v37  ;;  %v2136_v44 = vmax.f32 %v1752_v38, 0.0  ;;  %v1751_v45 = vsub.f32 1.0, %v1367_v39  ;;  %v898_v46 = vsub.f32 %v514_v32, %v5776_v28  ;;  %v490_v32 = vld [vmem:[#allocation6 + $0x298] sm:$0xff] }
  0xb6   : > { %v2385_v51 = vpack.c.bf16 %v2065_v5, %v2057_v40  ;;  %v1759_v52 = vsub.f32 1.0, %v1375_v41  ;;  %v1274_v53 = vand.u32 2147483647, %v890_v55  ;;  %v889_v54 = vsub.f32 %v505_v4, %v5785_v50  ;;  %v498_v35 = vld [vmem:[#allocation6 + $0x2d8] sm:$0xff]  ;;  %v567_v40 = vld [vmem:[#allocation6 + $0x500] sm:$0xff] }
  0xb7   : > { %v2144_v59 = vmax.f32 %v1760_v43, 0.0  ;;  %v2135_v60 = vmax.f32 %v1751_v45, 0.0  ;;  %v1282_v61 = vand.u32 2147483647, %v898_v46  ;;  %v897_v62 = vsub.f32 %v513_v42, %v5785_v50  ;;  %v5244_v5 = vld [vmem:[#allocation5 + $0x50] ss:$12 sps:$4 sm:$0xff]  }
  0xb8   : > { %3386 = vmatpush1.bf16.msra.mxu1 %v2385_v51  ;;  %v2143_v63 = vmax.f32 %v1759_v52, 0.0  ;;  %v1658_v6 = vsub.f32 1.0, %v1274_v53  ;;  %v1273_v7 = vand.u32 2147483647, %v889_v54  ;;  %v968_v8 = vsub.f32 %v584_v47, %v5696_v57 }
  0xb9   : > { %v2424_v56 = vpack.c.bf16 %v2144_v59, %v2136_v44  ;;  %v1666_v10 = vsub.f32 1.0, %v1282_v61  ;;  %v1281_v11 = vand.u32 2147483647, %v897_v62  ;;  %v976_v12 = vsub.f32 %v592_v58, %v5696_v57  ;;  %3285 = vmatmul.mubr.bf16.gmra.mxu1 %v5243_v49  ;;  %v575_v61 = vld [vmem:[#allocation6 + $0x540] sm:$0xff]  ;;  %v489_v62 = vld [vmem:[#allocation6 + $0x290] sm:$0xff] }
  0xba   : > { %v2423_v15 = vpack.c.bf16 %v2143_v63, %v2135_v60  ;;  %v2042_v17 = vmax.f32 %v1658_v6, 0.0  ;;  %v1657_v19 = vsub.f32 1.0, %v1273_v7  ;;  %v1352_v21 = vand.u32 2147483647, %v968_v8  ;;  %3294 = vmatprep.mubr.bf16.mxu1 %v7941_v1 }
  0xbb   : > { %3101 = vmatprep.subr.bf16.mxu0 %v2424_v56  ;;  %v2050_v3 = vmax.f32 %v1666_v10, 0.0  ;;  %v1665_v27 = vsub.f32 1.0, %v1281_v11  ;;  %v1360_v29 = vand.u32 2147483647, %v976_v12  ;;  %v967_v31 = vsub.f32 %v583_v9, %v5685_v48  ;;  %v497_v9 = vld [vmem:[#allocation6 + $0x2d0] sm:$0xff] }
  0xbc   : > { %3102 = vmatpush2.bf16.msra.mxu0 %v2423_v15  ;;  %v2041_v37 = vmax.f32 %v1657_v19, 0.0  ;;  %v1736_v38 = vsub.f32 1.0, %v1352_v21  ;;  %v975_v39 = vsub.f32 %v591_v13, %v5685_v48  ;;  %v952_v4 = vsub.f32 %v568_v14, %v5696_v57  ;;  %v552_v19 = vld [vmem:[#allocation6 + $0x488] sm:$0xff] }
  0xbd   : > { %v2378_v41 = vpack.c.bf16 %v2050_v3, %v2042_v17  ;;  %v2049_v55 = vmax.f32 %v1665_v27, 0.0  ;;  %v1744_v42 = vsub.f32 1.0, %v1360_v29  ;;  %v1351_v43 = vand.u32 2147483647, %v967_v31  ;;  %v560_v29 = vld [vmem:[#allocation6 + $0x4c8] sm:$0xff]  ;;  %v551_v31 = vld [vmem:[#allocation6 + $0x480] sm:$0xff] }
  0xbe   : > { %v2120_v44 = vmax.f32 %v1736_v38, 0.0  ;;  %v1359_v45 = vand.u32 2147483647, %v975_v39  ;;  %v960_v46 = vsub.f32 %v576_v25, %v5696_v57  ;;  %v1336_v47 = vand.u32 2147483647, %v952_v4 }
  0xbf   : > { %3387 = vmatprep.subr.bf16.mxu1 %v2378_v41  ;;  %v2377_v49 = vpack.c.bf16 %v2049_v55, %v2041_v37  ;;  %v2128_v51 = vmax.f32 %v1744_v42, 0.0  ;;  %v1735_v52 = vsub.f32 1.0, %v1351_v43  ;;  %v874_v53 = vsub.f32 %v490_v32, %v5776_v28  ;;  %v5248_v32 = vld [vmem:[#allocation5 + $0x68] ss:$12 sps:$4 sm:$0xff]   ;;  %v559_v55 = vld [vmem:[#allocation6 + $0x4c0] sm:$0xff] }
  0xc0   : > { %v1743_v54 = vsub.f32 1.0, %v1359_v45  ;;  %v1344_v58 = vand.u32 2147483647, %v960_v46  ;;  %v1720_v59 = vsub.f32 1.0, %v1336_v47  ;;  %v882_v60 = vsub.f32 %v498_v35, %v5776_v28  ;;  %v474_v46 = vld [vmem:[#allocation6 + $0x218] sm:$0xff] }
  0xc1   : > { %3388 = vmatpush1.bf16.msra.mxu1 %v2377_v49  ;;  %v2416_v63 = vpack.c.bf16 %v2128_v51, %v2120_v44  ;;  %v2119_v6 = vmax.f32 %v1735_v52, 0.0  ;;  %v1258_v7 = vand.u32 2147483647, %v874_v53  ;;  %v951_v8 = vsub.f32 %v567_v40, %v5685_v48  ;;  %v482_v53 = vld [vmem:[#allocation6 + $0x258] sm:$0xff] }
  0xc2   : > { %v2127_v56 = vmax.f32 %v1743_v54, 0.0  ;;  %v1728_v10 = vsub.f32 1.0, %v1344_v58  ;;  %v2104_v11 = vmax.f32 %v1720_v59, 0.0  ;;  %v1266_v12 = vand.u32 2147483647, %v882_v60  ;;  %3295 = vmatmul.mubr.bf16.gmra.mxu1 %v5244_v5 }
  0xc3   : > { %3103 = vmatprep.subr.bf16.mxu0 %v2416_v63  ;;  %v1642_v13 = vsub.f32 1.0, %v1258_v7  ;;  %v959_v14 = vsub.f32 %v575_v61, %v5685_v48  ;;  %v1335_v15 = vand.u32 2147483647, %v951_v8  ;;  %v873_v17 = vsub.f32 %v489_v62, %v5785_v50  ;;  %3304 = vmatprep.mubr.bf16.mxu1 %v7941_v1  ;;  %v473_v7 = vld [vmem:[#allocation6 + $0x210] sm:$0xff] }
  0xc4   : > { %v2415_v21 = vpack.c.bf16 %v2127_v56, %v2119_v6  ;;  %v2112_v25 = vmax.f32 %v1728_v10, 0.0  ;;  %v1650_v3 = vsub.f32 1.0, %v1266_v12  ;;  %v881_v27 = vsub.f32 %v497_v9, %v5785_v50  ;;  %v536_v12 = vld [vmem:[#allocation6 + $0x408] sm:$0xff] }
  0xc5   : > { %v2026_v35 = vmax.f32 %v1642_v13, 0.0  ;;  %v1343_v37 = vand.u32 2147483647, %v959_v14  ;;  %v1719_v38 = vsub.f32 1.0, %v1335_v15  ;;  %v1257_v39 = vand.u32 2147483647, %v873_v17 }
  0xc6   : > { %3104 = vmatpush2.bf16.msra.mxu0 %v2415_v21  ;;  %v2408_v4 = vpack.c.bf16 %v2112_v25, %v2104_v11  ;;  %v2034_v40 = vmax.f32 %v1650_v3, 0.0  ;;  %v1265_v5 = vand.u32 2147483647, %v881_v27  ;;  %v936_v41 = vsub.f32 %v552_v19, %v5696_v57  ;;  %v481_v11 = vld [vmem:[#allocation6 + $0x250] sm:$0xff]  ;;  %v544_v19 = vld [vmem:[#allocation6 + $0x448] sm:$0xff] }
  0xc7   : > { %v1727_v42 = vsub.f32 1.0, %v1343_v37  ;;  %v2103_v43 = vmax.f32 %v1719_v38, 0.0  ;;  %v1641_v44 = vsub.f32 1.0, %v1257_v39  ;;  %v944_v45 = vsub.f32 %v560_v29, %v5696_v57  ;;  %v535_v37 = vld [vmem:[#allocation6 + $0x400] sm:$0xff] }
  0xc8   : > { %3105 = vmatprep.subr.bf16.mxu0 %v2408_v4  ;;  %v2370_v47 = vpack.c.bf16 %v2034_v40, %v2026_v35  ;;  %v1649_v49 = vsub.f32 1.0, %v1265_v5  ;;  %v1320_v51 = vand.u32 2147483647, %v936_v41  ;;  %v935_v52 = vsub.f32 %v551_v31, %v5685_v48  ;;  %v5252_v38 = vld [vmem:[#allocation5 + $0x80] ss:$12 sps:$4 sm:$0xff]  }
  0xc9   : > { %v2111_v54 = vmax.f32 %v1727_v42, 0.0  ;;  %v2025_v58 = vmax.f32 %v1641_v44, 0.0  ;;  %v1328_v59 = vand.u32 2147483647, %v944_v45  ;;  %v943_v60 = vsub.f32 %v559_v55, %v5685_v48  ;;  %v543_v41 = vld [vmem:[#allocation6 + $0x440] sm:$0xff]  ;;  %v458_v45 = vld [vmem:[#allocation6 + $0x198] sm:$0xff] }
  0xca   : > { %3389 = vmatprep.subr.bf16.mxu1 %v2370_v47  ;;  %v2033_v61 = vmax.f32 %v1649_v49, 0.0  ;;  %v1704_v62 = vsub.f32 1.0, %v1320_v51  ;;  %v1319_v63 = vand.u32 2147483647, %v935_v52  ;;  %v858_v6 = vsub.f32 %v474_v46, %v5776_v28  ;;  %3305 = vmatmul.mubr.bf16.gmra.mxu1 %v5248_v32 }
  0xcb   : > { %v2407_v8 = vpack.c.bf16 %v2111_v54, %v2103_v43  ;;  %v1712_v9 = vsub.f32 1.0, %v1328_v59  ;;  %v1327_v56 = vand.u32 2147483647, %v943_v60  ;;  %v866_v10 = vsub.f32 %v482_v53, %v5776_v28  ;;  %3314 = vmatprep.mubr.bf16.mxu1 %v7941_v1  ;;  %v466_v59 = vld [vmem:[#allocation6 + $0x1d8] sm:$0xff] }
  0xcc   : > { %v2369_v13 = vpack.c.bf16 %v2033_v61, %v2025_v58  ;;  %v2088_v14 = vmax.f32 %v1704_v62, 0.0  ;;  %v1703_v15 = vsub.f32 1.0, %v1319_v63  ;;  %v1242_v17 = vand.u32 2147483647, %v858_v6  ;;  %v778_v60 = vld [vmem:[#allocation6 + $0xb98] sm:$0xff] }
  0xcd   : > { %3106 = vmatpush2.bf16.msra.mxu0 %v2407_v8  ;;  %v2096_v21 = vmax.f32 %v1712_v9, 0.0  ;;  %v1711_v25 = vsub.f32 1.0, %v1327_v56  ;;  %v1250_v3 = vand.u32 2147483647, %v866_v10  ;;  %v857_v27 = vsub.f32 %v473_v7, %v5785_v50  ;;  %v786_v6 = vld [vmem:[#allocation6 + $0xbd8] sm:$0xff] }
  0xce   : > { %3390 = vmatpush1.bf16.msra.mxu1 %v2369_v13  ;;  %v2087_v29 = vmax.f32 %v1703_v15, 0.0  ;;  %v1626_v31 = vsub.f32 1.0, %v1242_v17  ;;  %v865_v32 = vsub.f32 %v481_v11, %v5785_v50  ;;  %v920_v35 = vsub.f32 %v536_v12, %v5696_v57  ;;  %v457_v13 = vld [vmem:[#allocation6 + $0x190] sm:$0xff] }
  0xcf   : > { %v2400_v39 = vpack.c.bf16 %v2096_v21, %v2088_v14  ;;  %v2095_v4 = vmax.f32 %v1711_v25, 0.0  ;;  %v1634_v40 = vsub.f32 1.0, %v1250_v3  ;;  %v1241_v5 = vand.u32 2147483647, %v857_v27  ;;  %v465_v21 = vld [vmem:[#allocation6 + $0x1d0] sm:$0xff] }
  0xd0   : > { %v2010_v55 = vmax.f32 %v1626_v31, 0.0  ;;  %v1249_v42 = vand.u32 2147483647, %v865_v32  ;;  %v928_v43 = vsub.f32 %v544_v19, %v5696_v57  ;;  %v1304_v44 = vand.u32 2147483647, %v920_v35  ;;  %v777_v25 = vld [vmem:[#allocation6 + $0xb90] sm:$0xff] }
  0xd1   : > { %3107 = vmatprep.subr.bf16.mxu0 %v2400_v39  ;;  %v2399_v46 = vpack.c.bf16 %v2095_v4, %v2087_v29  ;;  %v2018_v47 = vmax.f32 %v1634_v40, 0.0  ;;  %v1625_v49 = vsub.f32 1.0, %v1241_v5  ;;  %v919_v51 = vsub.f32 %v535_v37, %v5685_v48  ;;  %v5256_v3 = vld [vmem:[#allocation5 + $0x98] ss:$12 sps:$4 sm:$0xff]   ;;  %v785_v4 = vld [vmem:[#allocation6 + $0xbd0] sm:$0xff] }
  0xd2   : > { %v1633_v52 = vsub.f32 1.0, %v1249_v42  ;;  %v1312_v53 = vand.u32 2147483647, %v928_v43  ;;  %v1688_v54 = vsub.f32 1.0, %v1304_v44  ;;  %v927_v58 = vsub.f32 %v543_v41, %v5685_v48  ;;  %3315 = vmatmul.mubr.bf16.gmra.mxu1 %v5252_v38  ;;  %v442_v42 = vld [vmem:[#allocation6 + $0x118] sm:$0xff] }
  0xd3   : > { %3108 = vmatpush2.bf16.msra.mxu0 %v2399_v46  ;;  %v2362_v61 = vpack.c.bf16 %v2018_v47, %v2010_v55  ;;  %v2009_v62 = vmax.f32 %v1625_v49, 0.0  ;;  %v1303_v57 = vand.u32 2147483647, %v919_v51  ;;  %v842_v63 = vsub.f32 %v458_v45, %v5776_v28  ;;  %3324 = vmatprep.mubr.bf16.mxu1 %v7941_v1  ;;  %v5832_v44 = vld [vmem:[#allocation5] ss:$12 sps:$4 sm:$0xff]   ;;  %v450_v49 = vld [vmem:[#allocation6 + $0x158] sm:$0xff] }
  0xd4   : > { %v2017_v7 = vmax.f32 %v1633_v52, 0.0  ;;  %v1696_v8 = vsub.f32 1.0, %v1312_v53  ;;  %v2072_v9 = vmax.f32 %v1688_v54, 0.0  ;;  %v1311_v56 = vand.u32 2147483647, %v927_v58 }
  0xd5   : > { %3391 = vmatprep.subr.bf16.mxu1 %v2362_v61  ;;  %v1687_v10 = vsub.f32 1.0, %v1303_v57  ;;  %v850_v48 = vsub.f32 %v466_v59, %v5776_v28  ;;  %v1226_v11 = vand.u32 2147483647, %v842_v63  ;;  %v1162_v12 = vsub.f32 %v778_v60, %v5776_v28  ;;  %v5836_v58 = vld [vmem:[#allocation5 + $0x1c] ss:$12 sps:$4 sm:$0xff]   ;;  %v441_v57 = vld [vmem:[#allocation6 + $0x110] sm:$0xff] }
  0xd6   : > { %v2361_v14 = vpack.c.bf16 %v2017_v7, %v2009_v62  ;;  %v2080_v15 = vmax.f32 %v1696_v8, 0.0  ;;  %v1695_v17 = vsub.f32 1.0, %v1311_v56  ;;  %v1170_v19 = vsub.f32 %v786_v6, %v5776_v28  ;;  %v426_v56 = vld [vmem:[#allocation6 + $0x98] sm:$0xff] }
  0xd7   : > { %v2071_v27 = vmax.f32 %v1687_v10, 0.0  ;;  %v1234_v29 = vand.u32 2147483647, %v850_v48  ;;  %v1610_v31 = vsub.f32 1.0, %v1226_v11  ;;  %v1546_v32 = vand.u32 2147483647, %v1162_v12 }
  0xd8   : > { %3392 = vmatpush1.bf16.msra.mxu1 %v2361_v14  ;;  %v2392_v35 = vpack.c.bf16 %v2080_v15, %v2072_v9  ;;  %v2079_v37 = vmax.f32 %v1695_v17, 0.0  ;;  %v1554_v38 = vand.u32 2147483647, %v1170_v19  ;;  %v841_v39 = vsub.f32 %v457_v13, %v5785_v50  ;;  %v449_v9 = vld [vmem:[#allocation6 + $0x150] sm:$0xff] }
  0xd9   : > { %v1618_v40 = vsub.f32 1.0, %v1234_v29  ;;  %v1994_v5 = vmax.f32 %v1610_v31, 0.0  ;;  %v1930_v41 = vsub.f32 1.0, %v1546_v32  ;;  %v849_v55 = vsub.f32 %v465_v21, %v5785_v50  ;;  %v5260_v13 = vld [vmem:[#allocation5 + $0xb0] ss:$12 sps:$4 sm:$0xff]  }
  0xda   : > { %3109 = vmatprep.subr.bf16.mxu0 %v2392_v35  ;;  %v2391_v43 = vpack.c.bf16 %v2079_v37, %v2071_v27  ;;  %v1938_v45 = vsub.f32 1.0, %v1554_v38  ;;  %v1225_v46 = vand.u32 2147483647, %v841_v39  ;;  %v1161_v47 = vsub.f32 %v777_v25, %v5785_v50  ;;  %3325 = vmatmul.mubr.bf16.gmra.mxu1 %v5256_v3  ;;  %v434_v21 = vld [vmem:[#allocation6 + $0xd8] sm:$0xff] }
  0xdb   : > { %v2002_v51 = vmax.f32 %v1618_v40, 0.0  ;;  %v2314_v52 = vmax.f32 %v1930_v41, 0.0  ;;  %v1233_v53 = vand.u32 2147483647, %v849_v55  ;;  %v1169_v54 = vsub.f32 %v785_v4, %v5785_v50  ;;  %3334 = vmatprep.mubr.bf16.mxu1 %v7941_v1  ;;  %v762_v31 = vld [vmem:[#allocation6 + $0xb18] sm:$0xff]  ;;  %v425_v55 = vld [vmem:[#allocation6 + $0x90] sm:$0xff] }
  0xdc   : > { %3110 = vmatpush2.bf16.msra.mxu0 %v2391_v43  ;;  %v2322_v59 = vmax.f32 %v1938_v45, 0.0  ;;  %v1609_v60 = vsub.f32 1.0, %v1225_v46  ;;  %v1545_v61 = vand.u32 2147483647, %v1161_v47  ;;  %v826_v62 = vsub.f32 %v442_v42, %v5776_v28  ;;  %v770_v39 = vld [vmem:[#allocation6 + $0xb58] sm:$0xff] }
  0xdd   : > { %v2354_v63 = vpack.c.bf16 %v2002_v51, %v1994_v5  ;;  %v1617_v6 = vsub.f32 1.0, %v1233_v53  ;;  %v1553_v7 = vand.u32 2147483647, %v1169_v54  ;;  %v834_v8 = vsub.f32 %v450_v49, %v5776_v28  ;;  %v5847_v46 = vld [vmem:[#allocation5 + $0x18] ss:$12 sps:$4 sm:$0xff]   ;;  %v433_v49 = vld [vmem:[#allocation6 + $0xd0] sm:$0xff] }
  0xde   : > { %v2514_v10 = vpack.c.bf16 %v2322_v59, %v2314_v52  ;;  %v1993_v48 = vmax.f32 %v1609_v60, 0.0  ;;  %v1929_v11 = vsub.f32 1.0, %v1545_v61  ;;  %v1210_v12 = vand.u32 2147483647, %v826_v62  ;;  %v761_v51 = vld [vmem:[#allocation6 + $0xb10] sm:$0xff] }
  0xdf   : > { %3112 = vmatmul.mubr.bf16.vlgmr.msra.gmra.mxu0 %v5832_v44  ;;  %3393 = vmatprep.subr.bf16.mxu1 %v2354_v63  ;;  %v2001_v14 = vmax.f32 %v1617_v6, 0.0  ;;  %v1937_v15 = vsub.f32 1.0, %v1553_v7  ;;  %v1218_v17 = vand.u32 2147483647, %v834_v8  ;;  %v825_v19 = vsub.f32 %v441_v57, %v5785_v50  ;;  %v5852_v60 = vld [vmem:[#allocation5 + $0x34] ss:$12 sps:$4 sm:$0xff]  }
  0xe0   : > { %3538 = vmatprep.subr.bf16.mxu0 %v2514_v10  ;;  %v2313_v25 = vmax.f32 %v1929_v11, 0.0  ;;  %v1594_v3 = vsub.f32 1.0, %v1210_v12  ;;  %3121 = vmatprep.mubr.bf16.mxu0 %v5836_v58  ;;  %v833_v27 = vsub.f32 %v449_v9, %v5785_v50  ;;  %v810_v29 = vsub.f32 %v426_v56, %v5776_v28  ;;  %v769_v6 = vld [vmem:[#allocation6 + $0xb50] sm:$0xff] }
  0xe1   : > { %v2353_v32 = vpack.c.bf16 %v2001_v14, %v1993_v48  ;;  %v2321_v35 = vmax.f32 %v1937_v15, 0.0  ;;  %v1602_v37 = vsub.f32 1.0, %v1218_v17  ;;  %v1209_v38 = vand.u32 2147483647, %v825_v19  ;;  %v5264_v14 = vld [vmem:[#allocation5 + $0xc8] ss:$12 sps:$4 sm:$0xff]  }
  0xe2   : > { %v1978_v4 = vmax.f32 %v1594_v3, 0.0  ;;  %v1217_v40 = vand.u32 2147483647, %v833_v27  ;;  %v818_v5 = vsub.f32 %v434_v21, %v5776_v28  ;;  %v1194_v41 = vand.u32 2147483647, %v810_v29  ;;  %3335 = vmatmul.mubr.bf16.gmra.mxu1 %v5260_v13  ;;  %v410_v13 = vld [vmem:[#allocation6 + $0x18] sm:$0xff] }
  0xe3   : > { %3394 = vmatpush1.bf16.msra.mxu1 %v2353_v32  ;;  %v2513_v42 = vpack.c.bf16 %v2321_v35, %v2313_v25  ;;  %v1986_v43 = vmax.f32 %v1602_v37, 0.0  ;;  %v1593_v45 = vsub.f32 1.0, %v1209_v38  ;;  %v1146_v47 = vsub.f32 %v762_v31, %v5776_v28  ;;  %3344 = vmatprep.mubr.bf16.mxu1 %v7941_v1  ;;  %v418_v25 = vld [vmem:[#allocation6 + $0x58] sm:$0xff]  ;;  %v409_v3 = vld [vmem:[#allocation6 + $0x10] sm:$0xff] }
  0xe4   : > { %v1601_v52 = vsub.f32 1.0, %v1217_v40  ;;  %v1202_v53 = vand.u32 2147483647, %v818_v5  ;;  %v1578_v54 = vsub.f32 1.0, %v1194_v41  ;;  %v1154_v59 = vsub.f32 %v770_v39, %v5776_v28 }
  0xe5   : > { %3539 = vmatpush1.bf16.msra.mxu0 %v2513_v42  ;;  %v2346_v61 = vpack.c.bf16 %v1986_v43, %v1978_v4  ;;  %v1977_v62 = vmax.f32 %v1593_v45, 0.0  ;;  %v1530_v57 = vand.u32 2147483647, %v1146_v47  ;;  %v809_v63 = vsub.f32 %v425_v55, %v5785_v50  ;;  %v417_v4 = vld [vmem:[#allocation6 + $0x50] sm:$0xff]  ;;  %v650_v43 = vld [vmem:[#allocation6 + $0x798] sm:$0xff] }
  0xe6   : > { %v1985_v7 = vmax.f32 %v1601_v52, 0.0  ;;  %v1586_v8 = vsub.f32 1.0, %v1202_v53  ;;  %v1962_v9 = vmax.f32 %v1578_v54, 0.0  ;;  %v1538_v56 = vand.u32 2147483647, %v1154_v59  ;;  %v658_v53 = vld [vmem:[#allocation6 + $0x7d8] sm:$0xff] }
  0xe7   : > { %3395 = vmatprep.subr.bf16.mxu1 %v2346_v61  ;;  %3122 = vmatmul.mubr.bf16.gmra.mxu0 %v5847_v46  ;;  %v1914_v10 = vsub.f32 1.0, %v1530_v57  ;;  %v817_v48 = vsub.f32 %v433_v49, %v5785_v50  ;;  %v1193_v11 = vand.u32 2147483647, %v809_v63  ;;  %v1145_v12 = vsub.f32 %v761_v51, %v5785_v50  ;;  %v5861_v55 = vld [vmem:[#allocation5 + $0x30] ss:$12 sps:$4 sm:$0xff]  }
  0xe8   : > { %v2345_v15 = vpack.c.bf16 %v1985_v7, %v1977_v62  ;;  %v1970_v17 = vmax.f32 %v1586_v8, 0.0  ;;  %v1922_v19 = vsub.f32 1.0, %v1538_v56  ;;  %v1153_v21 = vsub.f32 %v769_v6, %v5785_v50  ;;  %3131 = vmatprep.mubr.bf16.mxu0 %v5852_v60  ;;  %v5865_v52 = vld [vmem:[#allocation5 + $0x4c] ss:$12 sps:$4 sm:$0xff]  }
  0xe9   : > { %v2298_v27 = vmax.f32 %v1914_v10, 0.0  ;;  %v1201_v29 = vand.u32 2147483647, %v817_v48  ;;  %v1577_v31 = vsub.f32 1.0, %v1193_v11  ;;  %v1529_v32 = vand.u32 2147483647, %v1145_v12 }
  0xea   : > { %3396 = vmatpush1.bf16.msra.mxu1 %v2345_v15  ;;  %v2338_v35 = vpack.c.bf16 %v1970_v17, %v1962_v9  ;;  %v2306_v37 = vmax.f32 %v1922_v19, 0.0  ;;  %v1537_v38 = vand.u32 2147483647, %v1153_v21  ;;  %v794_v39 = vsub.f32 %v410_v13, %v5776_v28  ;;  %v746_v8 = vld [vmem:[#allocation6 + $0xa98] sm:$0xff]  ;;  %v649_v12 = vld [vmem:[#allocation6 + $0x790] sm:$0xff] }
  0xeb   : > { %v1585_v40 = vsub.f32 1.0, %v1201_v29  ;;  %v1961_v5 = vmax.f32 %v1577_v31, 0.0  ;;  %v1913_v41 = vsub.f32 1.0, %v1529_v32  ;;  %v802_v42 = vsub.f32 %v418_v25, %v5776_v28  ;;  %3345 = vmatmul.mubr.bf16.gmra.mxu1 %v5264_v14  ;;  %v754_v9 = vld [vmem:[#allocation6 + $0xad8] sm:$0xff]  ;;  %v5268_v13 = vld [vmem:[#allocation5 + $0xe0] ss:$12 sps:$4 sm:$0xff]  }
  0xec   : > { %3397 = vmatprep.subr.bf16.mxu1 %v2338_v35  ;;  %v2506_v45 = vpack.c.bf16 %v2306_v37, %v2298_v27  ;;  %v1921_v47 = vsub.f32 1.0, %v1537_v38  ;;  %v1178_v49 = vand.u32 2147483647, %v794_v39  ;;  %v793_v51 = vsub.f32 %v409_v3, %v5785_v50  ;;  %3354 = vmatprep.mubr.bf16.mxu1 %v7941_v1  ;;  %v657_v29 = vld [vmem:[#allocation6 + $0x7d0] sm:$0xff] }
  0xed   : > { %v1969_v54 = vmax.f32 %v1585_v40, 0.0  ;;  %v2297_v59 = vmax.f32 %v1913_v41, 0.0  ;;  %v1186_v61 = vand.u32 2147483647, %v802_v42  ;;  %v801_v62 = vsub.f32 %v417_v4, %v5785_v50  ;;  %v5874_v32 = vld [vmem:[#allocation5 + $0x48] ss:$12 sps:$4 sm:$0xff]  }
  0xee   : > { %3540 = vmatprep.subr.bf16.mxu0 %v2506_v45  ;;  %v2305_v57 = vmax.f32 %v1921_v47, 0.0  ;;  %v1562_v63 = vsub.f32 1.0, %v1178_v49  ;;  %v1177_v6 = vand.u32 2147483647, %v793_v51  ;;  %v1034_v7 = vsub.f32 %v650_v43, %v5776_v28  ;;  %v745_v39 = vld [vmem:[#allocation6 + $0xa90] sm:$0xff] }
  0xef   : > { %v2337_v56 = vpack.c.bf16 %v1969_v54, %v1961_v5  ;;  %3132 = vmatmul.mubr.bf16.gmra.mxu0 %v5861_v55  ;;  %v1570_v10 = vsub.f32 1.0, %v1186_v61  ;;  %v1185_v48 = vand.u32 2147483647, %v801_v62  ;;  %v1042_v11 = vsub.f32 %v658_v53, %v5776_v28  ;;  %v753_v4 = vld [vmem:[#allocation6 + $0xad0] sm:$0xff]  ;;  %v634_v53 = vld [vmem:[#allocation6 + $0x718] sm:$0xff] }
  0xf0   : > { %v2505_v14 = vpack.c.bf16 %v2305_v57, %v2297_v59  ;;  %v1946_v15 = vmax.f32 %v1562_v63, 0.0  ;;  %v1561_v17 = vsub.f32 1.0, %v1177_v6  ;;  %3141 = vmatprep.mubr.bf16.mxu0 %v5865_v52  ;;  %v1418_v19 = vand.u32 2147483647, %v1034_v7  ;;  %v5878_v43 = vld [vmem:[#allocation5 + $0x64] ss:$12 sps:$4 sm:$0xff]  }
  0xf1   : > { %3398 = vmatpush1.bf16.msra.mxu1 %v2337_v56  ;;  %v1954_v21 = vmax.f32 %v1570_v10, 0.0  ;;  %v1569_v25 = vsub.f32 1.0, %v1185_v48  ;;  %v1426_v3 = vand.u32 2147483647, %v1042_v11  ;;  %v1130_v27 = vsub.f32 %v746_v8, %v5776_v28  ;;  %v642_v8 = vld [vmem:[#allocation6 + $0x758] sm:$0xff] }
  0xf2   : > { %3541 = vmatpush1.bf16.msra.mxu0 %v2505_v14  ;;  %v1945_v31 = vmax.f32 %v1561_v17, 0.0  ;;  %v1802_v35 = vsub.f32 1.0, %v1418_v19  ;;  %v1138_v37 = vsub.f32 %v754_v9, %v5776_v28  ;;  %v1033_v38 = vsub.f32 %v649_v12, %v5785_v50  ;;  %v633_v9 = vld [vmem:[#allocation6 + $0x710] sm:$0xff] }
  0xf3   : > { %v2330_v40 = vpack.c.bf16 %v1954_v21, %v1946_v15  ;;  %v1953_v5 = vmax.f32 %v1569_v25, 0.0  ;;  %v1810_v41 = vsub.f32 1.0, %v1426_v3  ;;  %v1514_v42 = vand.u32 2147483647, %v1130_v27  ;;  %3355 = vmatmul.mubr.bf16.gmra.mxu1 %v5268_v13  ;;  %v641_v12 = vld [vmem:[#allocation6 + $0x750] sm:$0xff] }
  0xf4   : > { %v2186_v45 = vmax.f32 %v1802_v35, 0.0  ;;  %v1522_v47 = vand.u32 2147483647, %v1138_v37  ;;  %v1041_v49 = vsub.f32 %v657_v29, %v5785_v50  ;;  %v1417_v51 = vand.u32 2147483647, %v1033_v38  ;;  %3364 = vmatprep.mubr.bf16.mxu1 %v7941_v1  ;;  %v618_v29 = vld [vmem:[#allocation6 + $0x698] sm:$0xff] }
  0xf5   : > { %3399 = vmatprep.subr.bf16.mxu1 %v2330_v40  ;;  %v2329_v54 = vpack.c.bf16 %v1953_v5, %v1945_v31  ;;  %v2194_v59 = vmax.f32 %v1810_v41, 0.0  ;;  %v1898_v61 = vsub.f32 1.0, %v1514_v42  ;;  %v1129_v62 = vsub.f32 %v745_v39, %v5785_v50  ;;  %v5272_v13 = vld [vmem:[#allocation5 + $0xf8] ss:$12 sps:$4 sm:$0xff]   ;;  %v5890_v39 = vld [vmem:[#allocation5 + $0x60] ss:$12 sps:$4 sm:$0xff]  }
  0xf6   : > { %v1906_v57 = vsub.f32 1.0, %v1522_v47  ;;  %v1425_v63 = vand.u32 2147483647, %v1041_v49  ;;  %v1801_v6 = vsub.f32 1.0, %v1417_v51  ;;  %v1137_v7 = vsub.f32 %v753_v4, %v5785_v50  ;;  %v626_v4 = vld [vmem:[#allocation6 + $0x6d8] sm:$0xff] }
  0xf7   : > { %3400 = vmatpush1.bf16.msra.mxu1 %v2329_v54  ;;  %3142 = vmatmul.mubr.bf16.gmra.mxu0 %v5874_v32  ;;  %v2450_v56 = vpack.c.bf16 %v2194_v59, %v2186_v45  ;;  %v2282_v10 = vmax.f32 %v1898_v61, 0.0  ;;  %v1513_v48 = vand.u32 2147483647, %v1129_v62  ;;  %v1018_v11 = vsub.f32 %v634_v53, %v5776_v28  ;;  %v730_v40 = vld [vmem:[#allocation6 + $0xa18] sm:$0xff] }
  0xf8   : > { %v2290_v14 = vmax.f32 %v1906_v57, 0.0  ;;  %v1809_v15 = vsub.f32 1.0, %v1425_v63  ;;  %v2185_v17 = vmax.f32 %v1801_v6, 0.0  ;;  %v1521_v19 = vand.u32 2147483647, %v1137_v7  ;;  %3151 = vmatprep.mubr.bf16.mxu0 %v5878_v43  ;;  %v738_v54 = vld [vmem:[#allocation6 + $0xa58] sm:$0xff] }
  0xf9   : > { %3401 = vmatprep.subr.bf16.mxu1 %v2450_v56  ;;  %v1897_v21 = vsub.f32 1.0, %v1513_v48  ;;  %v1026_v25 = vsub.f32 %v642_v8, %v5776_v28  ;;  %v1402_v3 = vand.u32 2147483647, %v1018_v11  ;;  %v1017_v27 = vsub.f32 %v633_v9, %v5785_v50  ;;  %v5893_v59 = vld [vmem:[#allocation5 + $0x7c] ss:$12 sps:$4 sm:$0xff]   ;;  %v617_v6 = vld [vmem:[#allocation6 + $0x690] sm:$0xff] }
  0xfa   : > { %v2498_v31 = vpack.c.bf16 %v2290_v14, %v2282_v10  ;;  %v2193_v35 = vmax.f32 %v1809_v15, 0.0  ;;  %v1905_v37 = vsub.f32 1.0, %v1521_v19  ;;  %v1025_v38 = vsub.f32 %v641_v12, %v5785_v50  ;;  %v625_v10 = vld [vmem:[#allocation6 + $0x6d0] sm:$0xff] }
  0xfb   : > { %v2281_v5 = vmax.f32 %v1897_v21, 0.0  ;;  %v1410_v41 = vand.u32 2147483647, %v1026_v25  ;;  %v1786_v42 = vsub.f32 1.0, %v1402_v3  ;;  %v1401_v45 = vand.u32 2147483647, %v1017_v27  ;;  %3365 = vmatmul.mubr.bf16.gmra.mxu1 %v5272_v13 }
  0xfc   : > { %3542 = vmatprep.subr.bf16.mxu0 %v2498_v31  ;;  %v2449_v47 = vpack.c.bf16 %v2193_v35, %v2185_v17  ;;  %v2289_v49 = vmax.f32 %v1905_v37, 0.0  ;;  %v1409_v51 = vand.u32 2147483647, %v1025_v38  ;;  %v1002_v53 = vsub.f32 %v618_v29, %v5776_v28  ;;  %3374 = vmatprep.mubr.bf16.mxu1 %v7941_v1  ;;  %v5276_v14 = vld [vmem:[#allocation5 + $0x110] ss:$12 sps:$4 sm:$0xff]  }
  0xfd   : > { %v1794_v61 = vsub.f32 1.0, %v1410_v41  ;;  %v2170_v62 = vmax.f32 %v1786_v42, 0.0  ;;  %v1785_v57 = vsub.f32 1.0, %v1401_v45  ;;  %v1010_v63 = vsub.f32 %v626_v4, %v5776_v28  ;;  %v729_v25 = vld [vmem:[#allocation6 + $0xa10] sm:$0xff]  ;;  %v602_v37 = vld [vmem:[#allocation6 + $0x618] sm:$0xff] }
  0xfe   : > { %3402 = vmatpush2.bf16.msra.mxu1 %v2449_v47  ;;  %v2497_v7 = vpack.c.bf16 %v2289_v49, %v2281_v5  ;;  %v1793_v8 = vsub.f32 1.0, %v1409_v51  ;;  %v1386_v9 = vand.u32 2147483647, %v1002_v53  ;;  %v1114_v56 = vsub.f32 %v730_v40, %v5776_v28  ;;  %v737_v35 = vld [vmem:[#allocation6 + $0xa50] sm:$0xff]  ;;  %v5903_v41 = vld [vmem:[#allocation5 + $0x78] ss:$12 sps:$4 sm:$0xff]  }
  0xff   : > { %v2178_v48 = vmax.f32 %v1794_v61, 0.0  ;;  %v2169_v11 = vmax.f32 %v1785_v57, 0.0  ;;  %3152 = vmatmul.mubr.bf16.gmra.mxu0 %v5890_v39  ;;  %v1394_v12 = vand.u32 2147483647, %v1010_v63  ;;  %v1122_v13 = vsub.f32 %v738_v54, %v5776_v28  ;;  %v610_v51 = vld [vmem:[#allocation6 + $0x658] sm:$0xff]  ;;  %v601_v57 = vld [vmem:[#allocation6 + $0x610] sm:$0xff] }
 0x100   : > { %3543 = vmatpush1.bf16.msra.mxu0 %v2497_v7  ;;  %v2177_v15 = vmax.f32 %v1793_v8, 0.0  ;;  %v1770_v17 = vsub.f32 1.0, %v1386_v9  ;;  %v1498_v19 = vand.u32 2147483647, %v1114_v56  ;;  %v1001_v21 = vsub.f32 %v617_v6, %v5785_v50  ;;  %3161 = vmatprep.mubr.bf16.mxu0 %v5893_v59  ;;  %v5908_v63 = vld [vmem:[#allocation5 + $0x94] ss:$12 sps:$4 sm:$0xff]  }
 0x101   : > { %v2442_v3 = vpack.c.bf16 %v2178_v48, %v2170_v62  ;;  %v1778_v27 = vsub.f32 1.0, %v1394_v12  ;;  %v1506_v29 = vand.u32 2147483647, %v1122_v13  ;;  %v1009_v31 = vsub.f32 %v625_v10, %v5785_v50  ;;  %v5289_v6 = vld [vmem:[#allocation5 + $0x4] ss:$12 sps:$4 sm:$0xff]  }
 0x102   : > { %v2441_v38 = vpack.c.bf16 %v2177_v15, %v2169_v11  ;;  %v2154_v4 = vmax.f32 %v1770_v17, 0.0  ;;  %v1882_v40 = vsub.f32 1.0, %v1498_v19  ;;  %v1385_v5 = vand.u32 2147483647, %v1001_v21  ;;  %v609_v10 = vld [vmem:[#allocation6 + $0x650] sm:$0xff] }
 0x103   : > { %3403 = vmatprep.subr.bf16.mxu1 %v2442_v3  ;;  %v2162_v42 = vmax.f32 %v1778_v27, 0.0  ;;  %v1890_v45 = vsub.f32 1.0, %v1506_v29  ;;  %v1393_v47 = vand.u32 2147483647, %v1009_v31  ;;  %v1113_v49 = vsub.f32 %v729_v25, %v5785_v50  ;;  %3375 = vmatmul.mubr.bf16.gmra.mxu1 %v5276_v14  ;;  %v586_v14 = vld [vmem:[#allocation6 + $0x598] sm:$0xff] }
 0x104   : > { %3404 = vmatpush2.bf16.msra.mxu1 %v2441_v38  ;;  %v2266_v53 = vmax.f32 %v1882_v40, 0.0  ;;  %v1769_v54 = vsub.f32 1.0, %v1385_v5  ;;  %v1121_v61 = vsub.f32 %v737_v35, %v5785_v50  ;;  %v986_v62 = vsub.f32 %v602_v37, %v5776_v28  ;;  %3417 = vmatprep.mubr.bf16.mxu1 %v5289_v6  ;;  %v594_v31 = vld [vmem:[#allocation6 + $0x5d8] sm:$0xff] }
 0x105   : > { %v2434_v7 = vpack.c.bf16 %v2162_v42, %v2154_v4  ;;  %v2274_v8 = vmax.f32 %v1890_v45, 0.0  ;;  %v1777_v9 = vsub.f32 1.0, %v1393_v47  ;;  %v1497_v56 = vand.u32 2147483647, %v1113_v49  ;;  %v714_v35 = vld [vmem:[#allocation6 + $0x998] sm:$0xff] }
 0x106   : > { %v2153_v48 = vmax.f32 %v1769_v54, 0.0  ;;  %v1505_v11 = vand.u32 2147483647, %v1121_v61  ;;  %v994_v12 = vsub.f32 %v610_v51, %v5776_v28  ;;  %v1370_v13 = vand.u32 2147483647, %v986_v62  ;;  %v722_v5 = vld [vmem:[#allocation6 + $0x9d8] sm:$0xff] }
 0x107   : > { %3405 = vmatprep.subr.bf16.mxu1 %v2434_v7  ;;  %v2490_v15 = vpack.c.bf16 %v2274_v8, %v2266_v53  ;;  %v2161_v17 = vmax.f32 %v1777_v9, 0.0  ;;  %v1881_v19 = vsub.f32 1.0, %v1497_v56  ;;  %3162 = vmatmul.mubr.bf16.gmra.mxu0 %v5903_v41  ;;  %v985_v21 = vsub.f32 %v601_v57, %v5785_v50  ;;  %v5916_v53 = vld [vmem:[#allocation5 + $0x90] ss:$12 sps:$4 sm:$0xff]  }
 0x108   : > { %v1889_v25 = vsub.f32 1.0, %v1505_v11  ;;  %v1378_v3 = vand.u32 2147483647, %v994_v12  ;;  %v1754_v27 = vsub.f32 1.0, %v1370_v13  ;;  %v993_v29 = vsub.f32 %v609_v10, %v5785_v50  ;;  %3171 = vmatprep.mubr.bf16.mxu0 %v5908_v63  ;;  %v585_v57 = vld [vmem:[#allocation6 + $0x590] sm:$0xff] }
 0x109   : > { %3544 = vmatprep.subr.bf16.mxu0 %v2490_v15  ;;  %v2433_v37 = vpack.c.bf16 %v2161_v17, %v2153_v48  ;;  %v2265_v38 = vmax.f32 %v1881_v19, 0.0  ;;  %v1369_v4 = vand.u32 2147483647, %v985_v21  ;;  %v970_v40 = vsub.f32 %v586_v14, %v5776_v28  ;;  %v593_v56 = vld [vmem:[#allocation6 + $0x5d0] sm:$0xff]  ;;  %v5921_v48 = vld [vmem:[#allocation5 + $0xac] ss:$12 sps:$4 sm:$0xff]  }
 0x10a   : > { %v2273_v42 = vmax.f32 %v1889_v25, 0.0  ;;  %v1762_v45 = vsub.f32 1.0, %v1378_v3  ;;  %v2138_v47 = vmax.f32 %v1754_v27, 0.0  ;;  %v1377_v49 = vand.u32 2147483647, %v993_v29  ;;  %v713_v10 = vld [vmem:[#allocation6 + $0x990] sm:$0xff] }
 0x10b   : > { %3406 = vmatpush2.bf16.msra.mxu1 %v2433_v37  ;;  %v1753_v51 = vsub.f32 1.0, %v1369_v4  ;;  %v978_v54 = vsub.f32 %v594_v31, %v5776_v28  ;;  %v1354_v61 = vand.u32 2147483647, %v970_v40  ;;  %v1098_v62 = vsub.f32 %v714_v35, %v5776_v28  ;;  %v721_v25 = vld [vmem:[#allocation6 + $0x9d0] sm:$0xff]  ;;  %v570_v35 = vld [vmem:[#allocation6 + $0x518] sm:$0xff] }
 0x10c   : > { %v2489_v6 = vpack.c.bf16 %v2273_v42, %v2265_v38  ;;  %v2146_v7 = vmax.f32 %v1762_v45, 0.0  ;;  %v1761_v8 = vsub.f32 1.0, %v1377_v49  ;;  %v1106_v9 = vsub.f32 %v722_v5, %v5776_v28  ;;  %v578_v5 = vld [vmem:[#allocation6 + $0x558] sm:$0xff] }
 0x10d   : > { %v2137_v11 = vmax.f32 %v1753_v51, 0.0  ;;  %v1362_v12 = vand.u32 2147483647, %v978_v54  ;;  %v1738_v13 = vsub.f32 1.0, %v1354_v61  ;;  %v1482_v14 = vand.u32 2147483647, %v1098_v62 }
 0x10e   : > { %3545 = vmatpush1.bf16.msra.mxu0 %v2489_v6  ;;  %v2426_v15 = vpack.c.bf16 %v2146_v7, %v2138_v47  ;;  %v2145_v17 = vmax.f32 %v1761_v8, 0.0  ;;  %v1490_v19 = vand.u32 2147483647, %v1106_v9  ;;  %v969_v21 = vsub.f32 %v585_v57, %v5785_v50  ;;  %v569_v57 = vld [vmem:[#allocation6 + $0x510] sm:$0xff] }
 0x10f   : > { %3172 = vmatmul.mubr.bf16.gmra.mxu0 %v5916_v53  ;;  %v1746_v3 = vsub.f32 1.0, %v1362_v12  ;;  %v2122_v27 = vmax.f32 %v1738_v13, 0.0  ;;  %v1866_v29 = vsub.f32 1.0, %v1482_v14  ;;  %v977_v31 = vsub.f32 %v593_v56, %v5785_v50  ;;  %v577_v6 = vld [vmem:[#allocation6 + $0x550] sm:$0xff] }
 0x110   : > { %3407 = vmatprep.subr.bf16.mxu1 %v2426_v15  ;;  %v2425_v37 = vpack.c.bf16 %v2145_v17, %v2137_v11  ;;  %v1874_v38 = vsub.f32 1.0, %v1490_v19  ;;  %v1353_v4 = vand.u32 2147483647, %v969_v21  ;;  %v1097_v40 = vsub.f32 %v713_v10, %v5785_v50  ;;  %3181 = vmatprep.mubr.bf16.mxu0 %v5921_v48  ;;  %v5931_v10 = vld [vmem:[#allocation5 + $0xa8] ss:$12 sps:$4 sm:$0xff]   ;;  %v554_v11 = vld [vmem:[#allocation6 + $0x498] sm:$0xff] }
 0x111   : > { %v2130_v42 = vmax.f32 %v1746_v3, 0.0  ;;  %v2250_v45 = vmax.f32 %v1866_v29, 0.0  ;;  %v1361_v47 = vand.u32 2147483647, %v977_v31  ;;  %v1105_v49 = vsub.f32 %v721_v25, %v5785_v50  ;;  %v5933_v17 = vld [vmem:[#allocation5 + $0xc4] ss:$12 sps:$4 sm:$0xff]  }
 0x112   : > { %3408 = vmatpush2.bf16.msra.mxu1 %v2425_v37  ;;  %v2258_v51 = vmax.f32 %v1874_v38, 0.0  ;;  %v1737_v54 = vsub.f32 1.0, %v1353_v4  ;;  %v1481_v61 = vand.u32 2147483647, %v1097_v40  ;;  %v954_v62 = vsub.f32 %v570_v35, %v5776_v28  ;;  %v553_v38 = vld [vmem:[#allocation6 + $0x490] sm:$0xff] }
 0x113   : > { %v2418_v7 = vpack.c.bf16 %v2130_v42, %v2122_v27  ;;  %v1745_v8 = vsub.f32 1.0, %v1361_v47  ;;  %v1489_v9 = vand.u32 2147483647, %v1105_v49  ;;  %v962_v56 = vsub.f32 %v578_v5, %v5776_v28  ;;  %v562_v27 = vld [vmem:[#allocation6 + $0x4d8] sm:$0xff] }
 0x114   : > { %v2482_v12 = vpack.c.bf16 %v2258_v51, %v2250_v45  ;;  %v2121_v13 = vmax.f32 %v1737_v54, 0.0  ;;  %v1865_v14 = vsub.f32 1.0, %v1481_v61  ;;  %v1338_v15 = vand.u32 2147483647, %v954_v62  ;;  %v561_v45 = vld [vmem:[#allocation6 + $0x4d0] sm:$0xff]  ;;  %v538_v61 = vld [vmem:[#allocation6 + $0x418] sm:$0xff] }
 0x115   : > { %3409 = vmatprep.subr.bf16.mxu1 %v2418_v7  ;;  %v2129_v19 = vmax.f32 %v1745_v8, 0.0  ;;  %v1873_v21 = vsub.f32 1.0, %v1489_v9  ;;  %v1346_v25 = vand.u32 2147483647, %v962_v56  ;;  %v953_v3 = vsub.f32 %v569_v57, %v5785_v50  ;;  %v546_v8 = vld [vmem:[#allocation6 + $0x458] sm:$0xff] }
 0x116   : > { %3546 = vmatprep.subr.bf16.mxu0 %v2482_v12  ;;  %v2249_v29 = vmax.f32 %v1865_v14, 0.0  ;;  %v1722_v31 = vsub.f32 1.0, %v1338_v15  ;;  %v961_v35 = vsub.f32 %v577_v6, %v5785_v50  ;;  %v938_v37 = vsub.f32 %v554_v11, %v5776_v28  ;;  %v698_v9 = vld [vmem:[#allocation6 + $0x918] sm:$0xff]  ;;  %v5943_v14 = vld [vmem:[#allocation5 + $0xc0] ss:$12 sps:$4 sm:$0xff]  }
 0x117   : > { %v2417_v4 = vpack.c.bf16 %v2129_v19, %v2121_v13  ;;  %v2257_v40 = vmax.f32 %v1873_v21, 0.0  ;;  %v1730_v5 = vsub.f32 1.0, %v1346_v25  ;;  %v1337_v42 = vand.u32 2147483647, %v953_v3  ;;  %3182 = vmatmul.mubr.bf16.gmra.mxu0 %v5931_v10  ;;  %v706_v3 = vld [vmem:[#allocation6 + $0x958] sm:$0xff] }
 0x118   : > { %v2106_v47 = vmax.f32 %v1722_v31, 0.0  ;;  %v1345_v49 = vand.u32 2147483647, %v961_v35  ;;  %v946_v51 = vsub.f32 %v562_v27, %v5776_v28  ;;  %v1322_v54 = vand.u32 2147483647, %v938_v37  ;;  %3191 = vmatprep.mubr.bf16.mxu0 %v5933_v17 }
 0x119   : > { %3410 = vmatpush2.bf16.msra.mxu1 %v2417_v4  ;;  %v2481_v62 = vpack.c.bf16 %v2257_v40, %v2249_v29  ;;  %v2114_v57 = vmax.f32 %v1730_v5, 0.0  ;;  %v1721_v6 = vsub.f32 1.0, %v1337_v42  ;;  %v937_v7 = vsub.f32 %v553_v38, %v5785_v50  ;;  %v5946_v27 = vld [vmem:[#allocation5 + $0xdc] ss:$12 sps:$4 sm:$0xff]   ;;  %v537_v42 = vld [vmem:[#allocation6 + $0x410] sm:$0xff] }
 0x11a   : > { %v1729_v56 = vsub.f32 1.0, %v1345_v49  ;;  %v1330_v11 = vand.u32 2147483647, %v946_v51  ;;  %v1706_v12 = vsub.f32 1.0, %v1322_v54  ;;  %v945_v13 = vsub.f32 %v561_v45, %v5785_v50  ;;  %v545_v54 = vld [vmem:[#allocation6 + $0x450] sm:$0xff] }
 0x11b   : > { %3547 = vmatpush1.bf16.msra.mxu0 %v2481_v62  ;;  %v2410_v15 = vpack.c.bf16 %v2114_v57, %v2106_v47  ;;  %v2105_v19 = vmax.f32 %v1721_v6, 0.0  ;;  %v1321_v21 = vand.u32 2147483647, %v937_v7  ;;  %v922_v25 = vsub.f32 %v538_v61, %v5776_v28  ;;  %v697_v61 = vld [vmem:[#allocation6 + $0x910] sm:$0xff] }
 0x11c   : > { %v2113_v29 = vmax.f32 %v1729_v56, 0.0  ;;  %v1714_v31 = vsub.f32 1.0, %v1330_v11  ;;  %v2090_v35 = vmax.f32 %v1706_v12, 0.0  ;;  %v1329_v37 = vand.u32 2147483647, %v945_v13  ;;  %v705_v12 = vld [vmem:[#allocation6 + $0x950] sm:$0xff] }
 0x11d   : > { %3411 = vmatprep.subr.bf16.mxu1 %v2410_v15  ;;  %v1705_v38 = vsub.f32 1.0, %v1321_v21  ;;  %v930_v4 = vsub.f32 %v546_v8, %v5776_v28  ;;  %v1306_v40 = vand.u32 2147483647, %v922_v25  ;;  %v1082_v5 = vsub.f32 %v698_v9, %v5776_v28  ;;  %v682_v25 = vld [vmem:[#allocation6 + $0x898] sm:$0xff] }
 0x11e   : > { %v2409_v45 = vpack.c.bf16 %v2113_v29, %v2105_v19  ;;  %v2098_v47 = vmax.f32 %v1714_v31, 0.0  ;;  %v1713_v49 = vsub.f32 1.0, %v1329_v37  ;;  %v1090_v51 = vsub.f32 %v706_v3, %v5776_v28 }
 0x11f   : > { %v2089_v62 = vmax.f32 %v1705_v38, 0.0  ;;  %v1314_v57 = vand.u32 2147483647, %v930_v4  ;;  %v1690_v6 = vsub.f32 1.0, %v1306_v40  ;;  %v1466_v7 = vand.u32 2147483647, %v1082_v5  ;;  %3192 = vmatmul.mubr.bf16.gmra.mxu0 %v5943_v14 }
 0x120   : > { %3412 = vmatpush2.bf16.msra.mxu1 %v2409_v45  ;;  %v2402_v56 = vpack.c.bf16 %v2098_v47, %v2090_v35  ;;  %v2097_v8 = vmax.f32 %v1713_v49, 0.0  ;;  %v1474_v11 = vand.u32 2147483647, %v1090_v51  ;;  %v921_v9 = vsub.f32 %v537_v42, %v5785_v50  ;;  %3201 = vmatprep.mubr.bf16.mxu0 %v5946_v27  ;;  %v690_v35 = vld [vmem:[#allocation6 + $0x8d8] sm:$0xff] }
 0x121   : > { %v1698_v13 = vsub.f32 1.0, %v1314_v57  ;;  %v2074_v15 = vmax.f32 %v1690_v6, 0.0  ;;  %v1850_v19 = vsub.f32 1.0, %v1466_v7  ;;  %v929_v21 = vsub.f32 %v545_v54, %v5785_v50  ;;  %v5957_v42 = vld [vmem:[#allocation5 + $0xd8] ss:$12 sps:$4 sm:$0xff]   ;;  %v681_v7 = vld [vmem:[#allocation6 + $0x890] sm:$0xff] }
 0x122   : > { %3413 = vmatprep.subr.bf16.mxu1 %v2402_v56  ;;  %v2401_v3 = vpack.c.bf16 %v2097_v8, %v2089_v62  ;;  %v1858_v29 = vsub.f32 1.0, %v1474_v11  ;;  %v1305_v31 = vand.u32 2147483647, %v921_v9  ;;  %v1081_v37 = vsub.f32 %v697_v61, %v5785_v50  ;;  %v5960_v54 = vld [vmem:[#allocation5 + $0xf4] ss:$12 sps:$4 sm:$0xff]  }
 0x123   : > { %v2082_v38 = vmax.f32 %v1698_v13, 0.0  ;;  %v2234_v4 = vmax.f32 %v1850_v19, 0.0  ;;  %v1313_v40 = vand.u32 2147483647, %v929_v21  ;;  %v1089_v5 = vsub.f32 %v705_v12, %v5785_v50  ;;  %v689_v56 = vld [vmem:[#allocation6 + $0x8d0] sm:$0xff] }
 0x124   : > { %3414 = vmatpush2.bf16.msra.mxu1 %v2401_v3  ;;  %v2242_v45 = vmax.f32 %v1858_v29, 0.0  ;;  %v1689_v47 = vsub.f32 1.0, %v1305_v31  ;;  %v1465_v49 = vand.u32 2147483647, %v1081_v37  ;;  %v1066_v51 = vsub.f32 %v682_v25, %v5776_v28  ;;  %v666_v37 = vld [vmem:[#allocation6 + $0x818] sm:$0xff] }
 0x125   : > { %v2394_v62 = vpack.c.bf16 %v2082_v38, %v2074_v15  ;;  %v1697_v57 = vsub.f32 1.0, %v1313_v40  ;;  %v1473_v6 = vand.u32 2147483647, %v1089_v5  ;;  %v1074_v61 = vsub.f32 %v690_v35, %v5776_v28  ;;  %v674_v5 = vld [vmem:[#allocation6 + $0x858] sm:$0xff] }
 0x126   : > { %v2474_v8 = vpack.c.bf16 %v2242_v45, %v2234_v4  ;;  %v2073_v11 = vmax.f32 %v1689_v47, 0.0  ;;  %v1849_v9 = vsub.f32 1.0, %v1465_v49  ;;  %v1450_v12 = vand.u32 2147483647, %v1066_v51  ;;  %v665_v45 = vld [vmem:[#allocation6 + $0x810] sm:$0xff] }
 0x127   : > { %3415 = vmatprep.subr.bf16.mxu1 %v2394_v62  ;;  %v2081_v13 = vmax.f32 %v1697_v57, 0.0  ;;  %v1857_v19 = vsub.f32 1.0, %v1473_v6  ;;  %3202 = vmatmul.mubr.bf16.gmra.mxu0 %v5957_v42  ;;  %v1458_v21 = vand.u32 2147483647, %v1074_v61  ;;  %v5965_v25 = vadd.s32 640, %v5634_v2 }
 0x128   : > { %3548 = vmatprep.subr.bf16.mxu0 %v2474_v8  ;;  %v2233_v15 = vmax.f32 %v1849_v9, 0.0  ;;  %v1834_v3 = vsub.f32 1.0, %v1450_v12  ;;  %v1065_v29 = vsub.f32 %v681_v7, %v5785_v50  ;;  %v1073_v31 = vsub.f32 %v689_v56, %v5785_v50  ;;  %3211 = vmatprep.mubr.bf16.mxu0 %v5960_v54  ;;  %v5973_v9 = vld [vmem:[#allocation5 + $0xf0] ss:$12 sps:$4 sm:$0xff]  }
 0x129   : > { %v2393_v35 = vpack.c.bf16 %v2081_v13, %v2073_v11  ;;  %v2241_v38 = vmax.f32 %v1857_v19, 0.0  ;;  %v1842_v4 = vsub.f32 1.0, %v1458_v21  ;;  %v294_v40 = vcvt.s32.f32 %v5965_v25  ;;  %v673_v13 = vld [vmem:[#allocation6 + $0x850] sm:$0xff] }
 0x12a   : > { %v2218_v47 = vmax.f32 %v1834_v3, 0.0  ;;  %v1449_v49 = vand.u32 2147483647, %v1065_v29  ;;  %v1457_v51 = vand.u32 2147483647, %v1073_v31  ;;  %v275_v62 = vadd.s32 512, %v5634_v2 }
 0x12b   : > { %3416 = vmatpush2.bf16.msra.mxu1 %v2393_v35  ;;  %v2473_v57 = vpack.c.bf16 %v2241_v38, %v2233_v15  ;;  %v2226_v6 = vmax.f32 %v1842_v4, 0.0  ;;  %v302_v61 = vadd.f32 0.5, %v294_v40  ;;  %v1050_v7 = vsub.f32 %v666_v37, %v5776_v28  ;;  %v5977_v29 = vld [vmem:[#allocation5 + $0x10c] ss:$12 sps:$4 sm:$0xff]  }
 0x12c   : > { %v1833_v56 = vsub.f32 1.0, %v1449_v49  ;;  %v1841_v8 = vsub.f32 1.0, %v1457_v51  ;;  %v293_v11 = vcvt.s32.f32 %v275_v62  ;;  %v1058_v12 = vsub.f32 %v674_v5, %v5776_v28 }
 0x12d   : > { %3549 = vmatpush1.bf16.msra.mxu0 %v2473_v57  ;;  %v2466_v19 = vpack.c.bf16 %v2226_v6, %v2218_v47  ;;  %v310_v21 = vmul.f32 0.03125, %v302_v61  ;;  %v1434_v25 = vand.u32 2147483647, %v1050_v7  ;;  %v1049_v3 = vsub.f32 %v665_v45, %v5785_v50 }
 0x12e   : > { %3418 = vmatmul.mubr.bf16.vlgmr.msra.gmra.mxu1 %v5832_v44  ;;  %v2217_v15 = vmax.f32 %v1833_v56, 0.0  ;;  %v2225_v31 = vmax.f32 %v1841_v8, 0.0  ;;  %v301_v37 = vadd.f32 0.5, %v293_v11  ;;  %v1442_v35 = vand.u32 2147483647, %v1058_v12 }
 0x12f   : > { %3427 = vmatprep.mubr.bf16.mxu1 %v5836_v58  ;;  %3550 = vmatprep.subr.bf16.mxu0 %v2466_v19  ;;  %v5981_v38 = vfloor.f32 %v310_v21  ;;  %v1818_v28 = vsub.f32 1.0, %v1434_v25  ;;  %v1057_v4 = vsub.f32 %v673_v13, %v5785_v50  ;;  %v1433_v5 = vand.u32 2147483647, %v1049_v3  ;;  %v6005_v25 = vld [vmem:[#allocation5 + $0x108] ss:$12 sps:$4 sm:$0xff]  }
 0x130   : > { %v2465_v45 = vpack.c.bf16 %v2225_v31, %v2217_v15  ;;  %v309_v47 = vmul.f32 0.03125, %v301_v37  ;;  %3212 = vmatmul.mubr.bf16.gmra.mxu0 %v5973_v9  ;;  %v1826_v44 = vsub.f32 1.0, %v1442_v35  ;;  %v5986_v49 = vadd.s32 896, %v5634_v2 }
 0x131   : > { %8029 = vst [vmem:[#allocation16_spill] sm:$0xff] %v5981_v38  ;;  %v326_v51 = vmul.f32 32.0, %v5981_v38  ;;  %v2202_v58 = vmax.f32 %v1818_v28, 0.0  ;;  %v1441_v62 = vand.u32 2147483647, %v1057_v4  ;;  %3221 = vmatprep.mubr.bf16.mxu0 %v5977_v29  ;;  %v1817_v6 = vsub.f32 1.0, %v1433_v5 }
 0x132   : > { %3551 = vmatpush1.bf16.msra.mxu0 %v2465_v45  ;;  %v5990_v57 = vfloor.f32 %v309_v47  ;;  %v2210_v50 = vmax.f32 %v1826_v44, 0.0  ;;  %v7940_v61 = vcvt.s32.f32 %v5986_v49  ;;  %v352_v56 = vmul.f32 %v5644_v18, %v5981_v38  ;;  %v524_v28 = vld [vmem:[#allocation6 + $0x3a8] sm:$0xff] }
 0x133   : > { %v5995_v7 = vsub.f32 %v294_v40, %v326_v51  ;;  %v1825_v8 = vsub.f32 1.0, %v1441_v62  ;;  %v6000_v12 = vadd.s32 768, %v5634_v2  ;;  %v2201_v21 = vmax.f32 %v1817_v6, 0.0  ;;  %v532_v47 = vld [vmem:[#allocation6 + $0x3e8] sm:$0xff] }
 0x134   : > { %8030 = vst [vmem:[#allocation17_spill] sm:$0xff] %v5990_v57  ;;  %v325_v13 = vmul.f32 32.0, %v5990_v57  ;;  %v2458_v19 = vpack.c.bf16 %v2210_v50, %v2202_v58  ;;  %v304_v15 = vadd.f32 0.5, %v7940_v61  ;;  %v351_v37 = vmul.f32 %v5644_v18, %v5990_v57  ;;  %v516_v44 = vld [vmem:[#allocation6 + $0x368] sm:$0xff] }
 0x135   : > { %8031 = vst [vmem:[#allocation18_spill] sm:$0xff] %v5995_v7  ;;  %v343_v40 = vmul.f32 %v5651_v23, %v5995_v7  ;;  %v2209_v3 = vmax.f32 %v1825_v8, 0.0  ;;  %v7939_v2 = vcvt.s32.f32 %v6000_v12  ;;  %v492_v58 = vld [vmem:[#allocation6 + $0x2a8] sm:$0xff]  ;;  %v6034_v6 = vstv %s6002_s6 }
 0x136   : > { %3428 = vmatmul.mubr.bf16.gmra.mxu1 %v5847_v46  ;;  %v6015_v31 = vsub.f32 %v293_v11, %v325_v13  ;;  %3552 = vmatprep.subr.bf16.mxu0 %v2458_v19  ;;  %v312_v5 = vmul.f32 0.03125, %v304_v15  ;;  %v508_v11 = vld [vmem:[#allocation6 + $0x328] sm:$0xff]  ;;  %8034 = vst [vmem:[#allocation21_spill] sm:$0xff] %v6034_v6  ;;  %v6042_v19 = vmul.f32 %v6034_v6, %v5656_v26  ;;  %v523_v15 = vld [vmem:[#allocation6 + $0x3a0] sm:$0xff] }
 0x137   : > { %v360_v35 = vadd.f32 %v352_v56, %v343_v40  ;;  %3437 = vmatprep.mubr.bf16.mxu1 %v5852_v60  ;;  %v2457_v4 = vpack.c.bf16 %v2209_v3, %v2201_v21  ;;  %v303_v45 = vadd.f32 0.5, %v7939_v2  ;;  %v500_v60 = vld [vmem:[#allocation6 + $0x2e8] sm:$0xff]  ;;  %v6045_v21 = vstv %s6007_s7  ;;  %v491_v2 = vld [vmem:[#allocation6 + $0x2a0] sm:$0xff] }
 0x138   : > { %8032 = vst [vmem:[#allocation19_spill] sm:$0xff] %v6015_v31  ;;  %v342_v46 = vmul.f32 %v5651_v23, %v6015_v31  ;;  %3222 = vmatmul.mubr.bf16.gmra.mxu0 %v6005_v25  ;;  %v6028_v62 = vld [vmem:[#allocation6 + $0x228] sm:$0xff]  ;;  %v6031_v50 = vfloor.f32 %v312_v5  ;;  %8035 = vst [vmem:[#allocation22_spill] sm:$0xff] %v6045_v21  ;;  %v507_v5 = vld [vmem:[#allocation6 + $0x320] sm:$0xff] }
 0x139   : > { %v6026_v51 = vadd.f32 %v5670_v34, %v360_v35  ;;  %3553 = vmatpush1.bf16.msra.mxu0 %v2457_v4  ;;  %3570 = vmatprep.mubr.bf16.mxu0 %v7941_v1  ;;  %v6036_v8 = vld [vmem:[#allocation6 + $0x268] sm:$0xff]  ;;  %v6038_v13 = vmul.f32 0.03125, %v303_v45  ;;  %v531_v35 = vld [vmem:[#allocation6 + $0x3e0] sm:$0xff] }
 0x13a   : > { %8033 = vst [vmem:[#allocation20_spill] sm:$0xff] %v6031_v50  ;;  %v359_v56 = vadd.f32 %v351_v37, %v342_v46  ;;  %v515_v46 = vld [vmem:[#allocation6 + $0x360] sm:$0xff] }
 0x13b   : > { %v908_v40 = vsub.f32 %v524_v28, %v6026_v51  ;;  %v916_v3 = vsub.f32 %v532_v47, %v6026_v51  ;;  %v892_v4 = vsub.f32 %v508_v11, %v6026_v51  ;;  %v900_v37 = vsub.f32 %v516_v44, %v6026_v51 }
 0x13c   : > { %v6052_v45 = vadd.f32 %v5670_v34, %v359_v56  ;;  %v876_v26 = vsub.f32 %v492_v58, %v6026_v51  ;;  %v884_v0 = vsub.f32 %v500_v60, %v6026_v51  ;;  %v860_v28 = vsub.f32 %v6028_v62, %v6026_v51 }
 0x13d   : > { %v1292_v47 = vand.u32 2147483647, %v908_v40  ;;  %v1300_v61 = vand.u32 2147483647, %v916_v3  ;;  %v1276_v1 = vand.u32 2147483647, %v892_v4  ;;  %v868_v11 = vsub.f32 %v6036_v8, %v6026_v51 }
 0x13e   : > { %v907_v44 = vsub.f32 %v523_v15, %v6052_v45  ;;  %v915_v56 = vsub.f32 %v531_v35, %v6052_v45  ;;  %v1284_v38 = vand.u32 2147483647, %v900_v37  ;;  %v891_v7 = vsub.f32 %v507_v5, %v6052_v45  ;;  %3438 = vmatmul.mubr.bf16.gmra.mxu1 %v5861_v55  ;;  %v5290_v15 = vld [vmem:[#allocation5 + $0x8] ss:$12 sps:$4 sm:$0xff]  }
 0x13f   : > { %v1676_v58 = vsub.f32 1.0, %v1292_v47  ;;  %v1684_v60 = vsub.f32 1.0, %v1300_v61  ;;  %v1660_v57 = vsub.f32 1.0, %v1276_v1  ;;  %v899_v62 = vsub.f32 %v515_v46, %v6052_v45  ;;  %3447 = vmatprep.mubr.bf16.mxu1 %v5865_v52  ;;  %v499_v46 = vld [vmem:[#allocation6 + $0x2e0] sm:$0xff] }
 0x140   : > { %v1291_v40 = vand.u32 2147483647, %v907_v44  ;;  %v1299_v3 = vand.u32 2147483647, %v915_v56  ;;  %v1668_v4 = vsub.f32 1.0, %v1284_v38  ;;  %v875_v8 = vsub.f32 %v491_v2, %v6052_v45  ;;  %3571 = vmatmul.mubr.bf16.vlgmr.msra.gmra.mxu0 %v5290_v15  ;;  %v475_v15 = vld [vmem:[#allocation6 + $0x220] sm:$0xff] }
 0x141   : > { %v2060_v35 = vmax.f32 %v1676_v58, 0.0  ;;  %v2068_v37 = vmax.f32 %v1684_v60, 0.0  ;;  %v2044_v31 = vmax.f32 %v1660_v57, 0.0  ;;  %v1275_v5 = vand.u32 2147483647, %v891_v7  ;;  %3580 = vmatprep.mubr.bf16.mxu0 %v8036_v22 }
 0x142   : > { %v1675_v55 = vsub.f32 1.0, %v1291_v40  ;;  %v1683_v61 = vsub.f32 1.0, %v1299_v3  ;;  %v2052_v1 = vmax.f32 %v1668_v4, 0.0  ;;  %v1283_v47 = vand.u32 2147483647, %v899_v62  ;;  %v483_v40 = vld [vmem:[#allocation6 + $0x260] sm:$0xff] }
 0x143   : > { %v2388_v33 = vpack.c.bf16 %v2068_v37, %v2060_v35  ;;  %v1659_v52 = vsub.f32 1.0, %v1275_v5  ;;  %v1260_v44 = vand.u32 2147483647, %v876_v26  ;;  %v1268_v56 = vand.u32 2147483647, %v884_v0  ;;  %v460_v26 = vld [vmem:[#allocation6 + $0x1a8] sm:$0xff] }
 0x144   : > { %v2059_v38 = vmax.f32 %v1675_v55, 0.0  ;;  %v2067_v24 = vmax.f32 %v1683_v61, 0.0  ;;  %v2380_v2 = vpack.c.bf16 %v2052_v1, %v2044_v31  ;;  %v1667_v36 = vsub.f32 1.0, %v1283_v47  ;;  %v468_v47 = vld [vmem:[#allocation6 + $0x1e8] sm:$0xff] }
 0x145   : > { %3691 = vmatprep.subr.bf16.mxu1 %v2388_v33  ;;  %v2043_v58 = vmax.f32 %v1659_v52, 0.0  ;;  %v1644_v60 = vsub.f32 1.0, %v1260_v44  ;;  %v1652_v57 = vsub.f32 1.0, %v1268_v56  ;;  %v883_v7 = vsub.f32 %v499_v46, %v6052_v45  ;;  %v780_v46 = vld [vmem:[#allocation6 + $0xba8] sm:$0xff] }
 0x146   : > { %v2387_v3 = vpack.c.bf16 %v2067_v24, %v2059_v38  ;;  %v2051_v4 = vmax.f32 %v1667_v36, 0.0  ;;  %v1259_v62 = vand.u32 2147483647, %v875_v8  ;;  %3448 = vmatmul.mubr.bf16.gmra.mxu1 %v5874_v32  ;;  %v1244_v35 = vand.u32 2147483647, %v860_v28  ;;  %v788_v52 = vld [vmem:[#allocation6 + $0xbe8] sm:$0xff] }
 0x147   : > { %v2028_v0 = vmax.f32 %v1644_v60, 0.0  ;;  %v2036_v37 = vmax.f32 %v1652_v57, 0.0  ;;  %v1267_v5 = vand.u32 2147483647, %v883_v7  ;;  %v1252_v31 = vand.u32 2147483647, %v868_v11  ;;  %3457 = vmatprep.mubr.bf16.mxu1 %v5878_v43 }
 0x148   : > { %3692 = vmatpush1.bf16.msra.mxu1 %v2387_v3  ;;  %v2379_v33 = vpack.c.bf16 %v2051_v4, %v2043_v58  ;;  %v1643_v55 = vsub.f32 1.0, %v1259_v62  ;;  %v1628_v61 = vsub.f32 1.0, %v1244_v35  ;;  %v859_v1 = vsub.f32 %v475_v15, %v6052_v45  ;;  %v5291_v24 = vld [vmem:[#allocation5 + $0x20] ss:$12 sps:$4 sm:$0xff]  }
 0x149   : > { %3581 = vmatmul.mubr.bf16.gmra.mxu0 %v5291_v24  ;;  %3693 = vmatprep.subr.bf16.mxu1 %v2380_v2  ;;  %v2372_v36 = vpack.c.bf16 %v2036_v37, %v2028_v0  ;;  %v1651_v32 = vsub.f32 1.0, %v1267_v5  ;;  %v1636_v28 = vsub.f32 1.0, %v1252_v31  ;;  %v867_v8 = vsub.f32 %v483_v40, %v6052_v45  ;;  %v459_v3 = vld [vmem:[#allocation6 + $0x1a0] sm:$0xff] }
 0x14a   : > { %3590 = vmatprep.mubr.bf16.mxu0 %v8036_v22  ;;  %v2027_v43 = vmax.f32 %v1643_v55, 0.0  ;;  %v2012_v11 = vmax.f32 %v1628_v61, 0.0  ;;  %v1243_v44 = vand.u32 2147483647, %v859_v1  ;;  %v844_v56 = vsub.f32 %v460_v26, %v6026_v51  ;;  %v467_v4 = vld [vmem:[#allocation6 + $0x1e0] sm:$0xff] }
 0x14b   : > { %v2035_v38 = vmax.f32 %v1651_v32, 0.0  ;;  %v2020_v58 = vmax.f32 %v1636_v28, 0.0  ;;  %v1251_v60 = vand.u32 2147483647, %v867_v8  ;;  %v852_v57 = vsub.f32 %v468_v47, %v6026_v51  ;;  %v779_v26 = vld [vmem:[#allocation6 + $0xba0] sm:$0xff] }
 0x14c   : > { %3694 = vmatpush1.bf16.msra.mxu1 %v2379_v33  ;;  %v1627_v2 = vsub.f32 1.0, %v1243_v44  ;;  %v1228_v7 = vand.u32 2147483647, %v844_v56  ;;  %v1164_v15 = vsub.f32 %v780_v46, %v6026_v51  ;;  %v1172_v40 = vsub.f32 %v788_v52, %v6026_v51  ;;  %v787_v32 = vld [vmem:[#allocation6 + $0xbe0] sm:$0xff]  ;;  %v444_v52 = vld [vmem:[#allocation6 + $0x128] sm:$0xff] }
 0x14d   : > { %3695 = vmatprep.subr.bf16.mxu1 %v2372_v36  ;;  %v2371_v62 = vpack.c.bf16 %v2035_v38, %v2027_v43  ;;  %v2364_v35 = vpack.c.bf16 %v2020_v58, %v2012_v11  ;;  %v1635_v0 = vsub.f32 1.0, %v1251_v60  ;;  %v1236_v37 = vand.u32 2147483647, %v852_v57  ;;  %v452_v38 = vld [vmem:[#allocation6 + $0x168] sm:$0xff] }
 0x14e   : > { %v2011_v5 = vmax.f32 %v1627_v2, 0.0  ;;  %3458 = vmatmul.mubr.bf16.gmra.mxu1 %v5890_v39  ;;  %v1612_v31 = vsub.f32 1.0, %v1228_v7  ;;  %v1548_v55 = vand.u32 2147483647, %v1164_v15  ;;  %v1556_v33 = vand.u32 2147483647, %v1172_v40 }
 0x14f   : > { %v2019_v61 = vmax.f32 %v1635_v0, 0.0  ;;  %v1620_v1 = vsub.f32 1.0, %v1236_v37  ;;  %v843_v47 = vsub.f32 %v459_v3, %v6052_v45  ;;  %v851_v24 = vsub.f32 %v467_v4, %v6052_v45  ;;  %3467 = vmatprep.mubr.bf16.mxu1 %v5893_v59  ;;  %v5292_v39 = vld [vmem:[#allocation5 + $0x38] ss:$12 sps:$4 sm:$0xff]  }
 0x150   : > { %3696 = vmatpush1.bf16.msra.mxu1 %v2371_v62  ;;  %v1996_v36 = vmax.f32 %v1612_v31, 0.0  ;;  %v1932_v28 = vsub.f32 1.0, %v1548_v55  ;;  %v1940_v8 = vsub.f32 1.0, %v1556_v33  ;;  %v1163_v46 = vsub.f32 %v779_v26, %v6052_v45  ;;  %v443_v2 = vld [vmem:[#allocation6 + $0x120] sm:$0xff]  ;;  %v428_v26 = vld [vmem:[#allocation6 + $0xa8] sm:$0xff] }
 0x151   : > { %3591 = vmatmul.mubr.bf16.gmra.mxu0 %v5292_v39  ;;  %3697 = vmatprep.subr.bf16.mxu1 %v2364_v35  ;;  %v2363_v43 = vpack.c.bf16 %v2019_v61, %v2011_v5  ;;  %v2004_v11 = vmax.f32 %v1620_v1, 0.0  ;;  %v1227_v44 = vand.u32 2147483647, %v843_v47  ;;  %v1235_v56 = vand.u32 2147483647, %v851_v24  ;;  %v451_v4 = vld [vmem:[#allocation6 + $0x160] sm:$0xff] }
 0x152   : > { %3600 = vmatprep.mubr.bf16.mxu0 %v8036_v22  ;;  %v2316_v58 = vmax.f32 %v1932_v28, 0.0  ;;  %v2324_v60 = vmax.f32 %v1940_v8, 0.0  ;;  %v1171_v59 = vsub.f32 %v787_v32, %v6052_v45  ;;  %v1547_v57 = vand.u32 2147483647, %v1163_v46  ;;  %v436_v61 = vld [vmem:[#allocation6 + $0xe8] sm:$0xff] }
 0x153   : > { %v2356_v7 = vpack.c.bf16 %v2004_v11, %v1996_v36  ;;  %v1611_v15 = vsub.f32 1.0, %v1227_v44  ;;  %v1619_v40 = vsub.f32 1.0, %v1235_v56  ;;  %v828_v3 = vsub.f32 %v444_v52, %v6026_v51  ;;  %v764_v36 = vld [vmem:[#allocation6 + $0xb28] sm:$0xff] }
 0x154   : > { %3698 = vmatpush1.bf16.msra.mxu1 %v2363_v43  ;;  %v2516_v62 = vpack.c.bf16 %v2324_v60, %v2316_v58  ;;  %v1555_v35 = vand.u32 2147483647, %v1171_v59  ;;  %v1931_v0 = vsub.f32 1.0, %v1547_v57  ;;  %v836_v37 = vsub.f32 %v452_v38, %v6026_v51  ;;  %v772_v56 = vld [vmem:[#allocation6 + $0xb68] sm:$0xff]  ;;  %v5293_v38 = vld [vmem:[#allocation5 + $0x50] ss:$12 sps:$4 sm:$0xff]  }
 0x155   : > { %3699 = vmatprep.subr.bf16.mxu1 %v2356_v7  ;;  %v1995_v5 = vmax.f32 %v1611_v15, 0.0  ;;  %v2003_v31 = vmax.f32 %v1619_v40, 0.0  ;;  %v1212_v55 = vand.u32 2147483647, %v828_v3  ;;  %v827_v33 = vsub.f32 %v443_v2, %v6052_v45  ;;  %v427_v57 = vld [vmem:[#allocation6 + $0xa0] sm:$0xff] }
 0x156   : > { %3844 = vmatprep.subr.bf16.mxu0 %v2516_v62  ;;  %v1939_v1 = vsub.f32 1.0, %v1555_v35  ;;  %v2315_v47 = vmax.f32 %v1931_v0, 0.0  ;;  %v1220_v24 = vand.u32 2147483647, %v836_v37  ;;  %v835_v32 = vsub.f32 %v451_v4, %v6052_v45  ;;  %3468 = vmatmul.mubr.bf16.gmra.mxu1 %v5903_v41  ;;  %v435_v40 = vld [vmem:[#allocation6 + $0xe0] sm:$0xff] }
 0x157   : > { %v2355_v28 = vpack.c.bf16 %v2003_v31, %v1995_v5  ;;  %v1596_v8 = vsub.f32 1.0, %v1212_v55  ;;  %v1211_v46 = vand.u32 2147483647, %v827_v33  ;;  %v812_v52 = vsub.f32 %v428_v26, %v6026_v51  ;;  %3477 = vmatprep.mubr.bf16.mxu1 %v5908_v63  ;;  %v763_v0 = vld [vmem:[#allocation6 + $0xb20] sm:$0xff] }
 0x158   : > { %v2323_v39 = vmax.f32 %v1939_v1, 0.0  ;;  %v1604_v43 = vsub.f32 1.0, %v1220_v24  ;;  %v1219_v11 = vand.u32 2147483647, %v835_v32  ;;  %v820_v44 = vsub.f32 %v436_v61, %v6026_v51  ;;  %v771_v55 = vld [vmem:[#allocation6 + $0xb60] sm:$0xff]  ;;  %v412_v24 = vld [vmem:[#allocation6 + $0x28] sm:$0xff] }
 0x159   : > { %3601 = vmatmul.mubr.bf16.gmra.mxu0 %v5293_v38  ;;  %3700 = vmatpush1.bf16.msra.mxu1 %v2355_v28  ;;  %v1980_v58 = vmax.f32 %v1596_v8, 0.0  ;;  %v1595_v60 = vsub.f32 1.0, %v1211_v46  ;;  %v1196_v41 = vand.u32 2147483647, %v812_v52  ;;  %v1148_v59 = vsub.f32 %v764_v36, %v6026_v51  ;;  %v420_v46 = vld [vmem:[#allocation6 + $0x68] sm:$0xff] }
 0x15a   : > { %3610 = vmatprep.mubr.bf16.mxu0 %v8036_v22  ;;  %v2515_v2 = vpack.c.bf16 %v2323_v39, %v2315_v47  ;;  %v1988_v7 = vmax.f32 %v1604_v43, 0.0  ;;  %v1603_v63 = vsub.f32 1.0, %v1219_v11  ;;  %v1204_v15 = vand.u32 2147483647, %v820_v44  ;;  %v411_v44 = vld [vmem:[#allocation6 + $0x20] sm:$0xff] }
 0x15b   : > { %v1979_v3 = vmax.f32 %v1595_v60, 0.0  ;;  %v1580_v4 = vsub.f32 1.0, %v1196_v41  ;;  %v1156_v62 = vsub.f32 %v772_v56, %v6026_v51  ;;  %v1532_v35 = vand.u32 2147483647, %v1148_v59  ;;  %v5294_v41 = vld [vmem:[#allocation5 + $0x68] ss:$12 sps:$4 sm:$0xff]  }
 0x15c   : > { %3845 = vmatpush1.bf16.msra.mxu0 %v2515_v2  ;;  %v2348_v37 = vpack.c.bf16 %v1988_v7, %v1980_v58  ;;  %v1987_v26 = vmax.f32 %v1603_v63, 0.0  ;;  %v1588_v5 = vsub.f32 1.0, %v1204_v15  ;;  %v811_v31 = vsub.f32 %v427_v57, %v6052_v45  ;;  %v419_v7 = vld [vmem:[#allocation6 + $0x60] sm:$0xff] }
 0x15d   : > { %v1964_v33 = vmax.f32 %v1580_v4, 0.0  ;;  %v1540_v61 = vand.u32 2147483647, %v1156_v62  ;;  %v1916_v1 = vsub.f32 1.0, %v1532_v35  ;;  %v819_v47 = vsub.f32 %v435_v40, %v6052_v45 }
 0x15e   : > { %3701 = vmatprep.subr.bf16.mxu1 %v2348_v37  ;;  %v2347_v32 = vpack.c.bf16 %v1987_v26, %v1979_v3  ;;  %v1972_v36 = vmax.f32 %v1588_v5, 0.0  ;;  %v1195_v28 = vand.u32 2147483647, %v811_v31  ;;  %v1147_v8 = vsub.f32 %v763_v0, %v6052_v45  ;;  %3478 = vmatmul.mubr.bf16.gmra.mxu1 %v5916_v53  ;;  %v652_v3 = vld [vmem:[#allocation6 + $0x7a8] sm:$0xff] }
 0x15f   : > { %v1924_v52 = vsub.f32 1.0, %v1540_v61  ;;  %v2300_v39 = vmax.f32 %v1916_v1, 0.0  ;;  %v1203_v43 = vand.u32 2147483647, %v819_v47  ;;  %v1155_v11 = vsub.f32 %v771_v55, %v6052_v45  ;;  %3487 = vmatprep.mubr.bf16.mxu1 %v5921_v48  ;;  %v660_v37 = vld [vmem:[#allocation6 + $0x7e8] sm:$0xff] }
 0x160   : > { %3702 = vmatpush1.bf16.msra.mxu1 %v2347_v32  ;;  %v2340_v56 = vpack.c.bf16 %v1972_v36, %v1964_v33  ;;  %v1579_v38 = vsub.f32 1.0, %v1195_v28  ;;  %v1531_v58 = vand.u32 2147483647, %v1147_v8  ;;  %v796_v60 = vsub.f32 %v412_v24, %v6026_v51  ;;  %v748_v33 = vld [vmem:[#allocation6 + $0xaa8] sm:$0xff] }
 0x161   : > { %3611 = vmatmul.mubr.bf16.gmra.mxu0 %v5294_v41  ;;  %v2308_v59 = vmax.f32 %v1924_v52, 0.0  ;;  %v1587_v57 = vsub.f32 1.0, %v1203_v43  ;;  %v1539_v53 = vand.u32 2147483647, %v1155_v11  ;;  %v804_v2 = vsub.f32 %v420_v46, %v6026_v51  ;;  %v756_v32 = vld [vmem:[#allocation6 + $0xae8] sm:$0xff]  ;;  %v651_v52 = vld [vmem:[#allocation6 + $0x7a0] sm:$0xff] }
 0x162   : > { %3620 = vmatprep.mubr.bf16.mxu0 %v8036_v22  ;;  %3703 = vmatprep.subr.bf16.mxu1 %v2340_v56  ;;  %v1963_v63 = vmax.f32 %v1579_v38, 0.0  ;;  %v1915_v15 = vsub.f32 1.0, %v1531_v58  ;;  %v1180_v48 = vand.u32 2147483647, %v796_v60  ;;  %v795_v40 = vsub.f32 %v411_v44, %v6052_v45  ;;  %v659_v56 = vld [vmem:[#allocation6 + $0x7e0] sm:$0xff] }
 0x163   : > { %v2508_v4 = vpack.c.bf16 %v2308_v59, %v2300_v39  ;;  %v1971_v62 = vmax.f32 %v1587_v57, 0.0  ;;  %v1923_v35 = vsub.f32 1.0, %v1539_v53  ;;  %v1188_v0 = vand.u32 2147483647, %v804_v2  ;;  %v747_v59 = vld [vmem:[#allocation6 + $0xaa0] sm:$0xff] }
 0x164   : > { %v2299_v26 = vmax.f32 %v1915_v15, 0.0  ;;  %v1564_v5 = vsub.f32 1.0, %v1180_v48  ;;  %v803_v31 = vsub.f32 %v419_v7, %v6052_v45  ;;  %v1179_v55 = vand.u32 2147483647, %v795_v40  ;;  %v5295_v57 = vld [vmem:[#allocation5 + $0x80] ss:$12 sps:$4 sm:$0xff]  }
 0x165   : > { %3846 = vmatprep.subr.bf16.mxu0 %v2508_v4  ;;  %v2339_v61 = vpack.c.bf16 %v1971_v62, %v1963_v63  ;;  %v2307_v1 = vmax.f32 %v1923_v35, 0.0  ;;  %v1572_v47 = vsub.f32 1.0, %v1188_v0  ;;  %v1036_v24 = vsub.f32 %v652_v3, %v6026_v51  ;;  %v755_v3 = vld [vmem:[#allocation6 + $0xae0] sm:$0xff] }
 0x166   : > { %v1948_v36 = vmax.f32 %v1564_v5, 0.0  ;;  %v1187_v28 = vand.u32 2147483647, %v803_v31  ;;  %v1563_v8 = vsub.f32 1.0, %v1179_v55  ;;  %3488 = vmatmul.mubr.bf16.gmra.mxu1 %v5931_v10  ;;  %v1044_v46 = vsub.f32 %v660_v37, %v6026_v51  ;;  %v636_v37 = vld [vmem:[#allocation6 + $0x728] sm:$0xff] }
 0x167   : > { %3704 = vmatpush1.bf16.msra.mxu1 %v2339_v61  ;;  %v2507_v39 = vpack.c.bf16 %v2307_v1, %v2299_v26  ;;  %v1956_v43 = vmax.f32 %v1572_v47, 0.0  ;;  %v1420_v11 = vand.u32 2147483647, %v1036_v24  ;;  %v1132_v44 = vsub.f32 %v748_v33, %v6026_v51  ;;  %3497 = vmatprep.mubr.bf16.mxu1 %v5933_v17  ;;  %v644_v61 = vld [vmem:[#allocation6 + $0x768] sm:$0xff] }
 0x168   : > { %v1571_v38 = vsub.f32 1.0, %v1187_v28  ;;  %v1947_v58 = vmax.f32 %v1563_v8, 0.0  ;;  %v1428_v60 = vand.u32 2147483647, %v1044_v46  ;;  %v1140_v41 = vsub.f32 %v756_v32, %v6026_v51 }
 0x169   : > { %3621 = vmatmul.mubr.bf16.gmra.mxu0 %v5295_v57  ;;  %v2332_v10 = vpack.c.bf16 %v1956_v43, %v1948_v36  ;;  %v1804_v53 = vsub.f32 1.0, %v1420_v11  ;;  %v1516_v2 = vand.u32 2147483647, %v1132_v44  ;;  %v1035_v7 = vsub.f32 %v651_v52, %v6052_v45  ;;  %v6115_v63 = vpop.f32.mrf.mxu1  ;;  %v635_v36 = vld [vmem:[#allocation6 + $0x720] sm:$0xff] }
 0x16a   : > { %3847 = vmatpush1.bf16.msra.mxu0 %v2507_v39  ;;  %3630 = vmatprep.mubr.bf16.mxu0 %v8036_v22  ;;  %v1955_v15 = vmax.f32 %v1571_v38, 0.0  ;;  %v1812_v17 = vsub.f32 1.0, %v1428_v60  ;;  %v1524_v48 = vand.u32 2147483647, %v1140_v41  ;;  %v1043_v40 = vsub.f32 %v659_v56, %v6052_v45  ;;  %v643_v43 = vld [vmem:[#allocation6 + $0x760] sm:$0xff] }
 0x16b   : > { %3705 = vmatprep.subr.bf16.mxu1 %v2332_v10  ;;  %v2188_v4 = vmax.f32 %v1804_v53, 0.0  ;;  %v1900_v62 = vsub.f32 1.0, %v1516_v2  ;;  %v1419_v35 = vand.u32 2147483647, %v1035_v7  ;;  %v1131_v0 = vsub.f32 %v747_v59, %v6052_v45  ;;  %v6119_v26 = vpop.f32.mrf.mxu1  ;;  %v628_v53 = vld [vmem:[#allocation6 + $0x6e8] sm:$0xff] }
 0x16c   : > { %v2331_v5 = vpack.c.bf16 %v1955_v15, %v1947_v58  ;;  %v2196_v31 = vmax.f32 %v1812_v17, 0.0  ;;  %v1908_v55 = vsub.f32 1.0, %v1524_v48  ;;  %v1427_v33 = vand.u32 2147483647, %v1043_v40  ;;  %v620_v58 = vld [vmem:[#allocation6 + $0x6a8] sm:$0xff] }
 0x16d   : > { %v2284_v1 = vmax.f32 %v1900_v62, 0.0  ;;  %v1803_v47 = vsub.f32 1.0, %v1419_v35  ;;  %v1139_v24 = vsub.f32 %v755_v3, %v6052_v45  ;;  %v1515_v32 = vand.u32 2147483647, %v1131_v0  ;;  %v6122_v28 = vpop.f32.mrf.mxu1  ;;  %v732_v48 = vld [vmem:[#allocation6 + $0xa28] sm:$0xff] }
 0x16e   : > { %3706 = vmatpush1.bf16.msra.mxu1 %v2331_v5  ;;  %v2452_v8 = vpack.c.bf16 %v2196_v31, %v2188_v4  ;;  %v2292_v46 = vmax.f32 %v1908_v55, 0.0  ;;  %v1811_v52 = vsub.f32 1.0, %v1427_v33  ;;  %v1020_v39 = vsub.f32 %v636_v37, %v6026_v51  ;;  %v5296_v40 = vld [vmem:[#allocation5 + $0x98] ss:$12 sps:$4 sm:$0xff]   ;;  %v740_v31 = vld [vmem:[#allocation6 + $0xa68] sm:$0xff] }
 0x16f   : > { %v2187_v11 = vmax.f32 %v1803_v47, 0.0  ;;  %v1523_v44 = vand.u32 2147483647, %v1139_v24  ;;  %v1899_v56 = vsub.f32 1.0, %v1515_v32  ;;  %v1028_v38 = vsub.f32 %v644_v61, %v6026_v51  ;;  %3498 = vmatmul.mubr.bf16.gmra.mxu1 %v5943_v14  ;;  %v6127_v60 = vpop.f32.mrf.mxu1  ;;  %v619_v24 = vld [vmem:[#allocation6 + $0x6a0] sm:$0xff] }
 0x170   : > { %3707 = vmatprep.subr.bf16.mxu1 %v2452_v8  ;;  %v2500_v41 = vpack.c.bf16 %v2292_v46, %v2284_v1  ;;  %v2195_v59 = vmax.f32 %v1811_v52, 0.0  ;;  %v1404_v57 = vand.u32 2147483647, %v1020_v39  ;;  %v1019_v10 = vsub.f32 %v635_v36, %v6052_v45  ;;  %3507 = vmatprep.mubr.bf16.mxu1 %v5946_v27  ;;  %v627_v52 = vld [vmem:[#allocation6 + $0x6e0] sm:$0xff] }
 0x171   : > { %v1907_v2 = vsub.f32 1.0, %v1523_v44  ;;  %v2283_v7 = vmax.f32 %v1899_v56, 0.0  ;;  %v1412_v15 = vand.u32 2147483647, %v1028_v38  ;;  %v1027_v17 = vsub.f32 %v643_v43, %v6052_v45  ;;  %3631 = vmatmul.mubr.bf16.gmra.mxu0 %v5296_v40  ;;  %v6132_v14 = vpop.f32.mrf.mxu1  ;;  %v731_v38 = vld [vmem:[#allocation6 + $0xa20] sm:$0xff] }
 0x172   : > { %3848 = vmatprep.subr.bf16.mxu0 %v2500_v41  ;;  %v2451_v3 = vpack.c.bf16 %v2195_v59, %v2187_v11  ;;  %v1788_v4 = vsub.f32 1.0, %v1404_v57  ;;  %v1403_v62 = vand.u32 2147483647, %v1019_v10  ;;  %v1004_v35 = vsub.f32 %v620_v58, %v6026_v51  ;;  %3640 = vmatprep.mubr.bf16.mxu0 %v8036_v22  ;;  %v739_v10 = vld [vmem:[#allocation6 + $0xa60] sm:$0xff] }
 0x173   : > { %v2291_v0 = vmax.f32 %v1907_v2, 0.0  ;;  %v1796_v27 = vsub.f32 1.0, %v1412_v15  ;;  %v1411_v37 = vand.u32 2147483647, %v1027_v17  ;;  %v1012_v5 = vsub.f32 %v628_v53, %v6026_v51  ;;  %v6137_v55 = vpop.f32.mrf.mxu1 }
 0x174   : > { %3708 = vmatpush2.bf16.msra.mxu1 %v2451_v3  ;;  %v2172_v33 = vmax.f32 %v1788_v4, 0.0  ;;  %v1787_v61 = vsub.f32 1.0, %v1403_v62  ;;  %v1388_v1 = vand.u32 2147483647, %v1004_v35  ;;  %v1116_v47 = vsub.f32 %v732_v48, %v6026_v51  ;;  %v604_v48 = vld [vmem:[#allocation6 + $0x628] sm:$0xff] }
 0x175   : > { %v2499_v32 = vpack.c.bf16 %v2291_v0, %v2283_v7  ;;  %v2180_v36 = vmax.f32 %v1796_v27, 0.0  ;;  %v1795_v8 = vsub.f32 1.0, %v1411_v37  ;;  %v1396_v46 = vand.u32 2147483647, %v1012_v5  ;;  %v6140_v39 = vpop.f32.mrf.mxu1  ;;  %v612_v35 = vld [vmem:[#allocation6 + $0x668] sm:$0xff] }
 0x176   : > { %v2171_v43 = vmax.f32 %v1787_v61, 0.0  ;;  %v1772_v11 = vsub.f32 1.0, %v1388_v1  ;;  %v1124_v44 = vsub.f32 %v740_v31, %v6026_v51  ;;  %v1500_v56 = vand.u32 2147483647, %v1116_v47  ;;  %v5297_v0 = vld [vmem:[#allocation5 + $0xb0] ss:$12 sps:$4 sm:$0xff]  }
 0x177   : > { %3849 = vmatpush1.bf16.msra.mxu0 %v2499_v32  ;;  %v2444_v58 = vpack.c.bf16 %v2180_v36, %v2172_v33  ;;  %v2179_v41 = vmax.f32 %v1795_v8, 0.0  ;;  %v1780_v59 = vsub.f32 1.0, %v1396_v46  ;;  %v1003_v57 = vsub.f32 %v619_v24, %v6052_v45  ;;  %3508 = vmatmul.mubr.bf16.gmra.mxu1 %v5957_v42  ;;  %v6145_v53 = vpop.f32.mrf.mxu1  ;;  %v603_v33 = vld [vmem:[#allocation6 + $0x620] sm:$0xff] }
 0x178   : > { %v2156_v2 = vmax.f32 %v1772_v11, 0.0  ;;  %v1508_v7 = vand.u32 2147483647, %v1124_v44  ;;  %v1884_v15 = vsub.f32 1.0, %v1500_v56  ;;  %v1011_v17 = vsub.f32 %v627_v52, %v6052_v45  ;;  %3517 = vmatprep.mubr.bf16.mxu1 %v5960_v54  ;;  %v611_v52 = vld [vmem:[#allocation6 + $0x660] sm:$0xff] }
 0x179   : > { %3709 = vmatprep.subr.bf16.mxu1 %v2444_v58  ;;  %v2443_v40 = vpack.c.bf16 %v2179_v41, %v2171_v43  ;;  %v2164_v3 = vmax.f32 %v1780_v59, 0.0  ;;  %v1387_v4 = vand.u32 2147483647, %v1003_v57  ;;  %v1115_v62 = vsub.f32 %v731_v38, %v6052_v45  ;;  %3641 = vmatmul.mubr.bf16.gmra.mxu0 %v5297_v0  ;;  %v6150_v42 = vpop.f32.mrf.mxu1  ;;  %v588_v38 = vld [vmem:[#allocation6 + $0x5a8] sm:$0xff] }
 0x17a   : > { %v1892_v27 = vsub.f32 1.0, %v1508_v7  ;;  %v2268_v37 = vmax.f32 %v1884_v15, 0.0  ;;  %v1395_v5 = vand.u32 2147483647, %v1011_v17  ;;  %v1123_v31 = vsub.f32 %v739_v10, %v6052_v45  ;;  %3650 = vmatprep.mubr.bf16.mxu0 %v8036_v22 }
 0x17b   : > { %3710 = vmatpush2.bf16.msra.mxu1 %v2443_v40  ;;  %v2436_v54 = vpack.c.bf16 %v2164_v3, %v2156_v2  ;;  %v1771_v61 = vsub.f32 1.0, %v1387_v4  ;;  %v1499_v1 = vand.u32 2147483647, %v1115_v62  ;;  %v988_v47 = vsub.f32 %v604_v48, %v6026_v51  ;;  %v6155_v24 = vpop.f32.mrf.mxu1  ;;  %v596_v2 = vld [vmem:[#allocation6 + $0x5e8] sm:$0xff] }
 0x17c   : > { %v2276_v32 = vmax.f32 %v1892_v27, 0.0  ;;  %v1779_v36 = vsub.f32 1.0, %v1395_v5  ;;  %v1507_v8 = vand.u32 2147483647, %v1123_v31  ;;  %v996_v46 = vsub.f32 %v612_v35, %v6026_v51  ;;  %v716_v40 = vld [vmem:[#allocation6 + $0x9a8] sm:$0xff] }
 0x17d   : > { %3711 = vmatprep.subr.bf16.mxu1 %v2436_v54  ;;  %v2155_v43 = vmax.f32 %v1771_v61, 0.0  ;;  %v1883_v11 = vsub.f32 1.0, %v1499_v1  ;;  %v1372_v44 = vand.u32 2147483647, %v988_v47  ;;  %v987_v56 = vsub.f32 %v603_v33, %v6052_v45  ;;  %v6159_v58 = vpop.f32.mrf.mxu1  ;;  %v724_v27 = vld [vmem:[#allocation6 + $0x9e8] sm:$0xff]  ;;  %v587_v54 = vld [vmem:[#allocation6 + $0x5a0] sm:$0xff] }
 0x17e   : > { %v2492_v41 = vpack.c.bf16 %v2276_v32, %v2268_v37  ;;  %v2163_v59 = vmax.f32 %v1779_v36, 0.0  ;;  %v1891_v57 = vsub.f32 1.0, %v1507_v8  ;;  %v1380_v10 = vand.u32 2147483647, %v996_v46  ;;  %v5298_v61 = vld [vmem:[#allocation5 + $0xc8] ss:$12 sps:$4 sm:$0xff]  }
 0x17f   : > { %v2267_v7 = vmax.f32 %v1883_v11, 0.0  ;;  %v1756_v15 = vsub.f32 1.0, %v1372_v44  ;;  %v995_v17 = vsub.f32 %v611_v52, %v6052_v45  ;;  %v1371_v48 = vand.u32 2147483647, %v987_v56  ;;  %3518 = vmatmul.mubr.bf16.gmra.mxu1 %v5973_v9  ;;  %v6163_v3 = vpop.f32.mrf.mxu1  ;;  %v595_v36 = vld [vmem:[#allocation6 + $0x5e0] sm:$0xff] }
 0x180   : > { %3850 = vmatprep.subr.bf16.mxu0 %v2492_v41  ;;  %v2435_v4 = vpack.c.bf16 %v2163_v59, %v2155_v43  ;;  %v2275_v62 = vmax.f32 %v1891_v57, 0.0  ;;  %v1764_v35 = vsub.f32 1.0, %v1380_v10  ;;  %v972_v0 = vsub.f32 %v588_v38, %v6026_v51  ;;  %3527 = vmatprep.mubr.bf16.mxu1 %v5977_v29  ;;  %v715_v11 = vld [vmem:[#allocation6 + $0x9a0] sm:$0xff] }
 0x181   : > { %v2140_v37 = vmax.f32 %v1756_v15, 0.0  ;;  %v1379_v5 = vand.u32 2147483647, %v995_v17  ;;  %v1755_v31 = vsub.f32 1.0, %v1371_v48  ;;  %v980_v33 = vsub.f32 %v596_v2, %v6026_v51  ;;  %3651 = vmatmul.mubr.bf16.gmra.mxu0 %v5298_v61  ;;  %v723_v15 = vld [vmem:[#allocation6 + $0x9e0] sm:$0xff] }
 0x182   : > { %3712 = vmatpush2.bf16.msra.mxu1 %v2435_v4  ;;  %v2491_v9 = vpack.c.bf16 %v2275_v62, %v2267_v7  ;;  %v2148_v1 = vmax.f32 %v1764_v35, 0.0  ;;  %v1356_v47 = vand.u32 2147483647, %v972_v0  ;;  %v1100_v32 = vsub.f32 %v716_v40, %v6026_v51  ;;  %3660 = vmatprep.mubr.bf16.mxu0 %v8036_v22  ;;  %v6170_v8 = vpop.f32.mrf.mxu1  ;;  %v572_v62 = vld [vmem:[#allocation6 + $0x528] sm:$0xff] }
 0x183   : > { %v1763_v29 = vsub.f32 1.0, %v1379_v5  ;;  %v2139_v46 = vmax.f32 %v1755_v31, 0.0  ;;  %v1364_v52 = vand.u32 2147483647, %v980_v33  ;;  %v1108_v43 = vsub.f32 %v724_v27, %v6026_v51  ;;  %v580_v31 = vld [vmem:[#allocation6 + $0x568] sm:$0xff] }
 0x184   : > { %3851 = vmatpush1.bf16.msra.mxu0 %v2491_v9  ;;  %v2428_v44 = vpack.c.bf16 %v2148_v1, %v2140_v37  ;;  %v1740_v56 = vsub.f32 1.0, %v1356_v47  ;;  %v1484_v38 = vand.u32 2147483647, %v1100_v32  ;;  %v971_v41 = vsub.f32 %v587_v54, %v6052_v45  ;;  %v6174_v59 = vpop.f32.mrf.mxu1  ;;  %v571_v1 = vld [vmem:[#allocation6 + $0x520] sm:$0xff] }
 0x185   : > { %v2147_v57 = vmax.f32 %v1763_v29, 0.0  ;;  %v1748_v10 = vsub.f32 1.0, %v1364_v52  ;;  %v1492_v2 = vand.u32 2147483647, %v1108_v43  ;;  %v979_v7 = vsub.f32 %v595_v36, %v6052_v45  ;;  %v5299_v47 = vld [vmem:[#allocation5 + $0x4] ss:$12 sps:$4 sm:$0xff]  }
 0x186   : > { %3713 = vmatprep.subr.bf16.mxu1 %v2428_v44  ;;  %v2124_v17 = vmax.f32 %v1740_v56, 0.0  ;;  %v1868_v48 = vsub.f32 1.0, %v1484_v38  ;;  %v1355_v40 = vand.u32 2147483647, %v971_v41  ;;  %v1099_v4 = vsub.f32 %v715_v11, %v6052_v45  ;;  %v6178_v35 = vpop.f32.mrf.mxu1  ;;  %v579_v43 = vld [vmem:[#allocation6 + $0x560] sm:$0xff]  ;;  %v556_v41 = vld [vmem:[#allocation6 + $0x4a8] sm:$0xff] }
 0x187   : > { %v2427_v0 = vpack.c.bf16 %v2147_v57, %v2139_v46  ;;  %v2132_v27 = vmax.f32 %v1748_v10, 0.0  ;;  %v1876_v37 = vsub.f32 1.0, %v1492_v2  ;;  %v1363_v5 = vand.u32 2147483647, %v979_v7  ;;  %3528 = vmatmul.mubr.bf16.gmra.mxu1 %v6005_v25  ;;  %v5300_v11 = vld [vmem:[#allocation5 + $0xe0] ss:$12 sps:$4 sm:$0xff]  }
 0x188   : > { %v2252_v33 = vmax.f32 %v1868_v48, 0.0  ;;  %v1739_v54 = vsub.f32 1.0, %v1355_v40  ;;  %v1107_v61 = vsub.f32 %v723_v15, %v6052_v45  ;;  %v1483_v9 = vand.u32 2147483647, %v1099_v4  ;;  %3723 = vmatprep.mubr.bf16.mxu1 %v5299_v47  ;;  %v6182_v32 = vpop.f32.mrf.mxu1  ;;  %v563_v47 = vld [vmem:[#allocation6 + $0x4e0] sm:$0xff] }
 0x189   : > { %8037 = vst [vmem:[#allocation23_spill] sm:$0xff] %v6182_v32  ;;  %3714 = vmatpush2.bf16.msra.mxu1 %v2427_v0  ;;  %v2420_v36 = vpack.c.bf16 %v2132_v27, %v2124_v17  ;;  %v2260_v29 = vmax.f32 %v1876_v37, 0.0  ;;  %v1747_v46 = vsub.f32 1.0, %v1363_v5  ;;  %v956_v52 = vsub.f32 %v572_v62, %v6026_v51  ;;  %3661 = vmatmul.mubr.bf16.gmra.mxu0 %v5300_v11  ;;  %v564_v17 = vld [vmem:[#allocation6 + $0x4e8] sm:$0xff]  ;;  %v555_v0 = vld [vmem:[#allocation6 + $0x4a0] sm:$0xff] }
 0x18a   : > { %v2123_v25 = vmax.f32 %v1739_v54, 0.0  ;;  %v1491_v44 = vand.u32 2147483647, %v1107_v61  ;;  %v1867_v56 = vsub.f32 1.0, %v1483_v9  ;;  %v964_v38 = vsub.f32 %v580_v31, %v6026_v51  ;;  %3670 = vmatprep.mubr.bf16.mxu0 %v8036_v22  ;;  %v6187_v57 = vpop.f32.mrf.mxu1  ;;  %v540_v11 = vld [vmem:[#allocation6 + $0x428] sm:$0xff] }
 0x18b   : > { %8038 = vst [vmem:[#allocation24_spill] sm:$0xff] %v6187_v57  ;;  %3715 = vmatprep.subr.bf16.mxu1 %v2420_v36  ;;  %v2484_v10 = vpack.c.bf16 %v2260_v29, %v2252_v33  ;;  %v2131_v2 = vmax.f32 %v1747_v46, 0.0  ;;  %v1340_v7 = vand.u32 2147483647, %v956_v52  ;;  %v955_v15 = vsub.f32 %v571_v1, %v6052_v45 }
 0x18c   : > { %v1875_v48 = vsub.f32 1.0, %v1491_v44  ;;  %v2251_v40 = vmax.f32 %v1867_v56, 0.0  ;;  %v1348_v4 = vand.u32 2147483647, %v964_v38  ;;  %v963_v62 = vsub.f32 %v579_v43, %v6052_v45  ;;  %v6191_v27 = vpop.f32.mrf.mxu1 }
 0x18d   : > { %8039 = vst [vmem:[#allocation25_spill] sm:$0xff] %v6191_v27  ;;  %3852 = vmatprep.subr.bf16.mxu0 %v2484_v10  ;;  %v2419_v37 = vpack.c.bf16 %v2131_v2, %v2123_v25  ;;  %v1724_v5 = vsub.f32 1.0, %v1340_v7  ;;  %v1339_v31 = vand.u32 2147483647, %v955_v15  ;;  %v940_v54 = vsub.f32 %v556_v41, %v6026_v51  ;;  %v548_v41 = vld [vmem:[#allocation6 + $0x468] sm:$0xff]  ;;  %v493_v27 = vld [vmem:[#allocation6 + $0x2b0] sm:$0xff] }
 0x18e   : > { %v2259_v33 = vmax.f32 %v1875_v48, 0.0  ;;  %v1732_v61 = vsub.f32 1.0, %v1348_v4  ;;  %v1347_v9 = vand.u32 2147483647, %v963_v62  ;;  %v948_v1 = vsub.f32 %v564_v17, %v6026_v51  ;;  %v6195_v36 = vpop.f32.mrf.mxu1  ;;  %v700_v48 = vld [vmem:[#allocation6 + $0x928] sm:$0xff] }
 0x18f   : > { %8040 = vst [vmem:[#allocation26_spill] sm:$0xff] %v6195_v36  ;;  %3716 = vmatpush2.bf16.msra.mxu1 %v2419_v37  ;;  %v2108_v29 = vmax.f32 %v1724_v5, 0.0  ;;  %v1723_v46 = vsub.f32 1.0, %v1339_v31  ;;  %v1324_v52 = vand.u32 2147483647, %v940_v54  ;;  %v939_v43 = vsub.f32 %v555_v0, %v6052_v45  ;;  %v708_v5 = vld [vmem:[#allocation6 + $0x968] sm:$0xff] }
 0x190   : > { %v2483_v25 = vpack.c.bf16 %v2259_v33, %v2251_v40  ;;  %v2116_v44 = vmax.f32 %v1732_v61, 0.0  ;;  %v1731_v56 = vsub.f32 1.0, %v1347_v9  ;;  %v1332_v38 = vand.u32 2147483647, %v948_v1  ;;  %v6198_v10 = vpop.f32.mrf.mxu1  ;;  %v5301_v4 = vld [vmem:[#allocation5 + $0xf8] ss:$12 sps:$4 sm:$0xff]  }
 0x191   : > { %8041 = vst [vmem:[#allocation27_spill] sm:$0xff] %v6198_v10  ;;  %v2107_v2 = vmax.f32 %v1723_v46, 0.0  ;;  %v1708_v7 = vsub.f32 1.0, %v1324_v52  ;;  %v947_v15 = vsub.f32 %v563_v47, %v6052_v45  ;;  %v1323_v17 = vand.u32 2147483647, %v939_v43  ;;  %3671 = vmatmul.mubr.bf16.gmra.mxu0 %v5301_v4  ;;  %v539_v1 = vld [vmem:[#allocation6 + $0x420] sm:$0xff] }
 0x192   : > { %3853 = vmatpush1.bf16.msra.mxu0 %v2483_v25  ;;  %v2412_v62 = vpack.c.bf16 %v2116_v44, %v2108_v29  ;;  %v2115_v37 = vmax.f32 %v1731_v56, 0.0  ;;  %v1716_v0 = vsub.f32 1.0, %v1332_v38  ;;  %v924_v40 = vsub.f32 %v540_v11, %v6026_v51  ;;  %3680 = vmatprep.mubr.bf16.mxu0 %v8036_v22  ;;  %v6203_v31 = vpop.f32.mrf.mxu1  ;;  %v547_v43 = vld [vmem:[#allocation6 + $0x460] sm:$0xff] }
 0x193   : > { %8042 = vst [vmem:[#allocation28_spill] sm:$0xff] %v6203_v31  ;;  %v2092_v54 = vmax.f32 %v1708_v7, 0.0  ;;  %v1331_v33 = vand.u32 2147483647, %v947_v15  ;;  %v1707_v61 = vsub.f32 1.0, %v1323_v17  ;;  %v932_v9 = vsub.f32 %v548_v41, %v6026_v51  ;;  %v699_v7 = vld [vmem:[#allocation6 + $0x920] sm:$0xff] }
 0x194   : > { %3717 = vmatprep.subr.bf16.mxu1 %v2412_v62  ;;  %v2411_v47 = vpack.c.bf16 %v2115_v37, %v2107_v2  ;;  %v2100_v46 = vmax.f32 %v1716_v0, 0.0  ;;  %v1308_v52 = vand.u32 2147483647, %v924_v40  ;;  %v1084_v29 = vsub.f32 %v700_v48, %v6026_v51  ;;  %v6207_v25 = vpop.f32.mrf.mxu1  ;;  %v707_v40 = vld [vmem:[#allocation6 + $0x960] sm:$0xff]  ;;  %v517_v31 = vld [vmem:[#allocation6 + $0x370] sm:$0xff] }
 0x195   : > { %8043 = vst [vmem:[#allocation29_spill] sm:$0xff] %v6207_v25  ;;  %v1715_v11 = vsub.f32 1.0, %v1331_v33  ;;  %v2091_v44 = vmax.f32 %v1707_v61, 0.0  ;;  %v1316_v56 = vand.u32 2147483647, %v932_v9  ;;  %v1092_v38 = vsub.f32 %v708_v5, %v6026_v51 }
 0x196   : > { %3718 = vmatpush2.bf16.msra.mxu1 %v2411_v47  ;;  %v2404_v15 = vpack.c.bf16 %v2100_v46, %v2092_v54  ;;  %v1692_v17 = vsub.f32 1.0, %v1308_v52  ;;  %v1468_v41 = vand.u32 2147483647, %v1084_v29  ;;  %v923_v4 = vsub.f32 %v539_v1, %v6052_v45  ;;  %v6211_v2 = vpop.f32.mrf.mxu1  ;;  %v684_v47 = vld [vmem:[#allocation6 + $0x8a8] sm:$0xff] }
 0x197   : > { %8044 = vst [vmem:[#allocation30_spill] sm:$0xff] %v6211_v2  ;;  %v2099_v62 = vmax.f32 %v1715_v11, 0.0  ;;  %v1700_v37 = vsub.f32 1.0, %v1316_v56  ;;  %v1476_v48 = vand.u32 2147483647, %v1092_v38  ;;  %v931_v0 = vsub.f32 %v547_v43, %v6052_v45  ;;  %v692_v2 = vld [vmem:[#allocation6 + $0x8e8] sm:$0xff] }
 0x198   : > { %3719 = vmatprep.subr.bf16.mxu1 %v2404_v15  ;;  %v2076_v33 = vmax.f32 %v1692_v17, 0.0  ;;  %v1852_v61 = vsub.f32 1.0, %v1468_v41  ;;  %v1307_v9 = vand.u32 2147483647, %v923_v4  ;;  %v1083_v5 = vsub.f32 %v699_v7, %v6052_v45  ;;  %v6215_v54 = vpop.f32.mrf.mxu1  ;;  %v5302_v11 = vld [vmem:[#allocation5 + $0x110] ss:$12 sps:$4 sm:$0xff]  }
 0x199   : > { %8045 = vst [vmem:[#allocation31_spill] sm:$0xff] %v6215_v54  ;;  %v2403_v46 = vpack.c.bf16 %v2099_v62, %v2091_v44  ;;  %v2084_v52 = vmax.f32 %v1700_v37, 0.0  ;;  %v1860_v1 = vsub.f32 1.0, %v1476_v48  ;;  %v1315_v29 = vand.u32 2147483647, %v931_v0  ;;  %3681 = vmatmul.mubr.bf16.gmra.mxu0 %v5302_v11 }
 0x19a   : > { %v2236_v56 = vmax.f32 %v1852_v61, 0.0  ;;  %v1691_v38 = vsub.f32 1.0, %v1307_v9  ;;  %v1091_v43 = vsub.f32 %v707_v40, %v6052_v45  ;;  %v1467_v15 = vand.u32 2147483647, %v1083_v5  ;;  %3876 = vmatprep.mubr.bf16.mxu0 %v8036_v22  ;;  %v6219_v17 = vpop.f32.mrf.mxu1  ;;  %v683_v61 = vld [vmem:[#allocation6 + $0x8a0] sm:$0xff] }
 0x19b   : > { %8046 = vst [vmem:[#allocation32_spill] sm:$0xff] %v6219_v17  ;;  %3720 = vmatpush2.bf16.msra.mxu1 %v2403_v46  ;;  %v2396_v7 = vpack.c.bf16 %v2084_v52, %v2076_v33  ;;  %v2244_v41 = vmax.f32 %v1860_v1, 0.0  ;;  %v1699_v4 = vsub.f32 1.0, %v1315_v29  ;;  %v1068_v44 = vsub.f32 %v684_v47, %v6026_v51  ;;  %v691_v46 = vld [vmem:[#allocation6 + $0x8e0] sm:$0xff]  ;;  %v668_v29 = vld [vmem:[#allocation6 + $0x828] sm:$0xff] }
 0x19c   : > { %v2075_v62 = vmax.f32 %v1691_v38, 0.0  ;;  %v1475_v37 = vand.u32 2147483647, %v1091_v43  ;;  %v1851_v48 = vsub.f32 1.0, %v1467_v15  ;;  %v1076_v0 = vsub.f32 %v692_v2, %v6026_v51  ;;  %v6223_v9 = vpop.f32.mrf.mxu1 }
 0x19d   : > { %8047 = vst [vmem:[#allocation33_spill] sm:$0xff] %v6223_v9  ;;  %3721 = vmatprep.subr.bf16.mxu1 %v2396_v7  ;;  %v2476_v40 = vpack.c.bf16 %v2244_v41, %v2236_v56  ;;  %v2083_v5 = vmax.f32 %v1699_v4, 0.0  ;;  %v1452_v11 = vand.u32 2147483647, %v1068_v44  ;;  %v328_v17 = vmul.f32 32.0, %v6031_v50 }
 0x19e   : > { %v1859_v33 = vsub.f32 1.0, %v1475_v37  ;;  %v2235_v52 = vmax.f32 %v1851_v48, 0.0  ;;  %v1460_v1 = vand.u32 2147483647, %v1076_v0  ;;  %v354_v47 = vmul.f32 %v5644_v18, %v6031_v50  ;;  %v6228_v38 = vpop.f32.mrf.mxu1  ;;  %v676_v0 = vld [vmem:[#allocation6 + $0x868] sm:$0xff] }
 0x19f   : > { %8048 = vst [vmem:[#allocation34_spill] sm:$0xff] %v6228_v38  ;;  %3854 = vmatprep.subr.bf16.mxu0 %v2476_v40  ;;  %v2395_v2 = vpack.c.bf16 %v2083_v5, %v2075_v62  ;;  %v1836_v43 = vsub.f32 1.0, %v1452_v11  ;;  %v8049_v15 = vcvt.s32.f32 %v5986_v49  ;;  %v1067_v7 = vsub.f32 %v683_v61, %v6052_v45  ;;  %v6235_v41 = vpop.f32.mrf.mxu0 }
 0x1a0   : > { %v2243_v4 = vmax.f32 %v1859_v33, 0.0  ;;  %v1844_v44 = vsub.f32 1.0, %v1460_v1  ;;  %v1075_v37 = vsub.f32 %v691_v46, %v6052_v45  ;;  %v6239_v48 = vfloor.f32 %v6038_v13  ;;  %v6241_v50 = vpop.f32.mrf.mxu1  ;;  %v6249_v13 = vld [vmem:[#allocation6 + $0x820] sm:$0xff] }
 0x1a1   : > { %v6232_v56 = vsub.f32 %v8049_v15, %v328_v17  ;;  %8052 = vst [vmem:[#allocation37_spill] sm:$0xff] %v6241_v50  ;;  %3722 = vmatpush2.bf16.msra.mxu1 %v2395_v2  ;;  %v2220_v62 = vmax.f32 %v1836_v43, 0.0  ;;  %v1451_v17 = vand.u32 2147483647, %v1067_v7  ;;  %v1052_v61 = vsub.f32 %v668_v29, %v6026_v51  ;;  %v6246_v40 = vpop.f32.mrf.mxu0  ;;  %v526_v2 = vld [vmem:[#allocation6 + $0x3b8] sm:$0xff]  ;;  %v6256_v29 = vld [vmem:[#allocation6 + $0x860] sm:$0xff] }
 0x1a2   : > { %8051 = vst [vmem:[#allocation36_spill] sm:$0xff] %v6239_v48  ;;  %v2475_v5 = vpack.c.bf16 %v2243_v4, %v2235_v52  ;;  %v2228_v11 = vmax.f32 %v1844_v44, 0.0  ;;  %v1459_v33 = vand.u32 2147483647, %v1075_v37  ;;  %v327_v46 = vmul.f32 32.0, %v6239_v48  ;;  %v6251_v1 = vpop.f32.mrf.mxu1  ;;  %v534_v44 = vld [vmem:[#allocation6 + $0x3f8] sm:$0xff] }
 0x1a3   : > { %8050 = vst [vmem:[#allocation35_spill] sm:$0xff] %v6232_v56  ;;  %v345_v49 = vmul.f32 %v5651_v23, %v6232_v56  ;;  %8053 = vst [vmem:[#allocation38_spill] sm:$0xff] %v6251_v1  ;;  %v1835_v43 = vsub.f32 1.0, %v1451_v17  ;;  %v353_v56 = vmul.f32 %v5644_v18, %v6239_v48  ;;  %v1060_v7 = vsub.f32 %v676_v0, %v6026_v51  ;;  %v6258_v50 = vpop.f32.mrf.mxu0  ;;  %v5303_v52 = vld [vmem:[#allocation5] ss:$12 sps:$4 sm:$0xff]   ;;  %v518_v17 = vld [vmem:[#allocation6 + $0x378] sm:$0xff] }
 0x1a4   : > { %3855 = vmatpush1.bf16.msra.mxu0 %v2475_v5  ;;  %3724 = vmatmul.mubr.bf16.vlgmr.msra.gmra.mxu1 %v5303_v52  ;;  %v2468_v4 = vpack.c.bf16 %v2228_v11, %v2220_v62  ;;  %v1843_v37 = vsub.f32 1.0, %v1459_v33  ;;  %v8054_v1 = vcvt.s32.f32 %v6000_v12  ;;  %v1436_v38 = vand.u32 2147483647, %v1052_v61  ;;  %v6264_v18 = vpop.f32.mrf.mxu1  ;;  %v5304_v51 = vld [vmem:[#allocation5 + $0x1c] ss:$12 sps:$4 sm:$0xff]  }
 0x1a5   : > { %v362_v15 = vadd.f32 %v354_v47, %v345_v49  ;;  %v510_v49 = vld [vmem:[#allocation6 + $0x338] sm:$0xff]  ;;  %8056 = vst [vmem:[#allocation40_spill] sm:$0xff] %v6264_v18  ;;  %3733 = vmatprep.mubr.bf16.mxu1 %v5304_v51  ;;  %v2219_v5 = vmax.f32 %v1835_v43, 0.0  ;;  %v1444_v48 = vand.u32 2147483647, %v1060_v7  ;;  %v6271_v11 = vpop.f32.mrf.mxu0  ;;  %v509_v18 = vld [vmem:[#allocation6 + $0x330] sm:$0xff] }
 0x1a6   : > { %v6262_v47 = vsub.f32 %v8054_v1, %v327_v46  ;;  %3856 = vmatprep.subr.bf16.mxu0 %v2468_v4  ;;  %v2227_v12 = vmax.f32 %v1843_v37, 0.0  ;;  %v1820_v61 = vsub.f32 1.0, %v1436_v38  ;;  %v494_v46 = vld [vmem:[#allocation6 + $0x2b8] sm:$0xff]  ;;  %v6277_v52 = vpop.f32.mrf.mxu1  ;;  %v525_v38 = vld [vmem:[#allocation6 + $0x3b0] sm:$0xff] }
 0x1a7   : > { %v6267_v0 = vadd.f32 %v5670_v34, %v362_v15  ;;  %8057 = vst [vmem:[#allocation41_spill] sm:$0xff] %v6277_v52  ;;  %v502_v4 = vld [vmem:[#allocation6 + $0x2f8] sm:$0xff]  ;;  %v6283_v37 = vpop.f32.mrf.mxu0  ;;  %v1828_v9 = vsub.f32 1.0, %v1444_v48 }
 0x1a8   : > { %8055 = vst [vmem:[#allocation39_spill] sm:$0xff] %v6262_v47  ;;  %v344_v33 = vmul.f32 %v5651_v23, %v6262_v47  ;;  %v2467_v62 = vpack.c.bf16 %v2227_v12, %v2219_v5  ;;  %v533_v47 = vld [vmem:[#allocation6 + $0x3f0] sm:$0xff]  ;;  %v2204_v1 = vmax.f32 %v1820_v61, 0.0  ;;  %v6292_v12 = vpop.f32.mrf.mxu1 }
 0x1a9   : > { %v910_v15 = vsub.f32 %v526_v2, %v6267_v0  ;;  %v918_v43 = vsub.f32 %v534_v44, %v6267_v0  ;;  %v894_v7 = vsub.f32 %v510_v49, %v6267_v0  ;;  %v902_v51 = vsub.f32 %v518_v17, %v6267_v0  ;;  %v6286_v44 = vpop.f32.mrf.mxu0  ;;  %8058 = vst [vmem:[#allocation42_spill] sm:$0xff] %v6292_v12 }
 0x1aa   : > { %v361_v23 = vadd.f32 %v353_v56, %v344_v33  ;;  %v878_v2 = vsub.f32 %v494_v46, %v6267_v0  ;;  %3857 = vmatpush1.bf16.msra.mxu0 %v2467_v62  ;;  %v2212_v5 = vmax.f32 %v1828_v9, 0.0  ;;  %v886_v56 = vsub.f32 %v502_v4, %v6267_v0  ;;  %v5305_v46 = vld [vmem:[#allocation5 + $0x18] ss:$12 sps:$4 sm:$0xff]  }
 0x1ab   : > { %v1294_v54 = vand.u32 2147483647, %v910_v15  ;;  %v1302_v52 = vand.u32 2147483647, %v918_v43  ;;  %v1278_v25 = vand.u32 2147483647, %v894_v7  ;;  %v6294_v43 = vpop.f32.mrf.mxu0  ;;  %v6305_v10 = vpop.f32.mrf.mxu1 }
 0x1ac   : > { %v6289_v49 = vadd.f32 %v5670_v34, %v361_v23  ;;  %v1286_v17 = vand.u32 2147483647, %v902_v51  ;;  %v1262_v15 = vand.u32 2147483647, %v878_v2  ;;  %3734 = vmatmul.mubr.bf16.gmra.mxu1 %v5305_v46  ;;  %8059 = vst [vmem:[#allocation43_spill] sm:$0xff] %v6305_v10 }
 0x1ad   : > { %v1678_v48 = vsub.f32 1.0, %v1294_v54  ;;  %v1686_v33 = vsub.f32 1.0, %v1302_v52  ;;  %v1662_v61 = vsub.f32 1.0, %v1278_v25  ;;  %v5306_v54 = vld [vmem:[#allocation5 + $0x34] ss:$12 sps:$4 sm:$0xff]   ;;  %v6303_v52 = vpop.f32.mrf.mxu0 }
 0x1ae   : > { %v909_v62 = vsub.f32 %v525_v38, %v6289_v49  ;;  %v917_v34 = vsub.f32 %v533_v47, %v6289_v49  ;;  %v1670_v7 = vsub.f32 1.0, %v1286_v17  ;;  %v893_v9 = vsub.f32 %v509_v18, %v6289_v49  ;;  %3743 = vmatprep.mubr.bf16.mxu1 %v5306_v54 }
 0x1af   : > { %v2062_v51 = vmax.f32 %v1678_v48, 0.0  ;;  %v2070_v4 = vmax.f32 %v1686_v33, 0.0  ;;  %v6299_v23 = vmax.f32 %v1662_v61, 0.0  ;;  %v901_v25 = vsub.f32 %v517_v31, %v6289_v49  ;;  %v6307_v33 = vpop.f32.mrf.mxu0 }
 0x1b0   : > { %v1293_v2 = vand.u32 2147483647, %v909_v62  ;;  %v1301_v46 = vand.u32 2147483647, %v917_v34  ;;  %v2054_v12 = vmax.f32 %v1670_v7, 0.0  ;;  %v2460_v38 = vpack.c.bf16 %v2212_v5, %v2204_v1 }
 0x1b1   : > { %v2390_v47 = vpack.c.bf16 %v2070_v4, %v2062_v51  ;;  %v1277_v17 = vand.u32 2147483647, %v893_v9  ;;  %v1285_v18 = vand.u32 2147483647, %v901_v25  ;;  %v1270_v48 = vand.u32 2147483647, %v886_v56  ;;  %v6315_v9 = vpop.f32.mrf.mxu0 }
 0x1b2   : > { %v1677_v61 = vsub.f32 1.0, %v1293_v2  ;;  %v1685_v36 = vsub.f32 1.0, %v1301_v46  ;;  %v2382_v54 = vpack.c.bf16 %v2054_v12, %v6299_v23  ;;  %3858 = vmatprep.subr.bf16.mxu0 %v2460_v38  ;;  %v1646_v31 = vsub.f32 1.0, %v1262_v15  ;;  %v501_v56 = vld [vmem:[#allocation6 + $0x2f0] sm:$0xff]  ;;  %v478_v23 = vld [vmem:[#allocation6 + $0x238] sm:$0xff]  ;;  %v6320_v2 = vpop.f32.mrf.mxu1 }
 0x1b3   : > { %3997 = vmatprep.subr.bf16.mxu1 %v2390_v47  ;;  %v1661_v62 = vsub.f32 1.0, %v1277_v17  ;;  %v1669_v1 = vsub.f32 1.0, %v1285_v18  ;;  %v1654_v5 = vsub.f32 1.0, %v1270_v48  ;;  %v8060_v34 = vsub.f32 %v6249_v13, %v6052_v45  ;;  %8062 = vst [vmem:[#allocation44_spill] sm:$0xff] %v6320_v2  ;;  %v486_v18 = vld [vmem:[#allocation6 + $0x278] sm:$0xff]  ;;  %v6322_v13 = vpop.f32.mrf.mxu0 }
 0x1b4   : > { %v2061_v51 = vmax.f32 %v1677_v61, 0.0  ;;  %v2069_v4 = vmax.f32 %v1685_v36, 0.0  ;;  %v2030_v25 = vmax.f32 %v1646_v31, 0.0  ;;  %v8061_v12 = vsub.f32 %v6256_v29, %v6052_v45  ;;  %v477_v45 = vld [vmem:[#allocation6 + $0x230] sm:$0xff] }
 0x1b5   : > { %v1435_v7 = vand.u32 2147483647, %v8060_v34  ;;  %v2045_v46 = vmax.f32 %v1661_v62, 0.0  ;;  %v2053_v38 = vmax.f32 %v1669_v1, 0.0  ;;  %v2038_v47 = vmax.f32 %v1654_v5, 0.0  ;;  %v485_v29 = vld [vmem:[#allocation6 + $0x270] sm:$0xff]  ;;  %v6327_v5 = vpop.f32.mrf.mxu0 }
 0x1b6   : > { %v1443_v15 = vand.u32 2147483647, %v8061_v12  ;;  %v2389_v48 = vpack.c.bf16 %v2069_v4, %v2061_v51  ;;  %v5307_v34 = vld [vmem:[#allocation5 + $0x30] ss:$12 sps:$4 sm:$0xff]   ;;  %v877_v36 = vsub.f32 %v493_v27, %v6289_v49  ;;  %v885_v31 = vsub.f32 %v501_v56, %v6289_v49  ;;  %v5308_v62 = vld [vmem:[#allocation5 + $0x4c] ss:$12 sps:$4 sm:$0xff]   ;;  %v6330_v27 = vpop.f32.mrf.mxu1 }
 0x1b7   : > { %v1819_v17 = vsub.f32 1.0, %v1435_v7  ;;  %3744 = vmatmul.mubr.bf16.gmra.mxu1 %v5307_v34  ;;  %v2381_v12 = vpack.c.bf16 %v2053_v38, %v2045_v46  ;;  %v2374_v10 = vpack.c.bf16 %v2038_v47, %v2030_v25  ;;  %v862_v1 = vsub.f32 %v478_v23, %v6267_v0  ;;  %8063 = vst [vmem:[#allocation45_spill] sm:$0xff] %v6330_v27  ;;  %v6336_v23 = vpop.f32.mrf.mxu0  ;;  %v2519_v27 = vld [vmem:[#allocation8] sm:$0xff] }
 0x1b8   : > { %v1827_v61 = vsub.f32 1.0, %v1443_v15  ;;  %3753 = vmatprep.mubr.bf16.mxu1 %v5308_v62  ;;  %3998 = vmatpush1.bf16.msra.mxu1 %v2389_v48  ;;  %v1261_v51 = vand.u32 2147483647, %v877_v36  ;;  %v1269_v4 = vand.u32 2147483647, %v885_v31  ;;  %v870_v15 = vsub.f32 %v486_v18, %v6267_v0  ;;  %v462_v31 = vld [vmem:[#allocation6 + $0x1b8] sm:$0xff] }
 0x1b9   : > { %v2203_v2 = vmax.f32 %v1819_v17, 0.0  ;;  %3999 = vmatprep.subr.bf16.mxu1 %v2382_v54  ;;  %v1246_v56 = vand.u32 2147483647, %v862_v1  ;;  %v861_v46 = vsub.f32 %v477_v45, %v6289_v49  ;;  %v869_v25 = vsub.f32 %v485_v29, %v6289_v49  ;;  %v6339_v62 = vpop.f32.mrf.mxu0 }
 0x1ba   : > { %v2211_v7 = vmax.f32 %v1827_v61, 0.0  ;;  %v382_v38 = vmul.f32 %v6045_v21, %v5642_v16  ;;  %v1645_v17 = vsub.f32 1.0, %v1261_v51  ;;  %v1653_v48 = vsub.f32 1.0, %v1269_v4 }
 0x1bb   : > { %v1254_v34 = vand.u32 2147483647, %v870_v15  ;;  %v1630_v61 = vsub.f32 1.0, %v1246_v56  ;;  %v1245_v18 = vand.u32 2147483647, %v861_v46  ;;  %v6342_v1 = vstv %s6310_s9  ;;  %v782_v56 = vld [vmem:[#allocation6 + $0xbb8] sm:$0xff] }
 0x1bc   : > { %v2459_v47 = vpack.c.bf16 %v2211_v7, %v2203_v2  ;;  %v1253_v36 = vand.u32 2147483647, %v869_v25  ;;  %v390_v54 = vadd.f32 %v382_v38, %v6042_v19  ;;  %4000 = vmatpush1.bf16.msra.mxu1 %v2381_v12  ;;  %v2029_v45 = vmax.f32 %v1645_v17, 0.0  ;;  %8064 = vst [vmem:[#allocation46_spill] sm:$0xff] %v6342_v1  ;;  %v470_v2 = vld [vmem:[#allocation6 + $0x1f8] sm:$0xff]  ;;  %v6344_v7 = vpop.f32.mrf.mxu1  ;;  %v6349_v12 = vpop.f32.mrf.mxu0 }
 0x1bd   : > { %v2037_v29 = vmax.f32 %v1653_v48, 0.0  ;;  %v1638_v16 = vsub.f32 1.0, %v1254_v34  ;;  %8065 = vst [vmem:[#allocation47_spill] sm:$0xff] %v6344_v7  ;;  %4001 = vmatprep.subr.bf16.mxu1 %v2374_v10  ;;  %v2014_v51 = vmax.f32 %v1630_v61, 0.0  ;;  %v1629_v4 = vsub.f32 1.0, %v1245_v18  ;;  %v790_v46 = vld [vmem:[#allocation6 + $0xbf8] sm:$0xff] }
 0x1be   : > { %3859 = vmatpush1.bf16.msra.mxu0 %v2459_v47  ;;  %v1637_v15 = vsub.f32 1.0, %v1253_v36  ;;  %v6347_v19 = vadd.f32 %v6342_v1, %v390_v54  ;;  %v5309_v38 = vld [vmem:[#allocation5 + $0x48] ss:$12 sps:$4 sm:$0xff]   ;;  %v3267_v17 = vadd.f32 %v6115_v63, %v6235_v41  ;;  %v846_v48 = vsub.f32 %v462_v31, %v6267_v0  ;;  %v5310_v18 = vld [vmem:[#allocation5 + $0x64] ss:$12 sps:$4 sm:$0xff]  }
 0x1bf   : > { %v2373_v25 = vpack.c.bf16 %v2037_v29, %v2029_v45  ;;  %3754 = vmatmul.mubr.bf16.gmra.mxu1 %v5309_v38  ;;  %v2022_v47 = vmax.f32 %v1638_v16, 0.0  ;;  %v461_v10 = vld [vmem:[#allocation6 + $0x1b0] sm:$0xff]  ;;  %v2013_v34 = vmax.f32 %v1629_v4, 0.0  ;;  %v854_v7 = vsub.f32 %v470_v2, %v6267_v0  ;;  %v6356_v29 = vpop.f32.mrf.mxu0  ;;  %v6361_v4 = vpop.f32.mrf.mxu1 }
 0x1c0   : > { %v2021_v61 = vmax.f32 %v1637_v15, 0.0  ;;  %3763 = vmatprep.mubr.bf16.mxu1 %v5310_v18  ;;  %v2583_v36 = vsub.f32 %v2519_v27, %v6347_v19  ;;  %v5311_v54 = vld [vmem:[#allocation5 + $0x8] ss:$12 sps:$4 sm:$0xff]   ;;  %8066 = vst [vmem:[#allocation48_spill] sm:$0xff] %v6356_v29  ;;  %v1230_v38 = vand.u32 2147483647, %v846_v48  ;;  %v1166_v63 = vsub.f32 %v782_v56, %v6267_v0 }
 0x1c1   : > { %3877 = vmatmul.mubr.bf16.vlgmr.msra.gmra.mxu0 %v5311_v54  ;;  %v469_v45 = vld [vmem:[#allocation6 + $0x1f0] sm:$0xff]  ;;  %4002 = vmatpush1.bf16.msra.mxu1 %v2373_v25  ;;  %v2366_v16 = vpack.c.bf16 %v2022_v47, %v2014_v51  ;;  %v1174_v41 = vsub.f32 %v790_v46, %v6267_v0  ;;  %8067 = vst [vmem:[#allocation49_spill] sm:$0xff] %v6361_v4  ;;  %v1238_v18 = vand.u32 2147483647, %v854_v7  ;;  %v6364_v54 = vpop.f32.mrf.mxu0 }
 0x1c2   : > { %v781_v31 = vld [vmem:[#allocation6 + $0xbb0] sm:$0xff]  ;;  %3886 = vmatprep.mubr.bf16.mxu0 %v8036_v22  ;;  %v2365_v27 = vpack.c.bf16 %v2021_v61, %v2013_v34  ;;  %v2647_v15 = vand.u32 2147483647, %v2583_v36  ;;  %v845_v2 = vsub.f32 %v461_v10, %v6289_v49  ;;  %v1614_v25 = vsub.f32 1.0, %v1230_v38  ;;  %v6370_v36 = vpop.f32.mrf.mxu1 }
 0x1c3   : > { %4003 = vmatprep.subr.bf16.mxu1 %v2366_v16  ;;  %v1550_v51 = vand.u32 2147483647, %v1166_v63  ;;  %v1558_v47 = vand.u32 2147483647, %v1174_v41  ;;  %v853_v56 = vsub.f32 %v469_v45, %v6289_v49  ;;  %v789_v48 = vld [vmem:[#allocation6 + $0xbf0] sm:$0xff]  ;;  %v1622_v57 = vsub.f32 1.0, %v1238_v18  ;;  %v6368_v4 = vpop.f32.mrf.mxu0 }
 0x1c4   : > { %v2711_v46 = vsub.f32 1.0, %v2647_v15  ;;  %v1229_v32 = vand.u32 2147483647, %v845_v2  ;;  %v1165_v29 = vsub.f32 %v781_v31, %v6289_v49  ;;  %v1998_v7 = vmax.f32 %v1614_v25, 0.0  ;;  %8068 = vst [vmem:[#allocation50_spill] sm:$0xff] %v6370_v36  ;;  %v2527_v25 = vld [vmem:[#allocation8 + $0x40] sm:$0xff] }
 0x1c5   : > { %4004 = vmatpush1.bf16.msra.mxu1 %v2365_v27  ;;  %v1934_v34 = vsub.f32 1.0, %v1550_v51  ;;  %v1942_v10 = vsub.f32 1.0, %v1558_v47  ;;  %v1237_v61 = vand.u32 2147483647, %v853_v56  ;;  %v2006_v38 = vmax.f32 %v1622_v57, 0.0  ;;  %v6375_v41 = vpop.f32.mrf.mxu0 }
 0x1c6   : > { %v6372_v16 = vmax.f32 %v2711_v46, 0.0  ;;  %v1613_v63 = vsub.f32 1.0, %v1229_v32  ;;  %v1173_v45 = vsub.f32 %v789_v48, %v6289_v49  ;;  %v5312_v15 = vld [vmem:[#allocation5 + $0x60] ss:$12 sps:$4 sm:$0xff]   ;;  %v1549_v27 = vand.u32 2147483647, %v1165_v29 }
 0x1c7   : > { %3764 = vmatmul.mubr.bf16.gmra.mxu1 %v5312_v15  ;;  %v2318_v31 = vmax.f32 %v1934_v34, 0.0  ;;  %v2326_v18 = vmax.f32 %v1942_v10, 0.0  ;;  %v1621_v2 = vsub.f32 1.0, %v1237_v61  ;;  %v2358_v47 = vpack.c.bf16 %v2006_v38, %v1998_v7  ;;  %v5313_v36 = vld [vmem:[#allocation5 + $0x7c] ss:$12 sps:$4 sm:$0xff]   ;;  %v6380_v57 = vpop.f32.mrf.mxu0  ;;  %v2535_v61 = vld [vmem:[#allocation8 + $0x80] sm:$0xff] }
 0x1c8   : > { %8069 = vst [vmem:[#allocation51_spill] sm:$0xff] %v6372_v16  ;;  %v6378_v51 = vmul.f32 %v3267_v17, %v6372_v16  ;;  %v1997_v56 = vmax.f32 %v1613_v63, 0.0  ;;  %v1557_v46 = vand.u32 2147483647, %v1173_v45  ;;  %3773 = vmatprep.mubr.bf16.mxu1 %v5313_v36  ;;  %v5314_v32 = vld [vmem:[#allocation5 + $0x20] ss:$12 sps:$4 sm:$0xff]   ;;  %v374_v29 = vmul.f32 %v6034_v6, %v5662_v30  ;;  %v6387_v17 = vpop.f32.mrf.mxu1 }
 0x1c9   : > { %3887 = vmatmul.mubr.bf16.gmra.mxu0 %v5314_v32  ;;  %v6382_v48 = vpack.c.bf16 %v2326_v18, %v2318_v31  ;;  %v2005_v15 = vmax.f32 %v1621_v2, 0.0  ;;  %v1933_v34 = vsub.f32 1.0, %v1549_v27  ;;  %v446_v10 = vld [vmem:[#allocation6 + $0x138] sm:$0xff]  ;;  %8071 = vst [vmem:[#allocation53_spill] sm:$0xff] %v6387_v17  ;;  %4005 = vmatprep.subr.bf16.mxu1 %v2358_v47  ;;  %v383_v36 = vmul.f32 %v6045_v21, %v5646_v20  ;;  %v445_v31 = vld [vmem:[#allocation6 + $0x130] sm:$0xff]  ;;  %v6396_v18 = vpop.f32.mrf.mxu0  ;;  %v2520_v17 = vld [vmem:[#allocation8 + $0x8] sm:$0xff] }
 0x1ca   : > { %3896 = vmatprep.mubr.bf16.mxu0 %v8036_v22  ;;  %v1941_v7 = vsub.f32 1.0, %v1557_v46  ;;  %v6393_v38 = vadd.f32 %v6119_v26, %v6246_v40  ;;  %v2591_v63 = vsub.f32 %v2527_v25, %v6347_v19  ;;  %v454_v45 = vld [vmem:[#allocation6 + $0x178] sm:$0xff]  ;;  %v453_v30 = vld [vmem:[#allocation6 + $0x170] sm:$0xff]  ;;  %v3271_v47 = vadd.f32 %v6122_v28, %v6258_v50  ;;  %v2528_v21 = vld [vmem:[#allocation8 + $0x48] sm:$0xff] }
 0x1cb   : > { %8070 = vst [vmem:[#allocation52_spill] sm:$0xff] %v6382_v48  ;;  %4150 = vmatprep.subr.bf16.mxu0 %v6382_v48  ;;  %v2357_v2 = vpack.c.bf16 %v2005_v15, %v1997_v56  ;;  %v2317_v27 = vmax.f32 %v1933_v34, 0.0  ;;  %v6403_v20 = vadd.f32 %v6127_v60, %v6271_v11  ;;  %v391_v40 = vadd.f32 %v383_v36, %v374_v29  ;;  %v6406_v32 = vpop.f32.mrf.mxu0  ;;  %v6412_v60 = vpop.f32.mrf.mxu1 }
 0x1cc   : > { %v2325_v26 = vmax.f32 %v1941_v7, 0.0  ;;  %v2655_v46 = vand.u32 2147483647, %v2591_v63  ;;  %v830_v25 = vsub.f32 %v446_v10, %v6267_v0  ;;  %v838_v56 = vsub.f32 %v454_v45, %v6267_v0  ;;  %8072 = vst [vmem:[#allocation54_spill] sm:$0xff] %v6412_v60 }
 0x1cd   : > { %4006 = vmatpush1.bf16.msra.mxu1 %v2357_v2  ;;  %v829_v15 = vsub.f32 %v445_v31, %v6289_v49  ;;  %v837_v50 = vsub.f32 %v453_v30, %v6289_v49  ;;  %v2599_v28 = vsub.f32 %v2535_v61, %v6347_v19  ;;  %v6417_v34 = vadd.f32 %v6342_v1, %v391_v40  ;;  %v6419_v7 = vpop.f32.mrf.mxu0  ;;  %v5315_v30 = vld [vmem:[#allocation5 + $0x78] ss:$12 sps:$4 sm:$0xff]   ;;  %v5316_v40 = vld [vmem:[#allocation5 + $0x94] ss:$12 sps:$4 sm:$0xff]  }
 0x1ce   : > { %v6414_v11 = vpack.c.bf16 %v2325_v26, %v2317_v27  ;;  %v2719_v29 = vsub.f32 1.0, %v2655_v46  ;;  %v1214_v10 = vand.u32 2147483647, %v830_v25  ;;  %v1222_v36 = vand.u32 2147483647, %v838_v56 }
 0x1cf   : > { %v1213_v63 = vand.u32 2147483647, %v829_v15  ;;  %v1221_v45 = vand.u32 2147483647, %v837_v50  ;;  %v3277_v31 = vadd.f32 %v6132_v14, %v6283_v37  ;;  %3774 = vmatmul.mubr.bf16.gmra.mxu1 %v5315_v30  ;;  %v2584_v61 = vsub.f32 %v2520_v17, %v6417_v34  ;;  %v6428_v46 = vpop.f32.mrf.mxu0  ;;  %v2536_v14 = vld [vmem:[#allocation8 + $0x88] sm:$0xff]  ;;  %v6430_v30 = vpop.f32.mrf.mxu1 }
 0x1d0   : > { %8073 = vst [vmem:[#allocation55_spill] sm:$0xff] %v6414_v11  ;;  %4151 = vmatpush1.bf16.msra.mxu0 %v6414_v11  ;;  %v6425_v2 = vmax.f32 %v2719_v29, 0.0  ;;  %v2592_v27 = vsub.f32 %v2528_v21, %v6417_v34  ;;  %v1598_v26 = vsub.f32 1.0, %v1214_v10  ;;  %3783 = vmatprep.mubr.bf16.mxu1 %v5316_v40  ;;  %v1606_v25 = vsub.f32 1.0, %v1222_v36  ;;  %v5317_v37 = vld [vmem:[#allocation5 + $0x38] ss:$12 sps:$4 sm:$0xff]  }
 0x1d1   : > { %v1597_v56 = vsub.f32 1.0, %v1213_v63  ;;  %v1605_v15 = vsub.f32 1.0, %v1221_v45  ;;  %v2663_v50 = vand.u32 2147483647, %v2599_v28  ;;  %3897 = vmatmul.mubr.bf16.gmra.mxu0 %v5317_v37  ;;  %8075 = vst [vmem:[#allocation57_spill] sm:$0xff] %v6430_v30  ;;  %v6434_v21 = vpop.f32.mrf.mxu0  ;;  %v2543_v45 = vld [vmem:[#allocation8 + $0xc0] sm:$0xff]  ;;  %v2600_v30 = vsub.f32 %v2536_v14, %v6417_v34 }
 0x1d2   : > { %8074 = vst [vmem:[#allocation56_spill] sm:$0xff] %v6425_v2  ;;  %v2648_v60 = vand.u32 2147483647, %v2584_v61  ;;  %v4311_v17 = vmul.f32 %v3271_v47, %v6425_v2  ;;  %v2656_v29 = vand.u32 2147483647, %v2592_v27  ;;  %v1982_v1 = vmax.f32 %v1598_v26, 0.0  ;;  %3906 = vmatprep.mubr.bf16.mxu0 %v8036_v22 }
 0x1d3   : > { %v1990_v10 = vmax.f32 %v1606_v25, 0.0  ;;  %v1981_v40 = vmax.f32 %v1597_v56, 0.0  ;;  %v1989_v36 = vmax.f32 %v1605_v15, 0.0  ;;  %v2727_v63 = vsub.f32 1.0, %v2663_v50  ;;  %v430_v61 = vld [vmem:[#allocation6 + $0xb8] sm:$0xff]  ;;  %v6438_v47 = vpop.f32.mrf.mxu0  ;;  %v6444_v56 = vpop.f32.mrf.mxu1 }
 0x1d4   : > { %v2712_v28 = vsub.f32 1.0, %v2648_v60  ;;  %v4367_v6 = vadd.f32 %v4311_v17, %v6378_v51  ;;  %v2720_v37 = vsub.f32 1.0, %v2656_v29  ;;  %v438_v11 = vld [vmem:[#allocation6 + $0xf8] sm:$0xff]  ;;  %8076 = vst [vmem:[#allocation58_spill] sm:$0xff] %v6438_v47  ;;  %v3279_v25 = vadd.f32 %v6137_v55, %v6286_v44  ;;  %8078 = vst [vmem:[#allocation60_spill] sm:$0xff] %v6444_v56 }
 0x1d5   : > { %v2350_v27 = vpack.c.bf16 %v1990_v10, %v1982_v1  ;;  %v2349_v26 = vpack.c.bf16 %v1989_v36, %v1981_v40  ;;  %v6440_v48 = vmax.f32 %v2727_v63, 0.0  ;;  %v2664_v51 = vand.u32 2147483647, %v2600_v30  ;;  %v766_v14 = vld [vmem:[#allocation6 + $0xb38] sm:$0xff]  ;;  %v6451_v17 = vpop.f32.mrf.mxu0 }
 0x1d6   : > { %v6446_v15 = vmax.f32 %v2712_v28, 0.0  ;;  %v6448_v60 = vmax.f32 %v2720_v37, 0.0  ;;  %v2607_v50 = vsub.f32 %v2543_v45, %v6347_v19  ;;  %8081 = vst [vmem:[#allocation63_spill] sm:$0xff] %v6451_v17  ;;  %v3281_v29 = vadd.f32 %v6140_v39, %v6294_v43  ;;  %v774_v10 = vld [vmem:[#allocation6 + $0xb78] sm:$0xff]  ;;  %v429_v45 = vld [vmem:[#allocation6 + $0xb0] sm:$0xff] }
 0x1d7   : > { %8077 = vst [vmem:[#allocation59_spill] sm:$0xff] %v6440_v48  ;;  %4007 = vmatprep.subr.bf16.mxu1 %v2350_v27  ;;  %v4319_v1 = vmul.f32 %v3277_v31, %v6440_v48  ;;  %v814_v55 = vsub.f32 %v430_v61, %v6267_v0  ;;  %v822_v44 = vsub.f32 %v438_v11, %v6267_v0  ;;  %v2728_v36 = vsub.f32 1.0, %v2664_v51  ;;  %v6462_v28 = vpop.f32.mrf.mxu0  ;;  %v437_v61 = vld [vmem:[#allocation6 + $0xf0] sm:$0xff] }
 0x1d8   : > { %8079 = vst [vmem:[#allocation61_spill] sm:$0xff] %v6446_v15  ;;  %8080 = vst [vmem:[#allocation62_spill] sm:$0xff] %v6448_v60  ;;  %v4304_v40 = vmul.f32 %v6393_v38, %v6446_v15  ;;  %v4312_v30 = vmul.f32 %v6403_v20, %v6448_v60  ;;  %4008 = vmatpush1.bf16.msra.mxu1 %v2349_v26  ;;  %v2671_v63 = vand.u32 2147483647, %v2607_v50  ;;  %v5318_v11 = vld [vmem:[#allocation5 + $0x90] ss:$12 sps:$4 sm:$0xff]   ;;  %v6465_v38 = vpop.f32.mrf.mxu1 }
 0x1d9   : > { %8082 = vst [vmem:[#allocation64_spill] sm:$0xff] %v6462_v28  ;;  %v4368_v31 = vadd.f32 %v4367_v6, %v4319_v1  ;;  %v1198_v37 = vand.u32 2147483647, %v814_v55  ;;  %v1206_v39 = vand.u32 2147483647, %v822_v44  ;;  %v1150_v43 = vsub.f32 %v766_v14, %v6267_v0  ;;  %3784 = vmatmul.mubr.bf16.gmra.mxu1 %v5318_v11  ;;  %8083 = vst [vmem:[#allocation65_spill] sm:$0xff] %v6465_v38  ;;  %v6471_v6 = vpop.f32.mrf.mxu0 }
 0x1da   : > { %v5319_v27 = vld [vmem:[#allocation5 + $0x50] ss:$12 sps:$4 sm:$0xff]   ;;  %v4380_v56 = vadd.f32 %v4312_v30, %v4304_v40  ;;  %v6467_v20 = vmax.f32 %v2728_v36, 0.0  ;;  %v2735_v26 = vsub.f32 1.0, %v2671_v63  ;;  %v1158_v51 = vsub.f32 %v774_v10, %v6267_v0  ;;  %v5320_v50 = vld [vmem:[#allocation5 + $0xac] ss:$12 sps:$4 sm:$0xff]  }
 0x1db   : > { %3907 = vmatmul.mubr.bf16.gmra.mxu0 %v5319_v27  ;;  %3793 = vmatprep.mubr.bf16.mxu1 %v5320_v50  ;;  %8085 = vst [vmem:[#allocation67_spill] sm:$0xff] %v6471_v6  ;;  %v1582_v14 = vsub.f32 1.0, %v1198_v37  ;;  %v1590_v1 = vsub.f32 1.0, %v1206_v39  ;;  %v1534_v55 = vand.u32 2147483647, %v1150_v43  ;;  %v813_v44 = vsub.f32 %v429_v45, %v6289_v49  ;;  %v765_v36 = vld [vmem:[#allocation6 + $0xb30] sm:$0xff]  ;;  %v6478_v10 = vpop.f32.mrf.mxu0  ;;  %v6480_v37 = vpop.f32.mrf.mxu1 }
 0x1dc   : > { %8084 = vst [vmem:[#allocation66_spill] sm:$0xff] %v6467_v20  ;;  %3916 = vmatprep.mubr.bf16.mxu0 %v8036_v22  ;;  %v4320_v11 = vmul.f32 %v3279_v25, %v6467_v20  ;;  %v6475_v27 = vmax.f32 %v2735_v26, 0.0  ;;  %v1542_v40 = vand.u32 2147483647, %v1158_v51  ;;  %v821_v30 = vsub.f32 %v437_v61, %v6289_v49  ;;  %8087 = vst [vmem:[#allocation69_spill] sm:$0xff] %v6478_v10  ;;  %v773_v6 = vld [vmem:[#allocation6 + $0xb70] sm:$0xff] }
 0x1dd   : > { %v1966_v63 = vmax.f32 %v1582_v14, 0.0  ;;  %v1974_v50 = vmax.f32 %v1590_v1, 0.0  ;;  %v1918_v38 = vsub.f32 1.0, %v1534_v55  ;;  %v1197_v28 = vand.u32 2147483647, %v813_v44  ;;  %8088 = vst [vmem:[#allocation70_spill] sm:$0xff] %v6480_v37  ;;  %v6485_v51 = vpop.f32.mrf.mxu0 }
 0x1de   : > { %8086 = vst [vmem:[#allocation68_spill] sm:$0xff] %v6475_v27  ;;  %v6482_v39 = vadd.f32 %v4380_v56, %v4320_v11  ;;  %v4327_v45 = vmul.f32 %v3281_v29, %v6475_v27  ;;  %v1926_v25 = vsub.f32 1.0, %v1542_v40  ;;  %v1205_v43 = vand.u32 2147483647, %v821_v30  ;;  %v2544_v26 = vld [vmem:[#allocation8 + $0xc8] sm:$0xff]  ;;  %v2551_v1 = vld [vmem:[#allocation8 + $0x100] sm:$0xff] }
 0x1df   : > { %v2342_v61 = vpack.c.bf16 %v1974_v50, %v1966_v63  ;;  %v2302_v17 = vmax.f32 %v1918_v38, 0.0  ;;  %v1581_v47 = vsub.f32 1.0, %v1197_v28  ;;  %v1149_v14 = vsub.f32 %v765_v36, %v6289_v49  ;;  %v2552_v11 = vld [vmem:[#allocation8 + $0x108] sm:$0xff]  ;;  %v6491_v37 = vpop.f32.mrf.mxu0  ;;  %v6496_v36 = vpop.f32.mrf.mxu1 }
 0x1e0   : > { %v6488_v55 = vadd.f32 %v4368_v31, %v4327_v45  ;;  %v2310_v44 = vmax.f32 %v1926_v25, 0.0  ;;  %v1589_v10 = vsub.f32 1.0, %v1205_v43  ;;  %v1157_v56 = vsub.f32 %v773_v6, %v6289_v49  ;;  %v5321_v38 = vld [vmem:[#allocation5 + $0xa8] ss:$12 sps:$4 sm:$0xff]   ;;  %8089 = vst [vmem:[#allocation71_spill] sm:$0xff] %v6496_v36  ;;  %v414_v45 = vld [vmem:[#allocation6 + $0x38] sm:$0xff] }
 0x1e1   : > { %4009 = vmatprep.subr.bf16.mxu1 %v2342_v61  ;;  %v1965_v29 = vmax.f32 %v1581_v47, 0.0  ;;  %v1533_v40 = vand.u32 2147483647, %v1149_v14  ;;  %v2608_v30 = vsub.f32 %v2544_v26, %v6417_v34  ;;  %v3283_v28 = vadd.f32 %v6145_v53, %v6303_v52  ;;  %3794 = vmatmul.mubr.bf16.gmra.mxu1 %v5321_v38  ;;  %v5322_v25 = vld [vmem:[#allocation5 + $0xc4] ss:$12 sps:$4 sm:$0xff]   ;;  %v6501_v43 = vpop.f32.mrf.mxu0 }
 0x1e2   : > { %v6498_v31 = vpack.c.bf16 %v2310_v44, %v2302_v17  ;;  %v1973_v63 = vmax.f32 %v1589_v10, 0.0  ;;  %v1541_v50 = vand.u32 2147483647, %v1157_v56  ;;  %v2615_v6 = vsub.f32 %v2551_v1, %v6347_v19  ;;  %3803 = vmatprep.mubr.bf16.mxu1 %v5322_v25  ;;  %v5323_v47 = vld [vmem:[#allocation5 + $0x68] ss:$12 sps:$4 sm:$0xff]   ;;  %8090 = vst [vmem:[#allocation72_spill] sm:$0xff] %v6501_v43 }
 0x1e3   : > { %3917 = vmatmul.mubr.bf16.gmra.mxu0 %v5323_v47  ;;  %v1917_v26 = vsub.f32 1.0, %v1533_v40  ;;  %v2672_v61 = vand.u32 2147483647, %v2608_v30  ;;  %v3287_v53 = vadd.f32 %v6150_v42, %v6307_v33  ;;  %v2616_v52 = vsub.f32 %v2552_v11, %v6417_v34  ;;  %v422_v17 = vld [vmem:[#allocation6 + $0x78] sm:$0xff]  ;;  %v413_v14 = vld [vmem:[#allocation6 + $0x30] sm:$0xff]  ;;  %v6510_v40 = vpop.f32.mrf.mxu0  ;;  %v6513_v11 = vpop.f32.mrf.mxu1 }
 0x1e4   : > { %3926 = vmatprep.mubr.bf16.mxu0 %v8036_v22  ;;  %4152 = vmatprep.subr.bf16.mxu0 %v6498_v31  ;;  %v2341_v10 = vpack.c.bf16 %v1973_v63, %v1965_v29  ;;  %v1925_v1 = vsub.f32 1.0, %v1541_v50  ;;  %v2679_v44 = vand.u32 2147483647, %v2615_v6  ;;  %v3289_v56 = vadd.f32 %v6155_v24, %v6315_v9  ;;  %v421_v38 = vld [vmem:[#allocation6 + $0x70] sm:$0xff]  ;;  %8091 = vst [vmem:[#allocation73_spill] sm:$0xff] %v6510_v40 }
 0x1e5   : > { %v2301_v30 = vmax.f32 %v1917_v26, 0.0  ;;  %v2736_v25 = vsub.f32 1.0, %v2672_v61  ;;  %v2680_v42 = vand.u32 2147483647, %v2616_v52  ;;  %v798_v33 = vsub.f32 %v414_v45, %v6267_v0  ;;  %8092 = vst [vmem:[#allocation74_spill] sm:$0xff] %v6513_v11  ;;  %v6517_v50 = vpop.f32.mrf.mxu0  ;;  %v2559_v61 = vld [vmem:[#allocation8 + $0x140] sm:$0xff] }
 0x1e6   : > { %4010 = vmatpush1.bf16.msra.mxu1 %v2341_v10  ;;  %v2309_v47 = vmax.f32 %v1925_v1, 0.0  ;;  %v2743_v36 = vsub.f32 1.0, %v2679_v44  ;;  %v806_v29 = vsub.f32 %v422_v17, %v6267_v0  ;;  %v797_v63 = vsub.f32 %v413_v14, %v6289_v49  ;;  %8093 = vst [vmem:[#allocation75_spill] sm:$0xff] %v6517_v50  ;;  %v5324_v40 = vld [vmem:[#allocation5 + $0xc0] ss:$12 sps:$4 sm:$0xff]  }
 0x1e7   : > { %v6519_v24 = vmax.f32 %v2736_v25, 0.0  ;;  %v2744_v9 = vsub.f32 1.0, %v2680_v42  ;;  %v1182_v6 = vand.u32 2147483647, %v798_v33  ;;  %v805_v26 = vsub.f32 %v421_v38, %v6289_v49  ;;  %v6526_v44 = vpop.f32.mrf.mxu0  ;;  %v6531_v42 = vpop.f32.mrf.mxu1 }
 0x1e8   : > { %v6522_v52 = vpack.c.bf16 %v2309_v47, %v2301_v30  ;;  %v6524_v45 = vmax.f32 %v2743_v36, 0.0  ;;  %v1190_v10 = vand.u32 2147483647, %v806_v29  ;;  %v1181_v1 = vand.u32 2147483647, %v797_v63  ;;  %8096 = vst [vmem:[#allocation78_spill] sm:$0xff] %v6526_v44 }
 0x1e9   : > { %8094 = vst [vmem:[#allocation76_spill] sm:$0xff] %v6519_v24  ;;  %v4328_v17 = vmul.f32 %v3283_v28, %v6519_v24  ;;  %v6529_v14 = vmax.f32 %v2744_v9, 0.0  ;;  %v1566_v11 = vsub.f32 1.0, %v1182_v6  ;;  %v1189_v25 = vand.u32 2147483647, %v805_v26  ;;  %3804 = vmatmul.mubr.bf16.gmra.mxu1 %v5324_v40  ;;  %8098 = vst [vmem:[#allocation80_spill] sm:$0xff] %v6531_v42  ;;  %v6536_v28 = vpop.f32.mrf.mxu0 }
 0x1ea   : > { %8095 = vst [vmem:[#allocation77_spill] sm:$0xff] %v6524_v45  ;;  %4153 = vmatpush1.bf16.msra.mxu0 %v6522_v52  ;;  %v4335_v38 = vmul.f32 %v3287_v53, %v6524_v45  ;;  %v1574_v36 = vsub.f32 1.0, %v1190_v10  ;;  %v1565_v30 = vsub.f32 1.0, %v1181_v1  ;;  %v2623_v33 = vsub.f32 %v2559_v61, %v6347_v19  ;;  %v2560_v47 = vld [vmem:[#allocation8 + $0x148] sm:$0xff]  ;;  %8099 = vst [vmem:[#allocation81_spill] sm:$0xff] %v6536_v28  ;;  %v2567_v26 = vld [vmem:[#allocation8 + $0x180] sm:$0xff] }
 0x1eb   : > { %8097 = vst [vmem:[#allocation79_spill] sm:$0xff] %v6529_v14  ;;  %v5325_v29 = vld [vmem:[#allocation5 + $0xdc] ss:$12 sps:$4 sm:$0xff]   ;;  %v4382_v63 = vadd.f32 %v6482_v39, %v4328_v17  ;;  %v4336_v9 = vmul.f32 %v3289_v56, %v6529_v14  ;;  %v1950_v40 = vmax.f32 %v1566_v11, 0.0  ;;  %v1573_v6 = vsub.f32 1.0, %v1189_v25 }
 0x1ec   : > { %3813 = vmatprep.mubr.bf16.mxu1 %v5325_v29  ;;  %v5326_v42 = vld [vmem:[#allocation5 + $0x80] ss:$12 sps:$4 sm:$0xff]   ;;  %v4370_v53 = vadd.f32 %v6488_v55, %v4335_v38  ;;  %v1958_v10 = vmax.f32 %v1574_v36, 0.0  ;;  %v1949_v1 = vmax.f32 %v1565_v30, 0.0  ;;  %v2687_v44 = vand.u32 2147483647, %v2623_v33  ;;  %v6542_v29 = vpop.f32.mrf.mxu0 }
 0x1ed   : > { %3927 = vmatmul.mubr.bf16.gmra.mxu0 %v5326_v42  ;;  %v654_v61 = vld [vmem:[#allocation6 + $0x7b8] sm:$0xff]  ;;  %8100 = vst [vmem:[#allocation82_spill] sm:$0xff] %v6542_v29  ;;  %v6544_v28 = vadd.f32 %v4382_v63, %v4336_v9  ;;  %v1957_v39 = vmax.f32 %v1573_v6, 0.0  ;;  %v3291_v56 = vadd.f32 %v6159_v58, %v6322_v13  ;;  %v2624_v11 = vsub.f32 %v2560_v47, %v6417_v34  ;;  %v6549_v42 = vpop.f32.mrf.mxu1  ;;  %v653_v63 = vld [vmem:[#allocation6 + $0x7b0] sm:$0xff] }
 0x1ee   : > { %3936 = vmatprep.mubr.bf16.mxu0 %v8036_v22  ;;  %v662_v17 = vld [vmem:[#allocation6 + $0x7f8] sm:$0xff]  ;;  %8101 = vst [vmem:[#allocation83_spill] sm:$0xff] %v6549_v42  ;;  %v2334_v55 = vpack.c.bf16 %v1958_v10, %v1950_v40  ;;  %v2751_v38 = vsub.f32 1.0, %v2687_v44  ;;  %v3293_v36 = vadd.f32 %v6163_v3, %v6327_v5  ;;  %v2631_v30 = vsub.f32 %v2567_v26, %v6347_v19  ;;  %v6554_v9 = vpop.f32.mrf.mxu0  ;;  %v661_v5 = vld [vmem:[#allocation6 + $0x7f0] sm:$0xff] }
 0x1ef   : > { %v750_v25 = vld [vmem:[#allocation6 + $0xab8] sm:$0xff]  ;;  %8102 = vst [vmem:[#allocation84_spill] sm:$0xff] %v6554_v9  ;;  %v2333_v6 = vpack.c.bf16 %v1957_v39, %v1949_v1  ;;  %v2688_v29 = vand.u32 2147483647, %v2624_v11  ;;  %v3297_v58 = vadd.f32 %v6170_v8, %v6336_v23  ;;  %v1038_v13 = vsub.f32 %v654_v61, %v6267_v0  ;;  %v6567_v23 = vpop.f32.mrf.mxu1 }
 0x1f0   : > { %v758_v33 = vld [vmem:[#allocation6 + $0xaf8] sm:$0xff]  ;;  %4011 = vmatprep.subr.bf16.mxu1 %v2334_v55  ;;  %v6559_v47 = vmax.f32 %v2751_v38, 0.0  ;;  %v2695_v44 = vand.u32 2147483647, %v2631_v30  ;;  %v1046_v40 = vsub.f32 %v662_v17, %v6267_v0  ;;  %v1134_v3 = vsub.f32 %v750_v25, %v6267_v0  ;;  %v6563_v26 = vpop.f32.mrf.mxu0  ;;  %8105 = vst [vmem:[#allocation87_spill] sm:$0xff] %v6567_v23 }
 0x1f1   : > { %8104 = vst [vmem:[#allocation86_spill] sm:$0xff] %v6563_v26  ;;  %4012 = vmatpush1.bf16.msra.mxu1 %v2333_v6  ;;  %v2752_v10 = vsub.f32 1.0, %v2688_v29  ;;  %v1422_v1 = vand.u32 2147483647, %v1038_v13  ;;  %v1142_v39 = vsub.f32 %v758_v33, %v6267_v0  ;;  %v1037_v8 = vsub.f32 %v653_v63, %v6289_v49  ;;  %v5327_v17 = vld [vmem:[#allocation5 + $0xd8] ss:$12 sps:$4 sm:$0xff]   ;;  %v6573_v63 = vpop.f32.mrf.mxu1 }
 0x1f2   : > { %8103 = vst [vmem:[#allocation85_spill] sm:$0xff] %v6559_v47  ;;  %v4343_v61 = vmul.f32 %v3291_v56, %v6559_v47  ;;  %v2759_v11 = vsub.f32 1.0, %v2695_v44  ;;  %v1430_v55 = vand.u32 2147483647, %v1046_v40  ;;  %v1518_v38 = vand.u32 2147483647, %v1134_v3  ;;  %3814 = vmatmul.mubr.bf16.gmra.mxu1 %v5327_v17  ;;  %v6575_v13 = vpop.f32.mrf.mxu0 }
 0x1f3   : > { %v6570_v25 = vmax.f32 %v2752_v10, 0.0  ;;  %v1806_v30 = vsub.f32 1.0, %v1422_v1  ;;  %v1526_v42 = vand.u32 2147483647, %v1142_v39  ;;  %v1045_v29 = vsub.f32 %v661_v5, %v6289_v49  ;;  %v5328_v6 = vld [vmem:[#allocation5 + $0xf4] ss:$12 sps:$4 sm:$0xff]   ;;  %v6581_v26 = vpop.f32.mrf.mxu1 }
 0x1f4   : > { %3823 = vmatprep.mubr.bf16.mxu1 %v5328_v6  ;;  %v5329_v33 = vld [vmem:[#allocation5 + $0x98] ss:$12 sps:$4 sm:$0xff]   ;;  %8107 = vst [vmem:[#allocation89_spill] sm:$0xff] %v6573_v63  ;;  %8108 = vst [vmem:[#allocation90_spill] sm:$0xff] %v6575_v13  ;;  %v4371_v56 = vadd.f32 %v4370_v53, %v4343_v61  ;;  %v6577_v44 = vmax.f32 %v2759_v11, 0.0  ;;  %v1814_v40 = vsub.f32 1.0, %v1430_v55 }
 0x1f5   : > { %8106 = vst [vmem:[#allocation88_spill] sm:$0xff] %v6570_v25  ;;  %3937 = vmatmul.mubr.bf16.gmra.mxu0 %v5329_v33  ;;  %v1902_v3 = vsub.f32 1.0, %v1518_v38  ;;  %v749_v17 = vld [vmem:[#allocation6 + $0xab0] sm:$0xff]  ;;  %v4344_v10 = vmul.f32 %v3293_v36, %v6570_v25  ;;  %v2190_v1 = vmax.f32 %v1806_v30, 0.0  ;;  %v1910_v5 = vsub.f32 1.0, %v1526_v42  ;;  %8110 = vst [vmem:[#allocation92_spill] sm:$0xff] %v6581_v26  ;;  %v6583_v33 = vpop.f32.mrf.mxu0 }
 0x1f6   : > { %8109 = vst [vmem:[#allocation91_spill] sm:$0xff] %v6577_v44  ;;  %3946 = vmatprep.mubr.bf16.mxu0 %v8036_v22  ;;  %v1421_v39 = vand.u32 2147483647, %v1037_v8  ;;  %v757_v6 = vld [vmem:[#allocation6 + $0xaf0] sm:$0xff]  ;;  %8111 = vst [vmem:[#allocation93_spill] sm:$0xff] %v6583_v33  ;;  %v4351_v13 = vmul.f32 %v3297_v58, %v6577_v44  ;;  %v2198_v53 = vmax.f32 %v1814_v40, 0.0  ;;  %v1133_v36 = vsub.f32 %v749_v17, %v6289_v49  ;;  %v6590_v8 = vpop.f32.mrf.mxu1 }
 0x1f7   : > { %v2286_v61 = vmax.f32 %v1902_v3, 0.0  ;;  %v1429_v11 = vand.u32 2147483647, %v1045_v29  ;;  %v2568_v55 = vld [vmem:[#allocation8 + $0x188] sm:$0xff]  ;;  %v6587_v38 = vadd.f32 %v6544_v28, %v4344_v10  ;;  %v2294_v9 = vmax.f32 %v1910_v5, 0.0  ;;  %v2575_v42 = vld [vmem:[#allocation8 + $0x1c0] sm:$0xff]  ;;  %v6592_v30 = vpop.f32.mrf.mxu0 }
 0x1f8   : > { %v1805_v43 = vsub.f32 1.0, %v1421_v39  ;;  %8112 = vst [vmem:[#allocation94_spill] sm:$0xff] %v6590_v8  ;;  %8113 = vst [vmem:[#allocation95_spill] sm:$0xff] %v6592_v30  ;;  %v6594_v50 = vadd.f32 %v4371_v56, %v4351_v13  ;;  %v2454_v33 = vpack.c.bf16 %v2198_v53, %v2190_v1  ;;  %v1141_v40 = vsub.f32 %v757_v6, %v6289_v49  ;;  %v2576_v29 = vld [vmem:[#allocation8 + $0x1c8] sm:$0xff]  ;;  %v6600_v39 = vpop.f32.mrf.mxu1  ;;  %v5330_v56 = vld [vmem:[#allocation5 + $0xf0] ss:$12 sps:$4 sm:$0xff]  }
 0x1f9   : > { %v1813_v58 = vsub.f32 1.0, %v1429_v11  ;;  %v6597_v3 = vpack.c.bf16 %v2294_v9, %v2286_v61  ;;  %v1517_v10 = vand.u32 2147483647, %v1133_v36  ;;  %v2632_v5 = vsub.f32 %v2568_v55, %v6417_v34  ;;  %8114 = vst [vmem:[#allocation96_spill] sm:$0xff] %v6600_v39  ;;  %v6602_v17 = vpop.f32.mrf.mxu0  ;;  %v5331_v6 = vld [vmem:[#allocation5 + $0x10c] ss:$12 sps:$4 sm:$0xff]  }
 0x1fa   : > { %v2189_v28 = vmax.f32 %v1805_v43, 0.0  ;;  %8115 = vst [vmem:[#allocation97_spill] sm:$0xff] %v6602_v17  ;;  %4013 = vmatprep.subr.bf16.mxu1 %v2454_v33  ;;  %v1525_v30 = vand.u32 2147483647, %v1141_v40  ;;  %v2639_v13 = vsub.f32 %v2575_v42, %v6347_v19  ;;  %3824 = vmatmul.mubr.bf16.gmra.mxu1 %v5330_v56  ;;  %v2640_v43 = vsub.f32 %v2576_v29, %v6417_v34  ;;  %v6607_v53 = vpop.f32.mrf.mxu1  ;;  %v638_v36 = vld [vmem:[#allocation6 + $0x738] sm:$0xff]  ;;  %v637_v34 = vld [vmem:[#allocation6 + $0x730] sm:$0xff] }
 0x1fb   : > { %v2197_v23 = vmax.f32 %v1813_v58, 0.0  ;;  %4154 = vmatprep.subr.bf16.mxu0 %v6597_v3  ;;  %v1901_v1 = vsub.f32 1.0, %v1517_v10  ;;  %v2696_v9 = vand.u32 2147483647, %v2632_v5  ;;  %3833 = vmatprep.mubr.bf16.mxu1 %v5331_v6  ;;  %8116 = vst [vmem:[#allocation98_spill] sm:$0xff] %v6607_v53  ;;  %v6609_v61 = vpop.f32.mrf.mxu0  ;;  %v646_v58 = vld [vmem:[#allocation6 + $0x778] sm:$0xff]  ;;  %v3299_v10 = vadd.f32 %v6174_v59, %v6339_v62 }
 0x1fc   : > { %8117 = vst [vmem:[#allocation99_spill] sm:$0xff] %v6609_v61  ;;  %v1909_v33 = vsub.f32 1.0, %v1525_v30  ;;  %v2703_v55 = vand.u32 2147483647, %v2639_v13  ;;  %v5332_v19 = vld [vmem:[#allocation5 + $0xb0] ss:$12 sps:$4 sm:$0xff]   ;;  %v6614_v29 = vpop.f32.mrf.mxu1  ;;  %v1022_v62 = vsub.f32 %v638_v36, %v6267_v0 }
 0x1fd   : > { %v2453_v11 = vpack.c.bf16 %v2197_v23, %v2189_v28  ;;  %3947 = vmatmul.mubr.bf16.gmra.mxu0 %v5332_v19  ;;  %v2285_v42 = vmax.f32 %v1901_v1, 0.0  ;;  %v2760_v40 = vsub.f32 1.0, %v2696_v9  ;;  %v2704_v5 = vand.u32 2147483647, %v2640_v43  ;;  %8118 = vst [vmem:[#allocation100_spill] sm:$0xff] %v6614_v29  ;;  %v6616_v56 = vpop.f32.mrf.mxu0  ;;  %v8120_v13 = vld [vmem:[#allocation48_spill] sm:$0xff] }
 0x1fe   : > { %3956 = vmatprep.mubr.bf16.mxu0 %v8036_v22  ;;  %8119 = vst [vmem:[#allocation101_spill] sm:$0xff] %v6616_v56  ;;  %v2293_v23 = vmax.f32 %v1909_v33, 0.0  ;;  %v2767_v30 = vsub.f32 1.0, %v2703_v55  ;;  %v3301_v28 = vadd.f32 %v6178_v35, %v6349_v12  ;;  %v8121_v1 = vld [vmem:[#allocation23_spill] sm:$0xff]  ;;  %v1030_v43 = vsub.f32 %v646_v58, %v6267_v0  ;;  %v645_v19 = vld [vmem:[#allocation6 + $0x770] sm:$0xff]  ;;  %v6626_v17 = vpop.f32.mrf.mxu1 }
 0x1ff   : > { %4014 = vmatpush2.bf16.msra.mxu1 %v2453_v11  ;;  %v3303_v9 = vadd.f32 %v8121_v1, %v8120_v13  ;;  %v6622_v6 = vmax.f32 %v2760_v40, 0.0  ;;  %v2768_v59 = vsub.f32 1.0, %v2704_v5  ;;  %8123 = vst [vmem:[#allocation23_spill] sm:$0xff] %v6626_v17  ;;  %v6628_v56 = vpop.f32.mrf.mxu0  ;;  %v1021_v35 = vsub.f32 %v637_v34, %v6289_v49  ;;  %v5336_v17 = vld [vmem:[#allocation5 + $0xe0] ss:$12 sps:$4 sm:$0xff]  }
 0x200   : > { %8124 = vst [vmem:[#allocation102_spill] sm:$0xff] %v6628_v56  ;;  %v6630_v11 = vpack.c.bf16 %v2293_v23, %v2285_v42  ;;  %v6632_v33 = vmax.f32 %v2767_v30, 0.0  ;;  %v1406_v40 = vand.u32 2147483647, %v1022_v62  ;;  %v1414_v5 = vand.u32 2147483647, %v1030_v43  ;;  %v6638_v36 = vpop.f32.mrf.mxu1 }
 0x201   : > { %8122 = vst [vmem:[#allocation48_spill] sm:$0xff] %v6622_v6  ;;  %v4352_v12 = vmul.f32 %v3299_v10, %v6622_v6  ;;  %v6636_v55 = vmax.f32 %v2768_v59, 0.0  ;;  %8127 = vst [vmem:[#allocation105_spill] sm:$0xff] %v6638_v36  ;;  %v6640_v58 = vpop.f32.mrf.mxu0  ;;  %v1029_v42 = vsub.f32 %v645_v19, %v6289_v49  ;;  %v1405_v23 = vand.u32 2147483647, %v1021_v35  ;;  %v8131_v19 = vld [vmem:[#allocation24_spill] sm:$0xff] }
 0x202   : > { %8125 = vst [vmem:[#allocation103_spill] sm:$0xff] %v6632_v33  ;;  %8128 = vst [vmem:[#allocation106_spill] sm:$0xff] %v6640_v58  ;;  %4155 = vmatpush1.bf16.msra.mxu0 %v6630_v11  ;;  %v4359_v13 = vmul.f32 %v3301_v28, %v6632_v33  ;;  %v5333_v30 = vld [vmem:[#allocation5 + $0x108] ss:$12 sps:$4 sm:$0xff]   ;;  %v1790_v1 = vsub.f32 1.0, %v1406_v40  ;;  %v1798_v59 = vsub.f32 1.0, %v1414_v5  ;;  %v6647_v43 = vpop.f32.mrf.mxu1  ;;  %v3307_v35 = vadd.f32 %v8131_v19, %v6364_v54 }
 0x203   : > { %8126 = vst [vmem:[#allocation104_spill] sm:$0xff] %v6636_v55  ;;  %3834 = vmatmul.mubr.bf16.gmra.mxu1 %v5333_v30  ;;  %v4385_v34 = vadd.f32 %v6587_v38, %v4352_v12  ;;  %v4360_v10 = vmul.f32 %v3303_v9, %v6636_v55  ;;  %v5334_v62 = vld [vmem:[#allocation5 + $0x4] ss:$12 sps:$4 sm:$0xff]   ;;  %8129 = vst [vmem:[#allocation107_spill] sm:$0xff] %v6647_v43  ;;  %v6649_v58 = vpop.f32.mrf.mxu0  ;;  %v1413_v28 = vand.u32 2147483647, %v1029_v42 }
 0x204   : > { %4029 = vmatprep.mubr.bf16.mxu1 %v5334_v62  ;;  %8130 = vst [vmem:[#allocation108_spill] sm:$0xff] %v6649_v58  ;;  %v4373_v56 = vadd.f32 %v6594_v50, %v4359_v13  ;;  %v1789_v61 = vsub.f32 1.0, %v1405_v23  ;;  %v5335_v30 = vld [vmem:[#allocation5 + $0xc8] ss:$12 sps:$4 sm:$0xff]   ;;  %v2174_v12 = vmax.f32 %v1790_v1, 0.0  ;;  %v2182_v9 = vmax.f32 %v1798_v59, 0.0  ;;  %v6655_v62 = vpop.f32.mrf.mxu1 }
 0x205   : > { %3957 = vmatmul.mubr.bf16.gmra.mxu0 %v5335_v30  ;;  %v4386_v38 = vadd.f32 %v4385_v34, %v4360_v10  ;;  %v622_v40 = vld [vmem:[#allocation6 + $0x6b8] sm:$0xff]  ;;  %8132 = vst [vmem:[#allocation24_spill] sm:$0xff] %v6655_v62  ;;  %v6657_v36 = vpop.f32.mrf.mxu0  ;;  %v1797_v50 = vsub.f32 1.0, %v1413_v28  ;;  %v8134_v42 = vld [vmem:[#allocation25_spill] sm:$0xff]  ;;  %v4530_v1 = vmul.f32 %v3307_v35, %v6372_v16  ;;  %v8135_v59 = vld [vmem:[#allocation26_spill] sm:$0xff] }
 0x206   : > { %v630_v5 = vld [vmem:[#allocation6 + $0x6f8] sm:$0xff]  ;;  %3966 = vmatprep.mubr.bf16.mxu0 %v8036_v22  ;;  %8133 = vst [vmem:[#allocation109_spill] sm:$0xff] %v6657_v36  ;;  %v4374_v29 = vrot.slane %v4373_v56, 4  ;;  %v2173_v13 = vmax.f32 %v1789_v61, 0.0  ;;  %v6661_v23 = vadd.f32 %v8134_v42, %v6368_v4  ;;  %v2446_v10 = vpack.c.bf16 %v2182_v9, %v2174_v12  ;;  %v6666_v43 = vpop.f32.mrf.mxu1  ;;  %v621_v9 = vld [vmem:[#allocation6 + $0x6b0] sm:$0xff] }
 0x207   : > { %v734_v54 = vld [vmem:[#allocation6 + $0xa38] sm:$0xff]  ;;  %v4387_v34 = vrot.slane %v4386_v38, 4  ;;  %v3311_v30 = vadd.f32 %v8135_v59, %v6375_v41  ;;  %8136 = vst [vmem:[#allocation25_spill] sm:$0xff] %v6666_v43  ;;  %v6668_v62 = vpop.f32.mrf.mxu0  ;;  %v2181_v28 = vmax.f32 %v1797_v50, 0.0  ;;  %v1006_v61 = vsub.f32 %v622_v40, %v6267_v0  ;;  %v629_v40 = vld [vmem:[#allocation6 + $0x6f0] sm:$0xff] }
 0x208   : > { %v742_v19 = vld [vmem:[#allocation6 + $0xa78] sm:$0xff]  ;;  %8137 = vst [vmem:[#allocation26_spill] sm:$0xff] %v6668_v62  ;;  %v4375_v39 = vadd.f32 %v4374_v29, %v4373_v56  ;;  %v1014_v4 = vsub.f32 %v630_v5, %v6267_v0  ;;  %4015 = vmatprep.subr.bf16.mxu1 %v2446_v10  ;;  %v1118_v12 = vsub.f32 %v734_v54, %v6267_v0  ;;  %v6675_v41 = vpop.f32.mrf.mxu1  ;;  %v8164_v62 = vld [vmem:[#allocation33_spill] sm:$0xff] }
 0x209   : > { %v4388_v42 = vadd.f32 %v4387_v34, %v4386_v38  ;;  %v4538_v58 = vmul.f32 %v3311_v30, %v6425_v2  ;;  %v1126_v35 = vsub.f32 %v742_v19, %v6267_v0  ;;  %8138 = vst [vmem:[#allocation110_spill] sm:$0xff] %v6675_v41  ;;  %v6677_v59 = vpop.f32.mrf.mxu0  ;;  %v2445_v29 = vpack.c.bf16 %v2181_v28, %v2173_v13 }
 0x20a   : > { %8139 = vst [vmem:[#allocation111_spill] sm:$0xff] %v6677_v59  ;;  %v4376_v16 = vrot.slane %v4375_v39, 2  ;;  %v1390_v56 = vand.u32 2147483647, %v1006_v61  ;;  %v1398_v50 = vand.u32 2147483647, %v1014_v4  ;;  %v6681_v10 = vpop.f32.mrf.mxu1  ;;  %v1005_v41 = vsub.f32 %v621_v9, %v6289_v49 }
 0x20b   : > { %v4389_v43 = vrot.slane %v4388_v42, 2  ;;  %v6679_v5 = vadd.f32 %v4538_v58, %v4530_v1  ;;  %v1502_v38 = vand.u32 2147483647, %v1118_v12  ;;  %v1510_v34 = vand.u32 2147483647, %v1126_v35  ;;  %8140 = vst [vmem:[#allocation112_spill] sm:$0xff] %v6681_v10  ;;  %v6683_v54 = vpop.f32.mrf.mxu0  ;;  %4016 = vmatpush2.bf16.msra.mxu1 %v2445_v29 }
 0x20c   : > { %8141 = vst [vmem:[#allocation113_spill] sm:$0xff] %v6683_v54  ;;  %v4377_v19 = vadd.f32 %v4376_v16, %v4375_v39  ;;  %v1774_v30 = vsub.f32 1.0, %v1390_v56  ;;  %v1782_v2 = vsub.f32 1.0, %v1398_v50  ;;  %v1013_v58 = vsub.f32 %v629_v40, %v6289_v49  ;;  %v733_v1 = vld [vmem:[#allocation6 + $0xa30] sm:$0xff]  ;;  %v6688_v4 = vpop.f32.mrf.mxu1 }
 0x20d   : > { %3967 = vmatmul.mubr.bf16.gmra.mxu0 %v5336_v17  ;;  %v4390_v13 = vadd.f32 %v4389_v43, %v4388_v42  ;;  %v1886_v28 = vsub.f32 1.0, %v1502_v38  ;;  %v1894_v61 = vsub.f32 1.0, %v1510_v34  ;;  %8142 = vst [vmem:[#allocation114_spill] sm:$0xff] %v6688_v4  ;;  %v6690_v12 = vpop.f32.mrf.mxu0  ;;  %v1389_v29 = vand.u32 2147483647, %v1005_v41  ;;  %v741_v56 = vld [vmem:[#allocation6 + $0xa70] sm:$0xff] }
 0x20e   : > { %3976 = vmatprep.mubr.bf16.mxu0 %v8036_v22  ;;  %8143 = vst [vmem:[#allocation115_spill] sm:$0xff] %v6690_v12  ;;  %v4378_v16 = vrot.slane %v4377_v19, 1  ;;  %v2158_v39 = vmax.f32 %v1774_v30, 0.0  ;;  %v2166_v35 = vmax.f32 %v1782_v2, 0.0  ;;  %v1397_v43 = vand.u32 2147483647, %v1013_v58  ;;  %v6692_v42 = vpop.f32.mrf.mxu1 }
 0x20f   : > { %v4391_v9 = vrot.slane %v4390_v13, 1  ;;  %v2270_v50 = vmax.f32 %v1886_v28, 0.0  ;;  %v2278_v17 = vmax.f32 %v1894_v61, 0.0  ;;  %8144 = vst [vmem:[#allocation116_spill] sm:$0xff] %v6692_v42  ;;  %v6694_v38 = vpop.f32.mrf.mxu0  ;;  %v1773_v10 = vsub.f32 1.0, %v1389_v29  ;;  %v606_v28 = vld [vmem:[#allocation6 + $0x638] sm:$0xff] }
 0x210   : > { %8145 = vst [vmem:[#allocation117_spill] sm:$0xff] %v6694_v38  ;;  %v6696_v40 = vadd.f32 %v4378_v16, %v4377_v19  ;;  %v2438_v34 = vpack.c.bf16 %v2166_v35, %v2158_v39  ;;  %v1117_v4 = vsub.f32 %v733_v1, %v6289_v49  ;;  %v1781_v2 = vsub.f32 1.0, %v1397_v43  ;;  %v6704_v61 = vpop.f32.mrf.mxu1  ;;  %v8149_v16 = vld [vmem:[#allocation27_spill] sm:$0xff]  ;;  %v8150_v1 = vld [vmem:[#allocation28_spill] sm:$0xff]  ;;  %v717_v38 = vld [vmem:[#allocation6 + $0x9b0] sm:$0xff] }
 0x211   : > { %v6699_v54 = vadd.f32 %v4391_v9, %v4390_v13  ;;  %v6701_v30 = vpack.c.bf16 %v2278_v17, %v2270_v50  ;;  %v1125_v41 = vsub.f32 %v741_v56, %v6289_v49  ;;  %v6706_v58 = vpop.f32.mrf.mxu0  ;;  %v2157_v42 = vmax.f32 %v1773_v10, 0.0  ;;  %v614_v9 = vld [vmem:[#allocation6 + $0x678] sm:$0xff] }
 0x212   : > { %8146 = vst [vmem:[#allocation118_spill] sm:$0xff] %v6696_v40  ;;  %8148 = vst [vmem:[#allocation120_spill] sm:$0xff] %v6706_v58  ;;  %4017 = vmatprep.subr.bf16.mxu1 %v2438_v34  ;;  %v1501_v19 = vand.u32 2147483647, %v1117_v4  ;;  %v3313_v39 = vadd.f32 %v8149_v16, %v6380_v57  ;;  %v3317_v13 = vadd.f32 %v8150_v1, %v6396_v18  ;;  %v2165_v29 = vmax.f32 %v1781_v2, 0.0  ;;  %v6715_v50 = vpop.f32.mrf.mxu1  ;;  %v8152_v4 = vld [vmem:[#allocation29_spill] sm:$0xff] }
 0x213   : > { %8147 = vst [vmem:[#allocation119_spill] sm:$0xff] %v6699_v54  ;;  %4156 = vmatprep.subr.bf16.mxu0 %v6701_v30  ;;  %v1509_v56 = vand.u32 2147483647, %v1125_v41  ;;  %v6717_v17 = vpop.f32.mrf.mxu0  ;;  %v3319_v43 = vadd.f32 %v8152_v4, %v6406_v32  ;;  %v990_v57 = vsub.f32 %v606_v28, %v6267_v0  ;;  %v605_v34 = vld [vmem:[#allocation6 + $0x630] sm:$0xff]  ;;  %v5337_v16 = vld [vmem:[#allocation5 + $0xf8] ss:$12 sps:$4 sm:$0xff]   ;;  %v4531_v1 = vmul.f32 %v6661_v23, %v6446_v15 }
 0x214   : > { %8151 = vst [vmem:[#allocation27_spill] sm:$0xff] %v6717_v17  ;;  %v1885_v10 = vsub.f32 1.0, %v1501_v19  ;;  %v613_v18 = vld [vmem:[#allocation6 + $0x670] sm:$0xff]  ;;  %v2437_v2 = vpack.c.bf16 %v2165_v29, %v2157_v42  ;;  %v6725_v35 = vpop.f32.mrf.mxu1  ;;  %v4539_v32 = vmul.f32 %v3313_v39, %v6448_v60  ;;  %v4546_v28 = vmul.f32 %v3317_v13, %v6440_v48  ;;  %v8156_v13 = vld [vmem:[#allocation31_spill] sm:$0xff] }
 0x215   : > { %3977 = vmatmul.mubr.bf16.gmra.mxu0 %v5337_v16  ;;  %v1893_v41 = vsub.f32 1.0, %v1509_v56  ;;  %v6727_v54 = vpop.f32.mrf.mxu0  ;;  %v998_v4 = vsub.f32 %v614_v9, %v6267_v0  ;;  %v1374_v40 = vand.u32 2147483647, %v990_v57  ;;  %v989_v23 = vsub.f32 %v605_v34, %v6289_v49  ;;  %v8155_v39 = vld [vmem:[#allocation30_spill] sm:$0xff]  ;;  %v574_v12 = vld [vmem:[#allocation6 + $0x538] sm:$0xff] }
 0x216   : > { %3986 = vmatprep.mubr.bf16.mxu0 %v8036_v22  ;;  %8153 = vst [vmem:[#allocation28_spill] sm:$0xff] %v6727_v54  ;;  %v2269_v19 = vmax.f32 %v1885_v10, 0.0  ;;  %4018 = vmatpush2.bf16.msra.mxu1 %v2437_v2  ;;  %v997_v42 = vsub.f32 %v613_v18, %v6289_v49  ;;  %v6734_v29 = vpop.f32.mrf.mxu1  ;;  %v4547_v15 = vmul.f32 %v3319_v43, %v6467_v20  ;;  %v590_v2 = vld [vmem:[#allocation6 + $0x5b8] sm:$0xff] }
 0x217   : > { %v2277_v16 = vmax.f32 %v1893_v41, 0.0  ;;  %v6736_v56 = vpop.f32.mrf.mxu0  ;;  %v1382_v10 = vand.u32 2147483647, %v998_v4  ;;  %v3321_v60 = vadd.f32 %v8155_v39, %v6419_v7  ;;  %v3323_v9 = vadd.f32 %v8156_v13, %v6428_v46  ;;  %v598_v20 = vld [vmem:[#allocation6 + $0x5f8] sm:$0xff] }
 0x218   : > { %8154 = vst [vmem:[#allocation29_spill] sm:$0xff] %v6736_v56  ;;  %v1758_v57 = vsub.f32 1.0, %v1374_v40  ;;  %v1373_v34 = vand.u32 2147483647, %v989_v23  ;;  %v1381_v48 = vand.u32 2147483647, %v997_v42  ;;  %v6745_v18 = vpop.f32.mrf.mxu1  ;;  %v4607_v56 = vadd.f32 %v4539_v32, %v4531_v1 }
 0x219   : > { %v6743_v41 = vpack.c.bf16 %v2277_v16, %v2269_v19  ;;  %v6747_v17 = vpop.f32.mrf.mxu0  ;;  %v6750_v43 = vadd.f32 %v6679_v5, %v4546_v28  ;;  %v1766_v4 = vsub.f32 1.0, %v1382_v10  ;;  %v974_v19 = vsub.f32 %v590_v2, %v6267_v0  ;;  %v718_v40 = vld [vmem:[#allocation6 + $0x9b8] sm:$0xff]  ;;  %v589_v28 = vld [vmem:[#allocation6 + $0x5b0] sm:$0xff] }
 0x21a   : > { %8157 = vst [vmem:[#allocation30_spill] sm:$0xff] %v6747_v17  ;;  %v2142_v7 = vmax.f32 %v1758_v57, 0.0  ;;  %v1757_v46 = vsub.f32 1.0, %v1373_v34  ;;  %v1765_v39 = vsub.f32 1.0, %v1381_v48  ;;  %v726_v16 = vld [vmem:[#allocation6 + $0x9f8] sm:$0xff]  ;;  %v6754_v23 = vpop.f32.mrf.mxu1  ;;  %v6758_v13 = vadd.f32 %v4607_v56, %v4547_v15  ;;  %v597_v17 = vld [vmem:[#allocation6 + $0x5f0] sm:$0xff] }
 0x21b   : > { %4157 = vmatpush1.bf16.msra.mxu0 %v6743_v41  ;;  %v6756_v42 = vpop.f32.mrf.mxu0  ;;  %v2150_v1 = vmax.f32 %v1766_v4, 0.0  ;;  %v4554_v5 = vmul.f32 %v3321_v60, %v6475_v27  ;;  %v6762_v32 = vmul.f32 %v3323_v9, %v6519_v24  ;;  %v5338_v10 = vld [vmem:[#allocation5 + $0x110] ss:$12 sps:$4 sm:$0xff]   ;;  %v982_v2 = vsub.f32 %v598_v20, %v6267_v0  ;;  %v8160_v9 = vld [vmem:[#allocation32_spill] sm:$0xff] }
 0x21c   : > { %8158 = vst [vmem:[#allocation31_spill] sm:$0xff] %v6756_v42  ;;  %v2141_v48 = vmax.f32 %v1757_v46, 0.0  ;;  %v2149_v57 = vmax.f32 %v1765_v39, 0.0  ;;  %v1358_v34 = vand.u32 2147483647, %v974_v19  ;;  %v6766_v15 = vpop.f32.mrf.mxu1  ;;  %v3327_v4 = vadd.f32 %v8160_v9, %v6434_v21  ;;  %v725_v39 = vld [vmem:[#allocation6 + $0x9f0] sm:$0xff] }
 0x21d   : > { %3987 = vmatmul.mubr.bf16.gmra.mxu0 %v5338_v10  ;;  %v6768_v56 = vpop.f32.mrf.mxu0  ;;  %v2430_v60 = vpack.c.bf16 %v2150_v1, %v2142_v7  ;;  %v1102_v24 = vsub.f32 %v718_v40, %v6267_v0  ;;  %v1110_v46 = vsub.f32 %v726_v16, %v6267_v0  ;;  %v1366_v20 = vand.u32 2147483647, %v982_v2 }
 0x21e   : > { %4182 = vmatprep.mubr.bf16.mxu0 %v8036_v22  ;;  %8159 = vst [vmem:[#allocation121_spill] sm:$0xff] %v6768_v56  ;;  %v2429_v10 = vpack.c.bf16 %v2149_v57, %v2141_v48  ;;  %v1742_v19 = vsub.f32 1.0, %v1358_v34  ;;  %v973_v27 = vsub.f32 %v589_v28, %v6289_v49  ;;  %v6775_v42 = vpop.f32.mrf.mxu1  ;;  %v981_v1 = vsub.f32 %v597_v17, %v6289_v49  ;;  %v8163_v17 = vld [vmem:[#allocation58_spill] sm:$0xff] }
 0x21f   : > { %v6777_v54 = vpop.f32.mrf.mxu0  ;;  %4019 = vmatprep.subr.bf16.mxu1 %v2430_v60  ;;  %v1486_v56 = vand.u32 2147483647, %v1102_v24  ;;  %v1494_v7 = vand.u32 2147483647, %v1110_v46  ;;  %v1101_v21 = vsub.f32 %v717_v38, %v6289_v49  ;;  %v1750_v40 = vsub.f32 1.0, %v1366_v20 }
 0x220   : > { %8161 = vst [vmem:[#allocation32_spill] sm:$0xff] %v6777_v54  ;;  %4020 = vmatpush2.bf16.msra.mxu1 %v2429_v10  ;;  %v2126_v16 = vmax.f32 %v1742_v19, 0.0  ;;  %v1357_v9 = vand.u32 2147483647, %v973_v27  ;;  %v1109_v48 = vsub.f32 %v725_v39, %v6289_v49  ;;  %v6782_v57 = vpop.f32.mrf.mxu1  ;;  %v1365_v54 = vand.u32 2147483647, %v981_v1 }
 0x221   : > { %v6784_v28 = vpop.f32.mrf.mxu0  ;;  %v1870_v2 = vsub.f32 1.0, %v1486_v56  ;;  %v1878_v34 = vsub.f32 1.0, %v1494_v7  ;;  %v1485_v60 = vand.u32 2147483647, %v1101_v21  ;;  %v2134_v24 = vmax.f32 %v1750_v40, 0.0  ;;  %v573_v40 = vld [vmem:[#allocation6 + $0x530] sm:$0xff] }
 0x222   : > { %8162 = vst [vmem:[#allocation122_spill] sm:$0xff] %v6784_v28  ;;  %v1741_v46 = vsub.f32 1.0, %v1357_v9  ;;  %v1493_v58 = vand.u32 2147483647, %v1109_v48  ;;  %v3329_v38 = vadd.f32 %v8164_v62, %v8163_v17  ;;  %v6788_v10 = vpop.f32.mrf.mxu1  ;;  %v1749_v19 = vsub.f32 1.0, %v1365_v54  ;;  %v582_v28 = vld [vmem:[#allocation6 + $0x578] sm:$0xff] }
 0x223   : > { %v6790_v20 = vpop.f32.mrf.mxu0  ;;  %v2254_v27 = vmax.f32 %v1870_v2, 0.0  ;;  %v2262_v39 = vmax.f32 %v1878_v34, 0.0  ;;  %v1869_v26 = vsub.f32 1.0, %v1485_v60  ;;  %v4596_v56 = vadd.f32 %v6750_v43, %v4554_v5  ;;  %v581_v9 = vld [vmem:[#allocation6 + $0x570] sm:$0xff] }
 0x224   : > { %v2422_v7 = vpack.c.bf16 %v2134_v24, %v2126_v16  ;;  %v2125_v1 = vmax.f32 %v1741_v46, 0.0  ;;  %v1877_v21 = vsub.f32 1.0, %v1493_v58  ;;  %v6793_v48 = vpop.f32.mrf.mxu1  ;;  %v4562_v17 = vmul.f32 %v3327_v4, %v6524_v45  ;;  %v8166_v4 = vld [vmem:[#allocation63_spill] sm:$0xff]  ;;  %v8167_v46 = vld [vmem:[#allocation34_spill] sm:$0xff] }
 0x225   : > { %v6795_v62 = vpop.f32.mrf.mxu0  ;;  %v6798_v53 = vpack.c.bf16 %v2262_v39, %v2254_v27  ;;  %v2133_v2 = vmax.f32 %v1749_v19, 0.0  ;;  %v2253_v54 = vmax.f32 %v1869_v26, 0.0  ;;  %v4563_v60 = vmul.f32 %v3329_v38, %v6529_v14  ;;  %v558_v19 = vld [vmem:[#allocation6 + $0x4b8] sm:$0xff] }
 0x226   : > { %4021 = vmatprep.subr.bf16.mxu1 %v2422_v7  ;;  %v2261_v34 = vmax.f32 %v1877_v21, 0.0  ;;  %v958_v43 = vsub.f32 %v574_v12, %v6267_v0  ;;  %v966_v58 = vsub.f32 %v582_v28, %v6267_v0  ;;  %v6803_v5 = vpop.f32.mrf.mxu1  ;;  %v3331_v27 = vadd.f32 %v8167_v46, %v8166_v4  ;;  %v566_v21 = vld [vmem:[#allocation6 + $0x4f8] sm:$0xff]  ;;  %v8170_v46 = vld [vmem:[#allocation38_spill] sm:$0xff] }
 0x227   : > { %8165 = vst [vmem:[#allocation58_spill] sm:$0xff] %v6803_v5  ;;  %v6805_v16 = vpop.f32.mrf.mxu0  ;;  %4158 = vmatprep.subr.bf16.mxu0 %v6798_v53  ;;  %v2421_v24 = vpack.c.bf16 %v2133_v2, %v2125_v1  ;;  %v957_v26 = vsub.f32 %v573_v40, %v6289_v49  ;;  %v965_v39 = vsub.f32 %v581_v9, %v6289_v49  ;;  %v8169_v40 = vld [vmem:[#allocation67_spill] sm:$0xff] }
 0x228   : > { %v4609_v12 = vadd.f32 %v6758_v13, %v6762_v32  ;;  %v6814_v38 = vpack.c.bf16 %v2261_v34, %v2253_v54  ;;  %v1342_v28 = vand.u32 2147483647, %v958_v43  ;;  %v1350_v7 = vand.u32 2147483647, %v966_v58  ;;  %v6816_v14 = vpop.f32.mrf.mxu1 }
 0x229   : > { %8168 = vst [vmem:[#allocation33_spill] sm:$0xff] %v6816_v14  ;;  %v6818_v45 = vpop.f32.mrf.mxu0  ;;  %v4597_v1 = vadd.f32 %v4596_v56, %v4562_v17  ;;  %4022 = vmatpush2.bf16.msra.mxu1 %v2421_v24  ;;  %v1341_v2 = vand.u32 2147483647, %v957_v26  ;;  %v1349_v4 = vand.u32 2147483647, %v965_v39  ;;  %v3337_v9 = vadd.f32 %v8170_v46, %v8169_v40  ;;  %v557_v26 = vld [vmem:[#allocation6 + $0x4b0] sm:$0xff] }
 0x22a   : > { %4159 = vmatpush1.bf16.msra.mxu0 %v6814_v38  ;;  %v6823_v36 = vadd.f32 %v4609_v12, %v4563_v60  ;;  %v1726_v13 = vsub.f32 1.0, %v1342_v28  ;;  %v1734_v32 = vsub.f32 1.0, %v1350_v7  ;;  %v942_v54 = vsub.f32 %v558_v19, %v6267_v0  ;;  %v6826_v34 = vpop.f32.mrf.mxu1  ;;  %v565_v39 = vld [vmem:[#allocation6 + $0x4f0] sm:$0xff]  ;;  %v8172_v60 = vld [vmem:[#allocation64_spill] sm:$0xff]  ;;  %v8173_v12 = vld [vmem:[#allocation37_spill] sm:$0xff] }
 0x22b   : > { %8171 = vst [vmem:[#allocation63_spill] sm:$0xff] %v6826_v34  ;;  %v6828_v43 = vpop.f32.mrf.mxu0  ;;  %v4570_v56 = vmul.f32 %v3331_v27, %v6559_v47  ;;  %v1725_v17 = vsub.f32 1.0, %v1341_v2  ;;  %v1733_v58 = vsub.f32 1.0, %v1349_v4  ;;  %v950_v24 = vsub.f32 %v566_v21, %v6267_v0  ;;  %v542_v4 = vld [vmem:[#allocation6 + $0x438] sm:$0xff] }
 0x22c   : > { %v2110_v40 = vmax.f32 %v1726_v13, 0.0  ;;  %v2118_v46 = vmax.f32 %v1734_v32, 0.0  ;;  %v3333_v28 = vadd.f32 %v8173_v12, %v8172_v60  ;;  %v1326_v7 = vand.u32 2147483647, %v942_v54  ;;  %v6834_v63 = vpop.f32.mrf.mxu1  ;;  %v550_v32 = vld [vmem:[#allocation6 + $0x478] sm:$0xff] }
 0x22d   : > { %8174 = vst [vmem:[#allocation34_spill] sm:$0xff] %v6834_v63  ;;  %v6836_v19 = vpop.f32.mrf.mxu0  ;;  %v2109_v59 = vmax.f32 %v1725_v17, 0.0  ;;  %v2117_v8 = vmax.f32 %v1733_v58, 0.0  ;;  %v4578_v27 = vmul.f32 %v3337_v9, %v6577_v44  ;;  %v1334_v2 = vand.u32 2147483647, %v950_v24  ;;  %v8176_v17 = vld [vmem:[#allocation41_spill] sm:$0xff] }
 0x22e   : > { %v2414_v47 = vpack.c.bf16 %v2118_v46, %v2110_v40  ;;  %v1710_v21 = vsub.f32 1.0, %v1326_v7  ;;  %v941_v34 = vsub.f32 %v557_v26, %v6289_v49  ;;  %v949_v13 = vsub.f32 %v565_v39, %v6289_v49  ;;  %v6841_v14 = vpop.f32.mrf.mxu1  ;;  %v702_v9 = vld [vmem:[#allocation6 + $0x938] sm:$0xff] }
 0x22f   : > { %8175 = vst [vmem:[#allocation67_spill] sm:$0xff] %v6841_v14  ;;  %v6843_v54 = vpop.f32.mrf.mxu0  ;;  %v4598_v60 = vadd.f32 %v4597_v1, %v4570_v56  ;;  %v2413_v12 = vpack.c.bf16 %v2117_v8, %v2109_v59  ;;  %v1718_v63 = vsub.f32 1.0, %v1334_v2  ;;  %v3341_v58 = vadd.f32 %v8176_v17, %v6485_v51  ;;  %v710_v59 = vld [vmem:[#allocation6 + $0x978] sm:$0xff]  ;;  %v541_v2 = vld [vmem:[#allocation6 + $0x430] sm:$0xff] }
 0x230   : > { %4023 = vmatprep.subr.bf16.mxu1 %v2414_v47  ;;  %v2094_v24 = vmax.f32 %v1710_v21, 0.0  ;;  %v1325_v40 = vand.u32 2147483647, %v941_v34  ;;  %v1333_v46 = vand.u32 2147483647, %v949_v13  ;;  %v926_v26 = vsub.f32 %v542_v4, %v6267_v0  ;;  %v6852_v1 = vpop.f32.mrf.mxu1 }
 0x231   : > { %v6848_v7 = vpop.f32.mrf.mxu0  ;;  %4024 = vmatpush2.bf16.msra.mxu1 %v2413_v12  ;;  %v4599_v39 = vadd.f32 %v4598_v60, %v4578_v27  ;;  %v2102_v44 = vmax.f32 %v1718_v63, 0.0  ;;  %v4586_v14 = vmul.f32 %v3341_v58, %v6632_v33  ;;  %v934_v8 = vsub.f32 %v550_v32, %v6267_v0  ;;  %8177 = vst [vmem:[#allocation38_spill] sm:$0xff] %v6852_v1  ;;  %v549_v27 = vld [vmem:[#allocation6 + $0x470] sm:$0xff] }
 0x232   : > { %v1709_v51 = vsub.f32 1.0, %v1325_v40  ;;  %v1717_v56 = vsub.f32 1.0, %v1333_v46  ;;  %v1310_v47 = vand.u32 2147483647, %v926_v26  ;;  %v1086_v34 = vsub.f32 %v702_v9, %v6267_v0  ;;  %v6856_v63 = vpop.f32.mrf.mxu1  ;;  %v8179_v46 = vld [vmem:[#allocation69_spill] sm:$0xff]  ;;  %v8180_v26 = vld [vmem:[#allocation40_spill] sm:$0xff] }
 0x233   : > { %v4571_v4 = vmul.f32 %v3333_v28, %v6570_v25  ;;  %v2406_v21 = vpack.c.bf16 %v2102_v44, %v2094_v24  ;;  %v4600_v13 = vadd.f32 %v4599_v39, %v4586_v14  ;;  %v1318_v12 = vand.u32 2147483647, %v934_v8  ;;  %8178 = vst [vmem:[#allocation64_spill] sm:$0xff] %v6856_v63  ;;  %v6858_v60 = vpop.f32.mrf.mxu0  ;;  %v701_v14 = vld [vmem:[#allocation6 + $0x930] sm:$0xff] }
 0x234   : > { %v2093_v32 = vmax.f32 %v1709_v51, 0.0  ;;  %v2101_v17 = vmax.f32 %v1717_v56, 0.0  ;;  %v1694_v58 = vsub.f32 1.0, %v1310_v47  ;;  %v1094_v40 = vsub.f32 %v710_v59, %v6267_v0  ;;  %v709_v28 = vld [vmem:[#allocation6 + $0x970] sm:$0xff]  ;;  %v6864_v24 = vpop.f32.mrf.mxu1 }
 0x235   : > { %4025 = vmatprep.subr.bf16.mxu1 %v2406_v21  ;;  %v3339_v9 = vadd.f32 %v8180_v26, %v8179_v46  ;;  %v1702_v33 = vsub.f32 1.0, %v1318_v12  ;;  %v1470_v1 = vand.u32 2147483647, %v1086_v34  ;;  %v925_v44 = vsub.f32 %v541_v2, %v6289_v49  ;;  %8181 = vst [vmem:[#allocation37_spill] sm:$0xff] %v6864_v24  ;;  %v6866_v39 = vpop.f32.mrf.mxu0 }
 0x236   : > { %v2405_v8 = vpack.c.bf16 %v2101_v17, %v2093_v32  ;;  %v2078_v51 = vmax.f32 %v1694_v58, 0.0  ;;  %v1478_v56 = vand.u32 2147483647, %v1094_v40  ;;  %v933_v47 = vsub.f32 %v549_v27, %v6289_v49  ;;  %v6869_v46 = vpop.f32.mrf.mxu1 }
 0x237   : > { %v4601_v59 = vrot.slane %v4600_v13, 4  ;;  %v2086_v21 = vmax.f32 %v1702_v33, 0.0  ;;  %v1854_v25 = vsub.f32 1.0, %v1470_v1  ;;  %v1309_v63 = vand.u32 2147483647, %v925_v44  ;;  %8182 = vst [vmem:[#allocation41_spill] sm:$0xff] %v6869_v46  ;;  %v6871_v34 = vpop.f32.mrf.mxu0 }
 0x238   : > { %4026 = vmatpush2.bf16.msra.mxu1 %v2405_v8  ;;  %v1862_v2 = vsub.f32 1.0, %v1478_v56  ;;  %v1317_v12 = vand.u32 2147483647, %v933_v47  ;;  %v1085_v26 = vsub.f32 %v701_v14, %v6289_v49  ;;  %v1093_v24 = vsub.f32 %v709_v28, %v6289_v49  ;;  %v6876_v40 = vpop.f32.mrf.mxu1  ;;  %v8183_v28 = vld [vmem:[#allocation42_spill] sm:$0xff] }
 0x239   : > { %v4579_v32 = vmul.f32 %v3339_v9, %v6622_v6  ;;  %v2398_v17 = vpack.c.bf16 %v2086_v21, %v2078_v51  ;;  %v2238_v58 = vmax.f32 %v1854_v25, 0.0  ;;  %v1693_v27 = vsub.f32 1.0, %v1309_v63  ;;  %v6878_v33 = vpop.f32.mrf.mxu0 }
 0x23a   : > { %v2246_v1 = vmax.f32 %v1862_v2, 0.0  ;;  %v1701_v44 = vsub.f32 1.0, %v1317_v12  ;;  %v1469_v46 = vand.u32 2147483647, %v1085_v26  ;;  %v1477_v5 = vand.u32 2147483647, %v1093_v24  ;;  %v6883_v9 = vpop.f32.mrf.mxu1 }
 0x23b   : > { %v4611_v8 = vadd.f32 %v6823_v36, %v4571_v4  ;;  %v4602_v56 = vadd.f32 %v4601_v59, %v4600_v13  ;;  %4027 = vmatprep.subr.bf16.mxu1 %v2398_v17  ;;  %v2077_v14 = vmax.f32 %v1693_v27, 0.0  ;;  %v3343_v47 = vadd.f32 %v8183_v28, %v6491_v37  ;;  %8184 = vst [vmem:[#allocation69_spill] sm:$0xff] %v6883_v9  ;;  %v6885_v25 = vpop.f32.mrf.mxu0  ;;  %v686_v26 = vld [vmem:[#allocation6 + $0x8b8] sm:$0xff]  ;;  %v685_v17 = vld [vmem:[#allocation6 + $0x8b0] sm:$0xff]  ;;  %v8186_v28 = vld [vmem:[#allocation52_spill] sm:$0xff] }
 0x23c   : > { %v6887_v63 = vpack.c.bf16 %v2246_v1, %v2238_v58  ;;  %v2085_v51 = vmax.f32 %v1701_v44, 0.0  ;;  %v1853_v21 = vsub.f32 1.0, %v1469_v46  ;;  %v1861_v2 = vsub.f32 1.0, %v1477_v5  ;;  %v694_v59 = vld [vmem:[#allocation6 + $0x8f8] sm:$0xff]  ;;  %v6893_v27 = vpop.f32.mrf.mxu1  ;;  %v693_v44 = vld [vmem:[#allocation6 + $0x8f0] sm:$0xff] }
 0x23d   : > { %v4612_v12 = vadd.f32 %v4611_v8, %v4579_v32  ;;  %v4587_v24 = vmul.f32 %v3343_v47, %v6636_v55  ;;  %v6890_v36 = vpop.f32.mrf.mxu0  ;;  %8185 = vst [vmem:[#allocation40_spill] sm:$0xff] %v6893_v27  ;;  %v4603_v58 = vrot.slane %v4602_v56, 2  ;;  %v1070_v32 = vsub.f32 %v686_v26, %v6267_v0  ;;  %v8188_v55 = vld [vmem:[#allocation55_spill] sm:$0xff] }
 0x23e   : > { %4160 = vmatprep.subr.bf16.mxu0 %v6887_v63  ;;  %v2397_v4 = vpack.c.bf16 %v2085_v51, %v2077_v14  ;;  %v2237_v13 = vmax.f32 %v1853_v21, 0.0  ;;  %v2245_v37 = vmax.f32 %v1861_v2, 0.0  ;;  %v1078_v14 = vsub.f32 %v694_v59, %v6267_v0  ;;  %v5340_v59 = vld [vmem:[#allocation5 + $0x1c] ss:$12 sps:$4 sm:$0xff]  }
 0x23f   : > { %v4613_v1 = vadd.f32 %v4612_v12, %v4587_v24  ;;  %v6895_v46 = vpop.f32.mrf.mxu0  ;;  %v1069_v47 = vsub.f32 %v685_v17, %v6289_v49  ;;  %v1454_v21 = vand.u32 2147483647, %v1070_v32  ;;  %v1077_v2 = vsub.f32 %v693_v44, %v6289_v49  ;;  %v6907_v12 = vpop.f32.mrf.mxu1 }
 0x240   : > { %4028 = vmatpush2.bf16.msra.mxu1 %v2397_v4  ;;  %v6897_v5 = vpack.c.bf16 %v2245_v37, %v2237_v13  ;;  %8187 = vst [vmem:[#allocation42_spill] sm:$0xff] %v6907_v12  ;;  %v4604_v24 = vadd.f32 %v4603_v58, %v4602_v56  ;;  %v5339_v13 = vld [vmem:[#allocation5] ss:$12 sps:$4 sm:$0xff]   ;;  %v1462_v26 = vand.u32 2147483647, %v1078_v14 }
 0x241   : > { %v4614_v8 = vrot.slane %v4613_v1, 4  ;;  %5154 = vmatprep.subr.bf16.mxu1 %v8186_v28  ;;  %v6903_v51 = vpop.f32.mrf.mxu0  ;;  %v1453_v37 = vand.u32 2147483647, %v1069_v47  ;;  %v1838_v17 = vsub.f32 1.0, %v1454_v21  ;;  %v1461_v6 = vand.u32 2147483647, %v1077_v2 }
 0x242   : > { %4161 = vmatpush1.bf16.msra.mxu0 %v6897_v5  ;;  %v1846_v32 = vsub.f32 1.0, %v1462_v26 }
 0x243   : > { %v4615_v4 = vadd.f32 %v4614_v8, %v4613_v1  ;;  %4030 = vmatmul.mubr.bf16.vlgmr.msra.gmra.mxu1 %v5339_v13  ;;  %v6909_v28 = vpop.f32.mrf.mxu0  ;;  %v1837_v9 = vsub.f32 1.0, %v1453_v37  ;;  %v2222_v56 = vmax.f32 %v1838_v17, 0.0  ;;  %v1845_v58 = vsub.f32 1.0, %v1461_v6  ;;  %v6915_v1 = vpop.f32.mrf.mxu1  ;;  %v678_v37 = vld [vmem:[#allocation6 + $0x878] sm:$0xff]  ;;  %v669_v6 = vld [vmem:[#allocation6 + $0x830] sm:$0xff] }
 0x244   : > { %4039 = vmatprep.mubr.bf16.mxu1 %v5340_v59  ;;  %5162 = vmatpush1.bf16.msra.mxu1 %v8188_v55  ;;  %8189 = vst [vmem:[#allocation52_spill] sm:$0xff] %v6915_v1  ;;  %v4605_v8 = vrot.slane %v4604_v24, 1  ;;  %v2230_v47 = vmax.f32 %v1846_v32, 0.0  ;;  %v670_v55 = vld [vmem:[#allocation6 + $0x838] sm:$0xff] }
 0x245   : > { %v4616_v27 = vrot.slane %v4615_v4, 2  ;;  %5155 = vmatprep.subr.bf16.mxu1 %v6498_v31  ;;  %v6913_v44 = vpop.f32.mrf.mxu0  ;;  %v2221_v13 = vmax.f32 %v1837_v9, 0.0  ;;  %v2229_v21 = vmax.f32 %v1845_v58, 0.0  ;;  %v6923_v17 = vpop.f32.mrf.mxu1  ;;  %v5341_v9 = vld [vmem:[#allocation5 + $0x18] ss:$12 sps:$4 sm:$0xff]  }
 0x246   : > { %v2470_v26 = vpack.c.bf16 %v2230_v47, %v2222_v56  ;;  %8190 = vst [vmem:[#allocation55_spill] sm:$0xff] %v6923_v17  ;;  %v6925_v1 = vadd.f32 %v4605_v8, %v4604_v24  ;;  %v1062_v56 = vsub.f32 %v678_v37, %v6267_v0  ;;  %v1053_v8 = vsub.f32 %v669_v6, %v6289_v49 }
 0x247   : > { %v4617_v14 = vadd.f32 %v4616_v27, %v4615_v4  ;;  %v6917_v59 = vpop.f32.mrf.mxu0  ;;  %v6921_v31 = vpack.c.bf16 %v2229_v21, %v2221_v13  ;;  %v1054_v4 = vsub.f32 %v670_v55, %v6267_v0  ;;  %v6940_v13 = vpop.f32.mrf.mxu1 }
 0x248   : > { %5163 = vmatpush1.bf16.msra.mxu1 %v6522_v52  ;;  %8191 = vst [vmem:[#allocation123_spill] sm:$0xff] %v6925_v1  ;;  %4162 = vmatprep.subr.bf16.mxu0 %v2470_v26  ;;  %v677_v52 = vld [vmem:[#allocation6 + $0x870] sm:$0xff]  ;;  %8193 = vst [vmem:[#allocation125_spill] sm:$0xff] %v6940_v13  ;;  %v1437_v55 = vand.u32 2147483647, %v1053_v8 }
 0x249   : > { %v4618_v2 = vrot.slane %v4617_v14, 1  ;;  %5156 = vmatprep.subr.bf16.mxu1 %v6597_v3  ;;  %v6930_v32 = vpop.f32.mrf.mxu0  ;;  %4163 = vmatpush1.bf16.msra.mxu0 %v6921_v31  ;;  %v5342_v3 = vld [vmem:[#allocation5 + $0x34] ss:$12 sps:$4 sm:$0xff]   ;;  %v1438_v58 = vand.u32 2147483647, %v1054_v4  ;;  %v1061_v47 = vsub.f32 %v677_v52, %v6289_v49 }
 0x24a   : > { %v5343_v49 = vld [vmem:[#allocation5 + $0x30] ss:$12 sps:$4 sm:$0xff]   ;;  %v5344_v8 = vld [vmem:[#allocation5 + $0x4c] ss:$12 sps:$4 sm:$0xff]  }
 0x24b   : > { %v6927_v27 = vadd.f32 %v4618_v2, %v4617_v14  ;;  %4040 = vmatmul.mubr.bf16.gmra.mxu1 %v5341_v9  ;;  %v1446_v14 = vand.u32 2147483647, %v1062_v56  ;;  %v1822_v21 = vsub.f32 1.0, %v1438_v58  ;;  %v6942_v2 = vpop.f32.mrf.mxu0  ;;  %v1445_v37 = vand.u32 2147483647, %v1061_v47  ;;  %v8198_v47 = vld [vmem:[#allocation15_spill] sm:$0xff] }
 0x24c   : > { %4049 = vmatprep.mubr.bf16.mxu1 %v5342_v3  ;;  %5164 = vmatpush1.bf16.msra.mxu1 %v6630_v11  ;;  %v1821_v3 = vsub.f32 1.0, %v1437_v55  ;;  %v6946_v11 = vpop.f32.mrf.mxu1 }
 0x24d   : > { %8192 = vst [vmem:[#allocation124_spill] sm:$0xff] %v6927_v27  ;;  %5157 = vmatprep.subr.bf16.mxu1 %v6701_v30  ;;  %v1830_v0 = vsub.f32 1.0, %v1446_v14  ;;  %v2206_v9 = vmax.f32 %v1822_v21, 0.0  ;;  %v1829_v4 = vsub.f32 1.0, %v1445_v37  ;;  %8194 = vst [vmem:[#allocation126_spill] sm:$0xff] %v6946_v11  ;;  %v6948_v52 = vpop.f32.mrf.mxu0  ;;  %v8199_v21 = vld [vmem:[#allocation21_spill] sm:$0xff] }
 0x24e   : > { %v2205_v30 = vmax.f32 %v1821_v3, 0.0  ;;  %8195 = vst [vmem:[#allocation127_spill] sm:$0xff] %v6948_v52  ;;  %v375_v55 = vmul.f32 %v8199_v21, %v8198_v47  ;;  %v8201_v37 = vld [vmem:[#allocation22_spill] sm:$0xff] }
 0x24f   : > { %v2214_v6 = vmax.f32 %v1830_v0, 0.0  ;;  %v2213_v58 = vmax.f32 %v1829_v4, 0.0  ;;  %v8200_v0 = vld [vmem:[#allocation13_spill] sm:$0xff]  ;;  %v8202_v3 = vld [vmem:[#allocation14_spill] sm:$0xff] }
 0x250   : > { %5165 = vmatpush1.bf16.msra.mxu1 %v6743_v41  ;;  %v6951_v41 = vpop.f32.mrf.mxu1  ;;  %v2561_v27 = vld [vmem:[#allocation8 + $0x150] sm:$0xff] }
 0x251   : > { %5158 = vmatprep.subr.bf16.mxu1 %v6798_v53  ;;  %v2462_v56 = vpack.c.bf16 %v2214_v6, %v2206_v9  ;;  %v2461_v14 = vpack.c.bf16 %v2213_v58, %v2205_v30  ;;  %8196 = vst [vmem:[#allocation128_spill] sm:$0xff] %v6951_v41  ;;  %v6954_v53 = vpop.f32.mrf.mxu0  ;;  %v384_v9 = vmul.f32 %v8201_v37, %v8200_v0  ;;  %v8203_v6 = vld [vmem:[#allocation12_spill] sm:$0xff]  ;;  %v5346_v30 = vld [vmem:[#allocation5 + $0x8] ss:$12 sps:$4 sm:$0xff]   ;;  %v2554_v41 = vld [vmem:[#allocation8 + $0x118] sm:$0xff] }
 0x252   : > { %8197 = vst [vmem:[#allocation129_spill] sm:$0xff] %v6954_v53  ;;  %v385_v4 = vmul.f32 %v8201_v37, %v8203_v6  ;;  %v2538_v37 = vld [vmem:[#allocation8 + $0x98] sm:$0xff] }
 0x253   : > { %4050 = vmatmul.mubr.bf16.gmra.mxu1 %v5343_v49  ;;  %4164 = vmatprep.subr.bf16.mxu0 %v2462_v56  ;;  %v6965_v49 = vpop.f32.mrf.mxu1  ;;  %v6967_v58 = vpop.f32.mrf.mxu0 }
 0x254   : > { %4059 = vmatprep.mubr.bf16.mxu1 %v5344_v8  ;;  %5166 = vmatpush1.bf16.msra.mxu1 %v6814_v38  ;;  %v376_v38 = vmul.f32 %v8199_v21, %v8202_v3  ;;  %8204 = vst [vmem:[#allocation15_spill] sm:$0xff] %v6965_v49  ;;  %8205 = vst [vmem:[#allocation13_spill] sm:$0xff] %v6967_v58  ;;  %v5347_v8 = vld [vmem:[#allocation5 + $0x64] ss:$12 sps:$4 sm:$0xff]   ;;  %v2546_v21 = vld [vmem:[#allocation8 + $0xd8] sm:$0xff] }
 0x255   : > { %5159 = vmatprep.subr.bf16.mxu1 %v6887_v63  ;;  %4165 = vmatpush1.bf16.msra.mxu0 %v2461_v14  ;;  %v5345_v63 = vld [vmem:[#allocation5 + $0x48] ss:$12 sps:$4 sm:$0xff]   ;;  %v6971_v0 = vpop.f32.mrf.mxu1  ;;  %v2562_v58 = vld [vmem:[#allocation8 + $0x158] sm:$0xff] }
 0x256   : > { %v393_v47 = vadd.f32 %v385_v4, %v376_v38  ;;  %8206 = vst [vmem:[#allocation14_spill] sm:$0xff] %v6971_v0  ;;  %v8208_v3 = vld [vmem:[#allocation46_spill] sm:$0xff]  ;;  %v5349_v38 = vld [vmem:[#allocation5 + $0x20] ss:$12 sps:$4 sm:$0xff]   ;;  %v5350_v4 = vld [vmem:[#allocation5 + $0x7c] ss:$12 sps:$4 sm:$0xff]  }
 0x257   : > { %v6981_v24 = vpop.f32.mrf.mxu1  ;;  %v2553_v0 = vld [vmem:[#allocation8 + $0x110] sm:$0xff] }
 0x258   : > { %5167 = vmatpush1.bf16.msra.mxu1 %v6897_v5  ;;  %4183 = vmatmul.mubr.bf16.vlgmr.msra.gmra.mxu0 %v5346_v30  ;;  %v392_v5 = vadd.f32 %v384_v9, %v375_v55  ;;  %v6979_v30 = vadd.f32 %v8208_v3, %v393_v47  ;;  %8209 = vst [vmem:[#allocation130_spill] sm:$0xff] %v6981_v24  ;;  %v5348_v55 = vld [vmem:[#allocation5 + $0x60] ss:$12 sps:$4 sm:$0xff]   ;;  %v2530_v9 = vld [vmem:[#allocation8 + $0x58] sm:$0xff] }
 0x259   : > { %5160 = vmatprep.subr.bf16.mxu1 %v2470_v26  ;;  %4192 = vmatprep.mubr.bf16.mxu0 %v8036_v22  ;;  %v6973_v26 = vpop.f32.mrf.mxu0 }
 0x25a   : > { %8207 = vst [vmem:[#allocation12_spill] sm:$0xff] %v6973_v26  ;;  %v6976_v6 = vadd.f32 %v8208_v3, %v392_v5  ;;  %v2537_v5 = vld [vmem:[#allocation8 + $0x90] sm:$0xff]  ;;  %v2594_v24 = vsub.f32 %v2530_v9, %v6979_v30  ;;  %v5351_v26 = vld [vmem:[#allocation5 + $0x78] ss:$12 sps:$4 sm:$0xff]  }
 0x25b   : > { %4060 = vmatmul.mubr.bf16.gmra.mxu1 %v5345_v63  ;;  %v2521_v63 = vld [vmem:[#allocation8 + $0x10] sm:$0xff] }
 0x25c   : > { %4069 = vmatprep.mubr.bf16.mxu1 %v5347_v8  ;;  %5168 = vmatpush1.bf16.msra.mxu1 %v6921_v31  ;;  %v2529_v8 = vld [vmem:[#allocation8 + $0x50] sm:$0xff]  ;;  %v2522_v31 = vld [vmem:[#allocation8 + $0x18] sm:$0xff]  ;;  %v2601_v49 = vsub.f32 %v2537_v5, %v6976_v6  ;;  %v2617_v9 = vsub.f32 %v2553_v0, %v6976_v6  ;;  %v2618_v5 = vsub.f32 %v2554_v41, %v6979_v30 }
 0x25d   : > { %5161 = vmatprep.subr.bf16.mxu1 %v2462_v56  ;;  %v6983_v56 = vpop.f32.mrf.mxu0  ;;  %v2593_v47 = vsub.f32 %v2529_v8, %v6976_v6  ;;  %v2545_v3 = vld [vmem:[#allocation8 + $0xd0] sm:$0xff]  ;;  %v2610_v8 = vsub.f32 %v2546_v21, %v6979_v30  ;;  %v2625_v21 = vsub.f32 %v2561_v27, %v6976_v6  ;;  %v2626_v27 = vsub.f32 %v2562_v58, %v6979_v30 }
 0x25e   : > { %8210 = vst [vmem:[#allocation131_spill] sm:$0xff] %v6983_v56  ;;  %v5353_v0 = vld [vmem:[#allocation5 + $0x94] ss:$12 sps:$4 sm:$0xff]  }
 0x25f   : > { %v6994_v11 = vpop.f32.mrf.mxu0  ;;  %v2657_v13 = vand.u32 2147483647, %v2593_v47  ;;  %v2674_v47 = vand.u32 2147483647, %v2610_v8  ;;  %v2689_v8 = vand.u32 2147483647, %v2625_v21 }
 0x260   : > { %5169 = vmatpush1.bf16.msra.mxu1 %v2461_v14  ;;  %4193 = vmatmul.mubr.bf16.gmra.mxu0 %v5349_v38  ;;  %v2585_v14 = vsub.f32 %v2521_v63, %v6976_v6  ;;  %8212 = vst [vmem:[#allocation133_spill] sm:$0xff] %v6994_v11  ;;  %v2609_v63 = vsub.f32 %v2545_v3, %v6976_v6  ;;  %v5352_v3 = vld [vmem:[#allocation5 + $0x38] ss:$12 sps:$4 sm:$0xff]   ;;  %v2577_v58 = vld [vmem:[#allocation8 + $0x1d0] sm:$0xff]  ;;  %v2690_v21 = vand.u32 2147483647, %v2626_v27 }
 0x261   : > { %4202 = vmatprep.mubr.bf16.mxu0 %v8036_v22  ;;  %v2738_v52 = vsub.f32 1.0, %v2674_v47  ;;  %v5356_v27 = vld [vmem:[#allocation5 + $0xac] ss:$12 sps:$4 sm:$0xff]  }
 0x263   : > { %4070 = vmatmul.mubr.bf16.gmra.mxu1 %v5348_v55  ;;  %v2586_v55 = vsub.f32 %v2522_v31, %v6979_v30  ;;  %v2649_v31 = vand.u32 2147483647, %v2585_v14  ;;  %v2673_v14 = vand.u32 2147483647, %v2609_v63 }
 0x264   : > { %4079 = vmatprep.mubr.bf16.mxu1 %v5350_v4  ;;  %v6990_v38 = vpop.f32.mrf.mxu1  ;;  %v2602_v4 = vsub.f32 %v2538_v37, %v6979_v30  ;;  %v2665_v37 = vand.u32 2147483647, %v2601_v49  ;;  %v2721_v49 = vsub.f32 1.0, %v2657_v13 }
 0x265   : > { %8211 = vst [vmem:[#allocation132_spill] sm:$0xff] %v6990_v38  ;;  %v2650_v56 = vand.u32 2147483647, %v2586_v55  ;;  %v2658_v38 = vand.u32 2147483647, %v2594_v24  ;;  %v2713_v41 = vsub.f32 1.0, %v2649_v31 }
 0x266   : > { %v6998_v1 = vpop.f32.mrf.mxu1  ;;  %v2666_v11 = vand.u32 2147483647, %v2602_v4  ;;  %v2681_v55 = vand.u32 2147483647, %v2617_v9  ;;  %v2570_v31 = vld [vmem:[#allocation8 + $0x198] sm:$0xff] }
 0x267   : > { %8213 = vst [vmem:[#allocation134_spill] sm:$0xff] %v6998_v1  ;;  %v7005_v1 = vpop.f32.mrf.mxu0  ;;  %v2714_v4 = vsub.f32 1.0, %v2650_v56  ;;  %v7018_v9 = vmax.f32 %v2713_v41, 0.0  ;;  %v7020_v56 = vmax.f32 %v2721_v49, 0.0  ;;  %v2753_v41 = vsub.f32 1.0, %v2689_v8 }
 0x268   : > { %v7002_v17 = vpop.f32.mrf.mxu1  ;;  %4203 = vmatmul.mubr.bf16.gmra.mxu0 %v5352_v3  ;;  %8215 = vst [vmem:[#allocation136_spill] sm:$0xff] %v7005_v1  ;;  %v2682_v3 = vand.u32 2147483647, %v2618_v5  ;;  %v2729_v1 = vsub.f32 1.0, %v2665_v37  ;;  %v2730_v63 = vsub.f32 1.0, %v2666_v11  ;;  %v2634_v49 = vsub.f32 %v2570_v31, %v6979_v30 }
 0x269   : > { %8214 = vst [vmem:[#allocation135_spill] sm:$0xff] %v7002_v17  ;;  %4212 = vmatprep.mubr.bf16.mxu0 %v8036_v22  ;;  %v2722_v17 = vsub.f32 1.0, %v2658_v38  ;;  %v7013_v53 = vpop.f32.mrf.mxu0  ;;  %8219 = vst [vmem:[#allocation140_spill] sm:$0xff] %v7018_v9  ;;  %v2745_v38 = vsub.f32 1.0, %v2681_v55  ;;  %v7022_v5 = vmax.f32 %v2714_v4, 0.0  ;;  %v2578_v55 = vld [vmem:[#allocation8 + $0x1d8] sm:$0xff]  ;;  %v3613_v31 = vadd.f32 %v6790_v20, %v6704_v61 }
 0x26a   : > { %v7008_v24 = vpop.f32.mrf.mxu1  ;;  %8220 = vst [vmem:[#allocation141_spill] sm:$0xff] %v7020_v56  ;;  %v2746_v11 = vsub.f32 1.0, %v2682_v3  ;;  %v7030_v47 = vmax.f32 %v2730_v63, 0.0  ;;  %v7037_v3 = vmax.f32 %v2738_v52, 0.0  ;;  %v2641_v63 = vsub.f32 %v2577_v58, %v6976_v6 }
 0x26b   : > { %4080 = vmatmul.mubr.bf16.gmra.mxu1 %v5351_v26  ;;  %8216 = vst [vmem:[#allocation137_spill] sm:$0xff] %v7008_v24  ;;  %v2569_v26 = vld [vmem:[#allocation8 + $0x190] sm:$0xff]  ;;  %8221 = vst [vmem:[#allocation142_spill] sm:$0xff] %v7022_v5  ;;  %v7024_v37 = vmax.f32 %v2722_v17, 0.0  ;;  %v7033_v4 = vpop.f32.mrf.mxu0  ;;  %v7043_v8 = vmax.f32 %v2745_v38, 0.0  ;;  %v3617_v52 = vadd.f32 %v6805_v16, %v6725_v35  ;;  %v3619_v58 = vadd.f32 %v6818_v45, %v6734_v29 }
 0x26c   : > { %4089 = vmatprep.mubr.bf16.mxu1 %v5353_v0  ;;  %v7011_v12 = vpop.f32.mrf.mxu1  ;;  %v2737_v0 = vsub.f32 1.0, %v2673_v14  ;;  %v2633_v24 = vsub.f32 %v2569_v26, %v6976_v6  ;;  %v7028_v14 = vmax.f32 %v2729_v1, 0.0  ;;  %8224 = vst [vmem:[#allocation145_spill] sm:$0xff] %v7030_v47  ;;  %v5354_v26 = vld [vmem:[#allocation5 + $0x90] ss:$12 sps:$4 sm:$0xff]   ;;  %8226 = vst [vmem:[#allocation147_spill] sm:$0xff] %v7037_v3  ;;  %v2642_v6 = vsub.f32 %v2578_v55, %v6979_v30 }
 0x26d   : > { %8217 = vst [vmem:[#allocation138_spill] sm:$0xff] %v7011_v12  ;;  %8222 = vst [vmem:[#allocation143_spill] sm:$0xff] %v7024_v37  ;;  %v7058_v38 = vmax.f32 %v2753_v41, 0.0  ;;  %v4540_v61 = vmul.f32 %v3617_v52, %v7020_v56  ;;  %v7063_v20 = vpop.f32.mrf.mxu0  ;;  %v4532_v16 = vmul.f32 %v3613_v31, %v7018_v9  ;;  %v4541_v30 = vmul.f32 %v3619_v58, %v7024_v37 }
 0x26e   : > { %v7016_v13 = vpop.f32.mrf.mxu1  ;;  %8223 = vst [vmem:[#allocation144_spill] sm:$0xff] %v7028_v14  ;;  %v7035_v17 = vmax.f32 %v2737_v0, 0.0  ;;  %v2697_v1 = vand.u32 2147483647, %v2633_v24  ;;  %8228 = vst [vmem:[#allocation149_spill] sm:$0xff] %v7043_v8  ;;  %v3615_v0 = vadd.f32 %v6795_v62, %v6715_v50  ;;  %v2754_v24 = vsub.f32 1.0, %v2690_v21 }
 0x26f   : > { %8218 = vst [vmem:[#allocation139_spill] sm:$0xff] %v7016_v13  ;;  %v5355_v13 = vld [vmem:[#allocation5 + $0x50] ss:$12 sps:$4 sm:$0xff]   ;;  %8230 = vst [vmem:[#allocation151_spill] sm:$0xff] %v7058_v38  ;;  %v3623_v50 = vadd.f32 %v6828_v43, %v6745_v18  ;;  %v2705_v62 = vand.u32 2147483647, %v2641_v63  ;;  %v3625_v21 = vadd.f32 %v6836_v19, %v6754_v23  ;;  %v3627_v18 = vadd.f32 %v6843_v54, %v6766_v15  ;;  %v7083_v15 = vpop.f32.mrf.mxu0 }
 0x270   : > { %v7026_v12 = vpop.f32.mrf.mxu1  ;;  %4213 = vmatmul.mubr.bf16.gmra.mxu0 %v5355_v13  ;;  %8225 = vst [vmem:[#allocation146_spill] sm:$0xff] %v7035_v17  ;;  %v7051_v13 = vmax.f32 %v2746_v11, 0.0  ;;  %v2761_v35 = vsub.f32 1.0, %v2697_v1  ;;  %v4533_v45 = vmul.f32 %v3615_v0, %v7022_v5  ;;  %v7075_v43 = vmax.f32 %v2754_v24, 0.0  ;;  %v5357_v63 = vld [vmem:[#allocation5 + $0xa8] ss:$12 sps:$4 sm:$0xff]  }
 0x271   : > { %4222 = vmatprep.mubr.bf16.mxu0 %v8036_v22  ;;  %v4548_v29 = vmul.f32 %v3623_v50, %v7028_v14  ;;  %v2706_v41 = vand.u32 2147483647, %v2642_v6  ;;  %v3629_v55 = vadd.f32 %v6848_v7, %v6775_v42  ;;  %v5358_v0 = vld [vmem:[#allocation5 + $0x68] ss:$12 sps:$4 sm:$0xff]   ;;  %v4549_v23 = vmul.f32 %v3625_v21, %v7030_v47  ;;  %v5359_v24 = vld [vmem:[#allocation5 + $0xc4] ss:$12 sps:$4 sm:$0xff]  }
 0x272   : > { %8229 = vst [vmem:[#allocation150_spill] sm:$0xff] %v7051_v13  ;;  %8231 = vst [vmem:[#allocation152_spill] sm:$0xff] %v7075_v43  ;;  %v4633_v52 = vadd.f32 %v4541_v30, %v4533_v45  ;;  %v4556_v19 = vmul.f32 %v3627_v18, %v7035_v17  ;;  %v2769_v54 = vsub.f32 1.0, %v2705_v62  ;;  %v7091_v58 = vmax.f32 %v2761_v35, 0.0 }
 0x273   : > { %4090 = vmatmul.mubr.bf16.gmra.mxu1 %v5354_v26  ;;  %v7041_v26 = vpop.f32.mrf.mxu1  ;;  %v4557_v7 = vmul.f32 %v3629_v55, %v7037_v3  ;;  %v3635_v50 = vadd.f32 %v6866_v39, %v6788_v10  ;;  %v3637_v62 = vadd.f32 %v6871_v34, %v6793_v48 }
 0x274   : > { %4099 = vmatprep.mubr.bf16.mxu1 %v5356_v27  ;;  %8227 = vst [vmem:[#allocation148_spill] sm:$0xff] %v7041_v26  ;;  %v2698_v26 = vand.u32 2147483647, %v2634_v49  ;;  %v4620_v49 = vadd.f32 %v4540_v61, %v4532_v16  ;;  %8232 = vst [vmem:[#allocation153_spill] sm:$0xff] %v7091_v58  ;;  %v4634_v61 = vadd.f32 %v4633_v52, %v4549_v23  ;;  %v2770_v16 = vsub.f32 1.0, %v2706_v41  ;;  %v8237_v52 = vld [vmem:[#allocation63_spill] sm:$0xff] }
 0x275   : > { %v4572_v35 = vmul.f32 %v3637_v62, %v7058_v38  ;;  %v7110_v34 = vmax.f32 %v2769_v54, 0.0  ;;  %v3645_v23 = vadd.f32 %v6890_v36, %v8237_v52 }
 0x276   : > { %v2762_v31 = vsub.f32 1.0, %v2698_v26  ;;  %v4621_v42 = vadd.f32 %v4620_v49, %v4548_v29  ;;  %v3633_v26 = vadd.f32 %v6858_v60, %v6782_v57  ;;  %v8233_v29 = vld [vmem:[#allocation58_spill] sm:$0xff]  ;;  %v4635_v57 = vadd.f32 %v4634_v61, %v4557_v7  ;;  %v8234_v49 = vld [vmem:[#allocation33_spill] sm:$0xff] }
 0x277   : > { %v7056_v27 = vpop.f32.mrf.mxu1  ;;  %v3639_v21 = vadd.f32 %v6878_v33, %v8233_v29  ;;  %v4565_v60 = vmul.f32 %v3635_v50, %v7051_v13  ;;  %v3643_v10 = vadd.f32 %v6885_v25, %v8234_v49  ;;  %8236 = vst [vmem:[#allocation33_spill] sm:$0xff] %v7110_v34  ;;  %v5360_v61 = vld [vmem:[#allocation5 + $0xc0] ss:$12 sps:$4 sm:$0xff]  }
 0x278   : > { %4223 = vmatmul.mubr.bf16.gmra.mxu0 %v5358_v0  ;;  %v4622_v30 = vadd.f32 %v4621_v42, %v4556_v19  ;;  %v4564_v45 = vmul.f32 %v3633_v26, %v7043_v8  ;;  %v7108_v48 = vmax.f32 %v2762_v31, 0.0  ;;  %v8238_v19 = vld [vmem:[#allocation34_spill] sm:$0xff]  ;;  %v7122_v31 = vmax.f32 %v2770_v16, 0.0  ;;  %v8240_v42 = vld [vmem:[#allocation67_spill] sm:$0xff]  ;;  %v5361_v50 = vld [vmem:[#allocation5 + $0x80] ss:$12 sps:$4 sm:$0xff]  }
 0x279   : > { %v7067_v11 = vpop.f32.mrf.mxu1  ;;  %4232 = vmatprep.mubr.bf16.mxu0 %v8036_v22  ;;  %v4573_v55 = vmul.f32 %v3639_v21, %v7075_v43  ;;  %v4580_v0 = vmul.f32 %v3643_v10, %v7091_v58  ;;  %v3647_v25 = vadd.f32 %v6895_v46, %v8238_v19  ;;  %v3649_v7 = vadd.f32 %v6903_v51, %v8240_v42  ;;  %v8243_v10 = vld [vmem:[#allocation37_spill] sm:$0xff] }
 0x27a   : > { %8235 = vst [vmem:[#allocation58_spill] sm:$0xff] %v7108_v48  ;;  %v4623_v41 = vadd.f32 %v4622_v30, %v4564_v45  ;;  %8239 = vst [vmem:[#allocation63_spill] sm:$0xff] %v7122_v31  ;;  %v4581_v36 = vmul.f32 %v3645_v23, %v7108_v48  ;;  %v5362_v45 = vld [vmem:[#allocation5 + $0xdc] ss:$12 sps:$4 sm:$0xff]  }
 0x27b   : > { %v7079_v1 = vpop.f32.mrf.mxu1  ;;  %4100 = vmatmul.mubr.bf16.gmra.mxu1 %v5357_v63  ;;  %v4636_v63 = vadd.f32 %v4635_v57, %v4565_v60  ;;  %v4588_v30 = vmul.f32 %v3647_v25, %v7110_v34  ;;  %v4589_v51 = vmul.f32 %v3649_v7, %v7122_v31  ;;  %v8241_v57 = vld [vmem:[#allocation38_spill] sm:$0xff] }
 0x27c   : > { %4109 = vmatprep.mubr.bf16.mxu1 %v5359_v24  ;;  %v4624_v54 = vadd.f32 %v4623_v41, %v4572_v35  ;;  %v3653_v60 = vadd.f32 %v6909_v28, %v8241_v57  ;;  %v8242_v35 = vld [vmem:[#allocation64_spill] sm:$0xff]  ;;  %v3657_v41 = vadd.f32 %v6917_v59, %v8243_v10 }
 0x27d   : > { %v7089_v6 = vpop.f32.mrf.mxu1  ;;  %v4637_v62 = vadd.f32 %v4636_v63, %v4573_v55  ;;  %v3655_v49 = vadd.f32 %v6913_v44, %v8242_v35  ;;  %v5508_v63 = vmov 1966171168   ;;  %v8248_v57 = vld [vmem:[#allocation40_spill] sm:$0xff] }
 0x27e   : > { %v4625_v16 = vadd.f32 %v4624_v54, %v4580_v0  ;;  %v4484_v52 = vunpack.c.l.s4 %v5508_v63  ;;  %v8244_v0 = vld [vmem:[#allocation41_spill] sm:$0xff]  ;;  %v8245_v54 = vlaneseq  ;;  %v4760_v28 = vmul.f32 %v3653_v60, %v7018_v9 }
 0x27f   : > { %v7100_v18 = vpop.f32.mrf.mxu1  ;;  %v4638_v21 = vadd.f32 %v4637_v62, %v4581_v36  ;;  %v3659_v19 = vadd.f32 %v6930_v32, %v8244_v0  ;;  %v4768_v44 = vmul.f32 %v3657_v41, %v7020_v56  ;;  %v3663_v36 = vadd.f32 %v6942_v2, %v6876_v40  ;;  %v8249_v60 = vld [vmem:[#allocation129_spill] sm:$0xff]  ;;  %v5363_v40 = vld [vmem:[#allocation5 + $0xd8] ss:$12 sps:$4 sm:$0xff]  }
 0x280   : > { %4233 = vmatmul.mubr.bf16.gmra.mxu0 %v5361_v50  ;;  %v4626_v23 = vadd.f32 %v4625_v16, %v4588_v30  ;;  %v4487_v42 = vshrl.u32 %v8245_v54, 7  ;;  %v4761_v50 = vmul.f32 %v3655_v49, %v7022_v5  ;;  %v8246_v16 = vld [vmem:[#allocation69_spill] sm:$0xff]  ;;  %v3667_v35 = vadd.f32 %v8249_v60, %v8248_v57  ;;  %v5364_v2 = vld [vmem:[#allocation5 + $0x98] ss:$12 sps:$4 sm:$0xff]  }
 0x281   : > { %v7106_v39 = vpop.f32.mrf.mxu0  ;;  %v7113_v33 = vpop.f32.mrf.mxu1  ;;  %4242 = vmatprep.mubr.bf16.mxu0 %v8036_v22  ;;  %v4639_v7 = vadd.f32 %v4638_v21, %v4589_v51  ;;  %v4769_v62 = vmul.f32 %v3659_v19, %v7024_v37  ;;  %v8247_v51 = vld [vmem:[#allocation127_spill] sm:$0xff]  ;;  %v4485_v41 = vunpack.c.0.s8 %v4484_v52  ;;  %v4776_v0 = vmul.f32 %v3663_v36, %v7028_v14 }
 0x282   : > { %v4627_v59 = vrot.slane %v4626_v23, 4  ;;  %v3665_v21 = vadd.f32 %v8247_v51, %v8246_v16  ;;  %v5365_v51 = vld [vmem:[#allocation5 + $0xf4] ss:$12 sps:$4 sm:$0xff]  }
 0x283   : > { %v7120_v24 = vpop.f32.mrf.mxu0  ;;  %v7126_v26 = vpop.f32.mrf.mxu1  ;;  %4110 = vmatmul.mubr.bf16.gmra.mxu1 %v5360_v61  ;;  %v4640_v30 = vrot.slane %v4639_v7, 4  ;;  %v4861_v49 = vadd.f32 %v4769_v62, %v4761_v50  ;;  %v8251_v50 = vld [vmem:[#allocation13_spill] sm:$0xff] }
 0x284   : > { %4119 = vmatprep.mubr.bf16.mxu1 %v5362_v45  ;;  %v4848_v45 = vadd.f32 %v4768_v44, %v4760_v28  ;;  %v4628_v63 = vadd.f32 %v4627_v59, %v4626_v23  ;;  %v4777_v28 = vmul.f32 %v3665_v21, %v7030_v47  ;;  %v4784_v44 = vmul.f32 %v3667_v35, %v7035_v17  ;;  %v8250_v59 = vld [vmem:[#allocation42_spill] sm:$0xff]  ;;  %v8255_v35 = vld [vmem:[#allocation131_spill] sm:$0xff] }
 0x285   : > { %v7130_v46 = vpop.f32.mrf.mxu0  ;;  %v7134_v29 = vpop.f32.mrf.mxu1  ;;  %v4641_v54 = vadd.f32 %v4640_v30, %v4639_v7  ;;  %v3669_v62 = vadd.f32 %v8251_v50, %v8250_v59  ;;  %v8252_v7 = vld [vmem:[#allocation52_spill] sm:$0xff] }
 0x286   : > { %v4629_v52 = vrot.slane %v4628_v63, 2  ;;  %v4849_v23 = vadd.f32 %v4848_v45, %v4776_v0  ;;  %v4862_v60 = vadd.f32 %v4861_v49, %v4777_v28  ;;  %v8253_v30 = vld [vmem:[#allocation12_spill] sm:$0xff]  ;;  %v8257_v28 = vld [vmem:[#allocation125_spill] sm:$0xff] }
 0x287   : > { %v7142_v55 = vpop.f32.mrf.mxu0  ;;  %v7146_v25 = vpop.f32.mrf.mxu1  ;;  %v4642_v57 = vrot.slane %v4641_v54, 2  ;;  %v3673_v21 = vadd.f32 %v8253_v30, %v8252_v7  ;;  %v4785_v45 = vmul.f32 %v3669_v62, %v7037_v3  ;;  %v8258_v7 = vld [vmem:[#allocation133_spill] sm:$0xff] }
 0x288   : > { %4243 = vmatmul.mubr.bf16.gmra.mxu0 %v5364_v2  ;;  %v4630_v14 = vadd.f32 %v4629_v52, %v4628_v63  ;;  %v4850_v9 = vadd.f32 %v4849_v23, %v4784_v44  ;;  %v3677_v30 = vadd.f32 %v8258_v7, %v8257_v28  ;;  %v8263_v44 = vld [vmem:[#allocation126_spill] sm:$0xff]  ;;  %v8264_v52 = vld [vmem:[#allocation136_spill] sm:$0xff] }
 0x289   : > { %v7151_v61 = vpop.f32.mrf.mxu0  ;;  %v7157_v32 = vpop.f32.mrf.mxu1  ;;  %4252 = vmatprep.mubr.bf16.mxu0 %v8036_v22  ;;  %v4643_v59 = vadd.f32 %v4642_v57, %v4641_v54  ;;  %v4792_v50 = vmul.f32 %v3673_v21, %v7043_v8  ;;  %v4863_v63 = vadd.f32 %v4862_v60, %v4785_v45  ;;  %v3679_v23 = vadd.f32 %v8264_v52, %v8263_v44  ;;  %v8265_v28 = vld [vmem:[#allocation128_spill] sm:$0xff]  ;;  %v5366_v52 = vld [vmem:[#allocation5 + $0xf0] ss:$12 sps:$4 sm:$0xff]  }
 0x28a   : > { %v3683_v7 = vadd.f32 %v7013_v53, %v8265_v28  ;;  %v5368_v53 = vld [vmem:[#allocation5 + $0x10c] ss:$12 sps:$4 sm:$0xff]  }
 0x28b   : > { %v7163_v10 = vpop.f32.mrf.mxu0  ;;  %v7166_v19 = vpop.f32.mrf.mxu1  ;;  %4120 = vmatmul.mubr.bf16.gmra.mxu1 %v5363_v40  ;;  %v8254_v40 = vld [vmem:[#allocation55_spill] sm:$0xff]  ;;  %v4644_v57 = vrot.slane %v4643_v59, 1  ;;  %v4851_v21 = vadd.f32 %v4850_v9, %v4792_v50 }
 0x28c   : > { %4129 = vmatprep.mubr.bf16.mxu1 %v5365_v51  ;;  %v3675_v2 = vadd.f32 %v8255_v35, %v8254_v40  ;;  %v7183_v51 = vsub.s32 %v4485_v41, %v4487_v42  ;;  %v8259_v40 = vld [vmem:[#allocation123_spill] sm:$0xff]  ;;  %v8260_v35 = vld [vmem:[#allocation124_spill] sm:$0xff]  ;;  %v4631_v41 = vrot.slane %v4630_v14, 1 }
 0x28d   : > { %v7170_v16 = vpop.f32.mrf.mxu0  ;;  %v7175_v36 = vpop.f32.mrf.mxu1  ;;  %v8261_v56 = vcombine.low %v8259_v40, %v8260_v35  ;;  %v8266_v35 = vld [vmem:[#allocation15_spill] sm:$0xff]  ;;  %v4645_v9 = vadd.f32 %v4644_v57, %v4643_v59  ;;  %v8268_v59 = vld [vmem:[#allocation130_spill] sm:$0xff] }
 0x28e   : > { %8256 = vst [vmem:[#allocation34_spill] sm:$0xff] %v7183_v51  ;;  %v4793_v49 = vmul.f32 %v3675_v2, %v7051_v13  ;;  %v4800_v2 = vmul.f32 %v3677_v30, %v7058_v38  ;;  %v4632_v8 = vadd.f32 %v4631_v41, %v4630_v14  ;;  %v3685_v60 = vadd.f32 %v7033_v4, %v8266_v35  ;;  %v5367_v13 = vld [vmem:[#allocation5 + $0xb0] ss:$12 sps:$4 sm:$0xff]  }
 0x28f   : > { %v7181_v17 = vpop.f32.mrf.mxu0  ;;  %v7186_v0 = vpop.f32.mrf.mxu1  ;;  %v7196_v42 = vrot.slane %v8261_v56, %v7183_v51  ;;  %v4801_v56 = vmul.f32 %v3679_v23, %v7075_v43  ;;  %v4808_v30 = vmul.f32 %v3683_v7, %v7091_v58  ;;  %v8267_v4 = vld [vmem:[#allocation14_spill] sm:$0xff]  ;;  %v3689_v57 = vadd.f32 %v7083_v15, %v8268_v59 }
 0x290   : > { %v4864_v40 = vadd.f32 %v4863_v63, %v4793_v49  ;;  %4253 = vmatmul.mubr.bf16.gmra.mxu0 %v5367_v13  ;;  %v4852_v50 = vadd.f32 %v4851_v21, %v4800_v2  ;;  %v4809_v49 = vmul.f32 %v3685_v60, %v7108_v48  ;;  %v3687_v41 = vadd.f32 %v7063_v20, %v8267_v4  ;;  %v8269_v21 = vld [vmem:[#allocation19_spill] sm:$0xff]  ;;  %v8270_v2 = vld [vmem:[#allocation21_spill] sm:$0xff]  ;;  %v8272_v60 = vld [vmem:[#allocation22_spill] sm:$0xff] }
 0x291   : > { %8262 = vst [vmem:[#allocation67_spill] sm:$0xff] %v7196_v42  ;;  %v7200_v62 = vpop.f32.mrf.mxu1  ;;  %v7202_v54 = vpop.f32.mrf.mxu0  ;;  %4262 = vmatprep.mubr.bf16.mxu0 %v8036_v22  ;;  %v4707_v28 = vcombine.low %v4632_v8, %v4645_v9  ;;  %v377_v7 = vmul.f32 %v8270_v2, %v8269_v21  ;;  %v4817_v15 = vmul.f32 %v3689_v57, %v7122_v31  ;;  %v8275_v9 = vld [vmem:[#allocation18_spill] sm:$0xff]  ;;  %v8282_v57 = vld [vmem:[#allocation139_spill] sm:$0xff] }
 0x292   : > { %v4865_v14 = vadd.f32 %v4864_v40, %v4801_v56  ;;  %v4853_v13 = vadd.f32 %v4852_v50, %v4808_v30  ;;  %v4816_v40 = vmul.f32 %v3687_v41, %v7110_v34  ;;  %v8271_v56 = vld [vmem:[#allocation17_spill] sm:$0xff]  ;;  %v378_v50 = vmul.f32 %v8270_v2, %v8275_v9  ;;  %v8276_v30 = vld [vmem:[#allocation16_spill] sm:$0xff]  ;;  %v8277_v59 = vld [vmem:[#allocation134_spill] sm:$0xff] }
 0x293   : > { %v7210_v45 = vpop.f32.mrf.mxu1  ;;  %v7212_v44 = vpop.f32.mrf.mxu0  ;;  %4130 = vmatmul.mubr.bf16.gmra.mxu1 %v5366_v52  ;;  %v386_v52 = vmul.f32 %v8272_v60, %v8271_v56  ;;  %v7237_v8 = vrot.slane %v4707_v28, %v7183_v51  ;;  %v7246_v21 = vadd.f32 %v7120_v24, %v8277_v59  ;;  %v2523_v51 = vld [vmem:[#allocation8 + $0x20] sm:$0xff]  ;;  %v8281_v58 = vld [vmem:[#allocation138_spill] sm:$0xff] }
 0x294   : > { %4139 = vmatprep.mubr.bf16.mxu1 %v5368_v53  ;;  %v4866_v35 = vadd.f32 %v4865_v14, %v4809_v49  ;;  %v8273_v53 = vld [vmem:[#allocation132_spill] sm:$0xff]  ;;  %v387_v14 = vmul.f32 %v8272_v60, %v8276_v30  ;;  %v4854_v49 = vadd.f32 %v4853_v13, %v4816_v40  ;;  %v7267_v31 = vadd.f32 %v7151_v61, %v8281_v58 }
 0x295   : > { %v7219_v63 = vpop.f32.mrf.mxu1  ;;  %v7221_v23 = vpop.f32.mrf.mxu0  ;;  %v7232_v20 = vadd.f32 %v7106_v39, %v8273_v53  ;;  %8274 = vst [vmem:[#allocation38_spill] sm:$0xff] %v7237_v8  ;;  %v394_v41 = vadd.f32 %v386_v52, %v377_v7  ;;  %v8278_v39 = vld [vmem:[#allocation135_spill] sm:$0xff]  ;;  %v2531_v13 = vld [vmem:[#allocation8 + $0x60] sm:$0xff]  ;;  %v8279_v7 = vld [vmem:[#allocation137_spill] sm:$0xff]  ;;  %v7282_v58 = vadd.f32 %v7170_v16, %v7026_v12 }
 0x296   : > { %v7250_v56 = vadd.f32 %v7130_v46, %v8278_v39  ;;  %v4867_v9 = vadd.f32 %v4866_v35, %v4817_v15  ;;  %v395_v30 = vadd.f32 %v387_v14, %v378_v50  ;;  %v7260_v40 = vadd.f32 %v7142_v55, %v8279_v7  ;;  %v8280_v52 = vld [vmem:[#allocation46_spill] sm:$0xff]  ;;  %v2524_v46 = vld [vmem:[#allocation8 + $0x28] sm:$0xff]  ;;  %v2539_v34 = vld [vmem:[#allocation8 + $0xa0] sm:$0xff] }
 0x297   : > { %v7234_v4 = vpop.f32.mrf.mxu0  ;;  %v4855_v24 = vrot.slane %v4854_v49, 4  ;;  %v7263_v59 = vadd.f32 %v8280_v52, %v394_v41  ;;  %v2532_v39 = vld [vmem:[#allocation8 + $0x68] sm:$0xff]  ;;  %v7271_v35 = vadd.f32 %v7163_v10, %v8282_v57 }
 0x298   : > { %v5369_v55 = vld [vmem:[#allocation5 + $0x108] ss:$12 sps:$4 sm:$0xff]   ;;  %v4868_v41 = vrot.slane %v4867_v9, 4  ;;  %v7278_v7 = vadd.f32 %v8280_v52, %v395_v30 }
 0x299   : > { %v7252_v28 = vpop.f32.mrf.mxu1  ;;  %v5370_v14 = vld [vmem:[#allocation5 + $0xc8] ss:$12 sps:$4 sm:$0xff]   ;;  %v4856_v61 = vadd.f32 %v4855_v24, %v4854_v49  ;;  %v2587_v10 = vsub.f32 %v2523_v51, %v7263_v59  ;;  %v2595_v57 = vsub.f32 %v2531_v13, %v7263_v59  ;;  %v2603_v16 = vsub.f32 %v2539_v34, %v7263_v59 }
 0x29a   : > { %4263 = vmatmul.mubr.bf16.gmra.mxu0 %v5370_v14  ;;  %v2540_v8 = vld [vmem:[#allocation8 + $0xa8] sm:$0xff]  ;;  %v4869_v30 = vadd.f32 %v4868_v41, %v4867_v9  ;;  %v2588_v38 = vsub.f32 %v2524_v46, %v7278_v7  ;;  %v2596_v12 = vsub.f32 %v2532_v39, %v7278_v7 }
 0x29b   : > { %v7254_v53 = vpop.f32.mrf.mxu0  ;;  %v7273_v15 = vpop.f32.mrf.mxu1  ;;  %4140 = vmatmul.mubr.bf16.gmra.mxu1 %v5369_v55  ;;  %4272 = vmatprep.mubr.bf16.mxu0 %v8036_v22  ;;  %v2547_v55 = vld [vmem:[#allocation8 + $0xe0] sm:$0xff]  ;;  %v4857_v48 = vrot.slane %v4856_v61, 2  ;;  %v2651_v52 = vand.u32 2147483647, %v2587_v10  ;;  %v2659_v43 = vand.u32 2147483647, %v2595_v57  ;;  %v2604_v49 = vsub.f32 %v2540_v8, %v7278_v7 }
 0x29c   : > { %4282 = vmatprep.mubr.bf16.mxu1 %v8036_v22  ;;  %v4870_v24 = vrot.slane %v4869_v30, 2  ;;  %v2652_v3 = vand.u32 2147483647, %v2588_v38  ;;  %v2660_v47 = vand.u32 2147483647, %v2596_v12  ;;  %v2611_v9 = vsub.f32 %v2547_v55, %v7263_v59  ;;  %v2548_v55 = vld [vmem:[#allocation8 + $0xe8] sm:$0xff] }
 0x29d   : > { %v7275_v50 = vpop.f32.mrf.mxu0  ;;  %v7288_v14 = vpop.f32.mrf.mxu1  ;;  %v4858_v41 = vadd.f32 %v4857_v48, %v4856_v61  ;;  %v2715_v46 = vsub.f32 1.0, %v2651_v52  ;;  %v2723_v5 = vsub.f32 1.0, %v2659_v43  ;;  %v2667_v39 = vand.u32 2147483647, %v2603_v16  ;;  %v5371_v48 = vld [vmem:[#allocation5 + $0xf8] ss:$12 sps:$4 sm:$0xff]  }
 0x29e   : > { %8283 = vst [vmem:[#allocation64_spill] sm:$0xff] %v7288_v14  ;;  %v4871_v34 = vadd.f32 %v4870_v24, %v4869_v30  ;;  %v2716_v10 = vsub.f32 1.0, %v2652_v3  ;;  %v2724_v57 = vsub.f32 1.0, %v2660_v47  ;;  %v2668_v2 = vand.u32 2147483647, %v2604_v49 }
 0x29f   : > { %v7290_v42 = vpop.f32.mrf.mxu0  ;;  %v7296_v51 = vpop.f32.mrf.mxu1  ;;  %v4859_v37 = vrot.slane %v4858_v41, 1  ;;  %v7307_v14 = vmax.f32 %v2723_v5, 0.0  ;;  %v2731_v38 = vsub.f32 1.0, %v2667_v39  ;;  %v5372_v43 = vld [vmem:[#allocation5 + $0xe0] ss:$12 sps:$4 sm:$0xff]  }
 0x2a0   : > { %8284 = vst [vmem:[#allocation37_spill] sm:$0xff] %v7296_v51  ;;  %v7305_v51 = vmax.f32 %v2715_v46, 0.0  ;;  %v4872_v52 = vrot.slane %v4871_v34, 1  ;;  %v7311_v61 = vmax.f32 %v2716_v10, 0.0  ;;  %v7313_v3 = vmax.f32 %v2724_v57, 0.0 }
 0x2a1   : > { %v7298_v13 = vpop.f32.mrf.mxu0  ;;  %v7301_v60 = vpop.f32.mrf.mxu1  ;;  %v2732_v47 = vsub.f32 1.0, %v2668_v2  ;;  %v7318_v5 = vadd.f32 %v4859_v37, %v4858_v41  ;;  %v4315_v49 = vmul.f32 %v7250_v56, %v7307_v14  ;;  %v7324_v24 = vmax.f32 %v2731_v38, 0.0  ;;  %v2555_v41 = vld [vmem:[#allocation8 + $0x120] sm:$0xff] }
 0x2a2   : > { %4273 = vmatmul.mubr.bf16.gmra.mxu0 %v5372_v43  ;;  %v4307_v16 = vmul.f32 %v7232_v20, %v7305_v51  ;;  %v7328_v39 = vadd.f32 %v4872_v52, %v4871_v34  ;;  %v4308_v2 = vmul.f32 %v7246_v21, %v7311_v61  ;;  %v2675_v57 = vand.u32 2147483647, %v2611_v9  ;;  %v2556_v34 = vld [vmem:[#allocation8 + $0x128] sm:$0xff]  ;;  %v8290_v52 = vld [vmem:[#allocation148_spill] sm:$0xff] }
 0x2a3   : > { %v7303_v8 = vpop.f32.mrf.mxu0  ;;  %v7309_v12 = vpop.f32.mrf.mxu1  ;;  %4283 = vmatmul.mubr.bf16.vlgmr.msra.gmra.mxu1 %v5371_v48  ;;  %8286 = vst [vmem:[#allocation69_spill] sm:$0xff] %v7318_v5  ;;  %v7334_v37 = vmax.f32 %v2732_v47, 0.0  ;;  %v4323_v56 = vmul.f32 %v7267_v31, %v7324_v24  ;;  %v2612_v38 = vsub.f32 %v2548_v55, %v7278_v7  ;;  %v3895_v47 = vadd.f32 %v7181_v17, %v8290_v52 }
 0x2a4   : > { %8285 = vst [vmem:[#allocation41_spill] sm:$0xff] %v7309_v12  ;;  %4292 = vmatprep.mubr.bf16.mxu1 %v8036_v22  ;;  %8288 = vst [vmem:[#allocation40_spill] sm:$0xff] %v7328_v39  ;;  %v4316_v22 = vmul.f32 %v7260_v40, %v7313_v3  ;;  %v4419_v20 = vadd.f32 %v4315_v49, %v4307_v16  ;;  %v2739_v31 = vsub.f32 1.0, %v2675_v57  ;;  %v5373_v57 = vld [vmem:[#allocation5 + $0x110] ss:$12 sps:$4 sm:$0xff]  }
 0x2a5   : > { %v7315_v30 = vpop.f32.mrf.mxu0  ;;  %v7326_v46 = vpop.f32.mrf.mxu1  ;;  %v4324_v40 = vmul.f32 %v7271_v35, %v7334_v37  ;;  %v2676_v9 = vand.u32 2147483647, %v2612_v38  ;;  %v2619_v55 = vsub.f32 %v2555_v41, %v7263_v59  ;;  %v2564_v35 = vld [vmem:[#allocation8 + $0x168] sm:$0xff] }
 0x2a6   : > { %8287 = vst [vmem:[#allocation127_spill] sm:$0xff] %v7326_v46  ;;  %v4432_v43 = vadd.f32 %v4316_v22, %v4308_v2  ;;  %v4420_v49 = vadd.f32 %v4419_v20, %v4323_v56  ;;  %v2563_v46 = vld [vmem:[#allocation8 + $0x160] sm:$0xff]  ;;  %v3899_v2 = vadd.f32 %v7202_v54, %v7056_v27  ;;  %v2620_v22 = vsub.f32 %v2556_v34, %v7278_v7 }
 0x2a7   : > { %v7336_v10 = vpop.f32.mrf.mxu0  ;;  %v7341_v48 = vpop.f32.mrf.mxu1  ;;  %v7357_v21 = vmax.f32 %v2739_v31, 0.0  ;;  %v2740_v17 = vsub.f32 1.0, %v2676_v9  ;;  %v2683_v52 = vand.u32 2147483647, %v2619_v55  ;;  %v3901_v20 = vadd.f32 %v7212_v44, %v7067_v11  ;;  %v2571_v44 = vld [vmem:[#allocation8 + $0x1a0] sm:$0xff] }
 0x2a8   : > { %8289 = vst [vmem:[#allocation129_spill] sm:$0xff] %v7341_v48  ;;  %v4433_v48 = vadd.f32 %v4432_v43, %v4324_v40  ;;  %v2684_v38 = vand.u32 2147483647, %v2620_v22  ;;  %v2627_v43 = vsub.f32 %v2563_v46, %v7263_v59  ;;  %v3903_v27 = vadd.f32 %v7221_v23, %v7079_v1  ;;  %v2572_v46 = vld [vmem:[#allocation8 + $0x1a8] sm:$0xff] }
 0x2a9   : > { %v7349_v16 = vpop.f32.mrf.mxu0  ;;  %v7352_v12 = vpop.f32.mrf.mxu1  ;;  %v4331_v54 = vmul.f32 %v7282_v58, %v7357_v21  ;;  %v7370_v34 = vmax.f32 %v2740_v17, 0.0  ;;  %v2747_v40 = vsub.f32 1.0, %v2683_v52  ;;  %v2628_v11 = vsub.f32 %v2564_v35, %v7278_v7 }
 0x2aa   : > { %v2748_v9 = vsub.f32 1.0, %v2684_v38  ;;  %v2691_v55 = vand.u32 2147483647, %v2627_v43  ;;  %v3905_v22 = vadd.f32 %v7234_v4, %v7089_v6  ;;  %v2635_v5 = vsub.f32 %v2571_v44, %v7263_v59  ;;  %v2579_v43 = vld [vmem:[#allocation8 + $0x1e0] sm:$0xff]  ;;  %v2580_v44 = vld [vmem:[#allocation8 + $0x1e8] sm:$0xff] }
 0x2ab   : > { %v7361_v56 = vpop.f32.mrf.mxu1  ;;  %4293 = vmatmul.mubr.bf16.gmra.mxu1 %v5373_v57  ;;  %v4421_v1 = vadd.f32 %v4420_v49, %v4331_v54  ;;  %v4332_v23 = vmul.f32 %v3895_v47, %v7370_v34  ;;  %v7380_v58 = vmax.f32 %v2747_v40, 0.0  ;;  %v2692_v17 = vand.u32 2147483647, %v2628_v11 }
 0x2ac   : > { %v7382_v39 = vmax.f32 %v2748_v9, 0.0  ;;  %v2755_v35 = vsub.f32 1.0, %v2691_v55  ;;  %v3909_v38 = vadd.f32 %v7254_v53, %v7100_v18  ;;  %v2636_v49 = vsub.f32 %v2572_v46, %v7278_v7 }
 0x2ad   : > { %v7363_v41 = vpop.f32.mrf.mxu0  ;;  %v7377_v57 = vpop.f32.mrf.mxu1  ;;  %v4434_v6 = vadd.f32 %v4433_v48, %v4332_v23  ;;  %v4339_v4 = vmul.f32 %v3899_v2, %v7380_v58  ;;  %v2699_v11 = vand.u32 2147483647, %v2635_v5  ;;  %v3911_v9 = vadd.f32 %v7275_v50, %v7113_v33 }
 0x2ae   : > { %8291 = vst [vmem:[#allocation42_spill] sm:$0xff] %v7377_v57  ;;  %v2756_v57 = vsub.f32 1.0, %v2692_v17  ;;  %v4340_v54 = vmul.f32 %v3901_v20, %v7382_v39  ;;  %v7390_v40 = vmax.f32 %v2755_v35, 0.0  ;;  %v2700_v48 = vand.u32 2147483647, %v2636_v49 }
 0x2af   : > { %v7373_v31 = vpop.f32.mrf.mxu0  ;;  %v7394_v55 = vpop.f32.mrf.mxu1  ;;  %v4422_v18 = vadd.f32 %v4421_v1, %v4339_v4  ;;  %v2643_v2 = vsub.f32 %v2579_v43, %v7263_v59  ;;  %v2763_v20 = vsub.f32 1.0, %v2699_v11  ;;  %v3913_v5 = vadd.f32 %v7290_v42, %v7126_v26 }
 0x2b0   : > { %8292 = vst [vmem:[#allocation13_spill] sm:$0xff] %v7394_v55  ;;  %v7396_v53 = vmax.f32 %v2756_v57, 0.0  ;;  %v4435_v46 = vadd.f32 %v4434_v6, %v4340_v54  ;;  %v4347_v17 = vmul.f32 %v3903_v27, %v7390_v40  ;;  %v2764_v33 = vsub.f32 1.0, %v2700_v48 }
 0x2b1   : > { %v3932_v52 = vpop.f32.mrf.mxu0  ;;  %v2707_v50 = vand.u32 2147483647, %v2643_v2  ;;  %v2644_v55 = vsub.f32 %v2580_v44, %v7278_v7  ;;  %v7404_v4 = vmax.f32 %v2763_v20, 0.0  ;;  %v3915_v59 = vadd.f32 %v7298_v13, %v7134_v29 }
 0x2b2   : > { %v4348_v35 = vmul.f32 %v3905_v22, %v7396_v53  ;;  %v4423_v57 = vadd.f32 %v4422_v18, %v4347_v17  ;;  %v3919_v27 = vadd.f32 %v7303_v8, %v7146_v25  ;;  %v7410_v43 = vpop.f32.mrf.mxu1  ;;  %v7412_v26 = vmax.f32 %v2764_v33, 0.0 }
 0x2b3   : > { %v3934_v47 = vpop.f32.mrf.mxu0  ;;  %v2771_v42 = vsub.f32 1.0, %v2707_v50  ;;  %v2708_v22 = vand.u32 2147483647, %v2644_v55  ;;  %v4355_v7 = vmul.f32 %v3909_v38, %v7404_v4  ;;  %v3921_v11 = vadd.f32 %v7315_v30, %v7157_v32 }
 0x2b4   : > { %v4436_v6 = vadd.f32 %v4435_v46, %v4348_v35  ;;  %v4534_v54 = vmul.f32 %v3919_v27, %v7305_v51  ;;  %v3923_v29 = vadd.f32 %v7336_v10, %v7166_v19  ;;  %v4356_v25 = vmul.f32 %v3911_v9, %v7412_v26  ;;  %v7429_v30 = vpop.f32.mrf.mxu1 }
 0x2b5   : > { %v3938_v23 = vpop.f32.mrf.mxu0  ;;  %v7421_v13 = vmax.f32 %v2771_v42, 0.0  ;;  %v2772_v8 = vsub.f32 1.0, %v2708_v22  ;;  %v3925_v44 = vadd.f32 %v7349_v16, %v7175_v36  ;;  %v4424_v18 = vadd.f32 %v4423_v57, %v4355_v7 }
 0x2b6   : > { %v4535_v38 = vmul.f32 %v3921_v11, %v7311_v61  ;;  %v4542_v48 = vmul.f32 %v3923_v29, %v7307_v14  ;;  %v3929_v32 = vadd.f32 %v7363_v41, %v7186_v0  ;;  %v4437_v19 = vadd.f32 %v4436_v6, %v4356_v25  ;;  %v7442_v57 = vpop.f32.mrf.mxu1 }
 0x2b7   : > { %v3940_v1 = vpop.f32.mrf.mxu0  ;;  %v4363_v10 = vmul.f32 %v3913_v5, %v7421_v13  ;;  %v7432_v9 = vmax.f32 %v2772_v8, 0.0  ;;  %v4543_v2 = vmul.f32 %v3925_v44, %v7313_v3  ;;  %v3931_v16 = vadd.f32 %v7373_v31, %v7200_v62  ;;  %v8294_v8 = vld [vmem:[#allocation37_spill] sm:$0xff] }
 0x2b8   : > { %v4646_v46 = vadd.f32 %v4542_v48, %v4534_v54  ;;  %v4550_v36 = vmul.f32 %v3929_v32, %v7324_v24  ;;  %v3933_v17 = vadd.f32 %v3932_v52, %v7210_v45  ;;  %v3935_v33 = vadd.f32 %v3934_v47, %v7219_v63  ;;  %v8293_v47 = vld [vmem:[#allocation64_spill] sm:$0xff] }
 0x2b9   : > { %v3942_v49 = vpop.f32.mrf.mxu0  ;;  %v4425_v35 = vadd.f32 %v4424_v18, %v4363_v10  ;;  %v4364_v0 = vmul.f32 %v3915_v59, %v7432_v9  ;;  %v4659_v41 = vadd.f32 %v4543_v2, %v4535_v38  ;;  %v4551_v50 = vmul.f32 %v3931_v16, %v7334_v37 }
 0x2ba   : > { %v4647_v5 = vadd.f32 %v4646_v46, %v4550_v36  ;;  %v4558_v27 = vmul.f32 %v3933_v17, %v7357_v21  ;;  %v3939_v6 = vadd.f32 %v3938_v23, %v7252_v28  ;;  %v4559_v45 = vmul.f32 %v3935_v33, %v7370_v34  ;;  %v7452_v23 = vpop.f32.mrf.mxu1  ;;  %v8297_v33 = vld [vmem:[#allocation129_spill] sm:$0xff] }
 0x2bb   : > { %v3944_v55 = vpop.f32.mrf.mxu0  ;;  %v4426_v62 = vrot.slane %v4425_v35, 4  ;;  %v4438_v31 = vadd.f32 %v4437_v19, %v4364_v0  ;;  %v3941_v52 = vadd.f32 %v3940_v1, %v7273_v15  ;;  %v4660_v59 = vadd.f32 %v4659_v41, %v4551_v50  ;;  %v8295_v19 = vld [vmem:[#allocation41_spill] sm:$0xff] }
 0x2bc   : > { %v4648_v22 = vadd.f32 %v4647_v5, %v4558_v27  ;;  %v4566_v63 = vmul.f32 %v3939_v6, %v7380_v58  ;;  %v3943_v7 = vadd.f32 %v3942_v49, %v8293_v47  ;;  %v3945_v28 = vadd.f32 %v3944_v55, %v8294_v8  ;;  %v8296_v55 = vld [vmem:[#allocation127_spill] sm:$0xff] }
 0x2bd   : > { %v3948_v20 = vpop.f32.mrf.mxu0  ;;  %v4427_v11 = vadd.f32 %v4426_v62, %v4425_v35  ;;  %v4439_v29 = vrot.slane %v4438_v31, 4  ;;  %v4567_v25 = vmul.f32 %v3941_v52, %v7382_v39  ;;  %v4661_v44 = vadd.f32 %v4660_v59, %v4559_v45 }
 0x2be   : > { %v4649_v18 = vadd.f32 %v4648_v22, %v4566_v63  ;;  %v4574_v38 = vmul.f32 %v3943_v7, %v7390_v40  ;;  %v3949_v15 = vadd.f32 %v3948_v20, %v7301_v60  ;;  %v4575_v49 = vmul.f32 %v3945_v28, %v7396_v53  ;;  %v3825_v20 = vpop.f32.mrf.mxu1  ;;  %v8298_v7 = vld [vmem:[#allocation42_spill] sm:$0xff] }
 0x2bf   : > { %v3950_v42 = vpop.f32.mrf.mxu0  ;;  %v4428_v48 = vrot.slane %v4427_v11, 2  ;;  %v4440_v32 = vadd.f32 %v4439_v29, %v4438_v31  ;;  %v4662_v2 = vadd.f32 %v4661_v44, %v4567_v25 }
 0x2c0   : > { %v3951_v10 = vadd.f32 %v3950_v42, %v8295_v19  ;;  %v4650_v46 = vadd.f32 %v4649_v18, %v4574_v38  ;;  %v4582_v36 = vmul.f32 %v3949_v15, %v7404_v4  ;;  %v8299_v38 = vld [vmem:[#allocation13_spill] sm:$0xff] }
 0x2c1   : > { %v3952_v54 = vpop.f32.mrf.mxu0  ;;  %v4429_v35 = vadd.f32 %v4428_v48, %v4427_v11  ;;  %v4441_v0 = vrot.slane %v4440_v32, 2  ;;  %v4663_v5 = vadd.f32 %v4662_v2, %v4575_v49  ;;  %v3827_v11 = vpop.f32.mrf.mxu1 }
 0x2c2   : > { %v3953_v16 = vadd.f32 %v3952_v54, %v8296_v55  ;;  %v4583_v41 = vmul.f32 %v3951_v10, %v7412_v26  ;;  %v4651_v50 = vadd.f32 %v4650_v46, %v4582_v36 }
 0x2c3   : > { %v3954_v1 = vpop.f32.mrf.mxu0  ;;  %v4430_v62 = vrot.slane %v4429_v35, 1  ;;  %v4442_v31 = vadd.f32 %v4441_v0, %v4440_v32  ;;  %v3829_v2 = vpop.f32.mrf.mxu1 }
 0x2c4   : > { %v3955_v60 = vadd.f32 %v3954_v1, %v8297_v33  ;;  %v4590_v27 = vmul.f32 %v3953_v16, %v7421_v13  ;;  %v4664_v59 = vadd.f32 %v4663_v5, %v4583_v41 }
 0x2c5   : > { %v3958_v17 = vpop.f32.mrf.mxu0  ;;  %v4443_v47 = vrot.slane %v4442_v31, 1 }
 0x2c6   : > { %v3959_v6 = vadd.f32 %v3958_v17, %v7352_v12  ;;  %v4591_v45 = vmul.f32 %v3955_v60, %v7432_v9  ;;  %v4652_v22 = vadd.f32 %v4651_v50, %v4590_v27  ;;  %v7468_v12 = vadd.f32 %v4430_v62, %v4429_v35 }
 0x2c7   : > { %v3960_v42 = vpop.f32.mrf.mxu0  ;;  %v7470_v44 = vadd.f32 %v4443_v47, %v4442_v31 }
 0x2c8   : > { %v3961_v52 = vadd.f32 %v3960_v42, %v7361_v56  ;;  %v4653_v29 = vrot.slane %v4652_v22, 4  ;;  %v4665_v25 = vadd.f32 %v4664_v59, %v4591_v45  ;;  %v4762_v8 = vmul.f32 %v3959_v6, %v7305_v51 }
 0x2c9   : > { %v3962_v63 = vpop.f32.mrf.mxu0 }
 0x2ca   : > { %v3963_v54 = vadd.f32 %v3962_v63, %v8298_v7  ;;  %v4654_v15 = vadd.f32 %v4653_v29, %v4652_v22  ;;  %v4666_v1 = vrot.slane %v4665_v25, 4  ;;  %v4763_v48 = vmul.f32 %v3961_v52, %v7311_v61 }
 0x2cb   : > { %v3964_v28 = vpop.f32.mrf.mxu0 }
 0x2cc   : > { %v4770_v18 = vmul.f32 %v3963_v54, %v7307_v14  ;;  %v3965_v56 = vadd.f32 %v3964_v28, %v8299_v38  ;;  %v4655_v46 = vrot.slane %v4654_v15, 2  ;;  %v4667_v36 = vadd.f32 %v4666_v1, %v4665_v25 }
 0x2cd   : > { %v3968_v32 = vpop.f32.mrf.mxu0 }
 0x2ce   : > { %v4874_v19 = vadd.f32 %v4770_v18, %v4762_v8  ;;  %v4771_v51 = vmul.f32 %v3965_v56, %v7313_v3  ;;  %v3969_v10 = vadd.f32 %v3968_v32, %v7410_v43  ;;  %v4656_v35 = vadd.f32 %v4655_v46, %v4654_v15  ;;  %v3831_v3 = vpop.f32.mrf.mxu1 }
 0x2cf   : > { %v3970_v55 = vpop.f32.mrf.mxu0  ;;  %v4668_v61 = vrot.slane %v4667_v36, 2 }
 0x2d0   : > { %v4887_v14 = vadd.f32 %v4771_v51, %v4763_v48  ;;  %v4778_v16 = vmul.f32 %v3969_v10, %v7324_v24  ;;  %v3971_v17 = vadd.f32 %v3970_v55, %v7429_v30  ;;  %v4657_v5 = vrot.slane %v4656_v35, 1  ;;  %v3835_v52 = vpop.f32.mrf.mxu1 }
 0x2d1   : > { %v3972_v0 = vpop.f32.mrf.mxu0  ;;  %v4669_v43 = vadd.f32 %v4668_v61, %v4667_v36 }
 0x2d2   : > { %v4875_v41 = vadd.f32 %v4874_v19, %v4778_v16  ;;  %v4779_v33 = vmul.f32 %v3971_v17, %v7334_v37  ;;  %v3973_v60 = vadd.f32 %v3972_v0, %v7442_v57  ;;  %v7486_v59 = vadd.f32 %v4657_v5, %v4656_v35 }
 0x2d3   : > { %v3974_v50 = vpop.f32.mrf.mxu0  ;;  %v4670_v24 = vrot.slane %v4669_v43, 1 }
 0x2d4   : > { %v4888_v27 = vadd.f32 %v4887_v14, %v4779_v33  ;;  %v4786_v6 = vmul.f32 %v3973_v60, %v7357_v21  ;;  %v3975_v42 = vadd.f32 %v3974_v50, %v7452_v23  ;;  %8300 = vst [vmem:[#allocation52_spill] sm:$0xff] %v7486_v59  ;;  %v8375_v59 = vld [vmem:[#allocation56_spill] sm:$0xff] }
 0x2d5   : > { %v3978_v62 = vpop.f32.mrf.mxu0  ;;  %v7488_v37 = vadd.f32 %v4670_v24, %v4669_v43 }
 0x2d6   : > { %v4876_v30 = vadd.f32 %v4875_v41, %v4786_v6  ;;  %v4787_v31 = vmul.f32 %v3975_v42, %v7370_v34  ;;  %v3979_v45 = vadd.f32 %v3978_v62, %v3825_v20  ;;  %v3837_v34 = vpop.f32.mrf.mxu1  ;;  %v8304_v6 = vld [vmem:[#allocation94_spill] sm:$0xff]  ;;  %v8305_v42 = vld [vmem:[#allocation111_spill] sm:$0xff] }
 0x2d7   : > { %8301 = vst [vmem:[#allocation12_spill] sm:$0xff] %v7488_v37  ;;  %v3980_v57 = vpop.f32.mrf.mxu0  ;;  %v3579_v24 = vadd.f32 %v8305_v42, %v8304_v6  ;;  %v8333_v6 = vld [vmem:[#allocation25_spill] sm:$0xff]  ;;  %v8334_v42 = vld [vmem:[#allocation30_spill] sm:$0xff] }
 0x2d8   : > { %v4889_v22 = vadd.f32 %v4888_v27, %v4787_v31  ;;  %v4794_v63 = vmul.f32 %v3979_v45, %v7380_v58  ;;  %v3981_v47 = vadd.f32 %v3980_v57, %v3827_v11  ;;  %v3839_v11 = vpop.f32.mrf.mxu1  ;;  %v8307_v31 = vld [vmem:[#allocation109_spill] sm:$0xff]  ;;  %v8309_v57 = vld [vmem:[#allocation115_spill] sm:$0xff] }
 0x2d9   : > { %v3982_v23 = vpop.f32.mrf.mxu0  ;;  %v8372_v37 = vld [vmem:[#allocation73_spill] sm:$0xff] }
 0x2da   : > { %v4877_v7 = vadd.f32 %v4876_v30, %v4794_v63  ;;  %v4795_v54 = vmul.f32 %v3981_v47, %v7382_v39  ;;  %v3983_v29 = vadd.f32 %v3982_v23, %v3829_v2  ;;  %v3841_v2 = vpop.f32.mrf.mxu1  ;;  %v8306_v30 = vld [vmem:[#allocation89_spill] sm:$0xff]  ;;  %v8310_v47 = vld [vmem:[#allocation92_spill] sm:$0xff]  ;;  %v8311_v23 = vld [vmem:[#allocation26_spill] sm:$0xff] }
 0x2db   : > { %v3984_v20 = vpop.f32.mrf.mxu0  ;;  %v3575_v45 = vadd.f32 %v8307_v31, %v8306_v30 }
 0x2dc   : > { %v4890_v25 = vadd.f32 %v4889_v22, %v4795_v54  ;;  %v4802_v8 = vmul.f32 %v3983_v29, %v7390_v40  ;;  %v3985_v28 = vadd.f32 %v3984_v20, %v3831_v3  ;;  %v8312_v54 = vld [vmem:[#allocation143_spill] sm:$0xff]  ;;  %v8314_v20 = vld [vmem:[#allocation120_spill] sm:$0xff] }
 0x2dd   : > { %v3988_v18 = vpop.f32.mrf.mxu0  ;;  %v4314_v29 = vmul.f32 %v3579_v24, %v8312_v54  ;;  %v3599_v24 = vadd.f32 %v8334_v42, %v8333_v6  ;;  %v2533_v6 = vld [vmem:[#allocation8 + $0x70] sm:$0xff] }
 0x2de   : > { %v4878_v38 = vadd.f32 %v4877_v7, %v4802_v8  ;;  %v4803_v56 = vmul.f32 %v3985_v28, %v7396_v53  ;;  %v3989_v58 = vadd.f32 %v3988_v18, %v3835_v52  ;;  %v8308_v52 = vld [vmem:[#allocation98_spill] sm:$0xff]  ;;  %v3577_v7 = vadd.f32 %v8311_v23, %v8310_v47  ;;  %v8315_v28 = vld [vmem:[#allocation39_spill] sm:$0xff]  ;;  %v8316_v18 = vld [vmem:[#allocation21_spill] sm:$0xff] }
 0x2df   : > { %v3990_v15 = vpop.f32.mrf.mxu0  ;;  %v3585_v22 = vadd.f32 %v8309_v57, %v8308_v52  ;;  %v8336_v57 = vld [vmem:[#allocation144_spill] sm:$0xff]  ;;  %v8337_v47 = vld [vmem:[#allocation105_spill] sm:$0xff]  ;;  %v8338_v23 = vld [vmem:[#allocation27_spill] sm:$0xff] }
 0x2e0   : > { %v4891_v1 = vadd.f32 %v4890_v25, %v4803_v56  ;;  %v4810_v48 = vmul.f32 %v3989_v58, %v7404_v4  ;;  %v3991_v32 = vadd.f32 %v3990_v15, %v3837_v34  ;;  %v8313_v34 = vld [vmem:[#allocation23_spill] sm:$0xff]  ;;  %v8317_v56 = vld [vmem:[#allocation36_spill] sm:$0xff]  ;;  %v8318_v58 = vld [vmem:[#allocation22_spill] sm:$0xff]  ;;  %v3593_v54 = vadd.f32 %v8338_v23, %v8337_v47 }
 0x2e1   : > { %v3992_v19 = vpop.f32.mrf.mxu0  ;;  %v3589_v25 = vadd.f32 %v8314_v20, %v8313_v34  ;;  %v8319_v15 = vld [vmem:[#allocation87_spill] sm:$0xff]  ;;  %v8339_v20 = vld [vmem:[#allocation150_spill] sm:$0xff] }
 0x2e2   : > { %v4879_v39 = vadd.f32 %v4878_v38, %v4810_v48  ;;  %v4811_v51 = vmul.f32 %v3991_v32, %v7412_v26  ;;  %v3993_v10 = vadd.f32 %v3992_v19, %v3839_v11  ;;  %v379_v38 = vmul.f32 %v8316_v18, %v8315_v28  ;;  %v8321_v32 = vld [vmem:[#allocation96_spill] sm:$0xff]  ;;  %v8322_v19 = vld [vmem:[#allocation113_spill] sm:$0xff]  ;;  %v2541_v47 = vld [vmem:[#allocation8 + $0xb0] sm:$0xff] }
 0x2e3   : > { %v3994_v46 = vpop.f32.mrf.mxu0  ;;  %v388_v11 = vmul.f32 %v8318_v58, %v8317_v56  ;;  %v2542_v23 = vld [vmem:[#allocation8 + $0xb8] sm:$0xff] }
 0x2e4   : > { %v4892_v40 = vadd.f32 %v4891_v1, %v4811_v51  ;;  %v4818_v36 = vmul.f32 %v3993_v10, %v7421_v13  ;;  %v3995_v55 = vadd.f32 %v3994_v46, %v3841_v2  ;;  %v8320_v1 = vld [vmem:[#allocation108_spill] sm:$0xff]  ;;  %v8323_v51 = vld [vmem:[#allocation35_spill] sm:$0xff] }
 0x2e5   : > { %v3573_v48 = vadd.f32 %v8320_v1, %v8319_v15  ;;  %v380_v10 = vmul.f32 %v8316_v18, %v8323_v51  ;;  %v8324_v2 = vld [vmem:[#allocation20_spill] sm:$0xff]  ;;  %v396_v31 = vadd.f32 %v388_v11, %v379_v38  ;;  %v8341_v18 = vld [vmem:[#allocation121_spill] sm:$0xff]  ;;  %v8342_v15 = vld [vmem:[#allocation146_spill] sm:$0xff] }
 0x2e6   : > { %v4880_v14 = vadd.f32 %v4879_v39, %v4818_v36  ;;  %v4819_v53 = vmul.f32 %v3995_v55, %v7432_v9  ;;  %v3583_v39 = vadd.f32 %v8322_v19, %v8321_v32  ;;  %v389_v46 = vmul.f32 %v8318_v58, %v8324_v2  ;;  %v8326_v55 = vld [vmem:[#allocation145_spill] sm:$0xff]  ;;  %v8343_v38 = vld [vmem:[#allocation24_spill] sm:$0xff]  ;;  %v8347_v2 = vld [vmem:[#allocation122_spill] sm:$0xff] }
 0x2e7   : > { %v8344_v11 = vld [vmem:[#allocation29_spill] sm:$0xff]  ;;  %v8345_v19 = vld [vmem:[#allocation152_spill] sm:$0xff]  ;;  %v2582_v13 = vld [vmem:[#allocation8 + $0x1f8] sm:$0xff] }
 0x2e8   : > { %v4881_v16 = vrot.slane %v4880_v14, 4  ;;  %v4893_v17 = vadd.f32 %v4892_v40, %v4819_v53  ;;  %v8325_v40 = vld [vmem:[#allocation142_spill] sm:$0xff]  ;;  %v8327_v53 = vld [vmem:[#allocation107_spill] sm:$0xff]  ;;  %v8346_v51 = vld [vmem:[#allocation116_spill] sm:$0xff] }
 0x2e9   : > { %v4306_v36 = vmul.f32 %v3575_v45, %v8325_v40  ;;  %v8335_v45 = vld [vmem:[#allocation140_spill] sm:$0xff]  ;;  %v8348_v40 = vld [vmem:[#allocation46_spill] sm:$0xff] }
 0x2ea   : > { %v4882_v35 = vadd.f32 %v4881_v16, %v4880_v14  ;;  %v4894_v61 = vrot.slane %v4893_v17, 4  ;;  %v4322_v14 = vmul.f32 %v3585_v22, %v8326_v55  ;;  %v8328_v16 = vld [vmem:[#allocation28_spill] sm:$0xff]  ;;  %v4305_v52 = vmul.f32 %v3573_v48, %v8335_v45  ;;  %v8354_v45 = vld [vmem:[#allocation114_spill] sm:$0xff] }
 0x2eb   : > { %v4321_v22 = vmul.f32 %v3583_v39, %v8336_v57  ;;  %v3597_v48 = vadd.f32 %v8344_v11, %v8343_v38  ;;  %v4346_v39 = vmul.f32 %v3599_v24, %v8345_v19  ;;  %v8353_v24 = vld [vmem:[#allocation151_spill] sm:$0xff] }
 0x2ec   : > { %v4883_v4 = vrot.slane %v4882_v35, 2  ;;  %v4895_v0 = vadd.f32 %v4894_v61, %v4893_v17  ;;  %v3595_v17 = vadd.f32 %v8328_v16, %v8327_v53  ;;  %v8329_v61 = vld [vmem:[#allocation141_spill] sm:$0xff]  ;;  %v8350_v16 = vld [vmem:[#allocation110_spill] sm:$0xff]  ;;  %v2550_v38 = vld [vmem:[#allocation8 + $0xf8] sm:$0xff] }
 0x2ee   : > { %v4884_v41 = vadd.f32 %v4883_v4, %v4882_v35  ;;  %v4896_v33 = vrot.slane %v4895_v0, 2  ;;  %v4313_v4 = vmul.f32 %v3577_v7, %v8329_v61  ;;  %v397_v7 = vadd.f32 %v389_v46, %v380_v10 }
 0x2ef   : > { %v4338_v28 = vmul.f32 %v3595_v17, %v8339_v20  ;;  %v3609_v10 = vadd.f32 %v8347_v2, %v8346_v51  ;;  %v8351_v17 = vld [vmem:[#allocation31_spill] sm:$0xff]  ;;  %v2557_v2 = vld [vmem:[#allocation8 + $0x130] sm:$0xff] }
 0x2f0   : > { %v4885_v60 = vrot.slane %v4884_v41, 1  ;;  %v4897_v26 = vadd.f32 %v4896_v33, %v4895_v0  ;;  %v8330_v0 = vld [vmem:[#allocation100_spill] sm:$0xff]  ;;  %v4393_v58 = vadd.f32 %v4313_v4, %v4305_v52  ;;  %v3603_v61 = vadd.f32 %v8351_v17, %v8350_v16  ;;  %v2525_v4 = vld [vmem:[#allocation8 + $0x30] sm:$0xff] }
 0x2f1   : > { %v8355_v52 = vld [vmem:[#allocation32_spill] sm:$0xff] }
 0x2f2   : > { %v4898_v3 = vrot.slane %v4897_v26, 1  ;;  %v7500_v5 = vadd.f32 %v4885_v60, %v4884_v41  ;;  %v8331_v41 = vld [vmem:[#allocation117_spill] sm:$0xff]  ;;  %v4406_v60 = vadd.f32 %v4314_v29, %v4306_v36  ;;  %v8340_v29 = vld [vmem:[#allocation112_spill] sm:$0xff]  ;;  %v7573_v36 = vadd.f32 %v8348_v40, %v396_v31 }
 0x2f3   : > { %v3587_v33 = vadd.f32 %v8331_v41, %v8330_v0  ;;  %v4394_v55 = vadd.f32 %v4393_v58, %v4321_v22  ;;  %v7579_v0 = vadd.f32 %v8348_v40, %v397_v7  ;;  %v4345_v31 = vmul.f32 %v3597_v48, %v8353_v24  ;;  %v2534_v22 = vld [vmem:[#allocation8 + $0x78] sm:$0xff]  ;;  %v8358_v40 = vld [vmem:[#allocation33_spill] sm:$0xff] }
 0x2f4   : > { %8302 = vst [vmem:[#allocation55_spill] sm:$0xff] %v7500_v5  ;;  %v7502_v43 = vadd.f32 %v4898_v3, %v4897_v26  ;;  %v8332_v26 = vld [vmem:[#allocation147_spill] sm:$0xff]  ;;  %v4407_v34 = vadd.f32 %v4406_v60, %v4322_v14  ;;  %v8349_v14 = vld [vmem:[#allocation149_spill] sm:$0xff]  ;;  %v3607_v57 = vadd.f32 %v8355_v52, %v8354_v45 }
 0x2f5   : > { %v4330_v3 = vmul.f32 %v3589_v25, %v8332_v26  ;;  %v3605_v25 = vadd.f32 %v8341_v18, %v8340_v29  ;;  %v4329_v1 = vmul.f32 %v3587_v33, %v8342_v15  ;;  %v4337_v53 = vmul.f32 %v3593_v54, %v8349_v14  ;;  %v8352_v33 = vld [vmem:[#allocation58_spill] sm:$0xff] }
 0x2f6   : > { %8303 = vst [vmem:[#allocation131_spill] sm:$0xff] %v7502_v43  ;;  %v2549_v29 = vld [vmem:[#allocation8 + $0xf0] sm:$0xff]  ;;  %v2598_v19 = vsub.f32 %v2534_v22, %v7579_v0  ;;  %v2606_v51 = vsub.f32 %v2542_v23, %v7579_v0 }
 0x2f7   : > { %v4408_v32 = vadd.f32 %v4407_v34, %v4330_v3  ;;  %v4354_v60 = vmul.f32 %v3605_v25, %v8352_v33  ;;  %v2526_v3 = vld [vmem:[#allocation8 + $0x38] sm:$0xff]  ;;  %v4395_v42 = vadd.f32 %v4394_v55, %v4329_v1  ;;  %v8357_v25 = vld [vmem:[#allocation153_spill] sm:$0xff]  ;;  %v2597_v1 = vsub.f32 %v2533_v6, %v7573_v36 }
 0x2f8   : > { %v8356_v34 = vld [vmem:[#allocation63_spill] sm:$0xff]  ;;  %v4353_v58 = vmul.f32 %v3603_v61, %v8357_v25  ;;  %v2590_v15 = vsub.f32 %v2526_v3, %v7579_v0  ;;  %v4361_v55 = vmul.f32 %v3607_v57, %v8358_v40  ;;  %v2613_v14 = vsub.f32 %v2549_v29, %v7573_v36 }
 0x2f9   : > { %v4409_v41 = vadd.f32 %v4408_v32, %v4338_v28  ;;  %v4362_v7 = vmul.f32 %v3609_v10, %v8356_v34  ;;  %v2589_v28 = vsub.f32 %v2525_v4, %v7573_v36  ;;  %v4396_v18 = vadd.f32 %v4395_v42, %v4337_v53  ;;  %v2565_v42 = vld [vmem:[#allocation8 + $0x170] sm:$0xff]  ;;  %v2566_v25 = vld [vmem:[#allocation8 + $0x178] sm:$0xff] }
 0x2fa   : > { %v2614_v4 = vsub.f32 %v2550_v38, %v7579_v0  ;;  %v2661_v3 = vand.u32 2147483647, %v2597_v1  ;;  %v2621_v6 = vsub.f32 %v2557_v2, %v7573_v36  ;;  %v2662_v45 = vand.u32 2147483647, %v2598_v19  ;;  %v2573_v2 = vld [vmem:[#allocation8 + $0x1b0] sm:$0xff] }
 0x2fb   : > { %v4410_v54 = vadd.f32 %v4409_v41, %v4346_v39  ;;  %v2605_v39 = vsub.f32 %v2541_v47, %v7573_v36  ;;  %v4397_v10 = vadd.f32 %v4396_v18, %v4345_v31  ;;  %v2653_v17 = vand.u32 2147483647, %v2589_v28  ;;  %v2558_v41 = vld [vmem:[#allocation8 + $0x138] sm:$0xff] }
 0x2fc   : > { %v2670_v57 = vand.u32 2147483647, %v2606_v51  ;;  %v2677_v47 = vand.u32 2147483647, %v2613_v14  ;;  %v2622_v23 = vsub.f32 %v2558_v41, %v7579_v0  ;;  %v2678_v29 = vand.u32 2147483647, %v2614_v4 }
 0x2fd   : > { %v4411_v11 = vadd.f32 %v4410_v54, %v4354_v60  ;;  %v4398_v33 = vadd.f32 %v4397_v10, %v4353_v58  ;;  %v2654_v60 = vand.u32 2147483647, %v2590_v15  ;;  %v2669_v52 = vand.u32 2147483647, %v2605_v39 }
 0x2fe   : > { %v2629_v18 = vsub.f32 %v2565_v42, %v7573_v36  ;;  %v2725_v15 = vsub.f32 1.0, %v2661_v3  ;;  %v2685_v1 = vand.u32 2147483647, %v2621_v6  ;;  %v2734_v51 = vsub.f32 1.0, %v2670_v57 }
 0x2ff   : > { %v4412_v53 = vadd.f32 %v4411_v11, %v4362_v7  ;;  %v7611_v22 = vadd.f32 %v4398_v33, %v4361_v55  ;;  %v2717_v7 = vsub.f32 1.0, %v2653_v17  ;;  %v2718_v58 = vsub.f32 1.0, %v2654_v60  ;;  %v2574_v17 = vld [vmem:[#allocation8 + $0x1b8] sm:$0xff] }
 0x300   : > { %v2726_v11 = vsub.f32 1.0, %v2662_v45  ;;  %v2733_v19 = vsub.f32 1.0, %v2669_v52  ;;  %v2741_v40 = vsub.f32 1.0, %v2677_v47  ;;  %v2686_v55 = vand.u32 2147483647, %v2622_v23  ;;  %v2581_v47 = vld [vmem:[#allocation8 + $0x1f0] sm:$0xff] }
 0x301   : > { %v4413_v54 = vrot.slane %v4412_v53, 4  ;;  %v4400_v10 = vrot.slane %v7611_v22, 4  ;;  %v2630_v14 = vsub.f32 %v2566_v25, %v7579_v0  ;;  %v7623_v41 = vmax.f32 %v2717_v7, 0.0 }
 0x302   : > { %v2742_v3 = vsub.f32 1.0, %v2678_v29  ;;  %v2693_v6 = vand.u32 2147483647, %v2629_v18  ;;  %v7627_v42 = vmax.f32 %v2718_v58, 0.0  ;;  %v7629_v45 = vmax.f32 %v2725_v15, 0.0 }
 0x303   : > { %v7506_v50 = vpop.f32.mrf.mxu1  ;;  %v7621_v4 = vadd.f32 %v4413_v54, %v4412_v53  ;;  %v2749_v52 = vsub.f32 1.0, %v2685_v1  ;;  %v2637_v57 = vsub.f32 %v2573_v2, %v7573_v36  ;;  %v7634_v25 = vmax.f32 %v2726_v11, 0.0 }
 0x304   : > { %v7636_v53 = vmax.f32 %v2733_v19, 0.0  ;;  %v7638_v54 = vmax.f32 %v2734_v51, 0.0  ;;  %v2638_v29 = vsub.f32 %v2574_v17, %v7579_v0  ;;  %v7642_v58 = vmax.f32 %v2741_v40, 0.0 }
 0x305   : > { %v7508_v9 = vpop.f32.mrf.mxu1  ;;  %v2750_v15 = vsub.f32 1.0, %v2686_v55  ;;  %v2694_v1 = vand.u32 2147483647, %v2630_v14  ;;  %v7647_v11 = vmax.f32 %v2742_v3, 0.0  ;;  %v2757_v49 = vsub.f32 1.0, %v2693_v6 }
 0x306   : > { %v2645_v51 = vsub.f32 %v2581_v47, %v7573_v36  ;;  %v2701_v40 = vand.u32 2147483647, %v2637_v57  ;;  %v2702_v3 = vand.u32 2147483647, %v2638_v29  ;;  %v2646_v6 = vsub.f32 %v2582_v13, %v7579_v0 }
 0x307   : > { %v7510_v27 = vpop.f32.mrf.mxu1  ;;  %v7669_v57 = vmax.f32 %v2757_v49, 0.0 }
 0x309   : > { %v7514_v62 = vpop.f32.mrf.mxu1 }
 0x30b   : > { %v7520_v63 = vpop.f32.mrf.mxu1 }
 0x30d   : > { %v7527_v8 = vpop.f32.mrf.mxu1 }
 0x30f   : > { %v7545_v35 = vpop.f32.mrf.mxu1 }
 0x311   : > { %v7553_v30 = vpop.f32.mrf.mxu1 }
 0x313   : > { %v7562_v56 = vpop.f32.mrf.mxu1 }
 0x315   : > { %v7570_v46 = vpop.f32.mrf.mxu1 }
 0x317   : > { %v7582_v26 = vpop.f32.mrf.mxu1 }
 0x318   : > { %v7596_v32 = vpop.f32.mrf.mxu0 }
 0x319   : > { %v7588_v20 = vpop.f32.mrf.mxu1  ;;  %v4185_v17 = vadd.f32 %v7596_v32, %v7506_v50  ;;  %v7663_v32 = vmax.f32 %v2750_v15, 0.0 }
 0x31a   : > { %v7605_v61 = vpop.f32.mrf.mxu0 }
 0x31b   : > { %v7594_v48 = vpop.f32.mrf.mxu1  ;;  %v4187_v55 = vadd.f32 %v7605_v61, %v7508_v9 }
 0x31c   : > { %v4188_v31 = vpop.f32.mrf.mxu0 }
 0x31d   : > { %v7603_v16 = vpop.f32.mrf.mxu1  ;;  %v4189_v18 = vadd.f32 %v4188_v31, %v7510_v27  ;;  %v7653_v31 = vmax.f32 %v2749_v52, 0.0  ;;  %v4310_v47 = vmul.f32 %v4187_v55, %v7627_v42 }
 0x31e   : > { %v4190_v28 = vpop.f32.mrf.mxu0 }
 0x31f   : > { %v7609_v24 = vpop.f32.mrf.mxu1  ;;  %v4191_v21 = vadd.f32 %v4190_v28, %v7514_v62  ;;  %v4317_v36 = vmul.f32 %v4189_v18, %v7629_v45  ;;  %v2766_v18 = vsub.f32 1.0, %v2702_v3 }
 0x320   : > { %v4194_v39 = vpop.f32.mrf.mxu0 }
 0x321   : > { %v7614_v34 = vpop.f32.mrf.mxu1  ;;  %v4195_v27 = vadd.f32 %v4194_v39, %v7520_v63  ;;  %v2758_v63 = vsub.f32 1.0, %v2694_v1  ;;  %v4318_v39 = vmul.f32 %v4191_v21, %v7634_v25 }
 0x322   : > { %v4196_v60 = vpop.f32.mrf.mxu0 }
 0x323   : > { %v7617_v38 = vpop.f32.mrf.mxu1  ;;  %v4197_v62 = vadd.f32 %v4196_v60, %v7527_v8  ;;  %v2709_v8 = vand.u32 2147483647, %v2645_v51  ;;  %v4309_v60 = vmul.f32 %v4185_v17, %v7623_v41  ;;  %v4325_v13 = vmul.f32 %v4195_v27, %v7636_v53 }
 0x324   : > { %v4198_v7 = vpop.f32.mrf.mxu0  ;;  %v4458_v51 = vadd.f32 %v4318_v39, %v4310_v47  ;;  %v7684_v27 = vmax.f32 %v2758_v63, 0.0  ;;  %v7695_v39 = vmax.f32 %v2766_v18, 0.0 }
 0x325   : > { %v7625_v33 = vpop.f32.mrf.mxu1  ;;  %v4199_v50 = vadd.f32 %v4198_v7, %v7545_v35  ;;  %v2765_v35 = vsub.f32 1.0, %v2701_v40  ;;  %v4326_v7 = vmul.f32 %v4197_v62, %v7638_v54  ;;  %v4445_v15 = vadd.f32 %v4317_v36, %v4309_v60 }
 0x326   : > { %v4200_v19 = vpop.f32.mrf.mxu0  ;;  %v2773_v55 = vsub.f32 1.0, %v2709_v8  ;;  %8359 = vst [vmem:[#allocation125_spill] sm:$0xff] %v7695_v39  ;;  %v4415_v60 = vrot.slane %v7621_v4, 2 }
 0x327   : > { %v7632_v23 = vpop.f32.mrf.mxu1  ;;  %v4201_v9 = vadd.f32 %v4200_v19, %v7553_v30  ;;  %v2710_v30 = vand.u32 2147483647, %v2646_v6  ;;  %v4333_v49 = vmul.f32 %v4199_v50, %v7642_v58  ;;  %v4446_v62 = vadd.f32 %v4445_v15, %v4325_v13 }
 0x328   : > { %v4204_v28 = vpop.f32.mrf.mxu0  ;;  %v7688_v6 = vmax.f32 %v2765_v35, 0.0 }
 0x329   : > { %v7644_v2 = vpop.f32.mrf.mxu1  ;;  %v4205_v0 = vadd.f32 %v4204_v28, %v7562_v56  ;;  %v4334_v56 = vmul.f32 %v4201_v9, %v7647_v11  ;;  %v2774_v63 = vsub.f32 1.0, %v2710_v30  ;;  %v4447_v9 = vadd.f32 %v4446_v62, %v4333_v49 }
 0x32a   : > { %v4206_v61 = vpop.f32.mrf.mxu0 }
 0x32b   : > { %v7657_v14 = vpop.f32.mrf.mxu1  ;;  %v4207_v1 = vadd.f32 %v4206_v61, %v7570_v46  ;;  %v4341_v28 = vmul.f32 %v4205_v0, %v7653_v31  ;;  %v4401_v46 = vadd.f32 %v4400_v10, %v7611_v22  ;;  %v7703_v10 = vmax.f32 %v2773_v55, 0.0 }
 0x32c   : > { %v4208_v29 = vpop.f32.mrf.mxu0 }
 0x32d   : > { %v7666_v52 = vpop.f32.mrf.mxu1  ;;  %v4209_v19 = vadd.f32 %v4208_v29, %v7582_v26  ;;  %v4459_v26 = vadd.f32 %v4458_v51, %v4326_v7  ;;  %v4342_v61 = vmul.f32 %v4207_v1, %v7663_v32  ;;  %8360 = vst [vmem:[#allocation133_spill] sm:$0xff] %v7703_v10  ;;  %v4448_v35 = vadd.f32 %v4447_v9, %v4341_v28 }
 0x32e   : > { %v4210_v40 = vpop.f32.mrf.mxu0  ;;  %v4402_v18 = vrot.slane %v4401_v46, 2 }
 0x32f   : > { %v7676_v21 = vpop.f32.mrf.mxu1  ;;  %v4211_v3 = vadd.f32 %v4210_v40, %v7588_v20  ;;  %v4349_v8 = vmul.f32 %v4209_v19, %v7669_v57  ;;  %v4460_v13 = vadd.f32 %v4459_v26, %v4334_v56  ;;  %v4416_v56 = vadd.f32 %v4415_v60, %v7621_v4 }
 0x330   : > { %v4214_v50 = vpop.f32.mrf.mxu0 }
 0x331   : > { %v7681_v17 = vpop.f32.mrf.mxu1  ;;  %v4215_v20 = vadd.f32 %v4214_v50, %v7594_v48  ;;  %v4350_v47 = vmul.f32 %v4211_v3, %v7684_v27  ;;  %v7710_v48 = vmax.f32 %v2774_v63, 0.0  ;;  %v4461_v49 = vadd.f32 %v4460_v13, %v4342_v61 }
 0x332   : > { %v4216_v22 = vpop.f32.mrf.mxu0  ;;  %v4449_v1 = vadd.f32 %v4448_v35, %v4349_v8  ;;  %v4403_v63 = vadd.f32 %v4402_v18, %v4401_v46  ;;  %v8365_v46 = vld [vmem:[#allocation72_spill] sm:$0xff]  ;;  %v8366_v18 = vld [vmem:[#allocation43_spill] sm:$0xff] }
 0x333   : > { %v7693_v36 = vpop.f32.mrf.mxu1  ;;  %v4357_v7 = vmul.f32 %v4215_v20, %v7688_v6  ;;  %v4217_v29 = vadd.f32 %v4216_v22, %v7603_v16  ;;  %8361 = vst [vmem:[#allocation123_spill] sm:$0xff] %v7710_v48  ;;  %v4462_v62 = vadd.f32 %v4461_v49, %v4350_v47  ;;  %v4417_v20 = vrot.slane %v4416_v56, 1  ;;  %v8363_v47 = vld [vmem:[#allocation75_spill] sm:$0xff] }
 0x334   : > { %v4218_v15 = vpop.f32.mrf.mxu0 }
 0x335   : > { %v7701_v0 = vpop.f32.mrf.mxu1  ;;  %v4358_v19 = vmul.f32 %v4217_v29, %v7695_v39  ;;  %v4219_v51 = vadd.f32 %v4218_v15, %v7609_v24  ;;  %v4450_v28 = vadd.f32 %v4449_v1, %v4357_v7  ;;  %v8364_v7 = vld [vmem:[#allocation45_spill] sm:$0xff]  ;;  %v4404_v29 = vrot.slane %v4403_v63, 1  ;;  %v8382_v39 = vld [vmem:[#allocation119_spill] sm:$0xff] }
 0x336   : > { %v4220_v55 = vpop.f32.mrf.mxu0  ;;  %v3347_v1 = vadd.f32 %v8366_v18, %v8365_v46 }
 0x337   : > { %v7708_v30 = vpop.f32.mrf.mxu1  ;;  %v4365_v16 = vmul.f32 %v4219_v51, %v7703_v10  ;;  %v4221_v3 = vadd.f32 %v4220_v55, %v7614_v34  ;;  %v4463_v9 = vadd.f32 %v4462_v62, %v4358_v19  ;;  %v3351_v34 = vadd.f32 %v8364_v7, %v8363_v47  ;;  %v8367_v19 = vld [vmem:[#allocation78_spill] sm:$0xff]  ;;  %v8368_v51 = vld [vmem:[#allocation47_spill] sm:$0xff]  ;;  %v8373_v47 = vld [vmem:[#allocation44_spill] sm:$0xff] }
 0x338   : > { %v4224_v50 = vpop.f32.mrf.mxu0  ;;  %v3353_v55 = vadd.f32 %v8368_v51, %v8367_v19  ;;  %v3349_v7 = vadd.f32 %v8373_v47, %v8372_v37  ;;  %v4405_v18 = vadd.f32 %v4404_v29, %v4403_v63  ;;  %v8376_v51 = vld [vmem:[#allocation51_spill] sm:$0xff]  ;;  %v8377_v10 = vld [vmem:[#allocation62_spill] sm:$0xff] }
 0x339   : > { %v7715_v40 = vpop.f32.mrf.mxu1  ;;  %v4451_v61 = vadd.f32 %v4450_v28, %v4365_v16  ;;  %v4366_v8 = vmul.f32 %v4221_v3, %v7710_v48  ;;  %v8370_v16 = vld [vmem:[#allocation81_spill] sm:$0xff]  ;;  %v4766_v46 = vmul.f32 %v3351_v34, %v8375_v59  ;;  %v8380_v47 = vld [vmem:[#allocation34_spill] sm:$0xff] }
 0x33a   : > { %v4226_v4 = vpop.f32.mrf.mxu0  ;;  %v8371_v3 = vld [vmem:[#allocation49_spill] sm:$0xff] }
 0x33b   : > { %v7719_v26 = vpop.f32.mrf.mxu1  ;;  %v4452_v60 = vrot.slane %v4451_v61, 4  ;;  %v4464_v13 = vadd.f32 %v4463_v9, %v4366_v8  ;;  %v3357_v9 = vadd.f32 %v8371_v3, %v8370_v16  ;;  %v4418_v8 = vadd.f32 %v4417_v20, %v4416_v56  ;;  %v8379_v20 = vld [vmem:[#allocation59_spill] sm:$0xff] }
 0x33c   : > { %v4228_v35 = vpop.f32.mrf.mxu0 }
 0x33d   : > { %v7722_v24 = vpop.f32.mrf.mxu1  ;;  %v4453_v15 = vadd.f32 %v4452_v60, %v4451_v61  ;;  %v4465_v49 = vrot.slane %v4464_v13, 4 }
 0x33e   : > { %v4230_v28 = vpop.f32.mrf.mxu0 }
 0x33f   : > { %v7724_v22 = vpop.f32.mrf.mxu1  ;;  %v4454_v43 = vrot.slane %v4453_v15, 2  ;;  %v4466_v5 = vadd.f32 %v4465_v49, %v4464_v13  ;;  %v4774_v13 = vmul.f32 %v3357_v9, %v8379_v20  ;;  %v4480_v49 = vcombine.low %v4405_v18, %v4418_v8  ;;  %v8387_v9 = vld [vmem:[#allocation84_spill] sm:$0xff]  ;;  %v8388_v8 = vld [vmem:[#allocation53_spill] sm:$0xff] }
 0x340   : > { %8362 = vst [vmem:[#allocation124_spill] sm:$0xff] %v7724_v22  ;;  %v4234_v60 = vpop.f32.mrf.mxu0  ;;  %v4767_v22 = vmul.f32 %v3353_v55, %v8377_v10  ;;  %v8385_v55 = vld [vmem:[#allocation82_spill] sm:$0xff]  ;;  %v3361_v18 = vadd.f32 %v8388_v8, %v8387_v9 }
 0x341   : > { %v7732_v62 = vpop.f32.mrf.mxu1  ;;  %v4455_v48 = vadd.f32 %v4454_v43, %v4453_v15  ;;  %v4467_v19 = vrot.slane %v4466_v5, 2  ;;  %v8384_v43 = vld [vmem:[#allocation61_spill] sm:$0xff]  ;;  %v4229_v15 = vadd.f32 %v4228_v35, %v7632_v23  ;;  %v4235_v23 = vadd.f32 %v4234_v60, %v7657_v14  ;;  %v8390_v60 = vld [vmem:[#allocation68_spill] sm:$0xff] }
 0x342   : > { %8369 = vst [vmem:[#allocation126_spill] sm:$0xff] %v7732_v62  ;;  %v4758_v62 = vmul.f32 %v3347_v1, %v8376_v51  ;;  %v4236_v56 = vpop.f32.mrf.mxu0  ;;  %v4759_v34 = vmul.f32 %v3349_v7, %v8384_v43  ;;  %v8386_v51 = vld [vmem:[#allocation50_spill] sm:$0xff]  ;;  %v4231_v7 = vadd.f32 %v4230_v28, %v7644_v2  ;;  %v4227_v43 = vadd.f32 %v4226_v4, %v7625_v33 }
 0x343   : > { %v7738_v61 = vpop.f32.mrf.mxu1  ;;  %v4456_v37 = vrot.slane %v4455_v48, 1  ;;  %v4468_v3 = vadd.f32 %v4467_v19, %v4466_v5 }
 0x344   : > { %8374 = vst [vmem:[#allocation136_spill] sm:$0xff] %v7738_v61  ;;  %v8381_v61 = vld [vmem:[#allocation118_spill] sm:$0xff]  ;;  %v4238_v10 = vpop.f32.mrf.mxu0  ;;  %v4822_v1 = vadd.f32 %v4766_v46, %v4758_v62  ;;  %v4835_v19 = vadd.f32 %v4767_v22, %v4759_v34  ;;  %v4496_v46 = vrot.slane %v4480_v49, %v8380_v47  ;;  %v4544_v22 = vmul.f32 %v4229_v15, %v7629_v45 }
 0x345   : > { %v7743_v16 = vpop.f32.mrf.mxu1  ;;  %v8383_v59 = vcombine.low %v8381_v61, %v8382_v39  ;;  %v4469_v5 = vrot.slane %v4468_v3, 1  ;;  %v4225_v39 = vadd.f32 %v4224_v50, %v7617_v38  ;;  %v4457_v20 = vadd.f32 %v4456_v37, %v4455_v48  ;;  %v8389_v34 = vld [vmem:[#allocation66_spill] sm:$0xff] }
 0x346   : > { %8378 = vst [vmem:[#allocation128_spill] sm:$0xff] %v7743_v16  ;;  %v3359_v16 = vadd.f32 %v8386_v51, %v8385_v55  ;;  %v4240_v35 = vpop.f32.mrf.mxu0  ;;  %v7764_v62 = vadd.f32 %v4822_v1, %v4774_v13  ;;  %v4237_v50 = vadd.f32 %v4236_v56, %v7666_v52  ;;  %v4239_v2 = vadd.f32 %v4238_v10, %v7676_v21  ;;  %v8391_v1 = vld [vmem:[#allocation86_spill] sm:$0xff] }
 0x347   : > { %v4489_v63 = vrot.slane %v8383_v59, %v8380_v47  ;;  %v7751_v29 = vpop.f32.mrf.mxu1  ;;  %v4470_v59 = vadd.f32 %v4469_v5, %v4468_v3  ;;  %v4782_v13 = vmul.f32 %v3361_v18, %v8390_v60  ;;  %v8392_v55 = vld [vmem:[#allocation54_spill] sm:$0xff]  ;;  %v4536_v48 = vmul.f32 %v4225_v39, %v7623_v41 }
 0x348   : > { %v4244_v28 = vpop.f32.mrf.mxu0  ;;  %v4775_v14 = vmul.f32 %v3359_v16, %v8389_v34  ;;  %v3363_v49 = vadd.f32 %v8392_v55, %v8391_v1  ;;  %v4545_v4 = vmul.f32 %v4231_v7, %v7634_v25  ;;  %v4552_v52 = vmul.f32 %v4235_v23, %v7636_v53  ;;  %v8394_v23 = vld [vmem:[#allocation90_spill] sm:$0xff]  ;;  %v8397_v34 = vld [vmem:[#allocation95_spill] sm:$0xff] }
 0x349   : > { %v7760_v61 = vpop.f32.mrf.mxu1  ;;  %v4482_v33 = vcombine.low %v4457_v20, %v4470_v59  ;;  %v4241_v16 = vadd.f32 %v4240_v35, %v7681_v17  ;;  %v4511_v37 = vcombine.low %v4489_v63, %v4496_v46  ;;  %v8393_v3 = vcombine.low %v7468_v12, %v7470_v44  ;;  %v8395_v35 = vld [vmem:[#allocation57_spill] sm:$0xff] }
 0x34a   : > { %v4246_v56 = vpop.f32.mrf.mxu0  ;;  %v4245_v51 = vadd.f32 %v4244_v28, %v7693_v36  ;;  %v4537_v9 = vmul.f32 %v4227_v43, %v7627_v42  ;;  %v4672_v8 = vadd.f32 %v4544_v22, %v4536_v48  ;;  %v4553_v18 = vmul.f32 %v4237_v50, %v7638_v54  ;;  %v8396_v28 = vld [vmem:[#allocation76_spill] sm:$0xff] }
 0x34b   : > { %v7769_v38 = vpop.f32.mrf.mxu1  ;;  %v4503_v15 = vrot.slane %v8393_v3, %v8380_v47  ;;  %v4510_v10 = vrot.slane %v4482_v33, %v8380_v47  ;;  %v4560_v17 = vmul.f32 %v4239_v2, %v7642_v58  ;;  %v4836_v63 = vadd.f32 %v4835_v19, %v4775_v14  ;;  %v8398_v14 = vld [vmem:[#allocation65_spill] sm:$0xff]  ;;  %v8401_v3 = vld [vmem:[#allocation60_spill] sm:$0xff] }
 0x34c   : > { %v4248_v39 = vpop.f32.mrf.mxu0  ;;  %v4247_v12 = vadd.f32 %v4246_v56, %v7701_v0  ;;  %v3367_v36 = vadd.f32 %v8395_v35, %v8394_v23  ;;  %v4685_v46 = vadd.f32 %v4545_v4, %v4537_v9  ;;  %v4673_v20 = vadd.f32 %v4672_v8, %v4552_v52  ;;  %v8404_v23 = vld [vmem:[#allocation85_spill] sm:$0xff] }
 0x34d   : > { %v7785_v21 = vpop.f32.mrf.mxu1  ;;  %v4512_v7 = vcombine.low %v4503_v15, %v4510_v10  ;;  %v4249_v44 = vadd.f32 %v4248_v39, %v7708_v30  ;;  %v4561_v43 = vmul.f32 %v4241_v16, %v7647_v11  ;;  %v4519_v50 = vrot.slane %v4511_v37, %v8380_v47  ;;  %v8399_v16 = vld [vmem:[#allocation77_spill] sm:$0xff]  ;;  %v8402_v10 = vld [vmem:[#allocation99_spill] sm:$0xff] }
 0x34e   : > { %v4250_v22 = vpop.f32.mrf.mxu0  ;;  %v4568_v2 = vmul.f32 %v4245_v51, %v7653_v31  ;;  %v4783_v30 = vmul.f32 %v3363_v49, %v8396_v28  ;;  %v3371_v60 = vadd.f32 %v8398_v14, %v8397_v34  ;;  %v4686_v1 = vadd.f32 %v4685_v46, %v4553_v18  ;;  %v8400_v37 = vld [vmem:[#allocation93_spill] sm:$0xff]  ;;  %v8403_v51 = vld [vmem:[#allocation71_spill] sm:$0xff]  ;;  %v8406_v46 = vld [vmem:[#allocation70_spill] sm:$0xff] }
 0x34f   : > { %v7796_v5 = vpop.f32.mrf.mxu1  ;;  %v4526_v19 = vrot.slane %v4512_v7, %v8380_v47  ;;  %v4251_v0 = vadd.f32 %v4250_v22, %v7715_v40  ;;  %v4674_v55 = vadd.f32 %v4673_v20, %v4560_v17  ;;  %v4569_v52 = vmul.f32 %v4247_v12, %v7663_v32  ;;  %v8407_v22 = vld [vmem:[#allocation102_spill] sm:$0xff] }
 0x350   : > { %v4254_v48 = vpop.f32.mrf.mxu0  ;;  %v4576_v40 = vmul.f32 %v4249_v44, %v7669_v57  ;;  %v4790_v56 = vmul.f32 %v3367_v36, %v8399_v16  ;;  %v3369_v15 = vadd.f32 %v8401_v3, %v8400_v37  ;;  %v3377_v9 = vadd.f32 %v8403_v51, %v8402_v10  ;;  %v8405_v36 = vld [vmem:[#allocation97_spill] sm:$0xff] }
 0x351   : > { %v7804_v59 = vpop.f32.mrf.mxu1  ;;  %v4527_v4 = vcombine.low %v4519_v50, %v4526_v19  ;;  %v4255_v49 = vadd.f32 %v4254_v48, %v7719_v26  ;;  %v4687_v8 = vadd.f32 %v4686_v1, %v4561_v43  ;;  %v4675_v39 = vadd.f32 %v4674_v55, %v4568_v2  ;;  %v8408_v43 = vld [vmem:[#allocation80_spill] sm:$0xff]  ;;  %v8411_v48 = vld [vmem:[#allocation79_spill] sm:$0xff] }
 0x352   : > { %v4256_v17 = vpop.f32.mrf.mxu0  ;;  %v4577_v7 = vmul.f32 %v4251_v0, %v7684_v27  ;;  %v4824_v44 = vadd.f32 %v7764_v62, %v4782_v13  ;;  %v4798_v35 = vmul.f32 %v3371_v60, %v8404_v23  ;;  %v3373_v20 = vadd.f32 %v8406_v46, %v8405_v36  ;;  %v8409_v0 = vld [vmem:[#allocation125_spill] sm:$0xff]  ;;  %v8410_v1 = vld [vmem:[#allocation124_spill] sm:$0xff]  ;;  %v8412_v13 = vld [vmem:[#allocation91_spill] sm:$0xff] }
 0x353   : > { %v7819_v33 = vpop.f32.mrf.mxu1  ;;  %4529 = vst [vmem:[%s7817_s12] ss:$4 sm:$0xff] %v4527_v4  ;;  %v4584_v12 = vmul.f32 %v4255_v49, %v7688_v6  ;;  %v4257_v26 = vadd.f32 %v4256_v17, %v7722_v24  ;;  %v3381_v50 = vadd.f32 %v8408_v43, %v8407_v22  ;;  %v4688_v2 = vadd.f32 %v4687_v8, %v4569_v52  ;;  %v8413_v4 = vld [vmem:[#allocation101_spill] sm:$0xff]  ;;  %v8414_v49 = vld [vmem:[#allocation74_spill] sm:$0xff]  ;;  %v8417_v23 = vld [vmem:[#allocation88_spill] sm:$0xff] }
 0x354   : > { %v4258_v28 = vpop.f32.mrf.mxu0  ;;  %v4676_v34 = vadd.f32 %v4675_v39, %v4576_v40  ;;  %v4825_v24 = vadd.f32 %v4824_v44, %v4790_v56  ;;  %v4791_v62 = vmul.f32 %v3369_v15, %v8411_v48  ;;  %v4806_v60 = vmul.f32 %v3377_v9, %v8412_v13  ;;  %v8415_v17 = vld [vmem:[#allocation133_spill] sm:$0xff]  ;;  %v8416_v40 = vld [vmem:[#allocation126_spill] sm:$0xff]  ;;  %v8419_v15 = vld [vmem:[#allocation83_spill] sm:$0xff] }
 0x355   : > { %v7829_v18 = vpop.f32.mrf.mxu1  ;;  %v4585_v14 = vmul.f32 %v4257_v26, %v8409_v0  ;;  %v4259_v55 = vadd.f32 %v4258_v28, %v8410_v1  ;;  %v3379_v16 = vadd.f32 %v8414_v49, %v8413_v4  ;;  %v4689_v10 = vadd.f32 %v4688_v2, %v4577_v7  ;;  %v8418_v44 = vld [vmem:[#allocation106_spill] sm:$0xff]  ;;  %v8420_v22 = vld [vmem:[#allocation103_spill] sm:$0xff]  ;;  %v8423_v13 = vld [vmem:[#allocation104_spill] sm:$0xff] }
 0x356   : > { %v4260_v3 = vpop.f32.mrf.mxu0  ;;  %v4677_v51 = vadd.f32 %v4676_v34, %v4584_v12  ;;  %v4837_v39 = vadd.f32 %v4836_v63, %v4783_v30  ;;  %v4826_v26 = vadd.f32 %v4825_v24, %v4798_v35  ;;  %v4799_v56 = vmul.f32 %v3373_v20, %v8417_v23  ;;  %v8421_v7 = vld [vmem:[#allocation123_spill] sm:$0xff]  ;;  %v8422_v34 = vld [vmem:[#allocation48_spill] sm:$0xff] }
 0x357   : > { %v7841_v19 = vpop.f32.mrf.mxu1  ;;  %v4592_v52 = vmul.f32 %v4259_v55, %v8415_v17  ;;  %v4261_v8 = vadd.f32 %v4260_v3, %v8416_v40  ;;  %v3383_v36 = vadd.f32 %v8419_v15, %v8418_v44  ;;  %v4814_v43 = vmul.f32 %v3381_v50, %v8420_v22 }
 0x358   : > { %v4690_v28 = vadd.f32 %v4689_v10, %v4585_v14  ;;  %v4838_v2 = vadd.f32 %v4837_v39, %v4791_v62  ;;  %v4807_v55 = vmul.f32 %v3379_v16, %v8422_v34  ;;  %v4827_v30 = vadd.f32 %v4826_v26, %v4806_v60  ;;  %v8424_v26 = vld [vmem:[#allocation136_spill] sm:$0xff] }
 0x359   : > { %v7849_v37 = vpop.f32.mrf.mxu1  ;;  %v4678_v1 = vadd.f32 %v4677_v51, %v4592_v52  ;;  %v4593_v12 = vmul.f32 %v4261_v8, %v8421_v7  ;;  %v4815_v4 = vmul.f32 %v3383_v36, %v8423_v13 }
 0x35a   : > { %v4264_v46 = vpop.f32.mrf.mxu0  ;;  %v4839_v24 = vadd.f32 %v4838_v2, %v4799_v56  ;;  %v4828_v50 = vadd.f32 %v4827_v30, %v4814_v43  ;;  %v8425_v43 = vld [vmem:[#allocation128_spill] sm:$0xff] }
 0x35b   : > { %v7856_v9 = vpop.f32.mrf.mxu1  ;;  %v4679_v35 = vrot.slane %v4678_v1, 4  ;;  %v4691_v20 = vadd.f32 %v4690_v28, %v4593_v12  ;;  %v4265_v23 = vadd.f32 %v4264_v46, %v8424_v26 }
 0x35c   : > { %v4266_v63 = vpop.f32.mrf.mxu0  ;;  %v4840_v51 = vadd.f32 %v4839_v24, %v4807_v55  ;;  %v4829_v15 = vrot.slane %v4828_v50, 4 }
 0x35d   : > { %v7861_v48 = vpop.f32.mrf.mxu1  ;;  %v4680_v14 = vadd.f32 %v4679_v35, %v4678_v1  ;;  %v4692_v10 = vrot.slane %v4691_v20, 4  ;;  %v4267_v28 = vadd.f32 %v4266_v63, %v8425_v43  ;;  %v4764_v46 = vmul.f32 %v4265_v23, %v7623_v41  ;;  %v8427_v23 = vld [vmem:[#allocation12_spill] sm:$0xff] }
 0x35e   : > { %v4268_v3 = vpop.f32.mrf.mxu0  ;;  %v4841_v39 = vadd.f32 %v4840_v51, %v4815_v4  ;;  %v4830_v63 = vadd.f32 %v4829_v15, %v4828_v50 }
 0x35f   : > { %v7864_v49 = vpop.f32.mrf.mxu1  ;;  %v4269_v62 = vadd.f32 %v4268_v3, %v7751_v29  ;;  %v4681_v40 = vrot.slane %v4680_v14, 2  ;;  %v4693_v8 = vadd.f32 %v4692_v10, %v4691_v20 }
 0x360   : > { %v4270_v16 = vpop.f32.mrf.mxu0  ;;  %v4842_v30 = vrot.slane %v4841_v39, 4 }
 0x361   : > { %v7866_v52 = vpop.f32.mrf.mxu1  ;;  %v4271_v60 = vadd.f32 %v4270_v16, %v7760_v61  ;;  %v4682_v36 = vadd.f32 %v4681_v40, %v4680_v14  ;;  %v4694_v22 = vrot.slane %v4693_v8, 2  ;;  %v4772_v12 = vmul.f32 %v4269_v62, %v7629_v45 }
 0x362   : > { %v4274_v44 = vpop.f32.mrf.mxu0  ;;  %v4843_v50 = vadd.f32 %v4842_v30, %v4841_v39 }
 0x363   : > { %v4284_v56 = vpop.f32.mrf.mxu1  ;;  %v4275_v29 = vadd.f32 %v4274_v44, %v7769_v38  ;;  %v4683_v34 = vrot.slane %v4682_v36, 1  ;;  %v4695_v55 = vadd.f32 %v4694_v22, %v4693_v8  ;;  %v4773_v61 = vmul.f32 %v4271_v60, %v7634_v25 }
 0x364   : > { %v4276_v2 = vpop.f32.mrf.mxu0  ;;  %v4285_v45 = vadd.f32 %v4284_v56, %v7819_v33  ;;  %v4765_v38 = vmul.f32 %v4267_v28, %v7627_v42  ;;  %v4900_v14 = vadd.f32 %v4772_v12, %v4764_v46  ;;  %v4844_v43 = vrot.slane %v4843_v50, 2 }
 0x365   : > { %v4286_v1 = vpop.f32.mrf.mxu1  ;;  %v4780_v20 = vmul.f32 %v4275_v29, %v7636_v53  ;;  %v4277_v24 = vadd.f32 %v4276_v2, %v7785_v21  ;;  %v4696_v4 = vrot.slane %v4695_v55, 1  ;;  %v4684_v62 = vadd.f32 %v4683_v34, %v4682_v36  ;;  %v8429_v34 = vld [vmem:[#allocation67_spill] sm:$0xff] }
 0x366   : > { %v4278_v13 = vpop.f32.mrf.mxu0  ;;  %v4287_v3 = vadd.f32 %v4286_v1, %v7829_v18  ;;  %v4913_v16 = vadd.f32 %v4773_v61, %v4765_v38  ;;  %v4831_v2 = vrot.slane %v4830_v63, 2 }
 0x367   : > { %v4288_v35 = vpop.f32.mrf.mxu1  ;;  %v4781_v25 = vmul.f32 %v4277_v24, %v7638_v54  ;;  %v4279_v41 = vadd.f32 %v4278_v13, %v7796_v5  ;;  %v4697_v53 = vadd.f32 %v4696_v4, %v4695_v55  ;;  %v4901_v33 = vadd.f32 %v4900_v14, %v4780_v20  ;;  %v8426_v5 = vld [vmem:[#allocation52_spill] sm:$0xff]  ;;  %v8430_v55 = vld [vmem:[#allocation38_spill] sm:$0xff] }
 0x368   : > { %v4280_v51 = vpop.f32.mrf.mxu0  ;;  %v4289_v40 = vadd.f32 %v4288_v35, %v7841_v19  ;;  %v8428_v56 = vcombine.low %v8426_v5, %v8427_v23  ;;  %v8431_v61 = vcombine.low %v8429_v34, %v8430_v55  ;;  %v4845_v13 = vadd.f32 %v4844_v43, %v4843_v50 }
 0x369   : > { %v4290_v10 = vpop.f32.mrf.mxu1  ;;  %v4281_v21 = vadd.f32 %v4280_v51, %v7804_v59  ;;  %v4788_v42 = vmul.f32 %v4279_v41, %v7642_v58  ;;  %v4709_v18 = vcombine.low %v4684_v62, %v4697_v53  ;;  %v4914_v26 = vadd.f32 %v4913_v16, %v4781_v25 }
 0x36a   : > { %v4291_v60 = vadd.f32 %v4290_v10, %v7849_v37  ;;  %v4730_v44 = vrot.slane %v8428_v56, %v8380_v47  ;;  %v4796_v59 = vmul.f32 %v4285_v45, %v7653_v31  ;;  %v4797_v58 = vmul.f32 %v4287_v3, %v7663_v32  ;;  %v8435_v56 = vld [vmem:[#allocation55_spill] sm:$0xff] }
 0x36b   : > { %v4294_v8 = vpop.f32.mrf.mxu1  ;;  %v4789_v54 = vmul.f32 %v4281_v21, %v7647_v11  ;;  %v4902_v15 = vadd.f32 %v4901_v33, %v4788_v42  ;;  %v4737_v36 = vrot.slane %v4709_v18, %v8380_v47  ;;  %v4804_v11 = vmul.f32 %v4289_v40, %v7669_v57 }
 0x36c   : > { %v4295_v39 = vadd.f32 %v4294_v8, %v7856_v9  ;;  %v4805_v29 = vmul.f32 %v4291_v60, %v7684_v27  ;;  %v4746_v32 = vrot.slane %v8431_v61, %v8380_v47  ;;  %v4832_v14 = vadd.f32 %v4831_v2, %v4830_v63  ;;  %v8432_v63 = vld [vmem:[#allocation69_spill] sm:$0xff]  ;;  %v8433_v8 = vld [vmem:[#allocation40_spill] sm:$0xff] }
 0x36d   : > { %v4296_v19 = vpop.f32.mrf.mxu1  ;;  %v4915_v22 = vadd.f32 %v4914_v26, %v4789_v54  ;;  %v4903_v28 = vadd.f32 %v4902_v15, %v4796_v59  ;;  %v4739_v12 = vcombine.low %v4730_v44, %v4737_v36  ;;  %v4846_v25 = vrot.slane %v4845_v13, 1  ;;  %v8436_v44 = vld [vmem:[#allocation131_spill] sm:$0xff] }
 0x36e   : > { %v4297_v37 = vadd.f32 %v4296_v19, %v7861_v48  ;;  %v4812_v48 = vmul.f32 %v4295_v39, %v7688_v6  ;;  %v8434_v42 = vcombine.low %v8432_v63, %v8433_v8  ;;  %v8437_v59 = vcombine.low %v8435_v56, %v8436_v44 }
 0x36f   : > { %v4298_v1 = vpop.f32.mrf.mxu1  ;;  %v4916_v9 = vadd.f32 %v4915_v22, %v4797_v58  ;;  %v4904_v30 = vadd.f32 %v4903_v28, %v4804_v11  ;;  %v4753_v57 = vrot.slane %v4739_v12, %v8380_v47  ;;  %v4847_v53 = vadd.f32 %v4846_v25, %v4845_v13 }
 0x370   : > { %v4299_v31 = vadd.f32 %v4298_v1, %v7864_v49  ;;  %v4813_v35 = vmul.f32 %v4297_v37, %v8409_v0  ;;  %v4833_v0 = vrot.slane %v4832_v14, 1  ;;  %v4951_v18 = vrot.slane %v8434_v42, %v8380_v47 }
 0x371   : > { %v4300_v46 = vpop.f32.mrf.mxu1  ;;  %v4917_v20 = vadd.f32 %v4916_v9, %v4805_v29  ;;  %v4905_v24 = vadd.f32 %v4904_v30, %v4812_v48  ;;  %v4754_v4 = vcombine.low %v4746_v32, %v4753_v57  ;;  %v4958_v39 = vrot.slane %v8437_v59, %v8380_v47 }
 0x372   : > { %v4301_v27 = vadd.f32 %v4300_v46, %v7866_v52  ;;  %v4820_v49 = vmul.f32 %v4299_v31, %v8415_v17  ;;  %v4834_v21 = vadd.f32 %v4833_v0, %v4832_v14 }
 0x373   : > { %v4918_v38 = vadd.f32 %v4917_v20, %v4813_v35  ;;  %5149 = vst [vmem:[%s7817_s12 + $0x1] ss:$4 sm:$0xff] %v4754_v4 }
 0x374   : > { %v4821_v45 = vmul.f32 %v4301_v27, %v8421_v7  ;;  %v4906_v3 = vadd.f32 %v4905_v24, %v4820_v49  ;;  %v4934_v7 = vcombine.low %v4834_v21, %v4847_v53 }
 0x376   : > { %v4919_v6 = vadd.f32 %v4918_v38, %v4821_v45  ;;  %v4907_v10 = vrot.slane %v4906_v3, 4  ;;  %v4944_v54 = vrot.slane %v4934_v7, %v8380_v47 }
 0x378   : > { %v4920_v41 = vrot.slane %v4919_v6, 4  ;;  %v4908_v51 = vadd.f32 %v4907_v10, %v4906_v3  ;;  %v4966_v23 = vcombine.low %v4944_v54, %v4951_v18 }
 0x37a   : > { %v4921_v62 = vadd.f32 %v4920_v41, %v4919_v6  ;;  %v4909_v52 = vrot.slane %v4908_v51, 2  ;;  %v4974_v36 = vrot.slane %v4966_v23, %v8380_v47 }
 0x37c   : > { %v4922_v16 = vrot.slane %v4921_v62, 2  ;;  %v4910_v17 = vadd.f32 %v4909_v52, %v4908_v51 }
 0x37e   : > { %v4923_v50 = vadd.f32 %v4922_v16, %v4921_v62  ;;  %v4911_v40 = vrot.slane %v4910_v17, 1 }
 0x380   : > { %v4924_v33 = vrot.slane %v4923_v50, 1  ;;  %v4912_v60 = vadd.f32 %v4911_v40, %v4910_v17 }
 0x382   : > { %v4925_v26 = vadd.f32 %v4924_v33, %v4923_v50 }
 0x384   : > { %v4937_v5 = vcombine.low %v4912_v60, %v4925_v26 }
 0x386   : > { %v4965_v19 = vrot.slane %v4937_v5, %v8380_v47 }
 0x388   : > { %v4967_v15 = vcombine.low %v4958_v39, %v4965_v19 }
 0x38a   : > { %v4981_v58 = vrot.slane %v4967_v15, %v8380_v47 }
 0x38c   : > { %v4982_v37 = vcombine.low %v4974_v36, %v4981_v58 }
 0x38e   : > { %5150 = vst [vmem:[%s7817_s12 + $0x2] ss:$4 sm:$0xff] %v4982_v37 }
 0x38f PF: > { %s17_s17 = sadd.s32 1, %s5497_s17   ;;  %s8438_s15 = smov %s5493_s16 }
 0x390   : > { %p14_p3 = scmp.ge.s32.totalorder %s17_s17, 4   ;;  %s8439_s16 = smov %s8441_s24 }
 0x392   :  { %16 = sbr.rel (!%p14_p3) target bundleno = 4 (0x4), region = 83 }
 0x397   :  { %5016 = vsyncpa [#allocation3], 1 }
 0x398   :  { %5018 = vsyncpa [#allocation3 + $0x1], 1 }
 0x399   :  { %5019 = vsyncpa [#allocation7], 1 }
 0x39a   :  { %5020 = vsyncpa [#allocation4], 1 }
 0x39b   :  { %5022 = vsyncpa [#allocation4 + $0x1], 1 }

</bundles_post_ra>
